<compile_context>
chip_gen: v5e
topology: v5e:2x2
jax: 0.10.0
libtpu: 0.0.40
codegen_flags: <defaults>
</compile_context>

<pallas_src>
import math

import jax
import jax.numpy as jnp
from jax.experimental import pallas as pl
from jax.experimental.pallas import tpu as pltpu


HIDDEN = 512
NBLK = 4                      # hidden-axis blocks (hb = 128: lane aligned)
HB = HIDDEN // NBLK
N_ACT = 4
HEAD_W = 128                  # padded head width (cols 0..3 = Pi, col 4 = V)
CONV_C, CONV_HW = 64, 7       # conv3 output: 64 channels, 7x7 spatial
CONV_FLAT = CONV_C * CONV_HW * CONV_HW   # 3136


# ----------------------------------------------------------------------------
# Pallas kernels
# ----------------------------------------------------------------------------

def _mm_bias_relu_kernel(x_ref, w_ref, b_ref, o_ref):
    # o = relu(x @ w + b)      x:(M,K) w:(K,N) b:(1,N)
    acc = jnp.dot(x_ref[...], w_ref[...], preferred_element_type=jnp.float32)
    o_ref[...] = jnp.maximum(acc + b_ref[...], 0.0)


def _dequant_bf16(q_ref):
    # int8 -> f32 -> bf16 (two-step convert for robust lowering; |q| <= 127 is
    # exact in bf16).  VPU passes hide under the next block's weight DMA.
    return q_ref[...].astype(jnp.float32).astype(jnp.bfloat16)


def _lstm_heads_kernel(x_ref, h_ref, c_ref,
                       wih_ref, sih_ref, whh_ref, shh_ref, b_ref, whead_ref,
                       h_out_ref, c_out_ref, head_ref):
    """Fused LSTMCell + (actor|critic) heads for one hidden block.

    Weight layout (built at init): block b holds gate columns
    [i_b | f_b | g_b | o_b] (each HB wide) for hidden units [b*HB, (b+1)*HB),
    stored as one contiguous (K, 4*HB) int8 slab with per-column f32 scales.
    """
    hb = c_ref.shape[-1]
    gates = (jnp.dot(x_ref[...], _dequant_bf16(wih_ref),
                     preferred_element_type=jnp.float32) * sih_ref[...]
             + jnp.dot(h_ref[...], _dequant_bf16(whh_ref),
                       preferred_element_type=jnp.float32) * shh_ref[...]
             + b_ref[...])
    i = jax.nn.sigmoid(gates[:, 0 * hb:1 * hb])
    f = jax.nn.sigmoid(gates[:, 1 * hb:2 * hb])
    g = jnp.tanh(gates[:, 2 * hb:3 * hb])
    o = jax.nn.sigmoid(gates[:, 3 * hb:4 * hb])
    c_new = f * c_ref[...] + i * g
    h_new = o * jnp.tanh(c_new)
    h_out_ref[...] = h_new
    c_out_ref[...] = c_new
    # Single lane-dense (B, 128) partial head output: cols 0..3 -> Pi logits,
    # col 4 -> V, rest zero.  Summed over blocks in the wrapper.
    head_ref[...] = jnp.dot(h_new.astype(jnp.bfloat16), whead_ref[...],
                            preferred_element_type=jnp.float32)


_VMEM_SPEC = pl.BlockSpec(memory_space=pltpu.MemorySpace.VMEM)


def pallas_linear_relu(x, w, b):
    # TODO(synk): fuse the three conv GEMM+bias+ReLU stages into one
    # pallas_call (in-kernel im2col for conv2/conv3) to drop two kernel
    # launches and two activation HBM round-trips; kept separate here for
    # lowering safety at these tiny (B=2) sizes.
    M = x.shape[0]
    N = w.shape[1]
    return pl.pallas_call(
        _mm_bias_relu_kernel,
        out_shape=jax.ShapeDtypeStruct((M, N), jnp.float32),
        in_specs=[_VMEM_SPEC, _VMEM_SPEC, _VMEM_SPEC],
        out_specs=_VMEM_SPEC,
    )(x, w, b)


def _lstm_vmem_limit_bytes():
    # Generation-dependent limit: ~3/4 of reported VMEM, capped at 96 MiB,
    # floor 48 MiB (fits v7x's 64 MiB physical per-TC VMEM).
    try:
        cap = int(pltpu.get_tpu_info().vmem_capacity_bytes)
        return max(48 * 1024 * 1024, min(3 * cap // 4, 96 * 1024 * 1024))
    except Exception:
        return 48 * 1024 * 1024


def pallas_lstm_heads(flat_bf16, h_bf16, c, wih_q, s_ih, whh_q, s_hh, b_lstm,
                      w_head):
    B = c.shape[0]
    K = flat_bf16.shape[1]
    return pl.pallas_call(
        _lstm_heads_kernel,
        out_shape=(
            jax.ShapeDtypeStruct((B, HIDDEN), jnp.float32),        # h_new
            jax.ShapeDtypeStruct((B, HIDDEN), jnp.float32),        # c_new
            jax.ShapeDtypeStruct((NBLK, B, HEAD_W), jnp.float32),  # head partials
        ),
        grid=(NBLK,),
        in_specs=[
            pl.BlockSpec((B, K), lambda b: (0, 0)),                    # flat (resident)
            pl.BlockSpec((B, HIDDEN), lambda b: (0, 0)),               # h (resident)
            pl.BlockSpec((B, HB), lambda b: (0, b)),                   # c block
            pl.BlockSpec((None, K, 4 * HB), lambda b: (b, 0, 0)),      # wih slab (int8)
            pl.BlockSpec((None, 1, 4 * HB), lambda b: (b, 0, 0)),      # wih scales
            pl.BlockSpec((None, HIDDEN, 4 * HB), lambda b: (b, 0, 0)), # whh slab (int8)
            pl.BlockSpec((None, 1, 4 * HB), lambda b: (b, 0, 0)),      # whh scales
            pl.BlockSpec((None, 1, 4 * HB), lambda b: (b, 0, 0)),      # bias
            pl.BlockSpec((None, HB, HEAD_W), lambda b: (b, 0, 0)),     # head weight
        ],
        out_specs=(
            pl.BlockSpec((B, HB), lambda b: (0, b)),
            pl.BlockSpec((B, HB), lambda b: (0, b)),
            pl.BlockSpec((None, B, HEAD_W), lambda b: (b, 0, 0)),
        ),
        compiler_params=pltpu.CompilerParams(
            dimension_semantics=("parallel",),
            vmem_limit_bytes=_lstm_vmem_limit_bytes(),
        ),
    )(flat_bf16, h_bf16, c, wih_q, s_ih, whh_q, s_hh, b_lstm, w_head)


# ----------------------------------------------------------------------------
# Glue: im2col patch extraction (pure JAX reshapes/slices)
# ----------------------------------------------------------------------------

def im2col(x, kh, kw, stride):
    # x: (B, H, W, C) NHWC -> patches (B*oh*ow, kh*kw*C), inner order (kh, kw, C)
    B, H, W, C = x.shape
    oh = (H - kh) // stride + 1
    ow = (W - kw) // stride + 1
    cols = []
    for i in range(kh):
        for j in range(kw):
            cols.append(x[:, i:i + stride * oh:stride, j:j + stride * ow:stride, :])
    p = jnp.stack(cols, axis=3)              # (B, oh, ow, kh*kw, C)
    return p.reshape(B * oh * ow, kh * kw * C), oh, ow


# ----------------------------------------------------------------------------
# Parameter initialization + weight-layout transforms
# ----------------------------------------------------------------------------

def xavier_uniform(key, shape, fan_in, fan_out):
    bound = math.sqrt(6.0 / (fan_in + fan_out))
    return jax.random.uniform(key, shape, jnp.float32, -bound, bound)


def conv_w_to_kernel_layout(w_pt):
    # PyTorch (C_out, C_in, kh, kw) -> (kh*kw*C_in, C_out) matching im2col order
    c_out, c_in, kh, kw = w_pt.shape
    return jnp.transpose(w_pt, (2, 3, 1, 0)).reshape(kh * kw * c_in, c_out)


def permute_ih_rows_chw_to_hwc(w, c, hh, ww):
    # wih^T rows are in PyTorch flatten order (c, h, w); permute to the NHWC
    # flatten order (h, w, c) so the runtime transpose before the LSTM is free.
    n = w.shape[-1]
    w = w.reshape(c, hh, ww, n)
    return jnp.transpose(w, (1, 2, 0, 3)).reshape(c * hh * ww, n)


def block_gate_cols(w):
    # (K, 4*HIDDEN), cols [i|f|g|o] -> (NBLK, K, 4*HB): block b holds
    # [i_b|f_b|g_b|o_b] for hidden units [b*HB, (b+1)*HB), contiguous per block.
    K = w.shape[0]
    w = w.reshape(K, 4, NBLK, HB)
    w = jnp.transpose(w, (2, 0, 1, 3))
    return w.reshape(NBLK, K, 4 * HB)


def unblock_gate_cols(wb):
    # inverse of block_gate_cols: (NBLK, K, 4*HB) -> (K, 4*HIDDEN), [i|f|g|o]
    nblk, K, _ = wb.shape
    w = wb.reshape(nblk, K, 4, HB)
    w = jnp.transpose(w, (1, 2, 0, 3))
    return w.reshape(K, 4 * HIDDEN)


def quantize_int8_per_col(w):
    # symmetric per-(output)column int8 over the contraction axis (-2)
    amax = jnp.max(jnp.abs(w), axis=-2, keepdims=True)
    scale = jnp.maximum(amax, 1e-12) / 127.0
    q = jnp.clip(jnp.round(w / scale), -127.0, 127.0).astype(jnp.int8)
    return q, scale.astype(jnp.float32)


def init_params(key):
    ks = jax.random.split(key, 7)

    w1 = xavier_uniform(ks[0], (32, 1, 8, 8), 1 * 8 * 8, 32 * 8 * 8)
    w2 = xavier_uniform(ks[1], (64, 32, 4, 4), 32 * 4 * 4, 64 * 4 * 4)
    w3 = xavier_uniform(ks[2], (64, 64, 3, 3), 64 * 3 * 3, 64 * 3 * 3)

    # PyTorch nn.LSTMCell default weight init U(-1/sqrt(H), 1/sqrt(H));
    # bias_ih = bias_hh = 0 per initialize_weights() (their sum -> b_lstm).
    k = 1.0 / math.sqrt(HIDDEN)
    wih_pt = jax.random.uniform(ks[3], (4 * HIDDEN, CONV_FLAT), jnp.float32, -k, k)
    whh_pt = jax.random.uniform(ks[4], (4 * HIDDEN, HIDDEN), jnp.float32, -k, k)

    wpi = xavier_uniform(ks[5], (N_ACT, HIDDEN), HIDDEN, N_ACT)   # Pi: Linear(512,4)
    wv = xavier_uniform(ks[6], (1, HIDDEN), HIDDEN, 1)            # V : Linear(512,1)

    # LSTM weights: transpose, fold NCHW->NHWC flatten permutation into wih
    # rows, pre-block per hidden chunk (contiguous HBM slabs), int8-quantize.
    wihT = permute_ih_rows_chw_to_hwc(wih_pt.T, CONV_C, CONV_HW, CONV_HW)
    wih_q, s_ih = quantize_int8_per_col(block_gate_cols(wihT))
    whh_q, s_hh = quantize_int8_per_col(block_gate_cols(whh_pt.T))
    b_lstm = jnp.zeros((NBLK, 1, 4 * HB), jnp.float32)

    # Heads folded into one zero-padded lane-dense weight: cols 0..3 = Pi^T,
    # col 4 = V^T; stored pre-blocked (NBLK, HB, 128) bf16.
    w_head = jnp.zeros((HIDDEN, HEAD_W), jnp.float32)
    w_head = w_head.at[:, :N_ACT].set(wpi.T)
    w_head = w_head.at[:, N_ACT:N_ACT + 1].set(wv.T)
    w_head = w_head.reshape(NBLK, HB, HEAD_W).astype(jnp.bfloat16)

    return {
        "w1": conv_w_to_kernel_layout(w1), "b1": jnp.zeros((1, 32), jnp.float32),
        "w2": conv_w_to_kernel_layout(w2), "b2": jnp.zeros((1, 64), jnp.float32),
        "w3": conv_w_to_kernel_layout(w3), "b3": jnp.zeros((1, 64), jnp.float32),
        "wih_q": wih_q, "s_ih": s_ih,
        "whh_q": whh_q, "s_hh": s_hh,
        "b_lstm": b_lstm,
        "w_head": w_head,
        "bpi": jnp.zeros((1, N_ACT), jnp.float32),
        "bv": jnp.zeros((1, 1), jnp.float32),
    }


# ----------------------------------------------------------------------------
# Forward pass
# ----------------------------------------------------------------------------

def forward(params, x, hidden):
    # x: (B, 1, 84, 84) NCHW float32; hidden = (h, c), each (B, 512) f32.
    # TODO(synk): if forward() is called once per rollout timestep, add a time
    #   grid axis with constant wih/whh index_map so the int8 weights stay
    #   VMEM-resident across T steps instead of re-streaming ~7.4 MB per call.
    # TODO(synk): batch sizes >= 16 fill vreg sublanes / MXU rows; per-step
    #   wall time is weight-DMA-bound so throughput scales ~linearly with B.
    B = x.shape[0]
    xh = jnp.transpose(x, (0, 2, 3, 1))          # NCHW -> NHWC

    p, oh, ow = im2col(xh, 8, 8, 4)              # conv1: 1->32,  k8 s4, 84->20
    xh = pallas_linear_relu(p, params["w1"], params["b1"]).reshape(B, oh, ow, 32)
    p, oh, ow = im2col(xh, 4, 4, 2)              # conv2: 32->64, k4 s2, 20->9
    xh = pallas_linear_relu(p, params["w2"], params["b2"]).reshape(B, oh, ow, 64)
    p, oh, ow = im2col(xh, 3, 3, 1)              # conv3: 64->64, k3 s1, 9->7
    y = pallas_linear_relu(p, params["w3"], params["b3"])

    # NHWC flatten (permutation to PyTorch's NCHW flatten order is baked into
    # the wih rows at init).  Cast activations to bf16 once, here.
    flat = y.reshape(B, oh * ow * 64).astype(jnp.bfloat16)

    h, c = hidden
    h_new, c_new, head_part = pallas_lstm_heads(
        flat, h.astype(jnp.bfloat16), c,
        params["wih_q"], params["s_ih"], params["whh_q"], params["s_hh"],
        params["b_lstm"], params["w_head"])

    head = jnp.sum(head_part, axis=0)            # (B, 128)
    logits = head[:, :N_ACT] + params["bpi"]
    prob = jax.nn.softmax(logits, axis=-1)
    value = head[:, N_ACT:N_ACT + 1] + params["bv"]
    return prob, value, (h_new, c_new)


# ----------------------------------------------------------------------------
# Pure-JAX reference (validates kernel plumbing / weight-layout transforms)
# ----------------------------------------------------------------------------

def reference_forward(params, x, hidden):
    B = x.shape[0]
    xh = jnp.transpose(x, (0, 2, 3, 1))
    for wk, bk, kk, s, cout in (("w1", "b1", 8, 4, 32),
                                ("w2", "b2", 4, 2, 64),
                                ("w3", "b3", 3, 1, 64)):
        p, oh, ow = im2col(xh, kk, kk, s)
        y = jnp.maximum(p @ params[wk] + params[bk], 0.0)
        xh = y.reshape(B, oh, ow, cout)
    flat = xh.reshape(B, -1)
    h, c = hidden

    hp = jax.lax.Precision.HIGHEST
    wih = unblock_gate_cols(params["wih_q"].astype(jnp.float32) * params["s_ih"])
    whh = unblock_gate_cols(params["whh_q"].astype(jnp.float32) * params["s_hh"])
    b_l = unblock_gate_cols(params["b_lstm"])
    xb = flat.astype(jnp.bfloat16).astype(jnp.float32)
    hb_ = h.astype(jnp.bfloat16).astype(jnp.float32)
    gates = jnp.dot(xb, wih, precision=hp) + jnp.dot(hb_, whh, precision=hp) + b_l
    H = HIDDEN
    i = jax.nn.sigmoid(gates[:, 0 * H:1 * H])
    f = jax.nn.sigmoid(gates[:, 1 * H:2 * H])
    g = jnp.tanh(gates[:, 2 * H:3 * H])
    o = jax.nn.sigmoid(gates[:, 3 * H:4 * H])
    c_new = f * c + i * g
    h_new = o * jnp.tanh(c_new)

    w_head = params["w_head"].astype(jnp.float32).reshape(H, HEAD_W)
    head = jnp.dot(h_new.astype(jnp.bfloat16).astype(jnp.float32), w_head,
                   precision=hp)
    logits = head[:, :N_ACT] + params["bpi"]
    prob = jax.nn.softmax(logits, axis=-1)
    value = head[:, N_ACT:N_ACT + 1] + params["bv"]
    return prob, value, (h_new, c_new)


if __name__ == "__main__":
    key = jax.random.PRNGKey(0)
    k_param, k_x = jax.random.split(key)

    params = init_params(k_param)

    B = 2
    x = jax.random.normal(k_x, (B, 1, 84, 84), jnp.float32)
    h0 = jnp.zeros((B, HIDDEN), jnp.float32)
    c0 = jnp.zeros((B, HIDDEN), jnp.float32)

    fwd = jax.jit(forward)
    prob, value, (h1, c1) = fwd(params, x, (h0, c0))
    jax.block_until_ready((prob, value, h1, c1))

    assert prob.shape == (B, N_ACT) and value.shape == (B, 1)
    assert h1.shape == (B, HIDDEN) and c1.shape == (B, HIDDEN)
    # softmax rows sum to ~1
    assert bool(jnp.all(jnp.abs(jnp.sum(prob, axis=-1) - 1.0) < 1e-5))

    # correctness vs. pure-JAX reference built from the SAME int8 weights
    rprob, rvalue, (rh, rc) = reference_forward(params, x, (h0, c0))
    tol = 3e-2
    assert bool(jnp.all(jnp.abs(prob - rprob) < tol))
    assert bool(jnp.all(jnp.abs(value - rvalue) < tol))
    assert bool(jnp.all(jnp.abs(h1 - rh) < tol))
    assert bool(jnp.all(jnp.abs(c1 - rc) < tol))

    print("KERNEL_OK")
</pallas_src>

<mosaic_0001>
module attributes {stable_mosaic.version = 11 : i64} {
  func.func @_mm_bias_relu_kernel(%arg0: memref<800x64xf32, #tpu.memory_space<vmem>>, %arg1: memref<64x32xf32, #tpu.memory_space<vmem>>, %arg2: memref<1x32xf32, #tpu.memory_space<vmem>>, %arg3: memref<800x32xf32, #tpu.memory_space<vmem>>) attributes {dimension_semantics = [], scalar_prefetch = 0 : i64, scratch_operands = 0 : i64, tpu.core_type = #tpu.core_type<tc>} {
    %c0 = arith.constant 0 : index
    %c0_0 = arith.constant 0 : index
    %0 = vector.load %arg0[%c0, %c0_0] : memref<800x64xf32, #tpu.memory_space<vmem>>, vector<800x64xf32>
    %c0_1 = arith.constant 0 : index
    %c0_2 = arith.constant 0 : index
    %1 = vector.load %arg1[%c0_1, %c0_2] : memref<64x32xf32, #tpu.memory_space<vmem>>, vector<64x32xf32>
    %cst = arith.constant dense<0.000000e+00> : vector<800x32xf32>
    %2 = tpu.matmul %0, %1, %cst {dimension_numbers = #tpu.dot_dimension_numbers<[1], [0], [0], [1], [0, 0, 1, 1], [], []>} : vector<800x64xf32>, vector<64x32xf32>, vector<800x32xf32> -> vector<800x32xf32>
    %c0_3 = arith.constant 0 : index
    %c0_4 = arith.constant 0 : index
    %3 = vector.load %arg2[%c0_3, %c0_4] : memref<1x32xf32, #tpu.memory_space<vmem>>, vector<1x32xf32>
    %4 = vector.broadcast %3 : vector<1x32xf32> to vector<800x32xf32>
    %5 = arith.addf %2, %4 : vector<800x32xf32>
    %cst_5 = arith.constant 0.000000e+00 : f32
    %6 = vector.broadcast %cst_5 : f32 to vector<800x32xf32>
    %7 = arith.maximumf %5, %6 : vector<800x32xf32>
    %c0_6 = arith.constant 0 : index
    %c0_7 = arith.constant 0 : index
    %8 = vector.load %arg3[%c0_6, %c0_7] : memref<800x32xf32, #tpu.memory_space<vmem>>, vector<800x32xf32>
    tpu.vector_store %arg3[%c0_6, %c0_7], %7 {strides = array<i32>} : memref<800x32xf32, #tpu.memory_space<vmem>>, vector<800x32xf32>,
    return
  }
}

module attributes {stable_mosaic.version = 11 : i64} {
  func.func @_mm_bias_relu_kernel(%arg0: memref<162x512xf32, #tpu.memory_space<vmem>>, %arg1: memref<512x64xf32, #tpu.memory_space<vmem>>, %arg2: memref<1x64xf32, #tpu.memory_space<vmem>>, %arg3: memref<162x64xf32, #tpu.memory_space<vmem>>) attributes {dimension_semantics = [], scalar_prefetch = 0 : i64, scratch_operands = 0 : i64, tpu.core_type = #tpu.core_type<tc>} {
    %c0 = arith.constant 0 : index
    %c0_0 = arith.constant 0 : index
    %0 = vector.load %arg0[%c0, %c0_0] : memref<162x512xf32, #tpu.memory_space<vmem>>, vector<162x512xf32>
    %c0_1 = arith.constant 0 : index
    %c0_2 = arith.constant 0 : index
    %1 = vector.load %arg1[%c0_1, %c0_2] : memref<512x64xf32, #tpu.memory_space<vmem>>, vector<512x64xf32>
    %cst = arith.constant dense<0.000000e+00> : vector<162x64xf32>
    %2 = tpu.matmul %0, %1, %cst {dimension_numbers = #tpu.dot_dimension_numbers<[1], [0], [0], [1], [0, 0, 1, 1], [], []>} : vector<162x512xf32>, vector<512x64xf32>, vector<162x64xf32> -> vector<162x64xf32>
    %c0_3 = arith.constant 0 : index
    %c0_4 = arith.constant 0 : index
    %3 = vector.load %arg2[%c0_3, %c0_4] : memref<1x64xf32, #tpu.memory_space<vmem>>, vector<1x64xf32>
    %4 = vector.broadcast %3 : vector<1x64xf32> to vector<162x64xf32>
    %5 = arith.addf %2, %4 : vector<162x64xf32>
    %cst_5 = arith.constant 0.000000e+00 : f32
    %6 = vector.broadcast %cst_5 : f32 to vector<162x64xf32>
    %7 = arith.maximumf %5, %6 : vector<162x64xf32>
    %c0_6 = arith.constant 0 : index
    %c0_7 = arith.constant 0 : index
    %8 = vector.load %arg3[%c0_6, %c0_7] : memref<162x64xf32, #tpu.memory_space<vmem>>, vector<162x64xf32>
    tpu.vector_store %arg3[%c0_6, %c0_7], %7 {strides = array<i32>} : memref<162x64xf32, #tpu.memory_space<vmem>>, vector<162x64xf32>,
    return
  }
}

module attributes {stable_mosaic.version = 11 : i64} {
  func.func @_mm_bias_relu_kernel(%arg0: memref<98x576xf32, #tpu.memory_space<vmem>>, %arg1: memref<576x64xf32, #tpu.memory_space<vmem>>, %arg2: memref<1x64xf32, #tpu.memory_space<vmem>>, %arg3: memref<98x64xf32, #tpu.memory_space<vmem>>) attributes {dimension_semantics = [], scalar_prefetch = 0 : i64, scratch_operands = 0 : i64, tpu.core_type = #tpu.core_type<tc>} {
    %c0 = arith.constant 0 : index
    %c0_0 = arith.constant 0 : index
    %0 = vector.load %arg0[%c0, %c0_0] : memref<98x576xf32, #tpu.memory_space<vmem>>, vector<98x576xf32>
    %c0_1 = arith.constant 0 : index
    %c0_2 = arith.constant 0 : index
    %1 = vector.load %arg1[%c0_1, %c0_2] : memref<576x64xf32, #tpu.memory_space<vmem>>, vector<576x64xf32>
    %cst = arith.constant dense<0.000000e+00> : vector<98x64xf32>
    %2 = tpu.matmul %0, %1, %cst {dimension_numbers = #tpu.dot_dimension_numbers<[1], [0], [0], [1], [0, 0, 1, 1], [], []>} : vector<98x576xf32>, vector<576x64xf32>, vector<98x64xf32> -> vector<98x64xf32>
    %c0_3 = arith.constant 0 : index
    %c0_4 = arith.constant 0 : index
    %3 = vector.load %arg2[%c0_3, %c0_4] : memref<1x64xf32, #tpu.memory_space<vmem>>, vector<1x64xf32>
    %4 = vector.broadcast %3 : vector<1x64xf32> to vector<98x64xf32>
    %5 = arith.addf %2, %4 : vector<98x64xf32>
    %cst_5 = arith.constant 0.000000e+00 : f32
    %6 = vector.broadcast %cst_5 : f32 to vector<98x64xf32>
    %7 = arith.maximumf %5, %6 : vector<98x64xf32>
    %c0_6 = arith.constant 0 : index
    %c0_7 = arith.constant 0 : index
    %8 = vector.load %arg3[%c0_6, %c0_7] : memref<98x64xf32, #tpu.memory_space<vmem>>, vector<98x64xf32>
    tpu.vector_store %arg3[%c0_6, %c0_7], %7 {strides = array<i32>} : memref<98x64xf32, #tpu.memory_space<vmem>>, vector<98x64xf32>,
    return
  }
}

module attributes {stable_mosaic.version = 11 : i64} {
  func.func @_lstm_heads_kernel(%arg0: i32, %arg1: memref<2x3136xbf16, #tpu.memory_space<vmem>>, %arg2: memref<2x512xbf16, #tpu.memory_space<vmem>>, %arg3: memref<2x128xf32, #tpu.memory_space<vmem>>, %arg4: memref<1x3136x512xi8, #tpu.memory_space<vmem>>, %arg5: memref<1x1x512xf32, #tpu.memory_space<vmem>>, %arg6: memref<1x512x512xi8, #tpu.memory_space<vmem>>, %arg7: memref<1x1x512xf32, #tpu.memory_space<vmem>>, %arg8: memref<1x1x512xf32, #tpu.memory_space<vmem>>, %arg9: memref<1x128x128xbf16, #tpu.memory_space<vmem>>, %arg10: memref<2x128xf32, #tpu.memory_space<vmem>>, %arg11: memref<2x128xf32, #tpu.memory_space<vmem>>, %arg12: memref<1x2x128xf32, #tpu.memory_space<vmem>>) attributes {dimension_semantics = [#tpu.dimension_semantics<parallel>], iteration_bounds = array<i64: 4>, scalar_prefetch = 0 : i64, scratch_operands = 0 : i64, tpu.core_type = #tpu.core_type<tc>, window_params = [{pipeline_mode = #tpu.pipeline_mode<synchronous>, transform_indices = @transform_0, window_bounds = array<i64: 2, 3136>}, {pipeline_mode = #tpu.pipeline_mode<synchronous>, transform_indices = @transform_1, window_bounds = array<i64: 2, 512>}, {transform_indices = @transform_2, window_bounds = array<i64: 2, 128>}, {transform_indices = @transform_3, window_bounds = array<i64: 1, 3136, 512>}, {transform_indices = @transform_4, window_bounds = array<i64: 1, 1, 512>}, {transform_indices = @transform_5, window_bounds = array<i64: 1, 512, 512>}, {transform_indices = @transform_6, window_bounds = array<i64: 1, 1, 512>}, {transform_indices = @transform_7, window_bounds = array<i64: 1, 1, 512>}, {transform_indices = @transform_8, window_bounds = array<i64: 1, 128, 128>}, {transform_indices = @transform_9, window_bounds = array<i64: 2, 128>}, {transform_indices = @transform_10, window_bounds = array<i64: 2, 128>}, {transform_indices = @transform_11, window_bounds = array<i64: 1, 2, 128>}]} {
    %c0 = arith.constant 0 : index
    %c0_0 = arith.constant 0 : index
    %0 = vector.load %arg1[%c0, %c0_0] : memref<2x3136xbf16, #tpu.memory_space<vmem>>, vector<2x3136xbf16>
    %c0_1 = arith.constant 0 : index
    %c0_2 = arith.constant 0 : index
    %c0_3 = arith.constant 0 : index
    %1 = vector.load %arg4[%c0_1, %c0_2, %c0_3] : memref<1x3136x512xi8, #tpu.memory_space<vmem>>, vector<1x3136x512xi8>
    %2 = vector.shape_cast %1 : vector<1x3136x512xi8> to vector<3136x512xi8>
    %3 = arith.sitofp %2 : vector<3136x512xi8> to vector<3136x512xf32>
    %4 = arith.truncf %3 : vector<3136x512xf32> to vector<3136x512xbf16>
    %cst = arith.constant dense<0.000000e+00> : vector<2x512xf32>
    %5 = tpu.matmul %0, %4, %cst {dimension_numbers = #tpu.dot_dimension_numbers<[1], [0], [0], [1], [0, 0, 1, 1], [], []>} : vector<2x3136xbf16>, vector<3136x512xbf16>, vector<2x512xf32> -> vector<2x512xf32>
    %c0_4 = arith.constant 0 : index
    %c0_5 = arith.constant 0 : index
    %c0_6 = arith.constant 0 : index
    %6 = vector.load %arg5[%c0_4, %c0_5, %c0_6] : memref<1x1x512xf32, #tpu.memory_space<vmem>>, vector<1x1x512xf32>
    %7 = vector.shape_cast %6 : vector<1x1x512xf32> to vector<1x512xf32>
    %8 = vector.broadcast %7 : vector<1x512xf32> to vector<2x512xf32>
    %9 = arith.mulf %5, %8 : vector<2x512xf32>
    %c0_7 = arith.constant 0 : index
    %c0_8 = arith.constant 0 : index
    %10 = vector.load %arg2[%c0_7, %c0_8] : memref<2x512xbf16, #tpu.memory_space<vmem>>, vector<2x512xbf16>
    %c0_9 = arith.constant 0 : index
    %c0_10 = arith.constant 0 : index
    %c0_11 = arith.constant 0 : index
    %11 = vector.load %arg6[%c0_9, %c0_10, %c0_11] : memref<1x512x512xi8, #tpu.memory_space<vmem>>, vector<1x512x512xi8>
    %12 = vector.shape_cast %11 : vector<1x512x512xi8> to vector<512x512xi8>
    %13 = arith.sitofp %12 : vector<512x512xi8> to vector<512x512xf32>
    %14 = arith.truncf %13 : vector<512x512xf32> to vector<512x512xbf16>
    %cst_12 = arith.constant dense<0.000000e+00> : vector<2x512xf32>
    %15 = tpu.matmul %10, %14, %cst_12 {dimension_numbers = #tpu.dot_dimension_numbers<[1], [0], [0], [1], [0, 0, 1, 1], [], []>} : vector<2x512xbf16>, vector<512x512xbf16>, vector<2x512xf32> -> vector<2x512xf32>
    %c0_13 = arith.constant 0 : index
    %c0_14 = arith.constant 0 : index
    %c0_15 = arith.constant 0 : index
    %16 = vector.load %arg7[%c0_13, %c0_14, %c0_15] : memref<1x1x512xf32, #tpu.memory_space<vmem>>, vector<1x1x512xf32>
    %17 = vector.shape_cast %16 : vector<1x1x512xf32> to vector<1x512xf32>
    %18 = vector.broadcast %17 : vector<1x512xf32> to vector<2x512xf32>
    %19 = arith.mulf %15, %18 : vector<2x512xf32>
    %20 = arith.addf %9, %19 : vector<2x512xf32>
    %c0_16 = arith.constant 0 : index
    %c0_17 = arith.constant 0 : index
    %c0_18 = arith.constant 0 : index
    %21 = vector.load %arg8[%c0_16, %c0_17, %c0_18] : memref<1x1x512xf32, #tpu.memory_space<vmem>>, vector<1x1x512xf32>
    %22 = vector.shape_cast %21 : vector<1x1x512xf32> to vector<1x512xf32>
    %23 = vector.broadcast %22 : vector<1x512xf32> to vector<2x512xf32>
    %24 = arith.addf %20, %23 : vector<2x512xf32>
    %25 = vector.extract_strided_slice %24 {offsets = [0, 0], sizes = [2, 128], strides = [1, 1]} : vector<2x512xf32> to vector<2x128xf32>
    %26 = arith.negf %25 : vector<2x128xf32>
    %27 = math.exp %26 : vector<2x128xf32>
    %cst_19 = arith.constant 1.000000e+00 : f32
    %28 = vector.broadcast %cst_19 : f32 to vector<2x128xf32>
    %29 = arith.addf %28, %27 : vector<2x128xf32>
    %30 = arith.divf %28, %29 : vector<2x128xf32>
    %31 = vector.extract_strided_slice %24 {offsets = [0, 128], sizes = [2, 128], strides = [1, 1]} : vector<2x512xf32> to vector<2x128xf32>
    %32 = arith.negf %31 : vector<2x128xf32>
    %33 = math.exp %32 : vector<2x128xf32>
    %cst_20 = arith.constant 1.000000e+00 : f32
    %34 = vector.broadcast %cst_20 : f32 to vector<2x128xf32>
    %35 = arith.addf %34, %33 : vector<2x128xf32>
    %36 = arith.divf %34, %35 : vector<2x128xf32>
    %37 = vector.extract_strided_slice %24 {offsets = [0, 256], sizes = [2, 128], strides = [1, 1]} : vector<2x512xf32> to vector<2x128xf32>
    %38 = math.tanh %37 : vector<2x128xf32>
    %39 = vector.extract_strided_slice %24 {offsets = [0, 384], sizes = [2, 128], strides = [1, 1]} : vector<2x512xf32> to vector<2x128xf32>
    %40 = arith.negf %39 : vector<2x128xf32>
    %41 = math.exp %40 : vector<2x128xf32>
    %cst_21 = arith.constant 1.000000e+00 : f32
    %42 = vector.broadcast %cst_21 : f32 to vector<2x128xf32>
    %43 = arith.addf %42, %41 : vector<2x128xf32>
    %44 = arith.divf %42, %43 : vector<2x128xf32>
    %c0_22 = arith.constant 0 : index
    %c0_23 = arith.constant 0 : index
    %45 = vector.load %arg3[%c0_22, %c0_23] : memref<2x128xf32, #tpu.memory_space<vmem>>, vector<2x128xf32>
    %46 = arith.mulf %36, %45 : vector<2x128xf32>
    %47 = arith.mulf %30, %38 : vector<2x128xf32>
    %48 = arith.addf %46, %47 : vector<2x128xf32>
    %49 = math.tanh %48 : vector<2x128xf32>
    %50 = arith.mulf %44, %49 : vector<2x128xf32>
    %c0_24 = arith.constant 0 : index
    %c0_25 = arith.constant 0 : index
    %51 = vector.load %arg10[%c0_24, %c0_25] : memref<2x128xf32, #tpu.memory_space<vmem>>, vector<2x128xf32>
    tpu.vector_store %arg10[%c0_24, %c0_25], %50 {strides = array<i32>} : memref<2x128xf32, #tpu.memory_space<vmem>>, vector<2x128xf32>,
    %c0_26 = arith.constant 0 : index
    %c0_27 = arith.constant 0 : index
    %52 = vector.load %arg11[%c0_26, %c0_27] : memref<2x128xf32, #tpu.memory_space<vmem>>, vector<2x128xf32>
    tpu.vector_store %arg11[%c0_26, %c0_27], %48 {strides = array<i32>} : memref<2x128xf32, #tpu.memory_space<vmem>>, vector<2x128xf32>,
    %53 = arith.truncf %50 : vector<2x128xf32> to vector<2x128xbf16>
    %c0_28 = arith.constant 0 : index
    %c0_29 = arith.constant 0 : index
    %c0_30 = arith.constant 0 : index
    %54 = vector.load %arg9[%c0_28, %c0_29, %c0_30] : memref<1x128x128xbf16, #tpu.memory_space<vmem>>, vector<1x128x128xbf16>
    %55 = vector.shape_cast %54 : vector<1x128x128xbf16> to vector<128x128xbf16>
    %cst_31 = arith.constant dense<0.000000e+00> : vector<2x128xf32>
    %56 = tpu.matmul %53, %55, %cst_31 {dimension_numbers = #tpu.dot_dimension_numbers<[1], [0], [0], [1], [0, 0, 1, 1], [], []>} : vector<2x128xbf16>, vector<128x128xbf16>, vector<2x128xf32> -> vector<2x128xf32>
    %c0_32 = arith.constant 0 : index
    %c0_33 = arith.constant 0 : index
    %c0_34 = arith.constant 0 : index
    %57 = vector.load %arg12[%c0_32, %c0_33, %c0_34] : memref<1x2x128xf32, #tpu.memory_space<vmem>>, vector<1x2x128xf32>
    %58 = vector.shape_cast %57 : vector<1x2x128xf32> to vector<2x128xf32>
    %59 = vector.shape_cast %56 : vector<2x128xf32> to vector<1x2x128xf32>
    tpu.vector_store %arg12[%c0_32, %c0_33, %c0_34], %59 {strides = array<i32>} : memref<1x2x128xf32, #tpu.memory_space<vmem>>, vector<1x2x128xf32>,
    return
  }
  func.func @transform_0(%arg0: i32) -> (i32, i32) {
    %c0_i32 = arith.constant 0 : i32
    %c0_i32_0 = arith.constant 0 : i32
    %c0_i32_1 = arith.constant 0 : i32
    return %c0_i32, %c0_i32_0 : i32, i32
  }
  func.func @transform_1(%arg0: i32) -> (i32, i32) {
    %c0_i32 = arith.constant 0 : i32
    %c0_i32_0 = arith.constant 0 : i32
    %c0_i32_1 = arith.constant 0 : i32
    return %c0_i32, %c0_i32_0 : i32, i32
  }
  func.func @transform_2(%arg0: i32) -> (i32, i32) {
    %c0_i32 = arith.constant 0 : i32
    %c0_i32_0 = arith.constant 0 : i32
    return %c0_i32, %arg0 : i32, i32
  }
  func.func @transform_3(%arg0: i32) -> (i32, i32, i32) {
    %c0_i32 = arith.constant 0 : i32
    %c0_i32_0 = arith.constant 0 : i32
    %c0_i32_1 = arith.constant 0 : i32
    return %arg0, %c0_i32, %c0_i32_0 : i32, i32, i32
  }
  func.func @transform_4(%arg0: i32) -> (i32, i32, i32) {
    %c0_i32 = arith.constant 0 : i32
    %c0_i32_0 = arith.constant 0 : i32
    %c0_i32_1 = arith.constant 0 : i32
    return %arg0, %c0_i32, %c0_i32_0 : i32, i32, i32
  }
  func.func @transform_5(%arg0: i32) -> (i32, i32, i32) {
    %c0_i32 = arith.constant 0 : i32
    %c0_i32_0 = arith.constant 0 : i32
    %c0_i32_1 = arith.constant 0 : i32
    return %arg0, %c0_i32, %c0_i32_0 : i32, i32, i32
  }
  func.func @transform_6(%arg0: i32) -> (i32, i32, i32) {
    %c0_i32 = arith.constant 0 : i32
    %c0_i32_0 = arith.constant 0 : i32
    %c0_i32_1 = arith.constant 0 : i32
    return %arg0, %c0_i32, %c0_i32_0 : i32, i32, i32
  }
  func.func @transform_7(%arg0: i32) -> (i32, i32, i32) {
    %c0_i32 = arith.constant 0 : i32
    %c0_i32_0 = arith.constant 0 : i32
    %c0_i32_1 = arith.constant 0 : i32
    return %arg0, %c0_i32, %c0_i32_0 : i32, i32, i32
  }
  func.func @transform_8(%arg0: i32) -> (i32, i32, i32) {
    %c0_i32 = arith.constant 0 : i32
    %c0_i32_0 = arith.constant 0 : i32
    %c0_i32_1 = arith.constant 0 : i32
    return %arg0, %c0_i32, %c0_i32_0 : i32, i32, i32
  }
  func.func @transform_9(%arg0: i32) -> (i32, i32) {
    %c0_i32 = arith.constant 0 : i32
    %c0_i32_0 = arith.constant 0 : i32
    return %c0_i32, %arg0 : i32, i32
  }
  func.func @transform_10(%arg0: i32) -> (i32, i32) {
    %c0_i32 = arith.constant 0 : i32
    %c0_i32_0 = arith.constant 0 : i32
    return %c0_i32, %arg0 : i32, i32
  }
  func.func @transform_11(%arg0: i32) -> (i32, i32, i32) {
    %c0_i32 = arith.constant 0 : i32
    %c0_i32_0 = arith.constant 0 : i32
    %c0_i32_1 = arith.constant 0 : i32
    return %arg0, %c0_i32, %c0_i32_0 : i32, i32, i32
  }
}

</mosaic_0001>

<bundles_post_ra>
// kernel: forward.4
= control target key start
LH: loop header
LB: loop body
LE: loop exit
PB: predicated region body
PF: predicated region fallthrough
CT: control target
= control target key end

     0   :  { %vm126_vm0 = vcmask 523264   ;;  %vm844_vm1 = vcmask 261120   ;;  %s2023_s1 = inlined_call_operand.vmem [shape: f32[64,32], index: 1, kind: input, shape index: {}]   ;;  %s2024_s0 = inlined_call_operand.vmem [shape: f32[800,64], index: 0, kind: input, shape index: {}]   ;;  %s2025_s2 = inlined_call_operand.vmem [shape: f32[1,32], index: 2, kind: input, shape index: {}]   ;;  %s2026_s3 = inlined_call_operand.vmem [shape: f32[800,32], index: 3, kind: output, shape index: {}]  }
   0x1   :  { %v121_v0 = vld [vmem:[%s2023_s1 + $0x38] sm:$0xff]  ;;  %v120_v1 = vld [vmem:[%s2023_s1 + $0x30] sm:$0xff]  ;;  %v119_v2 = vld [vmem:[%s2023_s1 + $0x28] sm:$0xff] }
   0x2   :  { %1050 = vmatpush.msra.mxu2 %v121_v0  ;;  %1051 = vmatpush.msra.mxu3 %v121_v0  ;;  %v118_v3 = vld [vmem:[%s2023_s1 + $0x20] sm:$0xff]  ;;  %v117_v4 = vld [vmem:[%s2023_s1 + $0x18] sm:$0xff]  ;;  %v116_v5 = vld [vmem:[%s2023_s1 + $0x10] sm:$0xff] }
   0x3   :  { %435 = vmatpush.msra.mxu0 %v121_v0  ;;  %1049 = vmatpush.msra.mxu1 %v121_v0  ;;  %v115_v6 = vld [vmem:[%s2023_s1 + $0x8] sm:$0xff]  ;;  %v114_v7 = vld [vmem:[%s2023_s1] sm:$0xff]  ;;  %v64_v8 = vld [vmem:[%s2024_s0 + $0x190] sm:$0xff] }
   0x4   :  { %1053 = vmatpush.msra.mxu2 %v120_v1  ;;  %1054 = vmatpush.msra.mxu3 %v120_v1  ;;  %v89_v9 = vld [vmem:[%s2024_s0 + $0x258] sm:$0xff]  ;;  %v14_v10 = vld [vmem:[%s2024_s0] sm:$0xff]  ;;  %v39_v11 = vld [vmem:[%s2024_s0 + $0xc8] sm:$0xff] }
   0x5   :  { %436 = vmatpush.msra.mxu0 %v120_v1  ;;  %1052 = vmatpush.msra.mxu1 %v120_v1  ;;  %v65_v12 = vld [vmem:[%s2024_s0 + $0x198] sm:$0xff]  ;;  %v90_v13 = vld [vmem:[%s2024_s0 + $0x260] sm:$0xff]  ;;  %v15_v14 = vld [vmem:[%s2024_s0 + $0x8] sm:$0xff] }
   0x6   :  { %1056 = vmatpush.msra.mxu2 %v119_v2  ;;  %1057 = vmatpush.msra.mxu3 %v119_v2  ;;  %v40_v15 = vld [vmem:[%s2024_s0 + $0xd0] sm:$0xff]  ;;  %v66_v16 = vld [vmem:[%s2024_s0 + $0x1a0] sm:$0xff]  ;;  %v91_v17 = vld [vmem:[%s2024_s0 + $0x268] sm:$0xff] }
   0x7   :  { %437 = vmatpush.msra.mxu0 %v119_v2  ;;  %1055 = vmatpush.msra.mxu1 %v119_v2  ;;  %v16_v18 = vld [vmem:[%s2024_s0 + $0x10] sm:$0xff]  ;;  %v41_v19 = vld [vmem:[%s2024_s0 + $0xd8] sm:$0xff]  ;;  %v67_v20 = vld [vmem:[%s2024_s0 + $0x1a8] sm:$0xff] }
   0x8   :  { %1059 = vmatpush.msra.mxu2 %v118_v3  ;;  %1060 = vmatpush.msra.mxu3 %v118_v3  ;;  %v92_v21 = vld [vmem:[%s2024_s0 + $0x270] sm:$0xff]  ;;  %v17_v22 = vld [vmem:[%s2024_s0 + $0x18] sm:$0xff]  ;;  %v42_v23 = vld [vmem:[%s2024_s0 + $0xe0] sm:$0xff] }
   0x9   :  { %438 = vmatpush.msra.mxu0 %v118_v3  ;;  %1058 = vmatpush.msra.mxu1 %v118_v3  ;;  %v68_v24 = vld [vmem:[%s2024_s0 + $0x1b0] sm:$0xff]  ;;  %v93_v25 = vld [vmem:[%s2024_s0 + $0x278] sm:$0xff]  ;;  %v18_v26 = vld [vmem:[%s2024_s0 + $0x20] sm:$0xff] }
   0xa   :  { %1062 = vmatpush.msra.mxu2 %v117_v4  ;;  %1063 = vmatpush.msra.mxu3 %v117_v4  ;;  %v43_v27 = vld [vmem:[%s2024_s0 + $0xe8] sm:$0xff]  ;;  %v69_v28 = vld [vmem:[%s2024_s0 + $0x1b8] sm:$0xff]  ;;  %v94_v29 = vld [vmem:[%s2024_s0 + $0x280] sm:$0xff] }
   0xb   :  { %439 = vmatpush.msra.mxu0 %v117_v4  ;;  %1061 = vmatpush.msra.mxu1 %v117_v4  ;;  %v19_v30 = vld [vmem:[%s2024_s0 + $0x28] sm:$0xff]  ;;  %v44_v31 = vld [vmem:[%s2024_s0 + $0xf0] sm:$0xff]  ;;  %v70_v32 = vld [vmem:[%s2024_s0 + $0x1c0] sm:$0xff] }
   0xc   :  { %1065 = vmatpush.msra.mxu2 %v116_v5  ;;  %1066 = vmatpush.msra.mxu3 %v116_v5  ;;  %v95_v33 = vld [vmem:[%s2024_s0 + $0x288] sm:$0xff]  ;;  %v20_v34 = vld [vmem:[%s2024_s0 + $0x30] sm:$0xff]  ;;  %v45_v35 = vld [vmem:[%s2024_s0 + $0xf8] sm:$0xff] }
   0xd   :  { %440 = vmatpush.msra.mxu0 %v116_v5  ;;  %1064 = vmatpush.msra.mxu1 %v116_v5  ;;  %v71_v36 = vld [vmem:[%s2024_s0 + $0x1c8] sm:$0xff]  ;;  %v96_v37 = vld [vmem:[%s2024_s0 + $0x290] sm:$0xff]  ;;  %v21_v38 = vld [vmem:[%s2024_s0 + $0x38] sm:$0xff] }
   0xe   :  { %1068 = vmatpush.msra.mxu2 %v115_v6  ;;  %1069 = vmatpush.msra.mxu3 %v115_v6  ;;  %v46_v39 = vld [vmem:[%s2024_s0 + $0x100] sm:$0xff]  ;;  %v72_v40 = vld [vmem:[%s2024_s0 + $0x1d0] sm:$0xff]  ;;  %v97_v41 = vld [vmem:[%s2024_s0 + $0x298] sm:$0xff] }
   0xf   :  { %441 = vmatpush.msra.mxu0 %v115_v6  ;;  %1067 = vmatpush.msra.mxu1 %v115_v6  ;;  %v22_v42 = vld [vmem:[%s2024_s0 + $0x40] sm:$0xff]  ;;  %v47_v43 = vld [vmem:[%s2024_s0 + $0x108] sm:$0xff]  ;;  %v73_v44 = vld [vmem:[%s2024_s0 + $0x1d8] sm:$0xff] }
  0x10   :  { %1071 = vmatpush.msra.mxu2 %v114_v7  ;;  %1072 = vmatpush.msra.mxu3 %v114_v7  ;;  %v98_v45 = vld [vmem:[%s2024_s0 + $0x2a0] sm:$0xff]  ;;  %v23_v46 = vld [vmem:[%s2024_s0 + $0x48] sm:$0xff]  ;;  %v48_v47 = vld [vmem:[%s2024_s0 + $0x110] sm:$0xff] }
  0x11   :  { %999 = vmatmul.msk.f32.vlgmr.msra.gmra.mxu2 %vm126_vm0, %v64_v8  ;;  %1024 = vmatmul.msk.f32.vlgmr.msra.gmra.mxu3 %vm126_vm0, %v89_v9  ;;  %v74_v48 = vld [vmem:[%s2024_s0 + $0x1e0] sm:$0xff]  ;;  %v99_v49 = vld [vmem:[%s2024_s0 + $0x2a8] sm:$0xff]  ;;  %v24_v50 = vld [vmem:[%s2024_s0 + $0x50] sm:$0xff] }
  0x12   :  { %442 = vmatpush.msra.mxu0 %v114_v7  ;;  %1070 = vmatpush.msra.mxu1 %v114_v7  ;;  %v49_v51 = vld [vmem:[%s2024_s0 + $0x118] sm:$0xff]  ;;  %v75_v52 = vld [vmem:[%s2024_s0 + $0x1e8] sm:$0xff]  ;;  %v100_v53 = vld [vmem:[%s2024_s0 + $0x2b0] sm:$0xff] }
  0x13   :  { %949 = vmatmul.msk.f32.vlgmr.msra.gmra.mxu0 %vm126_vm0, %v14_v10  ;;  %974 = vmatmul.msk.f32.vlgmr.msra.gmra.mxu1 %vm126_vm0, %v39_v11  ;;  %v25_v54 = vld [vmem:[%s2024_s0 + $0x58] sm:$0xff]  ;;  %v50_v55 = vld [vmem:[%s2024_s0 + $0x120] sm:$0xff]  ;;  %v76_v56 = vld [vmem:[%s2024_s0 + $0x1f0] sm:$0xff] }
  0x14   :  { %v101_v57 = vld [vmem:[%s2024_s0 + $0x2b8] sm:$0xff]  ;;  %v26_v58 = vld [vmem:[%s2024_s0 + $0x60] sm:$0xff]  ;;  %v51_v59 = vld [vmem:[%s2024_s0 + $0x128] sm:$0xff] }
  0x15   :  { %v77_v60 = vld [vmem:[%s2024_s0 + $0x1f8] sm:$0xff]  ;;  %v102_v61 = vld [vmem:[%s2024_s0 + $0x2c0] sm:$0xff]  ;;  %v27_v62 = vld [vmem:[%s2024_s0 + $0x68] sm:$0xff] }
  0x16   :  { %v52_v63 = vld [vmem:[%s2024_s0 + $0x130] sm:$0xff]  ;;  %v78_v0 = vld [vmem:[%s2024_s0 + $0x200] sm:$0xff]  ;;  %v103_v1 = vld [vmem:[%s2024_s0 + $0x2c8] sm:$0xff] }
  0x17   :  { %v28_v2 = vld [vmem:[%s2024_s0 + $0x70] sm:$0xff]  ;;  %v53_v3 = vld [vmem:[%s2024_s0 + $0x138] sm:$0xff]  ;;  %v79_v4 = vld [vmem:[%s2024_s0 + $0x208] sm:$0xff] }
  0x18   :  { %v104_v5 = vld [vmem:[%s2024_s0 + $0x2d0] sm:$0xff]  ;;  %v29_v6 = vld [vmem:[%s2024_s0 + $0x78] sm:$0xff]  ;;  %v54_v7 = vld [vmem:[%s2024_s0 + $0x140] sm:$0xff] }
  0x19   :  { %1000 = vmatmul.msk.f32.gmra.mxu2 %vm126_vm0, %v65_v12  ;;  %1025 = vmatmul.msk.f32.gmra.mxu3 %vm126_vm0, %v90_v13  ;;  %v1377_v8 = vld [vmem:[%s2025_s2] ss:$0 sm:$0xff]  ;;  %v80_v9 = vld [vmem:[%s2024_s0 + $0x210] sm:$0xff]  ;;  %v105_v10 = vld [vmem:[%s2024_s0 + $0x2d8] sm:$0xff] }
  0x1a   :  { %v30_v13 = vld [vmem:[%s2024_s0 + $0x80] sm:$0xff] }
  0x1b   :  { %950 = vmatmul.msk.f32.gmra.mxu0 %vm126_vm0, %v15_v14  ;;  %975 = vmatmul.msk.f32.gmra.mxu1 %vm126_vm0, %v40_v15  ;;  %v55_v14 = vld [vmem:[%s2024_s0 + $0x148] sm:$0xff] }
  0x21   :  { %1001 = vmatmul.msk.f32.gmra.mxu2 %vm126_vm0, %v66_v16  ;;  %1026 = vmatmul.msk.f32.gmra.mxu3 %vm126_vm0, %v91_v17 }
  0x23   :  { %951 = vmatmul.msk.f32.gmra.mxu0 %vm126_vm0, %v16_v18  ;;  %976 = vmatmul.msk.f32.gmra.mxu1 %vm126_vm0, %v41_v19 }
  0x29   :  { %1002 = vmatmul.msk.f32.gmra.mxu2 %vm126_vm0, %v67_v20  ;;  %1027 = vmatmul.msk.f32.gmra.mxu3 %vm126_vm0, %v92_v21 }
  0x2b   :  { %952 = vmatmul.msk.f32.gmra.mxu0 %vm126_vm0, %v17_v22  ;;  %977 = vmatmul.msk.f32.gmra.mxu1 %vm126_vm0, %v42_v23  ;;  %v81_v23 = vld [vmem:[%s2024_s0 + $0x218] sm:$0xff] }
  0x31   :  { %1003 = vmatmul.msk.f32.gmra.mxu2 %vm126_vm0, %v68_v24  ;;  %1028 = vmatmul.msk.f32.gmra.mxu3 %vm126_vm0, %v93_v25  ;;  %v106_v24 = vld [vmem:[%s2024_s0 + $0x2e0] sm:$0xff] }
  0x33   :  { %953 = vmatmul.msk.f32.gmra.mxu0 %vm126_vm0, %v18_v26  ;;  %978 = vmatmul.msk.f32.gmra.mxu1 %vm126_vm0, %v43_v27 }
  0x39   :  { %1004 = vmatmul.msk.f32.gmra.mxu2 %vm126_vm0, %v69_v28  ;;  %1029 = vmatmul.msk.f32.gmra.mxu3 %vm126_vm0, %v94_v29  ;;  %v31_v29 = vld [vmem:[%s2024_s0 + $0x88] sm:$0xff] }
  0x3b   :  { %954 = vmatmul.msk.f32.gmra.mxu0 %vm126_vm0, %v19_v30  ;;  %979 = vmatmul.msk.f32.gmra.mxu1 %vm126_vm0, %v44_v31  ;;  %v56_v30 = vld [vmem:[%s2024_s0 + $0x150] sm:$0xff] }
  0x41   :  { %1005 = vmatmul.msk.f32.gmra.mxu2 %vm126_vm0, %v70_v32  ;;  %1030 = vmatmul.msk.f32.gmra.mxu3 %vm126_vm0, %v95_v33 }
  0x43   :  { %955 = vmatmul.msk.f32.gmra.mxu0 %vm126_vm0, %v20_v34  ;;  %980 = vmatmul.msk.f32.gmra.mxu1 %vm126_vm0, %v45_v35 }
  0x49   :  { %1006 = vmatmul.msk.f32.gmra.mxu2 %vm126_vm0, %v71_v36  ;;  %1031 = vmatmul.msk.f32.gmra.mxu3 %vm126_vm0, %v96_v37 }
  0x4b   :  { %956 = vmatmul.msk.f32.gmra.mxu0 %vm126_vm0, %v21_v38  ;;  %981 = vmatmul.msk.f32.gmra.mxu1 %vm126_vm0, %v46_v39  ;;  %v82_v39 = vld [vmem:[%s2024_s0 + $0x220] sm:$0xff] }
  0x51   :  { %1007 = vmatmul.msk.f32.gmra.mxu2 %vm126_vm0, %v72_v40  ;;  %1032 = vmatmul.msk.f32.gmra.mxu3 %vm126_vm0, %v97_v41  ;;  %v107_v40 = vld [vmem:[%s2024_s0 + $0x2e8] sm:$0xff] }
  0x53   :  { %957 = vmatmul.msk.f32.gmra.mxu0 %vm126_vm0, %v22_v42  ;;  %982 = vmatmul.msk.f32.gmra.mxu1 %vm126_vm0, %v47_v43 }
  0x59   :  { %1008 = vmatmul.msk.f32.gmra.mxu2 %vm126_vm0, %v73_v44  ;;  %1033 = vmatmul.msk.f32.gmra.mxu3 %vm126_vm0, %v98_v45  ;;  %v32_v45 = vld [vmem:[%s2024_s0 + $0x90] sm:$0xff] }
  0x5b   :  { %958 = vmatmul.msk.f32.gmra.mxu0 %vm126_vm0, %v23_v46  ;;  %983 = vmatmul.msk.f32.gmra.mxu1 %vm126_vm0, %v48_v47  ;;  %v57_v46 = vld [vmem:[%s2024_s0 + $0x158] sm:$0xff] }
  0x61   :  { %1009 = vmatmul.msk.f32.gmra.mxu2 %vm126_vm0, %v74_v48  ;;  %1034 = vmatmul.msk.f32.gmra.mxu3 %vm126_vm0, %v99_v49 }
  0x63   :  { %959 = vmatmul.msk.f32.gmra.mxu0 %vm126_vm0, %v24_v50  ;;  %984 = vmatmul.msk.f32.gmra.mxu1 %vm126_vm0, %v49_v51 }
  0x69   :  { %1010 = vmatmul.msk.f32.gmra.mxu2 %vm126_vm0, %v75_v52  ;;  %1035 = vmatmul.msk.f32.gmra.mxu3 %vm126_vm0, %v100_v53 }
  0x6b   :  { %960 = vmatmul.msk.f32.gmra.mxu0 %vm126_vm0, %v25_v54  ;;  %985 = vmatmul.msk.f32.gmra.mxu1 %vm126_vm0, %v50_v55  ;;  %v83_v55 = vld [vmem:[%s2024_s0 + $0x228] sm:$0xff] }
  0x71   :  { %1011 = vmatmul.msk.f32.gmra.mxu2 %vm126_vm0, %v76_v56  ;;  %1036 = vmatmul.msk.f32.gmra.mxu3 %vm126_vm0, %v101_v57  ;;  %v108_v56 = vld [vmem:[%s2024_s0 + $0x2f0] sm:$0xff] }
  0x73   :  { %961 = vmatmul.msk.f32.gmra.mxu0 %vm126_vm0, %v26_v58  ;;  %986 = vmatmul.msk.f32.gmra.mxu1 %vm126_vm0, %v51_v59 }
  0x79   :  { %1012 = vmatmul.msk.f32.gmra.mxu2 %vm126_vm0, %v77_v60  ;;  %1037 = vmatmul.msk.f32.gmra.mxu3 %vm126_vm0, %v102_v61  ;;  %v33_v61 = vld [vmem:[%s2024_s0 + $0x98] sm:$0xff] }
  0x7b   :  { %962 = vmatmul.msk.f32.gmra.mxu0 %vm126_vm0, %v27_v62  ;;  %987 = vmatmul.msk.f32.gmra.mxu1 %vm126_vm0, %v52_v63  ;;  %v58_v62 = vld [vmem:[%s2024_s0 + $0x160] sm:$0xff] }
  0x81   :  { %1013 = vmatmul.msk.f32.gmra.mxu2 %vm126_vm0, %v78_v0  ;;  %1038 = vmatmul.msk.f32.gmra.mxu3 %vm126_vm0, %v103_v1 }
  0x83   :  { %963 = vmatmul.msk.f32.gmra.mxu0 %vm126_vm0, %v28_v2  ;;  %988 = vmatmul.msk.f32.gmra.mxu1 %vm126_vm0, %v53_v3 }
  0x89   :  { %1014 = vmatmul.msk.f32.gmra.mxu2 %vm126_vm0, %v79_v4  ;;  %1039 = vmatmul.msk.f32.gmra.mxu3 %vm126_vm0, %v104_v5 }
  0x8b   :  { %964 = vmatmul.msk.f32.gmra.mxu0 %vm126_vm0, %v29_v6  ;;  %989 = vmatmul.msk.f32.gmra.mxu1 %vm126_vm0, %v54_v7  ;;  %v84_v7 = vld [vmem:[%s2024_s0 + $0x230] sm:$0xff] }
  0x90   :  { %v444_v11 = vpop.f32.mrf.mxu0  ;;  %v519_v12 = vpop.f32.mrf.mxu1 }
  0x91   :  { %1015 = vmatmul.msk.f32.gmra.mxu2 %vm126_vm0, %v80_v9  ;;  %1040 = vmatmul.msk.f32.gmra.mxu3 %vm126_vm0, %v105_v10  ;;  %v445_v15 = vadd.f32 %v1377_v8, %v444_v11  ;;  %v520_v16 = vadd.f32 %v1377_v8, %v519_v12  ;;  %v109_v9 = vld [vmem:[%s2024_s0 + $0x2f8] sm:$0xff] }
  0x93   :  { %v744_v17 = vmax.f32 %v445_v15, 0.0  ;;  %v769_v18 = vmax.f32 %v520_v16, 0.0  ;;  %965 = vmatmul.msk.f32.gmra.mxu0 %vm126_vm0, %v30_v13  ;;  %990 = vmatmul.msk.f32.gmra.mxu1 %vm126_vm0, %v55_v14  ;;  %v34_v14 = vld [vmem:[%s2024_s0 + $0xa0] sm:$0xff]  ;;  %v59_v15 = vld [vmem:[%s2024_s0 + $0x168] sm:$0xff] }
  0x94   :  { %v594_v19 = vpop.f32.mrf.mxu2  ;;  %v669_v20 = vpop.f32.mrf.mxu3 }
  0x95   :  { %845 = vst.msk [vmem:[%s2026_s3] sm:$0xff] %vm844_vm1, %v744_v17  ;;  %v595_v21 = vadd.f32 %v1377_v8, %v594_v19  ;;  %v670_v22 = vadd.f32 %v1377_v8, %v669_v20 }
  0x96   :  { %870 = vst.msk [vmem:[%s2026_s3 + $0xc8] sm:$0xff] %vm844_vm1, %v769_v18 }
  0x97   :  { %v794_v25 = vmax.f32 %v595_v21, 0.0  ;;  %v819_v26 = vmax.f32 %v670_v22, 0.0 }
  0x98   :  { %v447_v27 = vpop.f32.mrf.mxu0  ;;  %v522_v28 = vpop.f32.mrf.mxu1 }
  0x99   :  { %895 = vst.msk [vmem:[%s2026_s3 + $0x190] sm:$0xff] %vm844_vm1, %v794_v25  ;;  %1016 = vmatmul.msk.f32.gmra.mxu2 %vm126_vm0, %v81_v23  ;;  %1041 = vmatmul.msk.f32.gmra.mxu3 %vm126_vm0, %v106_v24  ;;  %v448_v31 = vadd.f32 %v1377_v8, %v447_v27  ;;  %v523_v32 = vadd.f32 %v1377_v8, %v522_v28  ;;  %v85_v24 = vld [vmem:[%s2024_s0 + $0x238] sm:$0xff]  ;;  %v110_v25 = vld [vmem:[%s2024_s0 + $0x300] sm:$0xff] }
  0x9a   :  { %920 = vst.msk [vmem:[%s2026_s3 + $0x258] sm:$0xff] %vm844_vm1, %v819_v26 }
  0x9b   :  { %v745_v33 = vmax.f32 %v448_v31, 0.0  ;;  %v770_v34 = vmax.f32 %v523_v32, 0.0  ;;  %966 = vmatmul.msk.f32.gmra.mxu0 %vm126_vm0, %v31_v29  ;;  %991 = vmatmul.msk.f32.gmra.mxu1 %vm126_vm0, %v56_v30  ;;  %v35_v30 = vld [vmem:[%s2024_s0 + $0xa8] sm:$0xff]  ;;  %v60_v31 = vld [vmem:[%s2024_s0 + $0x170] sm:$0xff] }
  0x9c   :  { %v597_v35 = vpop.f32.mrf.mxu2  ;;  %v672_v36 = vpop.f32.mrf.mxu3 }
  0x9d   :  { %846 = vst.msk [vmem:[%s2026_s3 + $0x8] sm:$0xff] %vm844_vm1, %v745_v33  ;;  %v598_v37 = vadd.f32 %v1377_v8, %v597_v35  ;;  %v673_v38 = vadd.f32 %v1377_v8, %v672_v36 }
  0x9e   :  { %871 = vst.msk [vmem:[%s2026_s3 + $0xd0] sm:$0xff] %vm844_vm1, %v770_v34 }
  0x9f   :  { %v795_v41 = vmax.f32 %v598_v37, 0.0  ;;  %v820_v42 = vmax.f32 %v673_v38, 0.0 }
  0xa0   :  { %v450_v43 = vpop.f32.mrf.mxu0  ;;  %v525_v44 = vpop.f32.mrf.mxu1 }
  0xa1   :  { %896 = vst.msk [vmem:[%s2026_s3 + $0x198] sm:$0xff] %vm844_vm1, %v795_v41  ;;  %1017 = vmatmul.msk.f32.gmra.mxu2 %vm126_vm0, %v82_v39  ;;  %1042 = vmatmul.msk.f32.gmra.mxu3 %vm126_vm0, %v107_v40  ;;  %v451_v47 = vadd.f32 %v1377_v8, %v450_v43  ;;  %v526_v48 = vadd.f32 %v1377_v8, %v525_v44  ;;  %v86_v40 = vld [vmem:[%s2024_s0 + $0x240] sm:$0xff]  ;;  %v111_v41 = vld [vmem:[%s2024_s0 + $0x308] sm:$0xff] }
  0xa2   :  { %921 = vst.msk [vmem:[%s2026_s3 + $0x260] sm:$0xff] %vm844_vm1, %v820_v42 }
  0xa3   :  { %v746_v49 = vmax.f32 %v451_v47, 0.0  ;;  %v771_v50 = vmax.f32 %v526_v48, 0.0  ;;  %967 = vmatmul.msk.f32.gmra.mxu0 %vm126_vm0, %v32_v45  ;;  %992 = vmatmul.msk.f32.gmra.mxu1 %vm126_vm0, %v57_v46  ;;  %v36_v46 = vld [vmem:[%s2024_s0 + $0xb0] sm:$0xff]  ;;  %v61_v47 = vld [vmem:[%s2024_s0 + $0x178] sm:$0xff] }
  0xa4   :  { %v600_v51 = vpop.f32.mrf.mxu2  ;;  %v675_v52 = vpop.f32.mrf.mxu3 }
  0xa5   :  { %847 = vst.msk [vmem:[%s2026_s3 + $0x10] sm:$0xff] %vm844_vm1, %v746_v49  ;;  %v601_v53 = vadd.f32 %v1377_v8, %v600_v51  ;;  %v676_v54 = vadd.f32 %v1377_v8, %v675_v52 }
  0xa6   :  { %872 = vst.msk [vmem:[%s2026_s3 + $0xd8] sm:$0xff] %vm844_vm1, %v771_v50 }
  0xa7   :  { %v796_v57 = vmax.f32 %v601_v53, 0.0  ;;  %v821_v58 = vmax.f32 %v676_v54, 0.0 }
  0xa8   :  { %v453_v59 = vpop.f32.mrf.mxu0  ;;  %v528_v60 = vpop.f32.mrf.mxu1 }
  0xa9   :  { %897 = vst.msk [vmem:[%s2026_s3 + $0x1a0] sm:$0xff] %vm844_vm1, %v796_v57  ;;  %1018 = vmatmul.msk.f32.gmra.mxu2 %vm126_vm0, %v83_v55  ;;  %1043 = vmatmul.msk.f32.gmra.mxu3 %vm126_vm0, %v108_v56  ;;  %v454_v63 = vadd.f32 %v1377_v8, %v453_v59  ;;  %v529_v0 = vadd.f32 %v1377_v8, %v528_v60  ;;  %v87_v56 = vld [vmem:[%s2024_s0 + $0x248] sm:$0xff]  ;;  %v112_v57 = vld [vmem:[%s2024_s0 + $0x310] sm:$0xff] }
  0xaa   :  { %922 = vst.msk [vmem:[%s2026_s3 + $0x268] sm:$0xff] %vm844_vm1, %v821_v58 }
  0xab   :  { %v747_v1 = vmax.f32 %v454_v63, 0.0  ;;  %v772_v2 = vmax.f32 %v529_v0, 0.0  ;;  %968 = vmatmul.msk.f32.gmra.mxu0 %vm126_vm0, %v33_v61  ;;  %993 = vmatmul.msk.f32.gmra.mxu1 %vm126_vm0, %v58_v62  ;;  %v37_v62 = vld [vmem:[%s2024_s0 + $0xb8] sm:$0xff]  ;;  %v62_v63 = vld [vmem:[%s2024_s0 + $0x180] sm:$0xff] }
  0xac   :  { %v603_v3 = vpop.f32.mrf.mxu2  ;;  %v678_v4 = vpop.f32.mrf.mxu3 }
  0xad   :  { %848 = vst.msk [vmem:[%s2026_s3 + $0x18] sm:$0xff] %vm844_vm1, %v747_v1  ;;  %v604_v5 = vadd.f32 %v1377_v8, %v603_v3  ;;  %v679_v6 = vadd.f32 %v1377_v8, %v678_v4 }
  0xae   :  { %873 = vst.msk [vmem:[%s2026_s3 + $0xe0] sm:$0xff] %vm844_vm1, %v772_v2 }
  0xaf   :  { %v797_v10 = vmax.f32 %v604_v5, 0.0  ;;  %v822_v11 = vmax.f32 %v679_v6, 0.0 }
  0xb0   :  { %v456_v12 = vpop.f32.mrf.mxu0  ;;  %v531_v13 = vpop.f32.mrf.mxu1 }
  0xb1   :  { %898 = vst.msk [vmem:[%s2026_s3 + $0x1a8] sm:$0xff] %vm844_vm1, %v797_v10  ;;  %1019 = vmatmul.msk.f32.gmra.mxu2 %vm126_vm0, %v84_v7  ;;  %1044 = vmatmul.msk.f32.gmra.mxu3 %vm126_vm0, %v109_v9  ;;  %v457_v16 = vadd.f32 %v1377_v8, %v456_v12  ;;  %v532_v17 = vadd.f32 %v1377_v8, %v531_v13  ;;  %v88_v9 = vld [vmem:[%s2024_s0 + $0x250] sm:$0xff]  ;;  %v113_v10 = vld [vmem:[%s2024_s0 + $0x318] sm:$0xff] }
  0xb2   :  { %923 = vst.msk [vmem:[%s2026_s3 + $0x270] sm:$0xff] %vm844_vm1, %v822_v11 }
  0xb3   :  { %v748_v18 = vmax.f32 %v457_v16, 0.0  ;;  %v773_v19 = vmax.f32 %v532_v17, 0.0  ;;  %969 = vmatmul.msk.f32.gmra.mxu0 %vm126_vm0, %v34_v14  ;;  %994 = vmatmul.msk.f32.gmra.mxu1 %vm126_vm0, %v59_v15  ;;  %v38_v15 = vld [vmem:[%s2024_s0 + $0xc0] sm:$0xff]  ;;  %v63_v16 = vld [vmem:[%s2024_s0 + $0x188] sm:$0xff] }
  0xb4   :  { %v606_v20 = vpop.f32.mrf.mxu2  ;;  %v681_v21 = vpop.f32.mrf.mxu3 }
  0xb5   :  { %849 = vst.msk [vmem:[%s2026_s3 + $0x20] sm:$0xff] %vm844_vm1, %v748_v18  ;;  %v607_v22 = vadd.f32 %v1377_v8, %v606_v20  ;;  %v682_v23 = vadd.f32 %v1377_v8, %v681_v21 }
  0xb6   :  { %874 = vst.msk [vmem:[%s2026_s3 + $0xe8] sm:$0xff] %vm844_vm1, %v773_v19 }
  0xb7   :  { %v798_v26 = vmax.f32 %v607_v22, 0.0  ;;  %v823_v27 = vmax.f32 %v682_v23, 0.0 }
  0xb8   :  { %v459_v28 = vpop.f32.mrf.mxu0  ;;  %v534_v29 = vpop.f32.mrf.mxu1 }
  0xb9   :  { %899 = vst.msk [vmem:[%s2026_s3 + $0x1b0] sm:$0xff] %vm844_vm1, %v798_v26  ;;  %1020 = vmatmul.msk.f32.gmra.mxu2 %vm126_vm0, %v85_v24  ;;  %1045 = vmatmul.msk.f32.gmra.mxu3 %vm126_vm0, %v110_v25  ;;  %v460_v32 = vadd.f32 %v1377_v8, %v459_v28  ;;  %v535_v33 = vadd.f32 %v1377_v8, %v534_v29 }
  0xba   :  { %924 = vst.msk [vmem:[%s2026_s3 + $0x278] sm:$0xff] %vm844_vm1, %v823_v27 }
  0xbb   :  { %v749_v34 = vmax.f32 %v460_v32, 0.0  ;;  %v774_v35 = vmax.f32 %v535_v33, 0.0  ;;  %970 = vmatmul.msk.f32.gmra.mxu0 %vm126_vm0, %v35_v30  ;;  %995 = vmatmul.msk.f32.gmra.mxu1 %vm126_vm0, %v60_v31 }
  0xbc   :  { %v609_v36 = vpop.f32.mrf.mxu2  ;;  %v684_v37 = vpop.f32.mrf.mxu3 }
  0xbd   :  { %850 = vst.msk [vmem:[%s2026_s3 + $0x28] sm:$0xff] %vm844_vm1, %v749_v34  ;;  %v610_v38 = vadd.f32 %v1377_v8, %v609_v36  ;;  %v685_v39 = vadd.f32 %v1377_v8, %v684_v37 }
  0xbe   :  { %875 = vst.msk [vmem:[%s2026_s3 + $0xf0] sm:$0xff] %vm844_vm1, %v774_v35 }
  0xbf   :  { %v799_v42 = vmax.f32 %v610_v38, 0.0  ;;  %v824_v43 = vmax.f32 %v685_v39, 0.0 }
  0xc0   :  { %v462_v44 = vpop.f32.mrf.mxu0  ;;  %v537_v45 = vpop.f32.mrf.mxu1 }
  0xc1   :  { %900 = vst.msk [vmem:[%s2026_s3 + $0x1b8] sm:$0xff] %vm844_vm1, %v799_v42  ;;  %1021 = vmatmul.msk.f32.gmra.mxu2 %vm126_vm0, %v86_v40  ;;  %1046 = vmatmul.msk.f32.gmra.mxu3 %vm126_vm0, %v111_v41  ;;  %v463_v48 = vadd.f32 %v1377_v8, %v462_v44  ;;  %v538_v49 = vadd.f32 %v1377_v8, %v537_v45 }
  0xc2   :  { %925 = vst.msk [vmem:[%s2026_s3 + $0x280] sm:$0xff] %vm844_vm1, %v824_v43 }
  0xc3   :  { %v750_v50 = vmax.f32 %v463_v48, 0.0  ;;  %v775_v51 = vmax.f32 %v538_v49, 0.0  ;;  %971 = vmatmul.msk.f32.gmra.mxu0 %vm126_vm0, %v36_v46  ;;  %996 = vmatmul.msk.f32.gmra.mxu1 %vm126_vm0, %v61_v47 }
  0xc4   :  { %v612_v52 = vpop.f32.mrf.mxu2  ;;  %v687_v53 = vpop.f32.mrf.mxu3 }
  0xc5   :  { %851 = vst.msk [vmem:[%s2026_s3 + $0x30] sm:$0xff] %vm844_vm1, %v750_v50  ;;  %v613_v54 = vadd.f32 %v1377_v8, %v612_v52  ;;  %v688_v55 = vadd.f32 %v1377_v8, %v687_v53 }
  0xc6   :  { %876 = vst.msk [vmem:[%s2026_s3 + $0xf8] sm:$0xff] %vm844_vm1, %v775_v51 }
  0xc7   :  { %v800_v58 = vmax.f32 %v613_v54, 0.0  ;;  %v825_v59 = vmax.f32 %v688_v55, 0.0 }
  0xc8   :  { %v465_v60 = vpop.f32.mrf.mxu0  ;;  %v540_v61 = vpop.f32.mrf.mxu1 }
  0xc9   :  { %901 = vst.msk [vmem:[%s2026_s3 + $0x1c0] sm:$0xff] %vm844_vm1, %v800_v58  ;;  %1022 = vmatmul.msk.f32.gmra.mxu2 %vm126_vm0, %v87_v56  ;;  %1047 = vmatmul.msk.f32.gmra.mxu3 %vm126_vm0, %v112_v57  ;;  %v466_v0 = vadd.f32 %v1377_v8, %v465_v60  ;;  %v541_v1 = vadd.f32 %v1377_v8, %v540_v61 }
  0xca   :  { %926 = vst.msk [vmem:[%s2026_s3 + $0x288] sm:$0xff] %vm844_vm1, %v825_v59 }
  0xcb   :  { %v751_v2 = vmax.f32 %v466_v0, 0.0  ;;  %v776_v3 = vmax.f32 %v541_v1, 0.0  ;;  %972 = vmatmul.msk.f32.gmra.mxu0 %vm126_vm0, %v37_v62  ;;  %997 = vmatmul.msk.f32.gmra.mxu1 %vm126_vm0, %v62_v63 }
  0xcc   :  { %v615_v4 = vpop.f32.mrf.mxu2  ;;  %v690_v5 = vpop.f32.mrf.mxu3 }
  0xcd   :  { %852 = vst.msk [vmem:[%s2026_s3 + $0x38] sm:$0xff] %vm844_vm1, %v751_v2  ;;  %v616_v6 = vadd.f32 %v1377_v8, %v615_v4  ;;  %v691_v7 = vadd.f32 %v1377_v8, %v690_v5 }
  0xce   :  { %877 = vst.msk [vmem:[%s2026_s3 + $0x100] sm:$0xff] %vm844_vm1, %v776_v3 }
  0xcf   :  { %v801_v11 = vmax.f32 %v616_v6, 0.0  ;;  %v826_v12 = vmax.f32 %v691_v7, 0.0 }
  0xd0   :  { %v468_v13 = vpop.f32.mrf.mxu0  ;;  %v543_v14 = vpop.f32.mrf.mxu1 }
  0xd1   :  { %902 = vst.msk [vmem:[%s2026_s3 + $0x1c8] sm:$0xff] %vm844_vm1, %v801_v11  ;;  %1023 = vmatmul.msk.f32.gmra.mxu2 %vm126_vm0, %v88_v9  ;;  %1048 = vmatmul.msk.f32.gmra.mxu3 %vm126_vm0, %v113_v10  ;;  %v469_v17 = vadd.f32 %v1377_v8, %v468_v13  ;;  %v544_v18 = vadd.f32 %v1377_v8, %v543_v14 }
  0xd2   :  { %927 = vst.msk [vmem:[%s2026_s3 + $0x290] sm:$0xff] %vm844_vm1, %v826_v12 }
  0xd3   :  { %v752_v19 = vmax.f32 %v469_v17, 0.0  ;;  %v777_v20 = vmax.f32 %v544_v18, 0.0  ;;  %973 = vmatmul.msk.f32.gmra.mxu0 %vm126_vm0, %v38_v15  ;;  %998 = vmatmul.msk.f32.gmra.mxu1 %vm126_vm0, %v63_v16 }
  0xd4   :  { %v618_v21 = vpop.f32.mrf.mxu2  ;;  %v693_v22 = vpop.f32.mrf.mxu3 }
  0xd5   :  { %853 = vst.msk [vmem:[%s2026_s3 + $0x40] sm:$0xff] %vm844_vm1, %v752_v19  ;;  %v619_v23 = vadd.f32 %v1377_v8, %v618_v21  ;;  %v694_v24 = vadd.f32 %v1377_v8, %v693_v22 }
  0xd6   :  { %878 = vst.msk [vmem:[%s2026_s3 + $0x108] sm:$0xff] %vm844_vm1, %v777_v20 }
  0xd7   :  { %v802_v25 = vmax.f32 %v619_v23, 0.0  ;;  %v827_v26 = vmax.f32 %v694_v24, 0.0 }
  0xd8   :  { %v471_v27 = vpop.f32.mrf.mxu0  ;;  %v546_v28 = vpop.f32.mrf.mxu1 }
  0xd9   :  { %903 = vst.msk [vmem:[%s2026_s3 + $0x1d0] sm:$0xff] %vm844_vm1, %v802_v25  ;;  %v472_v29 = vadd.f32 %v1377_v8, %v471_v27  ;;  %v547_v30 = vadd.f32 %v1377_v8, %v546_v28 }
  0xda   :  { %928 = vst.msk [vmem:[%s2026_s3 + $0x298] sm:$0xff] %vm844_vm1, %v827_v26 }
  0xdb   :  { %v753_v31 = vmax.f32 %v472_v29, 0.0  ;;  %v778_v32 = vmax.f32 %v547_v30, 0.0 }
  0xdc   :  { %v621_v33 = vpop.f32.mrf.mxu2  ;;  %v696_v34 = vpop.f32.mrf.mxu3 }
  0xdd   :  { %854 = vst.msk [vmem:[%s2026_s3 + $0x48] sm:$0xff] %vm844_vm1, %v753_v31  ;;  %v622_v35 = vadd.f32 %v1377_v8, %v621_v33  ;;  %v697_v36 = vadd.f32 %v1377_v8, %v696_v34 }
  0xde   :  { %879 = vst.msk [vmem:[%s2026_s3 + $0x110] sm:$0xff] %vm844_vm1, %v778_v32 }
  0xdf   :  { %v803_v37 = vmax.f32 %v622_v35, 0.0  ;;  %v828_v38 = vmax.f32 %v697_v36, 0.0 }
  0xe0   :  { %v474_v39 = vpop.f32.mrf.mxu0  ;;  %v549_v40 = vpop.f32.mrf.mxu1 }
  0xe1   :  { %904 = vst.msk [vmem:[%s2026_s3 + $0x1d8] sm:$0xff] %vm844_vm1, %v803_v37  ;;  %v475_v41 = vadd.f32 %v1377_v8, %v474_v39  ;;  %v550_v42 = vadd.f32 %v1377_v8, %v549_v40 }
  0xe2   :  { %929 = vst.msk [vmem:[%s2026_s3 + $0x2a0] sm:$0xff] %vm844_vm1, %v828_v38 }
  0xe3   :  { %v754_v43 = vmax.f32 %v475_v41, 0.0  ;;  %v779_v44 = vmax.f32 %v550_v42, 0.0 }
  0xe4   :  { %v624_v45 = vpop.f32.mrf.mxu2  ;;  %v699_v46 = vpop.f32.mrf.mxu3 }
  0xe5   :  { %855 = vst.msk [vmem:[%s2026_s3 + $0x50] sm:$0xff] %vm844_vm1, %v754_v43  ;;  %v625_v47 = vadd.f32 %v1377_v8, %v624_v45  ;;  %v700_v48 = vadd.f32 %v1377_v8, %v699_v46 }
  0xe6   :  { %880 = vst.msk [vmem:[%s2026_s3 + $0x118] sm:$0xff] %vm844_vm1, %v779_v44 }
  0xe7   :  { %v804_v49 = vmax.f32 %v625_v47, 0.0  ;;  %v829_v50 = vmax.f32 %v700_v48, 0.0 }
  0xe8   :  { %v477_v51 = vpop.f32.mrf.mxu0  ;;  %v552_v52 = vpop.f32.mrf.mxu1 }
  0xe9   :  { %905 = vst.msk [vmem:[%s2026_s3 + $0x1e0] sm:$0xff] %vm844_vm1, %v804_v49  ;;  %v478_v53 = vadd.f32 %v1377_v8, %v477_v51  ;;  %v553_v54 = vadd.f32 %v1377_v8, %v552_v52 }
  0xea   :  { %930 = vst.msk [vmem:[%s2026_s3 + $0x2a8] sm:$0xff] %vm844_vm1, %v829_v50 }
  0xeb   :  { %v755_v55 = vmax.f32 %v478_v53, 0.0  ;;  %v780_v56 = vmax.f32 %v553_v54, 0.0 }
  0xec   :  { %v627_v57 = vpop.f32.mrf.mxu2  ;;  %v702_v58 = vpop.f32.mrf.mxu3 }
  0xed   :  { %856 = vst.msk [vmem:[%s2026_s3 + $0x58] sm:$0xff] %vm844_vm1, %v755_v55  ;;  %v628_v59 = vadd.f32 %v1377_v8, %v627_v57  ;;  %v703_v60 = vadd.f32 %v1377_v8, %v702_v58 }
  0xee   :  { %881 = vst.msk [vmem:[%s2026_s3 + $0x120] sm:$0xff] %vm844_vm1, %v780_v56 }
  0xef   :  { %v805_v61 = vmax.f32 %v628_v59, 0.0  ;;  %v830_v62 = vmax.f32 %v703_v60, 0.0 }
  0xf0   :  { %v480_v63 = vpop.f32.mrf.mxu0  ;;  %v555_v0 = vpop.f32.mrf.mxu1 }
  0xf1   :  { %906 = vst.msk [vmem:[%s2026_s3 + $0x1e8] sm:$0xff] %vm844_vm1, %v805_v61  ;;  %v481_v1 = vadd.f32 %v1377_v8, %v480_v63  ;;  %v556_v2 = vadd.f32 %v1377_v8, %v555_v0 }
  0xf2   :  { %931 = vst.msk [vmem:[%s2026_s3 + $0x2b0] sm:$0xff] %vm844_vm1, %v830_v62 }
  0xf3   :  { %v756_v3 = vmax.f32 %v481_v1, 0.0  ;;  %v781_v4 = vmax.f32 %v556_v2, 0.0 }
  0xf4   :  { %v630_v5 = vpop.f32.mrf.mxu2  ;;  %v705_v6 = vpop.f32.mrf.mxu3 }
  0xf5   :  { %857 = vst.msk [vmem:[%s2026_s3 + $0x60] sm:$0xff] %vm844_vm1, %v756_v3  ;;  %v631_v7 = vadd.f32 %v1377_v8, %v630_v5  ;;  %v706_v9 = vadd.f32 %v1377_v8, %v705_v6 }
  0xf6   :  { %882 = vst.msk [vmem:[%s2026_s3 + $0x128] sm:$0xff] %vm844_vm1, %v781_v4 }
  0xf7   :  { %v806_v10 = vmax.f32 %v631_v7, 0.0  ;;  %v831_v11 = vmax.f32 %v706_v9, 0.0 }
  0xf8   :  { %v483_v12 = vpop.f32.mrf.mxu0  ;;  %v558_v13 = vpop.f32.mrf.mxu1 }
  0xf9   :  { %907 = vst.msk [vmem:[%s2026_s3 + $0x1f0] sm:$0xff] %vm844_vm1, %v806_v10  ;;  %v484_v14 = vadd.f32 %v1377_v8, %v483_v12  ;;  %v559_v15 = vadd.f32 %v1377_v8, %v558_v13 }
  0xfa   :  { %932 = vst.msk [vmem:[%s2026_s3 + $0x2b8] sm:$0xff] %vm844_vm1, %v831_v11 }
  0xfb   :  { %v757_v16 = vmax.f32 %v484_v14, 0.0  ;;  %v782_v17 = vmax.f32 %v559_v15, 0.0 }
  0xfc   :  { %v633_v18 = vpop.f32.mrf.mxu2  ;;  %v708_v19 = vpop.f32.mrf.mxu3 }
  0xfd   :  { %858 = vst.msk [vmem:[%s2026_s3 + $0x68] sm:$0xff] %vm844_vm1, %v757_v16  ;;  %v634_v20 = vadd.f32 %v1377_v8, %v633_v18  ;;  %v709_v21 = vadd.f32 %v1377_v8, %v708_v19 }
  0xfe   :  { %883 = vst.msk [vmem:[%s2026_s3 + $0x130] sm:$0xff] %vm844_vm1, %v782_v17 }
  0xff   :  { %v807_v22 = vmax.f32 %v634_v20, 0.0  ;;  %v832_v23 = vmax.f32 %v709_v21, 0.0 }
 0x100   :  { %v486_v24 = vpop.f32.mrf.mxu0  ;;  %v561_v25 = vpop.f32.mrf.mxu1 }
 0x101   :  { %908 = vst.msk [vmem:[%s2026_s3 + $0x1f8] sm:$0xff] %vm844_vm1, %v807_v22  ;;  %v487_v26 = vadd.f32 %v1377_v8, %v486_v24  ;;  %v562_v27 = vadd.f32 %v1377_v8, %v561_v25 }
 0x102   :  { %933 = vst.msk [vmem:[%s2026_s3 + $0x2c0] sm:$0xff] %vm844_vm1, %v832_v23 }
 0x103   :  { %v758_v28 = vmax.f32 %v487_v26, 0.0  ;;  %v783_v29 = vmax.f32 %v562_v27, 0.0 }
 0x104   :  { %v636_v30 = vpop.f32.mrf.mxu2  ;;  %v711_v31 = vpop.f32.mrf.mxu3 }
 0x105   :  { %859 = vst.msk [vmem:[%s2026_s3 + $0x70] sm:$0xff] %vm844_vm1, %v758_v28  ;;  %v637_v32 = vadd.f32 %v1377_v8, %v636_v30  ;;  %v712_v33 = vadd.f32 %v1377_v8, %v711_v31 }
 0x106   :  { %884 = vst.msk [vmem:[%s2026_s3 + $0x138] sm:$0xff] %vm844_vm1, %v783_v29 }
 0x107   :  { %v808_v34 = vmax.f32 %v637_v32, 0.0  ;;  %v833_v35 = vmax.f32 %v712_v33, 0.0 }
 0x108   :  { %v489_v36 = vpop.f32.mrf.mxu0  ;;  %v564_v37 = vpop.f32.mrf.mxu1 }
 0x109   :  { %909 = vst.msk [vmem:[%s2026_s3 + $0x200] sm:$0xff] %vm844_vm1, %v808_v34  ;;  %v490_v38 = vadd.f32 %v1377_v8, %v489_v36  ;;  %v565_v39 = vadd.f32 %v1377_v8, %v564_v37 }
 0x10a   :  { %934 = vst.msk [vmem:[%s2026_s3 + $0x2c8] sm:$0xff] %vm844_vm1, %v833_v35 }
 0x10b   :  { %v759_v40 = vmax.f32 %v490_v38, 0.0  ;;  %v784_v41 = vmax.f32 %v565_v39, 0.0 }
 0x10c   :  { %v639_v42 = vpop.f32.mrf.mxu2  ;;  %v714_v43 = vpop.f32.mrf.mxu3 }
 0x10d   :  { %860 = vst.msk [vmem:[%s2026_s3 + $0x78] sm:$0xff] %vm844_vm1, %v759_v40  ;;  %v640_v44 = vadd.f32 %v1377_v8, %v639_v42  ;;  %v715_v45 = vadd.f32 %v1377_v8, %v714_v43 }
 0x10e   :  { %885 = vst.msk [vmem:[%s2026_s3 + $0x140] sm:$0xff] %vm844_vm1, %v784_v41 }
 0x10f   :  { %v809_v46 = vmax.f32 %v640_v44, 0.0  ;;  %v834_v47 = vmax.f32 %v715_v45, 0.0 }
 0x110   :  { %v492_v48 = vpop.f32.mrf.mxu0  ;;  %v567_v49 = vpop.f32.mrf.mxu1 }
 0x111   :  { %910 = vst.msk [vmem:[%s2026_s3 + $0x208] sm:$0xff] %vm844_vm1, %v809_v46  ;;  %v493_v50 = vadd.f32 %v1377_v8, %v492_v48  ;;  %v568_v51 = vadd.f32 %v1377_v8, %v567_v49 }
 0x112   :  { %935 = vst.msk [vmem:[%s2026_s3 + $0x2d0] sm:$0xff] %vm844_vm1, %v834_v47 }
 0x113   :  { %v760_v52 = vmax.f32 %v493_v50, 0.0  ;;  %v785_v53 = vmax.f32 %v568_v51, 0.0 }
 0x114   :  { %v642_v54 = vpop.f32.mrf.mxu2  ;;  %v717_v55 = vpop.f32.mrf.mxu3 }
 0x115   :  { %861 = vst.msk [vmem:[%s2026_s3 + $0x80] sm:$0xff] %vm844_vm1, %v760_v52  ;;  %v643_v56 = vadd.f32 %v1377_v8, %v642_v54  ;;  %v718_v57 = vadd.f32 %v1377_v8, %v717_v55 }
 0x116   :  { %886 = vst.msk [vmem:[%s2026_s3 + $0x148] sm:$0xff] %vm844_vm1, %v785_v53 }
 0x117   :  { %v810_v58 = vmax.f32 %v643_v56, 0.0  ;;  %v835_v59 = vmax.f32 %v718_v57, 0.0 }
 0x118   :  { %v495_v60 = vpop.f32.mrf.mxu0  ;;  %v570_v61 = vpop.f32.mrf.mxu1 }
 0x119   :  { %911 = vst.msk [vmem:[%s2026_s3 + $0x210] sm:$0xff] %vm844_vm1, %v810_v58  ;;  %v496_v62 = vadd.f32 %v1377_v8, %v495_v60  ;;  %v571_v63 = vadd.f32 %v1377_v8, %v570_v61 }
 0x11a   :  { %936 = vst.msk [vmem:[%s2026_s3 + $0x2d8] sm:$0xff] %vm844_vm1, %v835_v59 }
 0x11b   :  { %v761_v0 = vmax.f32 %v496_v62, 0.0  ;;  %v786_v1 = vmax.f32 %v571_v63, 0.0 }
 0x11c   :  { %v645_v2 = vpop.f32.mrf.mxu2  ;;  %v720_v3 = vpop.f32.mrf.mxu3 }
 0x11d   :  { %862 = vst.msk [vmem:[%s2026_s3 + $0x88] sm:$0xff] %vm844_vm1, %v761_v0  ;;  %v646_v4 = vadd.f32 %v1377_v8, %v645_v2  ;;  %v721_v5 = vadd.f32 %v1377_v8, %v720_v3 }
 0x11e   :  { %887 = vst.msk [vmem:[%s2026_s3 + $0x150] sm:$0xff] %vm844_vm1, %v786_v1 }
 0x11f   :  { %v811_v6 = vmax.f32 %v646_v4, 0.0  ;;  %v836_v7 = vmax.f32 %v721_v5, 0.0 }
 0x120   :  { %v498_v9 = vpop.f32.mrf.mxu0  ;;  %v573_v10 = vpop.f32.mrf.mxu1 }
 0x121   :  { %912 = vst.msk [vmem:[%s2026_s3 + $0x218] sm:$0xff] %vm844_vm1, %v811_v6  ;;  %v499_v11 = vadd.f32 %v1377_v8, %v498_v9  ;;  %v574_v12 = vadd.f32 %v1377_v8, %v573_v10 }
 0x122   :  { %937 = vst.msk [vmem:[%s2026_s3 + $0x2e0] sm:$0xff] %vm844_vm1, %v836_v7 }
 0x123   :  { %v762_v13 = vmax.f32 %v499_v11, 0.0  ;;  %v787_v14 = vmax.f32 %v574_v12, 0.0 }
 0x124   :  { %v648_v15 = vpop.f32.mrf.mxu2  ;;  %v723_v16 = vpop.f32.mrf.mxu3 }
 0x125   :  { %863 = vst.msk [vmem:[%s2026_s3 + $0x90] sm:$0xff] %vm844_vm1, %v762_v13  ;;  %v649_v17 = vadd.f32 %v1377_v8, %v648_v15  ;;  %v724_v18 = vadd.f32 %v1377_v8, %v723_v16 }
 0x126   :  { %888 = vst.msk [vmem:[%s2026_s3 + $0x158] sm:$0xff] %vm844_vm1, %v787_v14 }
 0x127   :  { %v812_v19 = vmax.f32 %v649_v17, 0.0  ;;  %v837_v20 = vmax.f32 %v724_v18, 0.0 }
 0x128   :  { %v501_v21 = vpop.f32.mrf.mxu0  ;;  %v576_v22 = vpop.f32.mrf.mxu1 }
 0x129   :  { %913 = vst.msk [vmem:[%s2026_s3 + $0x220] sm:$0xff] %vm844_vm1, %v812_v19  ;;  %v502_v23 = vadd.f32 %v1377_v8, %v501_v21  ;;  %v577_v24 = vadd.f32 %v1377_v8, %v576_v22 }
 0x12a   :  { %938 = vst.msk [vmem:[%s2026_s3 + $0x2e8] sm:$0xff] %vm844_vm1, %v837_v20 }
 0x12b   :  { %v763_v25 = vmax.f32 %v502_v23, 0.0  ;;  %v788_v26 = vmax.f32 %v577_v24, 0.0 }
 0x12c   :  { %v651_v27 = vpop.f32.mrf.mxu2  ;;  %v726_v28 = vpop.f32.mrf.mxu3 }
 0x12d   :  { %864 = vst.msk [vmem:[%s2026_s3 + $0x98] sm:$0xff] %vm844_vm1, %v763_v25  ;;  %v652_v29 = vadd.f32 %v1377_v8, %v651_v27  ;;  %v727_v30 = vadd.f32 %v1377_v8, %v726_v28 }
 0x12e   :  { %889 = vst.msk [vmem:[%s2026_s3 + $0x160] sm:$0xff] %vm844_vm1, %v788_v26 }
 0x12f   :  { %v813_v31 = vmax.f32 %v652_v29, 0.0  ;;  %v838_v32 = vmax.f32 %v727_v30, 0.0 }
 0x130   :  { %v504_v33 = vpop.f32.mrf.mxu0  ;;  %v579_v34 = vpop.f32.mrf.mxu1 }
 0x131   :  { %914 = vst.msk [vmem:[%s2026_s3 + $0x228] sm:$0xff] %vm844_vm1, %v813_v31  ;;  %v505_v35 = vadd.f32 %v1377_v8, %v504_v33  ;;  %v580_v36 = vadd.f32 %v1377_v8, %v579_v34 }
 0x132   :  { %939 = vst.msk [vmem:[%s2026_s3 + $0x2f0] sm:$0xff] %vm844_vm1, %v838_v32 }
 0x133   :  { %v764_v37 = vmax.f32 %v505_v35, 0.0  ;;  %v789_v38 = vmax.f32 %v580_v36, 0.0 }
 0x134   :  { %v654_v39 = vpop.f32.mrf.mxu2  ;;  %v729_v40 = vpop.f32.mrf.mxu3 }
 0x135   :  { %865 = vst.msk [vmem:[%s2026_s3 + $0xa0] sm:$0xff] %vm844_vm1, %v764_v37  ;;  %v655_v41 = vadd.f32 %v1377_v8, %v654_v39  ;;  %v730_v42 = vadd.f32 %v1377_v8, %v729_v40 }
 0x136   :  { %890 = vst.msk [vmem:[%s2026_s3 + $0x168] sm:$0xff] %vm844_vm1, %v789_v38 }
 0x137   :  { %v814_v43 = vmax.f32 %v655_v41, 0.0  ;;  %v839_v44 = vmax.f32 %v730_v42, 0.0 }
 0x138   :  { %v507_v45 = vpop.f32.mrf.mxu0  ;;  %v582_v46 = vpop.f32.mrf.mxu1 }
 0x139   :  { %915 = vst.msk [vmem:[%s2026_s3 + $0x230] sm:$0xff] %vm844_vm1, %v814_v43  ;;  %v508_v47 = vadd.f32 %v1377_v8, %v507_v45  ;;  %v583_v48 = vadd.f32 %v1377_v8, %v582_v46 }
 0x13a   :  { %940 = vst.msk [vmem:[%s2026_s3 + $0x2f8] sm:$0xff] %vm844_vm1, %v839_v44 }
 0x13b   :  { %v765_v49 = vmax.f32 %v508_v47, 0.0  ;;  %v790_v50 = vmax.f32 %v583_v48, 0.0 }
 0x13c   :  { %v657_v51 = vpop.f32.mrf.mxu2  ;;  %v732_v52 = vpop.f32.mrf.mxu3 }
 0x13d   :  { %866 = vst.msk [vmem:[%s2026_s3 + $0xa8] sm:$0xff] %vm844_vm1, %v765_v49  ;;  %v658_v53 = vadd.f32 %v1377_v8, %v657_v51  ;;  %v733_v54 = vadd.f32 %v1377_v8, %v732_v52 }
 0x13e   :  { %891 = vst.msk [vmem:[%s2026_s3 + $0x170] sm:$0xff] %vm844_vm1, %v790_v50 }
 0x13f   :  { %v815_v55 = vmax.f32 %v658_v53, 0.0  ;;  %v840_v56 = vmax.f32 %v733_v54, 0.0 }
 0x140   :  { %v510_v57 = vpop.f32.mrf.mxu0  ;;  %v585_v58 = vpop.f32.mrf.mxu1 }
 0x141   :  { %916 = vst.msk [vmem:[%s2026_s3 + $0x238] sm:$0xff] %vm844_vm1, %v815_v55  ;;  %v511_v59 = vadd.f32 %v1377_v8, %v510_v57  ;;  %v586_v60 = vadd.f32 %v1377_v8, %v585_v58 }
 0x142   :  { %941 = vst.msk [vmem:[%s2026_s3 + $0x300] sm:$0xff] %vm844_vm1, %v840_v56 }
 0x143   :  { %v766_v61 = vmax.f32 %v511_v59, 0.0  ;;  %v791_v62 = vmax.f32 %v586_v60, 0.0 }
 0x144   :  { %v660_v63 = vpop.f32.mrf.mxu2  ;;  %v735_v0 = vpop.f32.mrf.mxu3 }
 0x145   :  { %867 = vst.msk [vmem:[%s2026_s3 + $0xb0] sm:$0xff] %vm844_vm1, %v766_v61  ;;  %v661_v1 = vadd.f32 %v1377_v8, %v660_v63  ;;  %v736_v2 = vadd.f32 %v1377_v8, %v735_v0 }
 0x146   :  { %892 = vst.msk [vmem:[%s2026_s3 + $0x178] sm:$0xff] %vm844_vm1, %v791_v62 }
 0x147   :  { %v816_v3 = vmax.f32 %v661_v1, 0.0  ;;  %v841_v4 = vmax.f32 %v736_v2, 0.0 }
 0x148   :  { %v513_v5 = vpop.f32.mrf.mxu0  ;;  %v588_v6 = vpop.f32.mrf.mxu1 }
 0x149   :  { %917 = vst.msk [vmem:[%s2026_s3 + $0x240] sm:$0xff] %vm844_vm1, %v816_v3  ;;  %v514_v7 = vadd.f32 %v1377_v8, %v513_v5  ;;  %v589_v9 = vadd.f32 %v1377_v8, %v588_v6 }
 0x14a   :  { %942 = vst.msk [vmem:[%s2026_s3 + $0x308] sm:$0xff] %vm844_vm1, %v841_v4 }
 0x14b   :  { %v767_v10 = vmax.f32 %v514_v7, 0.0  ;;  %v792_v11 = vmax.f32 %v589_v9, 0.0 }
 0x14c   :  { %v663_v12 = vpop.f32.mrf.mxu2  ;;  %v738_v13 = vpop.f32.mrf.mxu3 }
 0x14d   :  { %868 = vst.msk [vmem:[%s2026_s3 + $0xb8] sm:$0xff] %vm844_vm1, %v767_v10  ;;  %v664_v14 = vadd.f32 %v1377_v8, %v663_v12  ;;  %v739_v15 = vadd.f32 %v1377_v8, %v738_v13 }
 0x14e   :  { %893 = vst.msk [vmem:[%s2026_s3 + $0x180] sm:$0xff] %vm844_vm1, %v792_v11 }
 0x14f   :  { %v817_v16 = vmax.f32 %v664_v14, 0.0  ;;  %v842_v17 = vmax.f32 %v739_v15, 0.0 }
 0x150   :  { %v516_v18 = vpop.f32.mrf.mxu0  ;;  %v591_v19 = vpop.f32.mrf.mxu1 }
 0x151   :  { %918 = vst.msk [vmem:[%s2026_s3 + $0x248] sm:$0xff] %vm844_vm1, %v817_v16  ;;  %v517_v20 = vadd.f32 %v1377_v8, %v516_v18  ;;  %v592_v21 = vadd.f32 %v1377_v8, %v591_v19 }
 0x152   :  { %943 = vst.msk [vmem:[%s2026_s3 + $0x310] sm:$0xff] %vm844_vm1, %v842_v17 }
 0x153   :  { %v768_v22 = vmax.f32 %v517_v20, 0.0  ;;  %v793_v23 = vmax.f32 %v592_v21, 0.0 }
 0x154   :  { %v666_v24 = vpop.f32.mrf.mxu2  ;;  %v741_v25 = vpop.f32.mrf.mxu3 }
 0x155   :  { %869 = vst.msk [vmem:[%s2026_s3 + $0xc0] sm:$0xff] %vm844_vm1, %v768_v22  ;;  %v667_v26 = vadd.f32 %v1377_v8, %v666_v24  ;;  %v742_v27 = vadd.f32 %v1377_v8, %v741_v25 }
 0x156   :  { %894 = vst.msk [vmem:[%s2026_s3 + $0x188] sm:$0xff] %vm844_vm1, %v793_v23 }
 0x157   :  { %v818_v28 = vmax.f32 %v667_v26, 0.0  ;;  %v843_v29 = vmax.f32 %v742_v27, 0.0 }
 0x159   :  { %919 = vst.msk [vmem:[%s2026_s3 + $0x250] sm:$0xff] %vm844_vm1, %v818_v28 }
 0x15a   :  { %944 = vst.msk [vmem:[%s2026_s3 + $0x318] sm:$0xff] %vm844_vm1, %v843_v29 }

// kernel: forward.5
= control target key start
LH: loop header
LB: loop body
LE: loop exit
PB: predicated region body
PF: predicated region fallthrough
CT: control target
= control target key end

     0   :  { %vm507_vm0 = vcmask 523264   ;;  %vm528_vm1 = vcmask 517120   ;;  %s1108_s1 = inlined_call_operand.vmem [shape: f32[512,64], index: 1, kind: input, shape index: {}]   ;;  %s1109_s0 = inlined_call_operand.vmem [shape: f32[162,512], index: 0, kind: input, shape index: {}]   ;;  %s1110_s2 = inlined_call_operand.vmem [shape: f32[1,64], index: 2, kind: input, shape index: {}]   ;;  %s1111_s3 = inlined_call_operand.vmem [shape: f32[162,64], index: 3, kind: output, shape index: {}]  }
   0x1   :  { %v145_v0 = vld [vmem:[%s1108_s1 + $0x178] sm:$0xff]  ;;  %v144_v2 = vld [vmem:[%s1108_s1 + $0x170] sm:$0xff]  ;;  %v143_v6 = vld [vmem:[%s1108_s1 + $0x168] sm:$0xff] }
   0x2   :  { %v113_v1 = vld [vmem:[%s1108_s1 + $0x78] sm:$0xff]  ;;  %326 = vmatpush.msra.mxu2 %v145_v0  ;;  %v112_v4 = vld [vmem:[%s1108_s1 + $0x70] sm:$0xff]  ;;  %v111_v8 = vld [vmem:[%s1108_s1 + $0x68] sm:$0xff] }
   0x3   :  { %166 = vmatpush.msra.mxu0 %v113_v1  ;;  %v161_v3 = vld [vmem:[%s1108_s1 + $0x1f8] sm:$0xff]  ;;  %v160_v7 = vld [vmem:[%s1108_s1 + $0x1f0] sm:$0xff]  ;;  %v159_v10 = vld [vmem:[%s1108_s1 + $0x1e8] sm:$0xff] }
   0x4   :  { %v129_v5 = vld [vmem:[%s1108_s1 + $0xf8] sm:$0xff]  ;;  %406 = vmatpush.msra.mxu3 %v161_v3  ;;  %327 = vmatpush.msra.mxu2 %v144_v2  ;;  %v128_v9 = vld [vmem:[%s1108_s1 + $0xf0] sm:$0xff]  ;;  %v142_v11 = vld [vmem:[%s1108_s1 + $0x160] sm:$0xff] }
   0x5   :  { %246 = vmatpush.msra.mxu1 %v129_v5  ;;  %167 = vmatpush.msra.mxu0 %v112_v4  ;;  %v110_v12 = vld [vmem:[%s1108_s1 + $0x60] sm:$0xff]  ;;  %v127_v13 = vld [vmem:[%s1108_s1 + $0xe8] sm:$0xff]  ;;  %v141_v16 = vld [vmem:[%s1108_s1 + $0x158] sm:$0xff] }
   0x6   :  { %407 = vmatpush.msra.mxu3 %v160_v7  ;;  %328 = vmatpush.msra.mxu2 %v143_v6  ;;  %v158_v14 = vld [vmem:[%s1108_s1 + $0x1e0] sm:$0xff]  ;;  %v109_v17 = vld [vmem:[%s1108_s1 + $0x58] sm:$0xff]  ;;  %v140_v20 = vld [vmem:[%s1108_s1 + $0x150] sm:$0xff] }
   0x7   :  { %247 = vmatpush.msra.mxu1 %v128_v9  ;;  %168 = vmatpush.msra.mxu0 %v111_v8  ;;  %v126_v15 = vld [vmem:[%s1108_s1 + $0xe0] sm:$0xff]  ;;  %v157_v18 = vld [vmem:[%s1108_s1 + $0x1d8] sm:$0xff]  ;;  %v108_v21 = vld [vmem:[%s1108_s1 + $0x50] sm:$0xff] }
   0x8   :  { %408 = vmatpush.msra.mxu3 %v159_v10  ;;  %329 = vmatpush.msra.mxu2 %v142_v11  ;;  %v125_v19 = vld [vmem:[%s1108_s1 + $0xd8] sm:$0xff]  ;;  %v156_v22 = vld [vmem:[%s1108_s1 + $0x1d0] sm:$0xff]  ;;  %v139_v24 = vld [vmem:[%s1108_s1 + $0x148] sm:$0xff] }
   0x9   :  { %248 = vmatpush.msra.mxu1 %v127_v13  ;;  %169 = vmatpush.msra.mxu0 %v110_v12  ;;  %v124_v23 = vld [vmem:[%s1108_s1 + $0xd0] sm:$0xff]  ;;  %v107_v25 = vld [vmem:[%s1108_s1 + $0x48] sm:$0xff]  ;;  %v138_v28 = vld [vmem:[%s1108_s1 + $0x140] sm:$0xff] }
   0xa   :  { %409 = vmatpush.msra.mxu3 %v158_v14  ;;  %330 = vmatpush.msra.mxu2 %v141_v16  ;;  %v155_v26 = vld [vmem:[%s1108_s1 + $0x1c8] sm:$0xff]  ;;  %v106_v29 = vld [vmem:[%s1108_s1 + $0x40] sm:$0xff]  ;;  %v137_v32 = vld [vmem:[%s1108_s1 + $0x138] sm:$0xff] }
   0xb   :  { %249 = vmatpush.msra.mxu1 %v126_v15  ;;  %170 = vmatpush.msra.mxu0 %v109_v17  ;;  %v123_v27 = vld [vmem:[%s1108_s1 + $0xc8] sm:$0xff]  ;;  %v154_v30 = vld [vmem:[%s1108_s1 + $0x1c0] sm:$0xff]  ;;  %v105_v33 = vld [vmem:[%s1108_s1 + $0x38] sm:$0xff] }
   0xc   :  { %410 = vmatpush.msra.mxu3 %v157_v18  ;;  %331 = vmatpush.msra.mxu2 %v140_v20  ;;  %v122_v31 = vld [vmem:[%s1108_s1 + $0xc0] sm:$0xff]  ;;  %v153_v34 = vld [vmem:[%s1108_s1 + $0x1b8] sm:$0xff]  ;;  %v136_v36 = vld [vmem:[%s1108_s1 + $0x130] sm:$0xff] }
   0xd   :  { %250 = vmatpush.msra.mxu1 %v125_v19  ;;  %171 = vmatpush.msra.mxu0 %v108_v21  ;;  %v121_v35 = vld [vmem:[%s1108_s1 + $0xb8] sm:$0xff]  ;;  %v104_v37 = vld [vmem:[%s1108_s1 + $0x30] sm:$0xff]  ;;  %v135_v40 = vld [vmem:[%s1108_s1 + $0x128] sm:$0xff] }
   0xe   :  { %411 = vmatpush.msra.mxu3 %v156_v22  ;;  %332 = vmatpush.msra.mxu2 %v139_v24  ;;  %v152_v38 = vld [vmem:[%s1108_s1 + $0x1b0] sm:$0xff]  ;;  %v103_v41 = vld [vmem:[%s1108_s1 + $0x28] sm:$0xff]  ;;  %v134_v44 = vld [vmem:[%s1108_s1 + $0x120] sm:$0xff] }
   0xf   :  { %251 = vmatpush.msra.mxu1 %v124_v23  ;;  %172 = vmatpush.msra.mxu0 %v107_v25  ;;  %v120_v39 = vld [vmem:[%s1108_s1 + $0xb0] sm:$0xff]  ;;  %v151_v42 = vld [vmem:[%s1108_s1 + $0x1a8] sm:$0xff]  ;;  %v102_v45 = vld [vmem:[%s1108_s1 + $0x20] sm:$0xff] }
  0x10   :  { %412 = vmatpush.msra.mxu3 %v155_v26  ;;  %333 = vmatpush.msra.mxu2 %v138_v28  ;;  %v119_v43 = vld [vmem:[%s1108_s1 + $0xa8] sm:$0xff]  ;;  %v150_v46 = vld [vmem:[%s1108_s1 + $0x1a0] sm:$0xff]  ;;  %v133_v48 = vld [vmem:[%s1108_s1 + $0x118] sm:$0xff] }
  0x11   :  { %252 = vmatpush.msra.mxu1 %v123_v27  ;;  %173 = vmatpush.msra.mxu0 %v106_v29  ;;  %v118_v47 = vld [vmem:[%s1108_s1 + $0xa0] sm:$0xff]  ;;  %v101_v49 = vld [vmem:[%s1108_s1 + $0x18] sm:$0xff]  ;;  %v132_v52 = vld [vmem:[%s1108_s1 + $0x110] sm:$0xff] }
  0x12   :  { %413 = vmatpush.msra.mxu3 %v154_v30  ;;  %334 = vmatpush.msra.mxu2 %v137_v32  ;;  %v149_v50 = vld [vmem:[%s1108_s1 + $0x198] sm:$0xff]  ;;  %v100_v53 = vld [vmem:[%s1108_s1 + $0x10] sm:$0xff]  ;;  %v131_v56 = vld [vmem:[%s1108_s1 + $0x108] sm:$0xff] }
  0x13   :  { %253 = vmatpush.msra.mxu1 %v122_v31  ;;  %174 = vmatpush.msra.mxu0 %v105_v33  ;;  %v117_v51 = vld [vmem:[%s1108_s1 + $0x98] sm:$0xff]  ;;  %v148_v54 = vld [vmem:[%s1108_s1 + $0x190] sm:$0xff]  ;;  %v99_v57 = vld [vmem:[%s1108_s1 + $0x8] sm:$0xff] }
  0x14   :  { %414 = vmatpush.msra.mxu3 %v153_v34  ;;  %335 = vmatpush.msra.mxu2 %v136_v36  ;;  %v116_v55 = vld [vmem:[%s1108_s1 + $0x90] sm:$0xff]  ;;  %v147_v58 = vld [vmem:[%s1108_s1 + $0x188] sm:$0xff]  ;;  %v130_v60 = vld [vmem:[%s1108_s1 + $0x100] sm:$0xff] }
  0x15   :  { %254 = vmatpush.msra.mxu1 %v121_v35  ;;  %175 = vmatpush.msra.mxu0 %v104_v37  ;;  %v115_v59 = vld [vmem:[%s1108_s1 + $0x88] sm:$0xff]  ;;  %v98_v61 = vld [vmem:[%s1108_s1] sm:$0xff]  ;;  %v16_v62 = vld [vmem:[%s1109_s0 + $0x10] sm:$0xff] }
  0x16   :  { %415 = vmatpush.msra.mxu3 %v152_v38  ;;  %336 = vmatpush.msra.mxu2 %v135_v40  ;;  %v146_v63 = vld [vmem:[%s1108_s1 + $0x180] sm:$0xff]  ;;  %v17_v1 = vld [vmem:[%s1109_s0 + $0x18] sm:$0xff]  ;;  %v15_v3 = vld [vmem:[%s1109_s0 + $0x8] sm:$0xff] }
  0x17   :  { %255 = vmatpush.msra.mxu1 %v120_v39  ;;  %176 = vmatpush.msra.mxu0 %v103_v41  ;;  %v14_v0 = vld [vmem:[%s1109_s0] sm:$0xff]  ;;  %v20_v4 = vld [vmem:[%s1109_s0 + $0x30] sm:$0xff]  ;;  %v21_v6 = vld [vmem:[%s1109_s0 + $0x38] sm:$0xff] }
  0x18   :  { %416 = vmatpush.msra.mxu3 %v151_v42  ;;  %337 = vmatpush.msra.mxu2 %v134_v44  ;;  %v114_v2 = vld [vmem:[%s1108_s1 + $0x80] sm:$0xff]  ;;  %v19_v7 = vld [vmem:[%s1109_s0 + $0x28] sm:$0xff]  ;;  %v24_v8 = vld [vmem:[%s1109_s0 + $0x50] sm:$0xff] }
  0x19   :  { %256 = vmatpush.msra.mxu1 %v119_v43  ;;  %177 = vmatpush.msra.mxu0 %v102_v45  ;;  %v18_v5 = vld [vmem:[%s1109_s0 + $0x20] sm:$0xff]  ;;  %v25_v10 = vld [vmem:[%s1109_s0 + $0x58] sm:$0xff]  ;;  %v23_v11 = vld [vmem:[%s1109_s0 + $0x48] sm:$0xff] }
  0x1a   :  { %417 = vmatpush.msra.mxu3 %v150_v46  ;;  %338 = vmatpush.msra.mxu2 %v133_v48  ;;  %v22_v9 = vld [vmem:[%s1109_s0 + $0x40] sm:$0xff]  ;;  %v28_v12 = vld [vmem:[%s1109_s0 + $0x70] sm:$0xff]  ;;  %v29_v14 = vld [vmem:[%s1109_s0 + $0x78] sm:$0xff] }
  0x1b   :  { %257 = vmatpush.msra.mxu1 %v118_v47  ;;  %178 = vmatpush.msra.mxu0 %v101_v49  ;;  %v26_v13 = vld [vmem:[%s1109_s0 + $0x60] sm:$0xff]  ;;  %v27_v15 = vld [vmem:[%s1109_s0 + $0x68] sm:$0xff]  ;;  %v32_v16 = vld [vmem:[%s1109_s0 + $0x90] sm:$0xff] }
  0x1c   :  { %418 = vmatpush.msra.mxu3 %v149_v50  ;;  %339 = vmatpush.msra.mxu2 %v132_v52  ;;  %v30_v17 = vld [vmem:[%s1109_s0 + $0x80] sm:$0xff]  ;;  %v33_v18 = vld [vmem:[%s1109_s0 + $0x98] sm:$0xff]  ;;  %v31_v19 = vld [vmem:[%s1109_s0 + $0x88] sm:$0xff] }
  0x1d   :  { %258 = vmatpush.msra.mxu1 %v117_v51  ;;  %179 = vmatpush.msra.mxu0 %v100_v53  ;;  %v36_v20 = vld [vmem:[%s1109_s0 + $0xb0] sm:$0xff]  ;;  %v34_v21 = vld [vmem:[%s1109_s0 + $0xa0] sm:$0xff]  ;;  %v37_v22 = vld [vmem:[%s1109_s0 + $0xb8] sm:$0xff] }
  0x1e   :  { %419 = vmatpush.msra.mxu3 %v148_v54  ;;  %340 = vmatpush.msra.mxu2 %v131_v56  ;;  %v35_v23 = vld [vmem:[%s1109_s0 + $0xa8] sm:$0xff]  ;;  %v40_v24 = vld [vmem:[%s1109_s0 + $0xd0] sm:$0xff]  ;;  %v38_v25 = vld [vmem:[%s1109_s0 + $0xc0] sm:$0xff] }
  0x1f   :  { %259 = vmatpush.msra.mxu1 %v116_v55  ;;  %180 = vmatpush.msra.mxu0 %v99_v57  ;;  %v41_v26 = vld [vmem:[%s1109_s0 + $0xd8] sm:$0xff]  ;;  %v39_v27 = vld [vmem:[%s1109_s0 + $0xc8] sm:$0xff]  ;;  %v44_v28 = vld [vmem:[%s1109_s0 + $0xf0] sm:$0xff] }
  0x20   :  { %420 = vmatpush.msra.mxu3 %v147_v58  ;;  %341 = vmatpush.msra.mxu2 %v130_v60  ;;  %v42_v29 = vld [vmem:[%s1109_s0 + $0xe0] sm:$0xff]  ;;  %v45_v30 = vld [vmem:[%s1109_s0 + $0xf8] sm:$0xff]  ;;  %v43_v31 = vld [vmem:[%s1109_s0 + $0xe8] sm:$0xff] }
  0x21   :  { %260 = vmatpush.msra.mxu1 %v115_v59  ;;  %181 = vmatpush.msra.mxu0 %v98_v61  ;;  %v48_v32 = vld [vmem:[%s1109_s0 + $0x110] sm:$0xff]  ;;  %v46_v33 = vld [vmem:[%s1109_s0 + $0x100] sm:$0xff]  ;;  %v49_v34 = vld [vmem:[%s1109_s0 + $0x118] sm:$0xff] }
  0x22   :  { %342 = vmatmul.f32.vlgmr.msra.gmra.mxu2 %v16_v62  ;;  %421 = vmatpush.msra.mxu3 %v146_v63  ;;  %v47_v35 = vld [vmem:[%s1109_s0 + $0x108] sm:$0xff]  ;;  %v52_v36 = vld [vmem:[%s1109_s0 + $0x130] sm:$0xff]  ;;  %v50_v37 = vld [vmem:[%s1109_s0 + $0x120] sm:$0xff] }
  0x23   :  { %182 = vmatmul.f32.vlgmr.msra.gmra.mxu0 %v14_v0  ;;  %422 = vmatmul.f32.vlgmr.msra.gmra.mxu3 %v17_v1  ;;  %v53_v38 = vld [vmem:[%s1109_s0 + $0x138] sm:$0xff]  ;;  %v51_v39 = vld [vmem:[%s1109_s0 + $0x128] sm:$0xff]  ;;  %v56_v40 = vld [vmem:[%s1109_s0 + $0x150] sm:$0xff] }
  0x24   :  { %261 = vmatpush.msra.mxu1 %v114_v2  ;;  %v54_v41 = vld [vmem:[%s1109_s0 + $0x140] sm:$0xff]  ;;  %v57_v42 = vld [vmem:[%s1109_s0 + $0x158] sm:$0xff]  ;;  %v55_v43 = vld [vmem:[%s1109_s0 + $0x148] sm:$0xff] }
  0x25   :  { %262 = vmatmul.f32.vlgmr.msra.gmra.mxu1 %v15_v3  ;;  %v60_v44 = vld [vmem:[%s1109_s0 + $0x170] sm:$0xff]  ;;  %v58_v45 = vld [vmem:[%s1109_s0 + $0x160] sm:$0xff]  ;;  %v61_v46 = vld [vmem:[%s1109_s0 + $0x178] sm:$0xff] }
  0x26   :  { %v59_v47 = vld [vmem:[%s1109_s0 + $0x168] sm:$0xff]  ;;  %v64_v48 = vld [vmem:[%s1109_s0 + $0x190] sm:$0xff]  ;;  %v62_v49 = vld [vmem:[%s1109_s0 + $0x180] sm:$0xff] }
  0x27   :  { %v65_v50 = vld [vmem:[%s1109_s0 + $0x198] sm:$0xff]  ;;  %v63_v51 = vld [vmem:[%s1109_s0 + $0x188] sm:$0xff]  ;;  %v68_v52 = vld [vmem:[%s1109_s0 + $0x1b0] sm:$0xff] }
  0x28   :  { %v66_v53 = vld [vmem:[%s1109_s0 + $0x1a0] sm:$0xff]  ;;  %v69_v54 = vld [vmem:[%s1109_s0 + $0x1b8] sm:$0xff]  ;;  %v67_v55 = vld [vmem:[%s1109_s0 + $0x1a8] sm:$0xff] }
  0x29   :  { %v72_v56 = vld [vmem:[%s1109_s0 + $0x1d0] sm:$0xff]  ;;  %v70_v57 = vld [vmem:[%s1109_s0 + $0x1c0] sm:$0xff]  ;;  %v73_v58 = vld [vmem:[%s1109_s0 + $0x1d8] sm:$0xff] }
  0x2a   :  { %345 = vmatmul.f32.gmra.mxu2 %v20_v4  ;;  %v71_v59 = vld [vmem:[%s1109_s0 + $0x1c8] sm:$0xff]  ;;  %v76_v60 = vld [vmem:[%s1109_s0 + $0x1f0] sm:$0xff]  ;;  %v74_v61 = vld [vmem:[%s1109_s0 + $0x1e0] sm:$0xff] }
  0x2b   :  { %185 = vmatmul.f32.gmra.mxu0 %v18_v5  ;;  %425 = vmatmul.f32.gmra.mxu3 %v21_v6  ;;  %v77_v62 = vld [vmem:[%s1109_s0 + $0x1f8] sm:$0xff]  ;;  %v75_v63 = vld [vmem:[%s1109_s0 + $0x1e8] sm:$0xff]  ;;  %v942_v0 = vld [vmem:[%s1110_s2] ss:$0 sm:$0xff] }
  0x2c   :  { %v80_v1 = vld [vmem:[%s1109_s0 + $0x210] sm:$0xff]  ;;  %v78_v3 = vld [vmem:[%s1109_s0 + $0x200] sm:$0xff]  ;;  %v81_v4 = vld [vmem:[%s1109_s0 + $0x218] sm:$0xff] }
  0x2d   :  { %265 = vmatmul.f32.gmra.mxu1 %v19_v7  ;;  %v79_v7 = vld [vmem:[%s1109_s0 + $0x208] sm:$0xff] }
  0x32   :  { %348 = vmatmul.f32.gmra.mxu2 %v24_v8 }
  0x33   :  { %188 = vmatmul.f32.gmra.mxu0 %v22_v9  ;;  %428 = vmatmul.f32.gmra.mxu3 %v25_v10 }
  0x35   :  { %268 = vmatmul.f32.gmra.mxu1 %v23_v11 }
  0x3a   :  { %351 = vmatmul.f32.gmra.mxu2 %v28_v12  ;;  %v84_v12 = vld [vmem:[%s1109_s0 + $0x230] sm:$0xff] }
  0x3b   :  { %191 = vmatmul.f32.gmra.mxu0 %v26_v13  ;;  %431 = vmatmul.f32.gmra.mxu3 %v29_v14 }
  0x3d   :  { %271 = vmatmul.f32.gmra.mxu1 %v27_v15  ;;  %v82_v15 = vld [vmem:[%s1109_s0 + $0x220] sm:$0xff] }
  0x42   :  { %354 = vmatmul.f32.gmra.mxu2 %v32_v16  ;;  %v85_v16 = vld [vmem:[%s1109_s0 + $0x238] sm:$0xff] }
  0x43   :  { %194 = vmatmul.f32.gmra.mxu0 %v30_v17  ;;  %434 = vmatmul.f32.gmra.mxu3 %v33_v18 }
  0x45   :  { %274 = vmatmul.f32.gmra.mxu1 %v31_v19 }
  0x4a   :  { %357 = vmatmul.f32.gmra.mxu2 %v36_v20  ;;  %v83_v20 = vld [vmem:[%s1109_s0 + $0x228] sm:$0xff] }
  0x4b   :  { %197 = vmatmul.f32.gmra.mxu0 %v34_v21  ;;  %437 = vmatmul.f32.gmra.mxu3 %v37_v22 }
  0x4d   :  { %277 = vmatmul.f32.gmra.mxu1 %v35_v23 }
  0x52   :  { %360 = vmatmul.f32.gmra.mxu2 %v40_v24 }
  0x53   :  { %200 = vmatmul.f32.gmra.mxu0 %v38_v25  ;;  %440 = vmatmul.f32.gmra.mxu3 %v41_v26  ;;  %v88_v25 = vld [vmem:[%s1109_s0 + $0x250] sm:$0xff] }
  0x55   :  { %280 = vmatmul.f32.gmra.mxu1 %v39_v27 }
  0x5a   :  { %363 = vmatmul.f32.gmra.mxu2 %v44_v28  ;;  %v86_v28 = vld [vmem:[%s1109_s0 + $0x240] sm:$0xff] }
  0x5b   :  { %203 = vmatmul.f32.gmra.mxu0 %v42_v29  ;;  %443 = vmatmul.f32.gmra.mxu3 %v45_v30  ;;  %v89_v29 = vld [vmem:[%s1109_s0 + $0x258] sm:$0xff] }
  0x5d   :  { %283 = vmatmul.f32.gmra.mxu1 %v43_v31 }
  0x62   :  { %366 = vmatmul.f32.gmra.mxu2 %v48_v32 }
  0x63   :  { %206 = vmatmul.f32.gmra.mxu0 %v46_v33  ;;  %446 = vmatmul.f32.gmra.mxu3 %v49_v34  ;;  %v87_v33 = vld [vmem:[%s1109_s0 + $0x248] sm:$0xff] }
  0x65   :  { %286 = vmatmul.f32.gmra.mxu1 %v47_v35 }
  0x6a   :  { %369 = vmatmul.f32.gmra.mxu2 %v52_v36 }
  0x6b   :  { %209 = vmatmul.f32.gmra.mxu0 %v50_v37  ;;  %449 = vmatmul.f32.gmra.mxu3 %v53_v38  ;;  %v92_v38 = vld [vmem:[%s1109_s0 + $0x270] sm:$0xff] }
  0x6d   :  { %289 = vmatmul.f32.gmra.mxu1 %v51_v39 }
  0x72   :  { %372 = vmatmul.f32.gmra.mxu2 %v56_v40 }
  0x73   :  { %212 = vmatmul.f32.gmra.mxu0 %v54_v41  ;;  %452 = vmatmul.f32.gmra.mxu3 %v57_v42  ;;  %v90_v41 = vld [vmem:[%s1109_s0 + $0x260] sm:$0xff]  ;;  %v93_v42 = vld [vmem:[%s1109_s0 + $0x278] sm:$0xff] }
  0x75   :  { %292 = vmatmul.f32.gmra.mxu1 %v55_v43 }
  0x7a   :  { %375 = vmatmul.f32.gmra.mxu2 %v60_v44 }
  0x7b   :  { %215 = vmatmul.f32.gmra.mxu0 %v58_v45  ;;  %455 = vmatmul.f32.gmra.mxu3 %v61_v46  ;;  %v91_v46 = vld [vmem:[%s1109_s0 + $0x268] sm:$0xff] }
  0x7d   :  { %295 = vmatmul.f32.gmra.mxu1 %v59_v47 }
  0x82   :  { %378 = vmatmul.f32.gmra.mxu2 %v64_v48 }
  0x83   :  { %218 = vmatmul.f32.gmra.mxu0 %v62_v49  ;;  %458 = vmatmul.f32.gmra.mxu3 %v65_v50 }
  0x85   :  { %298 = vmatmul.f32.gmra.mxu1 %v63_v51  ;;  %v96_v51 = vld [vmem:[%s1109_s0 + $0x290] sm:$0x3] }
  0x8a   :  { %381 = vmatmul.f32.gmra.mxu2 %v68_v52 }
  0x8b   :  { %221 = vmatmul.f32.gmra.mxu0 %v66_v53  ;;  %461 = vmatmul.f32.gmra.mxu3 %v69_v54  ;;  %v94_v54 = vld [vmem:[%s1109_s0 + $0x280] sm:$0x3] }
  0x8d   :  { %301 = vmatmul.f32.gmra.mxu1 %v67_v55  ;;  %v97_v55 = vld [vmem:[%s1109_s0 + $0x298] sm:$0x3] }
  0x92   :  { %384 = vmatmul.f32.gmra.mxu2 %v72_v56 }
  0x93   :  { %224 = vmatmul.f32.gmra.mxu0 %v70_v57  ;;  %464 = vmatmul.f32.gmra.mxu3 %v73_v58 }
  0x95   :  { %304 = vmatmul.f32.gmra.mxu1 %v71_v59  ;;  %v95_v59 = vld [vmem:[%s1109_s0 + $0x288] sm:$0x3] }
  0x9a   :  { %387 = vmatmul.f32.gmra.mxu2 %v76_v60 }
  0x9b   :  { %227 = vmatmul.f32.gmra.mxu0 %v74_v61  ;;  %467 = vmatmul.f32.gmra.mxu3 %v77_v62 }
  0x9d   :  { %307 = vmatmul.f32.gmra.mxu1 %v75_v63 }
  0xa0   :  { %v183_v2 = vpop.f32.mrf.mxu0 }
  0xa1   :  { %v184_v5 = vadd.f32 %v942_v0, %v183_v2 }
  0xa2   :  { %390 = vmatmul.f32.gmra.mxu2 %v80_v1  ;;  %v263_v6 = vpop.f32.mrf.mxu1 }
  0xa3   :  { %v264_v8 = vadd.f32 %v263_v6, %v184_v5  ;;  %230 = vmatmul.f32.gmra.mxu0 %v78_v3  ;;  %470 = vmatmul.f32.gmra.mxu3 %v81_v4 }
  0xa5   :  { %v343_v9 = vpop.f32.mrf.mxu2  ;;  %310 = vmatmul.f32.gmra.mxu1 %v79_v7 }
  0xa6   :  { %v344_v10 = vadd.f32 %v343_v9, %v264_v8  ;;  %v423_v11 = vpop.f32.mrf.mxu3 }
  0xa8   :  { %v424_v13 = vadd.f32 %v423_v11, %v344_v10  ;;  %v186_v14 = vpop.f32.mrf.mxu0 }
  0xa9   :  { %v187_v17 = vadd.f32 %v942_v0, %v186_v14 }
  0xaa   :  { %v486_v18 = vmax.f32 %v424_v13, 0.0  ;;  %393 = vmatmul.f32.gmra.mxu2 %v84_v12  ;;  %v266_v19 = vpop.f32.mrf.mxu1 }
  0xab   :  { %v267_v21 = vadd.f32 %v266_v19, %v187_v17  ;;  %233 = vmatmul.f32.gmra.mxu0 %v82_v15  ;;  %473 = vmatmul.f32.gmra.mxu3 %v85_v16 }
  0xac   :  { %508 = vst.msk [vmem:[%s1111_s3] sm:$0xff] %vm507_vm0, %v486_v18 }
  0xad   :  { %v346_v22 = vpop.f32.mrf.mxu2  ;;  %313 = vmatmul.f32.gmra.mxu1 %v83_v20 }
  0xae   :  { %v347_v23 = vadd.f32 %v346_v22, %v267_v21  ;;  %v426_v24 = vpop.f32.mrf.mxu3 }
  0xb0   :  { %v427_v26 = vadd.f32 %v426_v24, %v347_v23  ;;  %v189_v27 = vpop.f32.mrf.mxu0 }
  0xb1   :  { %v190_v30 = vadd.f32 %v942_v0, %v189_v27 }
  0xb2   :  { %v487_v31 = vmax.f32 %v427_v26, 0.0  ;;  %396 = vmatmul.f32.gmra.mxu2 %v88_v25  ;;  %v269_v32 = vpop.f32.mrf.mxu1 }
  0xb3   :  { %v270_v34 = vadd.f32 %v269_v32, %v190_v30  ;;  %236 = vmatmul.f32.gmra.mxu0 %v86_v28  ;;  %476 = vmatmul.f32.gmra.mxu3 %v89_v29 }
  0xb4   :  { %509 = vst.msk [vmem:[%s1111_s3 + $0x8] sm:$0xff] %vm507_vm0, %v487_v31 }
  0xb5   :  { %v349_v35 = vpop.f32.mrf.mxu2  ;;  %316 = vmatmul.f32.gmra.mxu1 %v87_v33 }
  0xb6   :  { %v350_v36 = vadd.f32 %v349_v35, %v270_v34  ;;  %v429_v37 = vpop.f32.mrf.mxu3 }
  0xb8   :  { %v430_v39 = vadd.f32 %v429_v37, %v350_v36  ;;  %v192_v40 = vpop.f32.mrf.mxu0 }
  0xb9   :  { %v193_v43 = vadd.f32 %v942_v0, %v192_v40 }
  0xba   :  { %v488_v44 = vmax.f32 %v430_v39, 0.0  ;;  %399 = vmatmul.f32.gmra.mxu2 %v92_v38  ;;  %v272_v45 = vpop.f32.mrf.mxu1 }
  0xbb   :  { %v273_v47 = vadd.f32 %v272_v45, %v193_v43  ;;  %239 = vmatmul.f32.gmra.mxu0 %v90_v41  ;;  %479 = vmatmul.f32.gmra.mxu3 %v93_v42 }
  0xbc   :  { %510 = vst.msk [vmem:[%s1111_s3 + $0x10] sm:$0xff] %vm507_vm0, %v488_v44 }
  0xbd   :  { %v352_v48 = vpop.f32.mrf.mxu2  ;;  %319 = vmatmul.f32.gmra.mxu1 %v91_v46 }
  0xbe   :  { %v353_v49 = vadd.f32 %v352_v48, %v273_v47  ;;  %v432_v50 = vpop.f32.mrf.mxu3 }
  0xc0   :  { %v433_v52 = vadd.f32 %v432_v50, %v353_v49  ;;  %v195_v53 = vpop.f32.mrf.mxu0 }
  0xc1   :  { %v196_v56 = vadd.f32 %v942_v0, %v195_v53 }
  0xc2   :  { %v489_v57 = vmax.f32 %v433_v52, 0.0  ;;  %402 = vmatmul.f32.gmra.mxu2 %v96_v51  ;;  %v275_v58 = vpop.f32.mrf.mxu1 }
  0xc3   :  { %v276_v60 = vadd.f32 %v275_v58, %v196_v56  ;;  %242 = vmatmul.f32.gmra.mxu0 %v94_v54  ;;  %482 = vmatmul.f32.gmra.mxu3 %v97_v55 }
  0xc4   :  { %511 = vst.msk [vmem:[%s1111_s3 + $0x18] sm:$0xff] %vm507_vm0, %v489_v57 }
  0xc5   :  { %v355_v61 = vpop.f32.mrf.mxu2  ;;  %322 = vmatmul.f32.gmra.mxu1 %v95_v59 }
  0xc6   :  { %v356_v62 = vadd.f32 %v355_v61, %v276_v60  ;;  %v435_v63 = vpop.f32.mrf.mxu3 }
  0xc8   :  { %v436_v1 = vadd.f32 %v435_v63, %v356_v62  ;;  %v198_v2 = vpop.f32.mrf.mxu0 }
  0xc9   :  { %v199_v3 = vadd.f32 %v942_v0, %v198_v2 }
  0xca   :  { %v490_v4 = vmax.f32 %v436_v1, 0.0  ;;  %v278_v5 = vpop.f32.mrf.mxu1 }
  0xcb   :  { %v279_v6 = vadd.f32 %v278_v5, %v199_v3 }
  0xcc   :  { %512 = vst.msk [vmem:[%s1111_s3 + $0x20] sm:$0xff] %vm507_vm0, %v490_v4 }
  0xcd   :  { %v358_v7 = vpop.f32.mrf.mxu2 }
  0xce   :  { %v359_v8 = vadd.f32 %v358_v7, %v279_v6  ;;  %v438_v9 = vpop.f32.mrf.mxu3 }
  0xd0   :  { %v439_v10 = vadd.f32 %v438_v9, %v359_v8  ;;  %v201_v11 = vpop.f32.mrf.mxu0 }
  0xd1   :  { %v202_v12 = vadd.f32 %v942_v0, %v201_v11 }
  0xd2   :  { %v491_v13 = vmax.f32 %v439_v10, 0.0  ;;  %v281_v14 = vpop.f32.mrf.mxu1 }
  0xd3   :  { %v282_v15 = vadd.f32 %v281_v14, %v202_v12 }
  0xd4   :  { %513 = vst.msk [vmem:[%s1111_s3 + $0x28] sm:$0xff] %vm507_vm0, %v491_v13 }
  0xd5   :  { %v361_v16 = vpop.f32.mrf.mxu2 }
  0xd6   :  { %v362_v17 = vadd.f32 %v361_v16, %v282_v15  ;;  %v441_v18 = vpop.f32.mrf.mxu3 }
  0xd8   :  { %v442_v19 = vadd.f32 %v441_v18, %v362_v17  ;;  %v204_v20 = vpop.f32.mrf.mxu0 }
  0xd9   :  { %v205_v21 = vadd.f32 %v942_v0, %v204_v20 }
  0xda   :  { %v492_v22 = vmax.f32 %v442_v19, 0.0  ;;  %v284_v23 = vpop.f32.mrf.mxu1 }
  0xdb   :  { %v285_v24 = vadd.f32 %v284_v23, %v205_v21 }
  0xdc   :  { %514 = vst.msk [vmem:[%s1111_s3 + $0x30] sm:$0xff] %vm507_vm0, %v492_v22 }
  0xdd   :  { %v364_v25 = vpop.f32.mrf.mxu2 }
  0xde   :  { %v365_v26 = vadd.f32 %v364_v25, %v285_v24  ;;  %v444_v27 = vpop.f32.mrf.mxu3 }
  0xe0   :  { %v445_v28 = vadd.f32 %v444_v27, %v365_v26  ;;  %v207_v29 = vpop.f32.mrf.mxu0 }
  0xe1   :  { %v208_v30 = vadd.f32 %v942_v0, %v207_v29 }
  0xe2   :  { %v493_v31 = vmax.f32 %v445_v28, 0.0  ;;  %v287_v32 = vpop.f32.mrf.mxu1 }
  0xe3   :  { %v288_v33 = vadd.f32 %v287_v32, %v208_v30 }
  0xe4   :  { %515 = vst.msk [vmem:[%s1111_s3 + $0x38] sm:$0xff] %vm507_vm0, %v493_v31 }
  0xe5   :  { %v367_v34 = vpop.f32.mrf.mxu2 }
  0xe6   :  { %v368_v35 = vadd.f32 %v367_v34, %v288_v33  ;;  %v447_v36 = vpop.f32.mrf.mxu3 }
  0xe8   :  { %v448_v37 = vadd.f32 %v447_v36, %v368_v35  ;;  %v210_v38 = vpop.f32.mrf.mxu0 }
  0xe9   :  { %v211_v39 = vadd.f32 %v942_v0, %v210_v38 }
  0xea   :  { %v494_v40 = vmax.f32 %v448_v37, 0.0  ;;  %v290_v41 = vpop.f32.mrf.mxu1 }
  0xeb   :  { %v291_v42 = vadd.f32 %v290_v41, %v211_v39 }
  0xec   :  { %516 = vst.msk [vmem:[%s1111_s3 + $0x40] sm:$0xff] %vm507_vm0, %v494_v40 }
  0xed   :  { %v370_v43 = vpop.f32.mrf.mxu2 }
  0xee   :  { %v371_v44 = vadd.f32 %v370_v43, %v291_v42  ;;  %v450_v45 = vpop.f32.mrf.mxu3 }
  0xf0   :  { %v451_v46 = vadd.f32 %v450_v45, %v371_v44  ;;  %v213_v47 = vpop.f32.mrf.mxu0 }
  0xf1   :  { %v214_v48 = vadd.f32 %v942_v0, %v213_v47 }
  0xf2   :  { %v495_v49 = vmax.f32 %v451_v46, 0.0  ;;  %v293_v50 = vpop.f32.mrf.mxu1 }
  0xf3   :  { %v294_v51 = vadd.f32 %v293_v50, %v214_v48 }
  0xf4   :  { %517 = vst.msk [vmem:[%s1111_s3 + $0x48] sm:$0xff] %vm507_vm0, %v495_v49 }
  0xf5   :  { %v373_v52 = vpop.f32.mrf.mxu2 }
  0xf6   :  { %v374_v53 = vadd.f32 %v373_v52, %v294_v51  ;;  %v453_v54 = vpop.f32.mrf.mxu3 }
  0xf8   :  { %v454_v55 = vadd.f32 %v453_v54, %v374_v53  ;;  %v216_v56 = vpop.f32.mrf.mxu0 }
  0xf9   :  { %v217_v57 = vadd.f32 %v942_v0, %v216_v56 }
  0xfa   :  { %v496_v58 = vmax.f32 %v454_v55, 0.0  ;;  %v296_v59 = vpop.f32.mrf.mxu1 }
  0xfb   :  { %v297_v60 = vadd.f32 %v296_v59, %v217_v57 }
  0xfc   :  { %518 = vst.msk [vmem:[%s1111_s3 + $0x50] sm:$0xff] %vm507_vm0, %v496_v58 }
  0xfd   :  { %v376_v61 = vpop.f32.mrf.mxu2 }
  0xfe   :  { %v377_v62 = vadd.f32 %v376_v61, %v297_v60  ;;  %v456_v63 = vpop.f32.mrf.mxu3 }
 0x100   :  { %v457_v1 = vadd.f32 %v456_v63, %v377_v62  ;;  %v219_v2 = vpop.f32.mrf.mxu0 }
 0x101   :  { %v220_v3 = vadd.f32 %v942_v0, %v219_v2 }
 0x102   :  { %v497_v4 = vmax.f32 %v457_v1, 0.0  ;;  %v299_v5 = vpop.f32.mrf.mxu1 }
 0x103   :  { %v300_v6 = vadd.f32 %v299_v5, %v220_v3 }
 0x104   :  { %519 = vst.msk [vmem:[%s1111_s3 + $0x58] sm:$0xff] %vm507_vm0, %v497_v4 }
 0x105   :  { %v379_v7 = vpop.f32.mrf.mxu2 }
 0x106   :  { %v380_v8 = vadd.f32 %v379_v7, %v300_v6  ;;  %v459_v9 = vpop.f32.mrf.mxu3 }
 0x108   :  { %v460_v10 = vadd.f32 %v459_v9, %v380_v8  ;;  %v222_v11 = vpop.f32.mrf.mxu0 }
 0x109   :  { %v223_v12 = vadd.f32 %v942_v0, %v222_v11 }
 0x10a   :  { %v498_v13 = vmax.f32 %v460_v10, 0.0  ;;  %v302_v14 = vpop.f32.mrf.mxu1 }
 0x10b   :  { %v303_v15 = vadd.f32 %v302_v14, %v223_v12 }
 0x10c   :  { %520 = vst.msk [vmem:[%s1111_s3 + $0x60] sm:$0xff] %vm507_vm0, %v498_v13 }
 0x10d   :  { %v382_v16 = vpop.f32.mrf.mxu2 }
 0x10e   :  { %v383_v17 = vadd.f32 %v382_v16, %v303_v15  ;;  %v462_v18 = vpop.f32.mrf.mxu3 }
 0x110   :  { %v463_v19 = vadd.f32 %v462_v18, %v383_v17  ;;  %v225_v20 = vpop.f32.mrf.mxu0 }
 0x111   :  { %v226_v21 = vadd.f32 %v942_v0, %v225_v20 }
 0x112   :  { %v499_v22 = vmax.f32 %v463_v19, 0.0  ;;  %v305_v23 = vpop.f32.mrf.mxu1 }
 0x113   :  { %v306_v24 = vadd.f32 %v305_v23, %v226_v21 }
 0x114   :  { %521 = vst.msk [vmem:[%s1111_s3 + $0x68] sm:$0xff] %vm507_vm0, %v499_v22 }
 0x115   :  { %v385_v25 = vpop.f32.mrf.mxu2 }
 0x116   :  { %v386_v26 = vadd.f32 %v385_v25, %v306_v24  ;;  %v465_v27 = vpop.f32.mrf.mxu3 }
 0x118   :  { %v466_v28 = vadd.f32 %v465_v27, %v386_v26  ;;  %v228_v29 = vpop.f32.mrf.mxu0 }
 0x119   :  { %v229_v30 = vadd.f32 %v942_v0, %v228_v29 }
 0x11a   :  { %v500_v31 = vmax.f32 %v466_v28, 0.0  ;;  %v308_v32 = vpop.f32.mrf.mxu1 }
 0x11b   :  { %v309_v33 = vadd.f32 %v308_v32, %v229_v30 }
 0x11c   :  { %522 = vst.msk [vmem:[%s1111_s3 + $0x70] sm:$0xff] %vm507_vm0, %v500_v31 }
 0x11d   :  { %v388_v34 = vpop.f32.mrf.mxu2 }
 0x11e   :  { %v389_v35 = vadd.f32 %v388_v34, %v309_v33  ;;  %v468_v36 = vpop.f32.mrf.mxu3 }
 0x120   :  { %v469_v37 = vadd.f32 %v468_v36, %v389_v35  ;;  %v231_v38 = vpop.f32.mrf.mxu0 }
 0x121   :  { %v232_v39 = vadd.f32 %v942_v0, %v231_v38 }
 0x122   :  { %v501_v40 = vmax.f32 %v469_v37, 0.0  ;;  %v311_v41 = vpop.f32.mrf.mxu1 }
 0x123   :  { %v312_v42 = vadd.f32 %v311_v41, %v232_v39 }
 0x124   :  { %523 = vst.msk [vmem:[%s1111_s3 + $0x78] sm:$0xff] %vm507_vm0, %v501_v40 }
 0x125   :  { %v391_v43 = vpop.f32.mrf.mxu2 }
 0x126   :  { %v392_v44 = vadd.f32 %v391_v43, %v312_v42  ;;  %v471_v45 = vpop.f32.mrf.mxu3 }
 0x128   :  { %v472_v46 = vadd.f32 %v471_v45, %v392_v44  ;;  %v234_v47 = vpop.f32.mrf.mxu0 }
 0x129   :  { %v235_v48 = vadd.f32 %v942_v0, %v234_v47 }
 0x12a   :  { %v502_v49 = vmax.f32 %v472_v46, 0.0  ;;  %v314_v50 = vpop.f32.mrf.mxu1 }
 0x12b   :  { %v315_v51 = vadd.f32 %v314_v50, %v235_v48 }
 0x12c   :  { %524 = vst.msk [vmem:[%s1111_s3 + $0x80] sm:$0xff] %vm507_vm0, %v502_v49 }
 0x12d   :  { %v394_v52 = vpop.f32.mrf.mxu2 }
 0x12e   :  { %v395_v53 = vadd.f32 %v394_v52, %v315_v51  ;;  %v474_v54 = vpop.f32.mrf.mxu3 }
 0x130   :  { %v475_v55 = vadd.f32 %v474_v54, %v395_v53  ;;  %v237_v56 = vpop.f32.mrf.mxu0 }
 0x131   :  { %v238_v57 = vadd.f32 %v942_v0, %v237_v56 }
 0x132   :  { %v503_v58 = vmax.f32 %v475_v55, 0.0  ;;  %v317_v59 = vpop.f32.mrf.mxu1 }
 0x133   :  { %v318_v60 = vadd.f32 %v317_v59, %v238_v57 }
 0x134   :  { %525 = vst.msk [vmem:[%s1111_s3 + $0x88] sm:$0xff] %vm507_vm0, %v503_v58 }
 0x135   :  { %v397_v61 = vpop.f32.mrf.mxu2 }
 0x136   :  { %v398_v62 = vadd.f32 %v397_v61, %v318_v60  ;;  %v477_v63 = vpop.f32.mrf.mxu3 }
 0x138   :  { %v478_v1 = vadd.f32 %v477_v63, %v398_v62  ;;  %v240_v2 = vpop.f32.mrf.mxu0 }
 0x139   :  { %v241_v3 = vadd.f32 %v942_v0, %v240_v2 }
 0x13a   :  { %v504_v4 = vmax.f32 %v478_v1, 0.0  ;;  %v320_v5 = vpop.f32.mrf.mxu1 }
 0x13b   :  { %v321_v6 = vadd.f32 %v320_v5, %v241_v3 }
 0x13c   :  { %526 = vst.msk [vmem:[%s1111_s3 + $0x90] sm:$0xff] %vm507_vm0, %v504_v4 }
 0x13d   :  { %v400_v7 = vpop.f32.mrf.mxu2 }
 0x13e   :  { %v401_v8 = vadd.f32 %v400_v7, %v321_v6  ;;  %v480_v9 = vpop.f32.mrf.mxu3 }
 0x140   :  { %v481_v10 = vadd.f32 %v480_v9, %v401_v8  ;;  %v243_v11 = vpop.f32.mrf.mxu0 }
 0x141   :  { %v244_v12 = vadd.f32 %v942_v0, %v243_v11 }
 0x142   :  { %v505_v13 = vmax.f32 %v481_v10, 0.0  ;;  %v323_v14 = vpop.f32.mrf.mxu1 }
 0x143   :  { %v324_v15 = vadd.f32 %v323_v14, %v244_v12 }
 0x144   :  { %527 = vst.msk [vmem:[%s1111_s3 + $0x98] sm:$0xff] %vm507_vm0, %v505_v13 }
 0x145   :  { %v403_v16 = vpop.f32.mrf.mxu2 }
 0x146   :  { %v404_v17 = vadd.f32 %v403_v16, %v324_v15  ;;  %v483_v18 = vpop.f32.mrf.mxu3 }
 0x148   :  { %v484_v19 = vadd.f32 %v483_v18, %v404_v17 }
 0x14a   :  { %v506_v20 = vmax.f32 %v484_v19, 0.0 }
 0x14c   :  { %529 = vst.msk [vmem:[%s1111_s3 + $0xa0] sm:$0x3] %vm528_vm1, %v506_v20 }

// kernel: forward.6
= control target key start
LH: loop header
LB: loop body
LE: loop exit
PB: predicated region body
PF: predicated region fallthrough
CT: control target
= control target key end

     0   :  { %vm155_vm0 = vcmask 523264   ;;  %vm500_vm1 = vcmask 517120   ;;  %s1108_s1 = inlined_call_operand.vmem [shape: f32[576,64], index: 1, kind: input, shape index: {}]   ;;  %s1109_s0 = inlined_call_operand.vmem [shape: f32[98,576], index: 0, kind: input, shape index: {}]   ;;  %s1110_s2 = inlined_call_operand.vmem [shape: f32[1,64], index: 2, kind: input, shape index: {}]   ;;  %s1111_s3 = inlined_call_operand.vmem [shape: f32[98,64], index: 3, kind: output, shape index: {}]  }
   0x1   :  { %v94_v0 = vld [vmem:[%s1108_s1 + $0x78] sm:$0xff]  ;;  %v93_v1 = vld [vmem:[%s1108_s1 + $0x70] sm:$0xff]  ;;  %v92_v2 = vld [vmem:[%s1108_s1 + $0x68] sm:$0xff] }
   0x2   :  { %519 = vmatpush.msra.mxu1 %v94_v0  ;;  %520 = vmatpush.msra.mxu2 %v94_v0  ;;  %v91_v3 = vld [vmem:[%s1108_s1 + $0x60] sm:$0xff]  ;;  %v90_v4 = vld [vmem:[%s1108_s1 + $0x58] sm:$0xff]  ;;  %v89_v5 = vld [vmem:[%s1108_s1 + $0x50] sm:$0xff] }
   0x3   :  { %521 = vmatpush.msra.mxu3 %v94_v0  ;;  %195 = vmatpush.msra.mxu0 %v94_v0  ;;  %v88_v6 = vld [vmem:[%s1108_s1 + $0x48] sm:$0xff]  ;;  %v87_v7 = vld [vmem:[%s1108_s1 + $0x40] sm:$0xff]  ;;  %v86_v8 = vld [vmem:[%s1108_s1 + $0x38] sm:$0xff] }
   0x4   :  { %522 = vmatpush.msra.mxu1 %v93_v1  ;;  %523 = vmatpush.msra.mxu2 %v93_v1  ;;  %v85_v9 = vld [vmem:[%s1108_s1 + $0x30] sm:$0xff]  ;;  %v84_v10 = vld [vmem:[%s1108_s1 + $0x28] sm:$0xff]  ;;  %v83_v11 = vld [vmem:[%s1108_s1 + $0x20] sm:$0xff] }
   0x5   :  { %524 = vmatpush.msra.mxu3 %v93_v1  ;;  %196 = vmatpush.msra.mxu0 %v93_v1  ;;  %v82_v12 = vld [vmem:[%s1108_s1 + $0x18] sm:$0xff]  ;;  %v81_v13 = vld [vmem:[%s1108_s1 + $0x10] sm:$0xff]  ;;  %v80_v14 = vld [vmem:[%s1108_s1 + $0x8] sm:$0xff] }
   0x6   :  { %525 = vmatpush.msra.mxu1 %v92_v2  ;;  %526 = vmatpush.msra.mxu2 %v92_v2  ;;  %v79_v15 = vld [vmem:[%s1108_s1] sm:$0xff]  ;;  %v126_v18 = vld [vmem:[%s1108_s1 + $0x178] sm:$0xff]  ;;  %v125_v20 = vld [vmem:[%s1108_s1 + $0x170] sm:$0xff] }
   0x7   :  { %527 = vmatpush.msra.mxu3 %v92_v2  ;;  %197 = vmatpush.msra.mxu0 %v92_v2  ;;  %v34_v16 = vld [vmem:[%s1109_s0 + $0xa0] sm:$0xff]  ;;  %v110_v19 = vld [vmem:[%s1108_s1 + $0xf8] sm:$0xff]  ;;  %v109_v21 = vld [vmem:[%s1108_s1 + $0xf0] sm:$0xff] }
   0x8   :  { %528 = vmatpush.msra.mxu1 %v91_v3  ;;  %529 = vmatpush.msra.mxu2 %v91_v3  ;;  %v54_v17 = vld [vmem:[%s1109_s0 + $0x140] sm:$0xff]  ;;  %v142_v22 = vld [vmem:[%s1108_s1 + $0x1f8] sm:$0xff]  ;;  %v124_v24 = vld [vmem:[%s1108_s1 + $0x168] sm:$0xff] }
   0x9   :  { %530 = vmatpush.msra.mxu3 %v91_v3  ;;  %198 = vmatpush.msra.mxu0 %v91_v3  ;;  %v14_v23 = vld [vmem:[%s1109_s0] sm:$0xff]  ;;  %v108_v25 = vld [vmem:[%s1108_s1 + $0xe8] sm:$0xff]  ;;  %v141_v26 = vld [vmem:[%s1108_s1 + $0x1f0] sm:$0xff] }
   0xa   :  { %531 = vmatpush.msra.mxu1 %v90_v4  ;;  %532 = vmatpush.msra.mxu2 %v90_v4  ;;  %v150_v27 = vld [vmem:[%s1108_s1 + $0x238] sm:$0xff]  ;;  %v123_v28 = vld [vmem:[%s1108_s1 + $0x160] sm:$0xff]  ;;  %v140_v30 = vld [vmem:[%s1108_s1 + $0x1e8] sm:$0xff] }
   0xb   :  { %533 = vmatpush.msra.mxu3 %v90_v4  ;;  %199 = vmatpush.msra.mxu0 %v90_v4  ;;  %v107_v29 = vld [vmem:[%s1108_s1 + $0xe0] sm:$0xff]  ;;  %v39_v31 = vld [vmem:[%s1109_s0 + $0xc8] sm:$0xff]  ;;  %v106_v33 = vld [vmem:[%s1108_s1 + $0xd8] sm:$0xff] }
   0xc   :  { %534 = vmatpush.msra.mxu1 %v89_v5  ;;  %535 = vmatpush.msra.mxu2 %v89_v5  ;;  %v59_v32 = vld [vmem:[%s1109_s0 + $0x168] sm:$0xff]  ;;  %v122_v34 = vld [vmem:[%s1108_s1 + $0x158] sm:$0xff]  ;;  %v139_v35 = vld [vmem:[%s1108_s1 + $0x1e0] sm:$0xff] }
   0xd   :  { %536 = vmatpush.msra.mxu3 %v89_v5  ;;  %200 = vmatpush.msra.mxu0 %v89_v5  ;;  %v105_v36 = vld [vmem:[%s1108_s1 + $0xd0] sm:$0xff]  ;;  %v138_v39 = vld [vmem:[%s1108_s1 + $0x1d8] sm:$0xff]  ;;  %v104_v40 = vld [vmem:[%s1108_s1 + $0xc8] sm:$0xff] }
   0xe   :  { %537 = vmatpush.msra.mxu1 %v88_v6  ;;  %538 = vmatpush.msra.mxu2 %v88_v6  ;;  %v149_v37 = vld [vmem:[%s1108_s1 + $0x230] sm:$0xff]  ;;  %v19_v41 = vld [vmem:[%s1109_s0 + $0x28] sm:$0xff]  ;;  %v103_v44 = vld [vmem:[%s1108_s1 + $0xc0] sm:$0xff] }
   0xf   :  { %539 = vmatpush.msra.mxu3 %v88_v6  ;;  %201 = vmatpush.msra.mxu0 %v88_v6  ;;  %v121_v38 = vld [vmem:[%s1108_s1 + $0x150] sm:$0xff]  ;;  %v120_v42 = vld [vmem:[%s1108_s1 + $0x148] sm:$0xff]  ;;  %v119_v46 = vld [vmem:[%s1108_s1 + $0x140] sm:$0xff] }
  0x10   :  { %540 = vmatpush.msra.mxu1 %v87_v7  ;;  %541 = vmatpush.msra.mxu2 %v87_v7  ;;  %v137_v43 = vld [vmem:[%s1108_s1 + $0x1d0] sm:$0xff]  ;;  %v148_v45 = vld [vmem:[%s1108_s1 + $0x228] sm:$0xff]  ;;  %v118_v50 = vld [vmem:[%s1108_s1 + $0x138] sm:$0xff] }
  0x11   :  { %542 = vmatpush.msra.mxu3 %v87_v7  ;;  %202 = vmatpush.msra.mxu0 %v87_v7  ;;  %v136_v47 = vld [vmem:[%s1108_s1 + $0x1c8] sm:$0xff]  ;;  %v44_v48 = vld [vmem:[%s1109_s0 + $0xf0] sm:$0xff]  ;;  %v102_v51 = vld [vmem:[%s1108_s1 + $0xb8] sm:$0xff] }
  0x12   :  { %543 = vmatpush.msra.mxu1 %v86_v8  ;;  %544 = vmatpush.msra.mxu2 %v86_v8  ;;  %v64_v49 = vld [vmem:[%s1109_s0 + $0x190] sm:$0xff]  ;;  %v135_v52 = vld [vmem:[%s1108_s1 + $0x1c0] sm:$0xff]  ;;  %v134_v56 = vld [vmem:[%s1108_s1 + $0x1b8] sm:$0xff] }
  0x13   :  { %545 = vmatpush.msra.mxu3 %v86_v8  ;;  %203 = vmatpush.msra.mxu0 %v86_v8  ;;  %v147_v53 = vld [vmem:[%s1108_s1 + $0x220] sm:$0xff]  ;;  %v117_v54 = vld [vmem:[%s1108_s1 + $0x130] sm:$0xff]  ;;  %v116_v58 = vld [vmem:[%s1108_s1 + $0x128] sm:$0xff] }
  0x14   :  { %546 = vmatpush.msra.mxu1 %v85_v9  ;;  %547 = vmatpush.msra.mxu2 %v85_v9  ;;  %v101_v55 = vld [vmem:[%s1108_s1 + $0xb0] sm:$0xff]  ;;  %v100_v59 = vld [vmem:[%s1108_s1 + $0xa8] sm:$0xff]  ;;  %v146_v61 = vld [vmem:[%s1108_s1 + $0x218] sm:$0xff] }
  0x15   :  { %548 = vmatpush.msra.mxu3 %v85_v9  ;;  %204 = vmatpush.msra.mxu0 %v85_v9  ;;  %v24_v57 = vld [vmem:[%s1109_s0 + $0x50] sm:$0xff]  ;;  %v115_v62 = vld [vmem:[%s1108_s1 + $0x120] sm:$0xff]  ;;  %v132_v0 = vld [vmem:[%s1108_s1 + $0x1a8] sm:$0xff] }
  0x16   :  { %549 = vmatpush.msra.mxu1 %v84_v10  ;;  %550 = vmatpush.msra.mxu2 %v84_v10  ;;  %v133_v60 = vld [vmem:[%s1108_s1 + $0x1b0] sm:$0xff]  ;;  %v99_v63 = vld [vmem:[%s1108_s1 + $0xa0] sm:$0xff]  ;;  %v49_v1 = vld [vmem:[%s1109_s0 + $0x118] sm:$0xff] }
  0x17   :  { %551 = vmatpush.msra.mxu3 %v84_v10  ;;  %205 = vmatpush.msra.mxu0 %v84_v10  ;;  %v69_v2 = vld [vmem:[%s1109_s0 + $0x1b8] sm:$0xff]  ;;  %v131_v5 = vld [vmem:[%s1108_s1 + $0x1a0] sm:$0xff]  ;;  %v97_v7 = vld [vmem:[%s1108_s1 + $0x90] sm:$0xff] }
  0x18   :  { %552 = vmatpush.msra.mxu1 %v83_v11  ;;  %553 = vmatpush.msra.mxu2 %v83_v11  ;;  %v98_v3 = vld [vmem:[%s1108_s1 + $0x98] sm:$0xff]  ;;  %v74_v6 = vld [vmem:[%s1109_s0 + $0x1e0] sm:$0x3]  ;;  %v113_v8 = vld [vmem:[%s1108_s1 + $0x110] sm:$0xff] }
  0x19   :  { %554 = vmatpush.msra.mxu3 %v83_v11  ;;  %206 = vmatpush.msra.mxu0 %v83_v11  ;;  %v114_v4 = vld [vmem:[%s1108_s1 + $0x118] sm:$0xff]  ;;  %v96_v10 = vld [vmem:[%s1108_s1 + $0x88] sm:$0xff]  ;;  %v145_v11 = vld [vmem:[%s1108_s1 + $0x210] sm:$0xff] }
  0x1a   :  { %555 = vmatpush.msra.mxu1 %v82_v12  ;;  %556 = vmatpush.msra.mxu2 %v82_v12  ;;  %v130_v9 = vld [vmem:[%s1108_s1 + $0x198] sm:$0xff] }
  0x1b   :  { %557 = vmatpush.msra.mxu3 %v82_v12  ;;  %207 = vmatpush.msra.mxu0 %v82_v12  ;;  %v112_v12 = vld [vmem:[%s1108_s1 + $0x108] sm:$0xff] }
  0x1c   :  { %558 = vmatpush.msra.mxu1 %v81_v13  ;;  %559 = vmatpush.msra.mxu2 %v81_v13 }
  0x1d   :  { %560 = vmatpush.msra.mxu3 %v81_v13  ;;  %208 = vmatpush.msra.mxu0 %v81_v13  ;;  %v129_v13 = vld [vmem:[%s1108_s1 + $0x190] sm:$0xff] }
  0x1e   :  { %561 = vmatpush.msra.mxu1 %v80_v14  ;;  %562 = vmatpush.msra.mxu2 %v80_v14 }
  0x1f   :  { %563 = vmatpush.msra.mxu3 %v80_v14  ;;  %209 = vmatpush.msra.mxu0 %v80_v14  ;;  %v95_v14 = vld [vmem:[%s1108_s1 + $0x80] sm:$0xff] }
  0x20   :  { %564 = vmatpush.msra.mxu1 %v79_v15  ;;  %565 = vmatpush.msra.mxu2 %v79_v15 }
  0x21   :  { %223 = vmatmul.f32.vlgmr.msra.gmra.mxu1 %v34_v16  ;;  %235 = vmatmul.f32.vlgmr.msra.gmra.mxu2 %v54_v17  ;;  %v111_v16 = vld [vmem:[%s1108_s1 + $0x100] sm:$0xff]  ;;  %v128_v17 = vld [vmem:[%s1108_s1 + $0x188] sm:$0xff] }
  0x22   :  { %307 = vmatpush.msrb.mxu2 %v126_v18  ;;  %251 = vmatpush.msrb.mxu1 %v110_v19  ;;  %v15_v18 = vld [vmem:[%s1109_s0 + $0x8] sm:$0xff]  ;;  %v16_v19 = vld [vmem:[%s1109_s0 + $0x10] sm:$0xff] }
  0x23   :  { %566 = vmatpush.msra.mxu3 %v79_v15  ;;  %210 = vmatpush.msra.mxu0 %v79_v15  ;;  %v29_v15 = vld [vmem:[%s1109_s0 + $0x78] sm:$0xff] }
  0x24   :  { %308 = vmatpush.msrb.mxu2 %v125_v20  ;;  %252 = vmatpush.msrb.mxu1 %v109_v21  ;;  %v127_v20 = vld [vmem:[%s1108_s1 + $0x180] sm:$0xff]  ;;  %v144_v21 = vld [vmem:[%s1108_s1 + $0x208] sm:$0xff] }
  0x25   :  { %363 = vmatpush.msrb.mxu3 %v142_v22  ;;  %211 = vmatmul.f32.vlgmr.msra.gmra.mxu0 %v14_v23  ;;  %v17_v22 = vld [vmem:[%s1109_s0 + $0x18] sm:$0xff]  ;;  %v143_v23 = vld [vmem:[%s1108_s1 + $0x200] sm:$0xff] }
  0x26   :  { %309 = vmatpush.msrb.mxu2 %v124_v24  ;;  %253 = vmatpush.msrb.mxu1 %v108_v25  ;;  %v18_v24 = vld [vmem:[%s1109_s0 + $0x20] sm:$0xff]  ;;  %v20_v25 = vld [vmem:[%s1109_s0 + $0x30] sm:$0xff] }
  0x27   :  { %364 = vmatpush.msrb.mxu3 %v141_v26  ;;  %427 = vmatpush.msrb.mxu0 %v150_v27  ;;  %v21_v26 = vld [vmem:[%s1109_s0 + $0x38] sm:$0xff]  ;;  %v22_v27 = vld [vmem:[%s1109_s0 + $0x40] sm:$0xff] }
  0x28   :  { %310 = vmatpush.msrb.mxu2 %v123_v28  ;;  %254 = vmatpush.msrb.mxu1 %v107_v29  ;;  %v23_v28 = vld [vmem:[%s1109_s0 + $0x48] sm:$0xff]  ;;  %v25_v29 = vld [vmem:[%s1109_s0 + $0x58] sm:$0xff] }
  0x29   :  { %365 = vmatpush.msrb.mxu3 %v140_v30  ;;  %226 = vmatmul.f32.gmra.mxu1 %v39_v31  ;;  %v26_v30 = vld [vmem:[%s1109_s0 + $0x60] sm:$0xff]  ;;  %v27_v31 = vld [vmem:[%s1109_s0 + $0x68] sm:$0xff] }
  0x2a   :  { %238 = vmatmul.f32.gmra.mxu2 %v59_v32  ;;  %255 = vmatpush.msrb.mxu1 %v106_v33  ;;  %v28_v32 = vld [vmem:[%s1109_s0 + $0x70] sm:$0xff]  ;;  %v30_v33 = vld [vmem:[%s1109_s0 + $0x80] sm:$0xff] }
  0x2b   :  { %311 = vmatpush.msrb.mxu2 %v122_v34  ;;  %366 = vmatpush.msrb.mxu3 %v139_v35  ;;  %v31_v34 = vld [vmem:[%s1109_s0 + $0x88] sm:$0xff]  ;;  %v32_v35 = vld [vmem:[%s1109_s0 + $0x90] sm:$0xff] }
  0x2c   :  { %256 = vmatpush.msrb.mxu1 %v105_v36  ;;  %428 = vmatpush.msrb.mxu0 %v149_v37  ;;  %v33_v36 = vld [vmem:[%s1109_s0 + $0x98] sm:$0xff]  ;;  %v35_v37 = vld [vmem:[%s1109_s0 + $0xa8] sm:$0xff] }
  0x2d   :  { %312 = vmatpush.msrb.mxu2 %v121_v38  ;;  %367 = vmatpush.msrb.mxu3 %v138_v39  ;;  %v36_v38 = vld [vmem:[%s1109_s0 + $0xb0] sm:$0xff]  ;;  %v37_v39 = vld [vmem:[%s1109_s0 + $0xb8] sm:$0xff] }
  0x2e   :  { %257 = vmatpush.msrb.mxu1 %v104_v40  ;;  %214 = vmatmul.f32.gmra.mxu0 %v19_v41  ;;  %v38_v40 = vld [vmem:[%s1109_s0 + $0xc0] sm:$0xff]  ;;  %v40_v41 = vld [vmem:[%s1109_s0 + $0xd0] sm:$0xff] }
  0x2f   :  { %313 = vmatpush.msrb.mxu2 %v120_v42  ;;  %368 = vmatpush.msrb.mxu3 %v137_v43  ;;  %v41_v42 = vld [vmem:[%s1109_s0 + $0xd8] sm:$0xff]  ;;  %v42_v43 = vld [vmem:[%s1109_s0 + $0xe0] sm:$0xff] }
  0x30   :  { %258 = vmatpush.msrb.mxu1 %v103_v44  ;;  %429 = vmatpush.msrb.mxu0 %v148_v45  ;;  %v43_v44 = vld [vmem:[%s1109_s0 + $0xe8] sm:$0xff]  ;;  %v45_v45 = vld [vmem:[%s1109_s0 + $0xf8] sm:$0xff] }
  0x31   :  { %314 = vmatpush.msrb.mxu2 %v119_v46  ;;  %369 = vmatpush.msrb.mxu3 %v136_v47  ;;  %v46_v46 = vld [vmem:[%s1109_s0 + $0x100] sm:$0xff]  ;;  %v47_v47 = vld [vmem:[%s1109_s0 + $0x108] sm:$0xff] }
  0x32   :  { %229 = vmatmul.f32.gmra.mxu1 %v44_v48  ;;  %241 = vmatmul.f32.gmra.mxu2 %v64_v49  ;;  %v48_v48 = vld [vmem:[%s1109_s0 + $0x110] sm:$0xff]  ;;  %v50_v49 = vld [vmem:[%s1109_s0 + $0x120] sm:$0xff] }
  0x33   :  { %315 = vmatpush.msrb.mxu2 %v118_v50  ;;  %259 = vmatpush.msrb.mxu1 %v102_v51  ;;  %v51_v50 = vld [vmem:[%s1109_s0 + $0x128] sm:$0xff]  ;;  %v52_v51 = vld [vmem:[%s1109_s0 + $0x130] sm:$0xff] }
  0x34   :  { %370 = vmatpush.msrb.mxu3 %v135_v52  ;;  %430 = vmatpush.msrb.mxu0 %v147_v53  ;;  %v53_v52 = vld [vmem:[%s1109_s0 + $0x138] sm:$0xff]  ;;  %v55_v53 = vld [vmem:[%s1109_s0 + $0x148] sm:$0xff] }
  0x35   :  { %316 = vmatpush.msrb.mxu2 %v117_v54  ;;  %260 = vmatpush.msrb.mxu1 %v101_v55  ;;  %v56_v54 = vld [vmem:[%s1109_s0 + $0x150] sm:$0xff]  ;;  %v57_v55 = vld [vmem:[%s1109_s0 + $0x158] sm:$0xff] }
  0x36   :  { %371 = vmatpush.msrb.mxu3 %v134_v56  ;;  %217 = vmatmul.f32.gmra.mxu0 %v24_v57  ;;  %v58_v56 = vld [vmem:[%s1109_s0 + $0x160] sm:$0xff]  ;;  %v60_v57 = vld [vmem:[%s1109_s0 + $0x170] sm:$0xff] }
  0x37   :  { %317 = vmatpush.msrb.mxu2 %v116_v58  ;;  %261 = vmatpush.msrb.mxu1 %v100_v59  ;;  %v61_v58 = vld [vmem:[%s1109_s0 + $0x178] sm:$0xff]  ;;  %v62_v59 = vld [vmem:[%s1109_s0 + $0x180] sm:$0xff] }
  0x38   :  { %372 = vmatpush.msrb.mxu3 %v133_v60  ;;  %431 = vmatpush.msrb.mxu0 %v146_v61  ;;  %v63_v60 = vld [vmem:[%s1109_s0 + $0x188] sm:$0xff]  ;;  %v65_v61 = vld [vmem:[%s1109_s0 + $0x198] sm:$0xff] }
  0x39   :  { %318 = vmatpush.msrb.mxu2 %v115_v62  ;;  %262 = vmatpush.msrb.mxu1 %v99_v63  ;;  %v66_v62 = vld [vmem:[%s1109_s0 + $0x1a0] sm:$0xff]  ;;  %v67_v63 = vld [vmem:[%s1109_s0 + $0x1a8] sm:$0xff] }
  0x3a   :  { %373 = vmatpush.msrb.mxu3 %v132_v0  ;;  %232 = vmatmul.f32.gmra.mxu1 %v49_v1  ;;  %v68_v0 = vld [vmem:[%s1109_s0 + $0x1b0] sm:$0xff]  ;;  %v70_v1 = vld [vmem:[%s1109_s0 + $0x1c0] sm:$0xff] }
  0x3b   :  { %244 = vmatmul.f32.gmra.mxu2 %v69_v2  ;;  %263 = vmatpush.msrb.mxu1 %v98_v3  ;;  %v71_v2 = vld [vmem:[%s1109_s0 + $0x1c8] sm:$0xff]  ;;  %v72_v3 = vld [vmem:[%s1109_s0 + $0x1d0] sm:$0xff] }
  0x3c   :  { %319 = vmatpush.msrb.mxu2 %v114_v4  ;;  %374 = vmatpush.msrb.mxu3 %v131_v5  ;;  %v73_v5 = vld [vmem:[%s1109_s0 + $0x1d8] sm:$0xff] }
  0x3d   :  { %247 = vmatmul.f32.vlgmr.msra.gmra.mxu3 %v74_v6  ;;  %264 = vmatpush.msrb.mxu1 %v97_v7  ;;  %v75_v6 = vld [vmem:[%s1109_s0 + $0x1e8] sm:$0x3]  ;;  %v76_v7 = vld [vmem:[%s1109_s0 + $0x1f0] sm:$0x3] }
  0x3e   :  { %320 = vmatpush.msrb.mxu2 %v113_v8  ;;  %375 = vmatpush.msrb.mxu3 %v130_v9  ;;  %v77_v8 = vld [vmem:[%s1109_s0 + $0x1f8] sm:$0x3] }
  0x3f   :  { %265 = vmatpush.msrb.mxu1 %v96_v10  ;;  %432 = vmatpush.msrb.mxu0 %v145_v11  ;;  %v1013_v10 = vld [vmem:[%s1110_s2] ss:$0 sm:$0xff] }
  0x40   :  { %321 = vmatpush.msrb.mxu2 %v112_v12  ;;  %376 = vmatpush.msrb.mxu3 %v129_v13 }
  0x41   :  { %266 = vmatpush.msrb.mxu1 %v95_v14  ;;  %220 = vmatmul.f32.gmra.mxu0 %v29_v15  ;;  %v78_v14 = vld [vmem:[%s1109_s0 + $0x200] sm:$0x3] }
  0x42   :  { %322 = vmatpush.msrb.mxu2 %v111_v16  ;;  %377 = vmatpush.msrb.mxu3 %v128_v17 }
  0x43   :  { %267 = vmatmul.f32.vlgmr.msrb.gmra.mxu1 %v15_v18  ;;  %323 = vmatmul.f32.vlgmr.msrb.gmra.mxu2 %v16_v19 }
  0x44   :  { %378 = vmatpush.msrb.mxu3 %v127_v20  ;;  %433 = vmatpush.msrb.mxu0 %v144_v21 }
  0x45   :  { %379 = vmatmul.f32.vlgmr.msrb.gmra.mxu3 %v17_v22 }
  0x46   :  { %434 = vmatpush.msrb.mxu0 %v143_v23 }
  0x49   :  { %506 = vmatmul.msk.f32.vlgmr.msrb.gmra.mxu0 %vm155_vm0, %v18_v24 }
  0x4b   :  { %270 = vmatmul.f32.gmra.mxu1 %v20_v25  ;;  %326 = vmatmul.f32.gmra.mxu2 %v21_v26 }
  0x4d   :  { %382 = vmatmul.f32.gmra.mxu3 %v22_v27 }
  0x51   :  { %507 = vmatmul.msk.f32.gmra.mxu0 %vm155_vm0, %v23_v28 }
  0x53   :  { %273 = vmatmul.f32.gmra.mxu1 %v25_v29  ;;  %329 = vmatmul.f32.gmra.mxu2 %v26_v30 }
  0x55   :  { %385 = vmatmul.f32.gmra.mxu3 %v27_v31 }
  0x59   :  { %508 = vmatmul.msk.f32.gmra.mxu0 %vm155_vm0, %v28_v32 }
  0x5b   :  { %276 = vmatmul.f32.gmra.mxu1 %v30_v33  ;;  %332 = vmatmul.f32.gmra.mxu2 %v31_v34 }
  0x5d   :  { %388 = vmatmul.f32.gmra.mxu3 %v32_v35 }
  0x61   :  { %509 = vmatmul.msk.f32.gmra.mxu0 %vm155_vm0, %v33_v36 }
  0x63   :  { %279 = vmatmul.f32.gmra.mxu1 %v35_v37  ;;  %335 = vmatmul.f32.gmra.mxu2 %v36_v38 }
  0x65   :  { %391 = vmatmul.f32.gmra.mxu3 %v37_v39 }
  0x69   :  { %510 = vmatmul.msk.f32.gmra.mxu0 %vm155_vm0, %v38_v40 }
  0x6b   :  { %282 = vmatmul.f32.gmra.mxu1 %v40_v41  ;;  %338 = vmatmul.f32.gmra.mxu2 %v41_v42 }
  0x6d   :  { %394 = vmatmul.f32.gmra.mxu3 %v42_v43 }
  0x71   :  { %511 = vmatmul.msk.f32.gmra.mxu0 %vm155_vm0, %v43_v44 }
  0x73   :  { %285 = vmatmul.f32.gmra.mxu1 %v45_v45  ;;  %341 = vmatmul.f32.gmra.mxu2 %v46_v46 }
  0x75   :  { %397 = vmatmul.f32.gmra.mxu3 %v47_v47 }
  0x79   :  { %512 = vmatmul.msk.f32.gmra.mxu0 %vm155_vm0, %v48_v48 }
  0x7b   :  { %288 = vmatmul.f32.gmra.mxu1 %v50_v49  ;;  %344 = vmatmul.f32.gmra.mxu2 %v51_v50 }
  0x7d   :  { %400 = vmatmul.f32.gmra.mxu3 %v52_v51 }
  0x81   :  { %513 = vmatmul.msk.f32.gmra.mxu0 %vm155_vm0, %v53_v52 }
  0x83   :  { %291 = vmatmul.f32.gmra.mxu1 %v55_v53  ;;  %347 = vmatmul.f32.gmra.mxu2 %v56_v54 }
  0x85   :  { %403 = vmatmul.f32.gmra.mxu3 %v57_v55 }
  0x89   :  { %514 = vmatmul.msk.f32.gmra.mxu0 %vm155_vm0, %v58_v56 }
  0x8b   :  { %294 = vmatmul.f32.gmra.mxu1 %v60_v57  ;;  %350 = vmatmul.f32.gmra.mxu2 %v61_v58 }
  0x8d   :  { %406 = vmatmul.f32.gmra.mxu3 %v62_v59 }
  0x91   :  { %515 = vmatmul.msk.f32.gmra.mxu0 %vm155_vm0, %v63_v60 }
  0x93   :  { %297 = vmatmul.f32.gmra.mxu1 %v65_v61  ;;  %353 = vmatmul.f32.gmra.mxu2 %v66_v62 }
  0x95   :  { %409 = vmatmul.f32.gmra.mxu3 %v67_v63 }
  0x99   :  { %516 = vmatmul.msk.f32.gmra.mxu0 %vm155_vm0, %v68_v0 }
  0x9b   :  { %300 = vmatmul.f32.gmra.mxu1 %v70_v1  ;;  %356 = vmatmul.f32.gmra.mxu2 %v71_v2 }
  0x9d   :  { %412 = vmatmul.f32.gmra.mxu3 %v72_v3 }
  0x9e   :  { %v995_v4 = vpop.f32.mrf.mxu1 }
  0x9f   :  { %v225_v3 = vadd.f32 %v1013_v10, %v995_v4 }
  0xa1   :  { %517 = vmatmul.msk.f32.gmra.mxu0 %vm155_vm0, %v73_v5 }
  0xa2   :  { %v212_v9 = vpop.f32.mrf.mxu0 }
  0xa3   :  { %303 = vmatmul.f32.gmra.mxu1 %v75_v6  ;;  %359 = vmatmul.f32.gmra.mxu2 %v76_v7  ;;  %v213_v29 = vadd.f32 %v1013_v10, %v212_v9 }
  0xa4   :  { %v236_v11 = vpop.f32.mrf.mxu2 }
  0xa5   :  { %415 = vmatmul.f32.gmra.mxu3 %v77_v8  ;;  %v1016_v12 = vadd.f32 %v1013_v10, %v236_v11 }
  0xa6   :  { %v1018_v13 = vpop.f32.mrf.mxu1 }
  0xa9   :  { %518 = vmatmul.msk.f32.gmra.mxu0 %vm155_vm0, %v78_v14 }
  0xab   :  { %v215_v15 = vpop.f32.mrf.mxu0 }
  0xac   :  { %v216_v37 = vadd.f32 %v1013_v10, %v215_v15 }
  0xad   :  { %v239_v16 = vpop.f32.mrf.mxu2 }
  0xae   :  { %v1025_v17 = vadd.f32 %v1013_v10, %v239_v16 }
  0xaf   :  { %v1027_v18 = vpop.f32.mrf.mxu1 }
  0xb3   :  { %v218_v19 = vpop.f32.mrf.mxu0 }
  0xb4   :  { %v219_v47 = vadd.f32 %v1013_v10, %v218_v19  ;;  %v228_v19 = vadd.f32 %v1013_v10, %v1018_v13 }
  0xb5   :  { %v242_v20 = vpop.f32.mrf.mxu2 }
  0xb6   :  { %v1030_v21 = vadd.f32 %v1013_v10, %v242_v20 }
  0xb7   :  { %v1032_v22 = vpop.f32.mrf.mxu1 }
  0xbe   :  { %v245_v23 = vpop.f32.mrf.mxu2  ;;  %v221_v24 = vpop.f32.mrf.mxu0 }
  0xbf   :  { %v1035_v25 = vadd.f32 %v1013_v10, %v245_v23  ;;  %v222_v57 = vadd.f32 %v1013_v10, %v221_v24 }
  0xc0   :  { %v248_v26 = vpop.f32.mrf.mxu3  ;;  %v268_v27 = vpop.f32.mrf.mxu1 }
  0xc1   :  { %v1038_v28 = vadd.f32 %v1013_v10, %v248_v26  ;;  %v269_v30 = vadd.f32 %v268_v27, %v213_v29 }
  0xc6   :  { %v324_v31 = vpop.f32.mrf.mxu2  ;;  %v436_v32 = vpop.f32.mrf.mxu0 }
  0xc7   :  { %v325_v33 = vadd.f32 %v324_v31, %v269_v30 }
  0xc8   :  { %v271_v34 = vpop.f32.mrf.mxu1  ;;  %v380_v35 = vpop.f32.mrf.mxu3 }
  0xc9   :  { %v381_v36 = vadd.f32 %v380_v35, %v325_v33  ;;  %v272_v39 = vadd.f32 %v271_v34, %v216_v37 }
  0xcb   :  { %v437_v38 = vadd.f32 %v436_v32, %v381_v36  ;;  %v231_v32 = vadd.f32 %v1013_v10, %v1027_v18 }
  0xcd   :  { %v475_v40 = vmax.f32 %v437_v38, 0.0 }
  0xce   :  { %v327_v41 = vpop.f32.mrf.mxu2  ;;  %v439_v42 = vpop.f32.mrf.mxu0 }
  0xcf   :  { %488 = vst.msk [vmem:[%s1111_s3] sm:$0xff] %vm155_vm0, %v475_v40  ;;  %v328_v43 = vadd.f32 %v327_v41, %v272_v39  ;;  %v234_v41 = vadd.f32 %v1013_v10, %v1032_v22 }
  0xd0   :  { %v274_v44 = vpop.f32.mrf.mxu1  ;;  %v383_v45 = vpop.f32.mrf.mxu3 }
  0xd1   :  { %v384_v46 = vadd.f32 %v383_v45, %v328_v43  ;;  %v275_v49 = vadd.f32 %v274_v44, %v219_v47 }
  0xd3   :  { %v440_v48 = vadd.f32 %v439_v42, %v384_v46 }
  0xd5   :  { %v476_v50 = vmax.f32 %v440_v48, 0.0 }
  0xd6   :  { %v330_v51 = vpop.f32.mrf.mxu2  ;;  %v442_v52 = vpop.f32.mrf.mxu0 }
  0xd7   :  { %489 = vst.msk [vmem:[%s1111_s3 + $0x8] sm:$0xff] %vm155_vm0, %v476_v50  ;;  %v331_v53 = vadd.f32 %v330_v51, %v275_v49 }
  0xd8   :  { %v277_v54 = vpop.f32.mrf.mxu1  ;;  %v386_v55 = vpop.f32.mrf.mxu3 }
  0xd9   :  { %v387_v56 = vadd.f32 %v386_v55, %v331_v53  ;;  %v278_v59 = vadd.f32 %v277_v54, %v222_v57 }
  0xdb   :  { %v443_v58 = vadd.f32 %v442_v52, %v387_v56 }
  0xdd   :  { %v477_v60 = vmax.f32 %v443_v58, 0.0 }
  0xde   :  { %v333_v61 = vpop.f32.mrf.mxu2  ;;  %v445_v62 = vpop.f32.mrf.mxu0 }
  0xdf   :  { %490 = vst.msk [vmem:[%s1111_s3 + $0x10] sm:$0xff] %vm155_vm0, %v477_v60  ;;  %v334_v63 = vadd.f32 %v333_v61, %v278_v59 }
  0xe0   :  { %v280_v0 = vpop.f32.mrf.mxu1  ;;  %v389_v1 = vpop.f32.mrf.mxu3 }
  0xe1   :  { %v390_v2 = vadd.f32 %v389_v1, %v334_v63  ;;  %v281_v6 = vadd.f32 %v280_v0, %v225_v3 }
  0xe3   :  { %v446_v5 = vadd.f32 %v445_v62, %v390_v2 }
  0xe5   :  { %v478_v7 = vmax.f32 %v446_v5, 0.0 }
  0xe6   :  { %v336_v8 = vpop.f32.mrf.mxu2  ;;  %v448_v9 = vpop.f32.mrf.mxu0 }
  0xe7   :  { %491 = vst.msk [vmem:[%s1111_s3 + $0x18] sm:$0xff] %vm155_vm0, %v478_v7  ;;  %v337_v11 = vadd.f32 %v336_v8, %v281_v6 }
  0xe8   :  { %v283_v14 = vpop.f32.mrf.mxu1  ;;  %v392_v15 = vpop.f32.mrf.mxu3 }
  0xe9   :  { %v393_v16 = vadd.f32 %v392_v15, %v337_v11  ;;  %v284_v23 = vadd.f32 %v283_v14, %v228_v19 }
  0xeb   :  { %v449_v20 = vadd.f32 %v448_v9, %v393_v16 }
  0xed   :  { %v479_v4 = vmax.f32 %v449_v20, 0.0 }
  0xee   :  { %v339_v24 = vpop.f32.mrf.mxu2  ;;  %v451_v26 = vpop.f32.mrf.mxu0 }
  0xef   :  { %492 = vst.msk [vmem:[%s1111_s3 + $0x20] sm:$0xff] %vm155_vm0, %v479_v4  ;;  %v340_v27 = vadd.f32 %v339_v24, %v284_v23 }
  0xf0   :  { %v286_v29 = vpop.f32.mrf.mxu1  ;;  %v395_v30 = vpop.f32.mrf.mxu3 }
  0xf1   :  { %v396_v31 = vadd.f32 %v395_v30, %v340_v27  ;;  %v287_v34 = vadd.f32 %v286_v29, %v231_v32 }
  0xf3   :  { %v452_v33 = vadd.f32 %v451_v26, %v396_v31 }
  0xf5   :  { %v480_v13 = vmax.f32 %v452_v33, 0.0 }
  0xf6   :  { %v342_v35 = vpop.f32.mrf.mxu2  ;;  %v454_v36 = vpop.f32.mrf.mxu0 }
  0xf7   :  { %493 = vst.msk [vmem:[%s1111_s3 + $0x28] sm:$0xff] %vm155_vm0, %v480_v13  ;;  %v343_v37 = vadd.f32 %v342_v35, %v287_v34 }
  0xf8   :  { %v289_v38 = vpop.f32.mrf.mxu1  ;;  %v398_v39 = vpop.f32.mrf.mxu3 }
  0xf9   :  { %v399_v40 = vadd.f32 %v398_v39, %v343_v37  ;;  %v290_v43 = vadd.f32 %v289_v38, %v234_v41 }
  0xfb   :  { %v455_v42 = vadd.f32 %v454_v36, %v399_v40 }
  0xfd   :  { %v481_v18 = vmax.f32 %v455_v42, 0.0 }
  0xfe   :  { %v345_v44 = vpop.f32.mrf.mxu2  ;;  %v457_v45 = vpop.f32.mrf.mxu0 }
  0xff   :  { %494 = vst.msk [vmem:[%s1111_s3 + $0x30] sm:$0xff] %vm155_vm0, %v481_v18  ;;  %v346_v46 = vadd.f32 %v345_v44, %v290_v43 }
 0x100   :  { %v292_v47 = vpop.f32.mrf.mxu1  ;;  %v401_v48 = vpop.f32.mrf.mxu3 }
 0x101   :  { %v402_v49 = vadd.f32 %v401_v48, %v346_v46  ;;  %v293_v51 = vadd.f32 %v292_v47, %v1016_v12 }
 0x103   :  { %v458_v50 = vadd.f32 %v457_v45, %v402_v49 }
 0x105   :  { %v482_v52 = vmax.f32 %v458_v50, 0.0 }
 0x106   :  { %v348_v53 = vpop.f32.mrf.mxu2  ;;  %v460_v10 = vpop.f32.mrf.mxu0 }
 0x107   :  { %495 = vst.msk [vmem:[%s1111_s3 + $0x38] sm:$0xff] %vm155_vm0, %v482_v52  ;;  %v349_v22 = vadd.f32 %v348_v53, %v293_v51 }
 0x108   :  { %v295_v54 = vpop.f32.mrf.mxu1  ;;  %v404_v55 = vpop.f32.mrf.mxu3 }
 0x109   :  { %v405_v56 = vadd.f32 %v404_v55, %v349_v22  ;;  %v296_v58 = vadd.f32 %v295_v54, %v1025_v17 }
 0x10b   :  { %v461_v57 = vadd.f32 %v460_v10, %v405_v56 }
 0x10d   :  { %v483_v59 = vmax.f32 %v461_v57, 0.0 }
 0x10e   :  { %v351_v60 = vpop.f32.mrf.mxu2  ;;  %v463_v61 = vpop.f32.mrf.mxu0 }
 0x10f   :  { %496 = vst.msk [vmem:[%s1111_s3 + $0x40] sm:$0xff] %vm155_vm0, %v483_v59  ;;  %v352_v12 = vadd.f32 %v351_v60, %v296_v58 }
 0x110   :  { %v298_v62 = vpop.f32.mrf.mxu1  ;;  %v407_v63 = vpop.f32.mrf.mxu3 }
 0x111   :  { %v408_v0 = vadd.f32 %v407_v63, %v352_v12  ;;  %v299_v2 = vadd.f32 %v298_v62, %v1030_v21 }
 0x113   :  { %v464_v1 = vadd.f32 %v463_v61, %v408_v0 }
 0x115   :  { %v484_v3 = vmax.f32 %v464_v1, 0.0 }
 0x116   :  { %v354_v5 = vpop.f32.mrf.mxu2  ;;  %v466_v6 = vpop.f32.mrf.mxu0 }
 0x117   :  { %497 = vst.msk [vmem:[%s1111_s3 + $0x48] sm:$0xff] %vm155_vm0, %v484_v3  ;;  %v355_v17 = vadd.f32 %v354_v5, %v299_v2 }
 0x118   :  { %v301_v7 = vpop.f32.mrf.mxu1  ;;  %v410_v8 = vpop.f32.mrf.mxu3 }
 0x119   :  { %v411_v9 = vadd.f32 %v410_v8, %v355_v17  ;;  %v302_v14 = vadd.f32 %v301_v7, %v1035_v25 }
 0x11b   :  { %v467_v11 = vadd.f32 %v466_v6, %v411_v9 }
 0x11d   :  { %v485_v15 = vmax.f32 %v467_v11, 0.0 }
 0x11e   :  { %v357_v16 = vpop.f32.mrf.mxu2  ;;  %v469_v19 = vpop.f32.mrf.mxu0 }
 0x11f   :  { %498 = vst.msk [vmem:[%s1111_s3 + $0x50] sm:$0xff] %vm155_vm0, %v485_v15  ;;  %v358_v21 = vadd.f32 %v357_v16, %v302_v14 }
 0x120   :  { %v413_v20 = vpop.f32.mrf.mxu3  ;;  %v304_v4 = vpop.f32.mrf.mxu1 }
 0x121   :  { %v414_v23 = vadd.f32 %v413_v20, %v358_v21  ;;  %v305_v26 = vadd.f32 %v304_v4, %v1038_v28 }
 0x123   :  { %v470_v24 = vadd.f32 %v469_v19, %v414_v23 }
 0x125   :  { %v486_v27 = vmax.f32 %v470_v24, 0.0 }
 0x126   :  { %v360_v29 = vpop.f32.mrf.mxu2  ;;  %v472_v31 = vpop.f32.mrf.mxu0 }
 0x127   :  { %499 = vst.msk [vmem:[%s1111_s3 + $0x58] sm:$0xff] %vm155_vm0, %v486_v27  ;;  %v361_v25 = vadd.f32 %v360_v29, %v305_v26 }
 0x128   :  { %v416_v30 = vpop.f32.mrf.mxu3 }
 0x129   :  { %v417_v32 = vadd.f32 %v416_v30, %v361_v25 }
 0x12b   :  { %v473_v33 = vadd.f32 %v472_v31, %v417_v32 }
 0x12d   :  { %v487_v34 = vmax.f32 %v473_v33, 0.0 }
 0x12f   :  { %501 = vst.msk [vmem:[%s1111_s3 + $0x60] sm:$0x3] %vm500_vm1, %v487_v34 }

// kernel: forward.7
= control target key start
LH: loop header
LB: loop body
LE: loop exit
PB: predicated region body
PF: predicated region fallthrough
CT: control target
= control target key end

     0   :  { %s9390_s0 = inlined_call_operand.vmem [shape: bf16[2,3136], index: 0, kind: input, shape index: {}]   ;;  %s9391_s1 = inlined_call_operand.vmem [shape: bf16[2,512], index: 1, kind: input, shape index: {}]   ;;  %s9392_s2 = inlined_call_operand.vmem [shape: f32[2,512], index: 2, kind: input, shape index: {}]   ;;  %s9393_s3 = inlined_call_operand.vmem [shape: s8[4,3136,512], index: 3, kind: input, shape index: {}]   ;;  %s9394_s4 = inlined_call_operand.vmem [shape: f32[4,1,512], index: 4, kind: input, shape index: {}]   ;;  %s9395_s5 = inlined_call_operand.vmem [shape: s8[4,512,512], index: 5, kind: input, shape index: {}]   ;;  %s9396_s6 = inlined_call_operand.vmem [shape: f32[4,1,512], index: 6, kind: input, shape index: {}]   ;;  %s9397_s7 = inlined_call_operand.vmem [shape: f32[4,1,512], index: 7, kind: input, shape index: {}]   ;;  %s9398_s8 = inlined_call_operand.vmem [shape: bf16[4,128,128], index: 8, kind: input, shape index: {}]   ;;  %s9399_s9 = inlined_call_operand.hbm [shape: f32[2,512], index: 9, kind: output, shape index: {0}]   ;;  %s9400_s10 = inlined_call_operand.hbm [shape: f32[2,512], index: 10, kind: output, shape index: {1}]   ;;  %s9401_s11 = inlined_call_operand.vmem [shape: f32[4,2,128], index: 11, kind: output, shape index: {2}]  }
   0x1   :  { %9403 = sst [smem:[#allocation8_spill]] %s9390_s0 }
   0x2   :  { %9404 = sst [smem:[#allocation9_spill]] %s9391_s1 }
   0x3   :  { %9405 = sst [smem:[#allocation10_spill]] %s9392_s2 }
   0x4   :  { %9406 = sst [smem:[#allocation11_spill]] %s9393_s3 }
   0x5   :  { %9407 = sst [smem:[#allocation12_spill]] %s9394_s4 }
   0x6   :  { %9408 = sst [smem:[#allocation13_spill]] %s9395_s5 }
   0x7   :  { %9409 = sst [smem:[#allocation14_spill]] %s9396_s6 }
   0x8   :  { %9410 = sst [smem:[#allocation15_spill]] %s9397_s7 }
   0x9   :  { %17 = vsyncpa [#allocation3], 0 }
   0xa   :  { %19 = vsyncpa [#allocation3 + $0x1], 0 }
   0xb   :  { %20 = vsyncpa [#allocation5], 0 }
   0xc   :  { %22 = vsyncpa [#allocation5 + $0x1], 0  ;;  %s7830_s17 = smov 0   ;;  %s7832_s18 = smov 0  }
   0xd   :  { %s7834_s19 = smov 0   ;;  %s7836_s20 = smov 0  }
   0xe LB: > { %s7851_s21 = sadd.s32 4294967295, %s7768_s20   ;;  %s7535_s22 = sadd.s32 4294967294, %s7768_s20   ;;  %s7768_s20 = sphi %s7836_s20, %s9427_s20   ;;  %s7764_s19 = sphi %s7834_s19, %s9426_s19   ;;  %s7760_s18 = sphi %s7832_s18, %s9425_s18   ;;  %s7756_s17 = sphi %s7830_s17, %s9424_s17  }
   0xf   : > { %s7855_s23 = sadd.s32 1, %s7768_s20   ;;  %s259_s24 = sadd.s32 1, %s7764_s19 }
  0x10   : > { %s256_s25 = ssub.s32 %s7768_s20, %s7855_s23  ;;  %p269_p0 = scmp.ne.s32.totalorder %s7764_s19, %s7760_s18 }
  0x11   : > { %p257_p1 = scmp.eq.s32.totalorder %s256_s25, 0  ;;  %p270_p2 = scmp.eq.s32.totalorder %s7851_s21, 3 }
  0x12   : > { %p275_p3 = scmp.ne.s32.totalorder %s7760_s18, %s7756_s17  ;;  %p276_p4 = scmp.eq.s32.totalorder %s7535_s22, 3 }
  0x13   : > { %s7866_s26 = scalar_select %p257_p1, %s7764_s19, %s259_s24  }
  0x14   : > { %p7868_p5 = por %p270_p2, %p269_p0  ;;  %p7872_p6 = por %p276_p4, %p275_p3 }
  0x15   : > { %p7538_p7 = scmp.ge.s32.totalorder %s7768_s20, 1  ;;  %p404_p8 = scmp.lt.s32.totalorder %s7768_s20, 5 }
  0x17   : > { %p405_p9 = pnand %p7538_p7, %p404_p8 }
  0x18   : > { %p479_p10 = scmp.lt.s32.totalorder (!%p405_p9), %s7851_s21, 3  ;;  %s9413_s3 = sld [smem:[#allocation11_spill]] (!%p405_p9) }
  0x19   : > { %408 = sbr.rel (%p405_p9) target bundleno = 1515 (0x5eb), region = 56  ;;  %s9414_s0 = sld [smem:[#allocation8_spill]] (!%p405_p9) }
  0x1a   : > { %s9415_s5 = sld [smem:[#allocation13_spill]] (!%p405_p9) }
  0x1b   : > { %s9416_s1 = sld [smem:[#allocation9_spill]] (!%p405_p9) }
  0x1c   : > { %s9417_s4 = sld [smem:[#allocation12_spill]] (!%p405_p9) }
  0x1d   : > { %s9418_s6 = sld [smem:[#allocation14_spill]] (!%p405_p9) }
  0x1e   : > { %s7880_s29 = scalar_select %p479_p10, %s7851_s21, 3  ;;  %vm4888_vm0 = vcmask 523264  }
  0x1f   : > { %s9419_s7 = sld [smem:[#allocation15_spill]] }
  0x20   : > { %s7606_s30 = smul.u32 3136, %s7880_s29  ;;  %s7596_s15 = sshll.u32 %s7880_s29, 9 }
  0x21   : > { %s8947_s24 = scalar_lea.vmem %s9415_s5, %s7596_s15  ;;  %s9402_s13 = sshll.u32 %s7880_s29, 1 }
  0x22   : > { %s7886_s14 = scalar_lea.vmem %s9413_s3, %s7606_s30  ;;  %s9265_s30 = sshll.u32 %s7880_s29, 2 }
  0x23   : > { %v531_v0 = vld [vmem:[%s7886_s14 + $0x60] sm:$0xff]  ;;  %s491_s15 = scalar_lea.vmem %s9417_s4, %s9265_s30  ;;  %s9422_s2 = sld [smem:[#allocation10_spill]] }
  0x24   : > { %v547_v1 = vld [vmem:[%s7886_s14 + $0xe0] sm:$0xff]  ;;  %v967_v3 = vunpack.c.2.s8 %v531_v0  ;;  %v971_v4 = vunpack.c.3.s8 %v531_v0  ;;  %v959_v22 = vunpack.c.0.s8 %v531_v0  ;;  %v963_v23 = vunpack.c.1.s8 %v531_v0 }
  0x25   : > { %v563_v2 = vld [vmem:[%s7886_s14 + $0x160] sm:$0xff]  ;;  %v1031_v5 = vunpack.c.2.s8 %v547_v1  ;;  %v1035_v6 = vunpack.c.3.s8 %v547_v1  ;;  %v1023_v26 = vunpack.c.0.s8 %v547_v1  ;;  %v1027_v27 = vunpack.c.1.s8 %v547_v1  ;;  %s504_s12 = scalar_lea.vmem %s9419_s7, %s9265_s30 }
  0x26   : > { %v579_v7 = vld [vmem:[%s7886_s14 + $0x1e0] sm:$0xff]  ;;  %v1095_v8 = vunpack.c.2.s8 %v563_v2  ;;  %v1099_v9 = vunpack.c.3.s8 %v563_v2  ;;  %v2535_v12 = vcvt.s32.f32 %v967_v3  ;;  %v2539_v13 = vcvt.s32.f32 %v971_v4 }
  0x27   : > { %v1159_v10 = vunpack.c.2.s8 %v579_v7  ;;  %v1163_v11 = vunpack.c.3.s8 %v579_v7  ;;  %v2599_v14 = vcvt.s32.f32 %v1031_v5  ;;  %v2603_v15 = vcvt.s32.f32 %v1035_v6  ;;  %v527_v28 = vld [vmem:[%s7886_s14 + $0x40] sm:$0xff] }
  0x28   : > { %v2663_v16 = vcvt.s32.f32 %v1095_v8  ;;  %v2667_v17 = vcvt.s32.f32 %v1099_v9  ;;  %v4075_v20 = vpack.c.bf16 %v2539_v13, %v2535_v12  ;;  %v2527_v29 = vcvt.s32.f32 %v959_v22  ;;  %v543_v37 = vld [vmem:[%s7886_s14 + $0xc0] sm:$0xff] }
  0x29   : > { %v2727_v18 = vcvt.s32.f32 %v1159_v10  ;;  %v2731_v19 = vcvt.s32.f32 %v1163_v11  ;;  %v4107_v21 = vpack.c.bf16 %v2603_v15, %v2599_v14  ;;  %v2531_v30 = vcvt.s32.f32 %v963_v23  ;;  %v559_v42 = vld [vmem:[%s7886_s14 + $0x140] sm:$0xff]  ;;  %s482_s25 = scalar_lea.vmem %s9422_s2, %s9402_s13 }
  0x2a   : > { %v4139_v24 = vpack.c.bf16 %v2667_v17, %v2663_v16  ;;  %4891 = vmatpush.bf16.msra.mxu0 %v4075_v20  ;;  %v1087_v31 = vunpack.c.0.s8 %v563_v2  ;;  %v1091_v32 = vunpack.c.1.s8 %v563_v2  ;;  %v2591_v33 = vcvt.s32.f32 %v1023_v26  ;;  %v575_v47 = vld [vmem:[%s7886_s14 + $0x1c0] sm:$0xff] }
  0x2b   : > { %v4171_v25 = vpack.c.bf16 %v2731_v19, %v2727_v18  ;;  %4904 = vmatpush.bf16.msra.mxu1 %v4107_v21  ;;  %v2595_v34 = vcvt.s32.f32 %v1027_v27  ;;  %v1151_v35 = vunpack.c.0.s8 %v579_v7  ;;  %v1155_v36 = vunpack.c.1.s8 %v579_v7  ;;  %v523_v8 = vld [vmem:[%s7886_s14 + $0x20] sm:$0xff] }
  0x2c   : > { %4917 = vmatpush.bf16.msra.mxu2 %v4139_v24  ;;  %v4071_v38 = vpack.c.bf16 %v2531_v30, %v2527_v29  ;;  %v2655_v39 = vcvt.s32.f32 %v1087_v31  ;;  %v2659_v40 = vcvt.s32.f32 %v1091_v32  ;;  %v951_v41 = vunpack.c.2.s8 %v527_v28  ;;  %v539_v17 = vld [vmem:[%s7886_s14 + $0xa0] sm:$0xff] }
  0x2d   : > { %4930 = vmatpush.bf16.msra.mxu3 %v4171_v25  ;;  %v4103_v43 = vpack.c.bf16 %v2595_v34, %v2591_v33  ;;  %v2719_v44 = vcvt.s32.f32 %v1151_v35  ;;  %v2723_v45 = vcvt.s32.f32 %v1155_v36  ;;  %v955_v46 = vunpack.c.3.s8 %v527_v28  ;;  %v555_v22 = vld [vmem:[%s7886_s14 + $0x120] sm:$0xff] }
  0x2e   : > { %4892 = vmatpush.bf16.msra.mxu0 %v4071_v38  ;;  %v4135_v48 = vpack.c.bf16 %v2659_v40, %v2655_v39  ;;  %v2519_v49 = vcvt.s32.f32 %v951_v41  ;;  %v1015_v50 = vunpack.c.2.s8 %v543_v37  ;;  %v1019_v51 = vunpack.c.3.s8 %v543_v37  ;;  %v571_v27 = vld [vmem:[%s7886_s14 + $0x1a0] sm:$0xff] }
  0x2f   : > { %4905 = vmatpush.bf16.msra.mxu1 %v4103_v43  ;;  %v4167_v52 = vpack.c.bf16 %v2723_v45, %v2719_v44  ;;  %v2523_v53 = vcvt.s32.f32 %v955_v46  ;;  %v1079_v54 = vunpack.c.2.s8 %v559_v42  ;;  %v1083_v55 = vunpack.c.3.s8 %v559_v42 }
  0x30   : > { %4918 = vmatpush.bf16.msra.mxu2 %v4135_v48  ;;  %v2583_v56 = vcvt.s32.f32 %v1015_v50  ;;  %v2587_v57 = vcvt.s32.f32 %v1019_v51  ;;  %v1143_v58 = vunpack.c.2.s8 %v575_v47  ;;  %v1147_v59 = vunpack.c.3.s8 %v575_v47 }
  0x31   : > { %4931 = vmatpush.bf16.msra.mxu3 %v4167_v52  ;;  %v4067_v60 = vpack.c.bf16 %v2523_v53, %v2519_v49  ;;  %v2647_v61 = vcvt.s32.f32 %v1079_v54  ;;  %v2651_v62 = vcvt.s32.f32 %v1083_v55  ;;  %v943_v63 = vunpack.c.0.s8 %v527_v28  ;;  %v519_v52 = vld [vmem:[%s7886_s14] sm:$0xff] }
  0x32   : > { %v4099_v0 = vpack.c.bf16 %v2587_v57, %v2583_v56  ;;  %v2711_v1 = vcvt.s32.f32 %v1143_v58  ;;  %v2715_v2 = vcvt.s32.f32 %v1147_v59  ;;  %v947_v3 = vunpack.c.1.s8 %v527_v28 }
  0x33   : > { %4893 = vmatpush.bf16.msra.mxu0 %v4067_v60  ;;  %v4131_v4 = vpack.c.bf16 %v2651_v62, %v2647_v61  ;;  %v2511_v5 = vcvt.s32.f32 %v943_v63  ;;  %v1007_v6 = vunpack.c.0.s8 %v543_v37  ;;  %v1011_v7 = vunpack.c.1.s8 %v543_v37  ;;  %v535_v61 = vld [vmem:[%s7886_s14 + $0x80] sm:$0xff] }
  0x34   : > { %4906 = vmatpush.bf16.msra.mxu1 %v4099_v0  ;;  %v4163_v9 = vpack.c.bf16 %v2715_v2, %v2711_v1  ;;  %v2515_v10 = vcvt.s32.f32 %v947_v3  ;;  %v1071_v11 = vunpack.c.0.s8 %v559_v42  ;;  %v1075_v12 = vunpack.c.1.s8 %v559_v42  ;;  %v551_v2 = vld [vmem:[%s7886_s14 + $0x100] sm:$0xff] }
  0x35   : > { %4919 = vmatpush.bf16.msra.mxu2 %v4131_v4  ;;  %v2575_v13 = vcvt.s32.f32 %v1007_v6  ;;  %v2579_v14 = vcvt.s32.f32 %v1011_v7  ;;  %v1135_v15 = vunpack.c.0.s8 %v575_v47  ;;  %v1139_v16 = vunpack.c.1.s8 %v575_v47  ;;  %v567_v7 = vld [vmem:[%s7886_s14 + $0x180] sm:$0xff] }
  0x36   : > { %4932 = vmatpush.bf16.msra.mxu3 %v4163_v9  ;;  %v4063_v18 = vpack.c.bf16 %v2515_v10, %v2511_v5  ;;  %v2639_v19 = vcvt.s32.f32 %v1071_v11  ;;  %v2643_v20 = vcvt.s32.f32 %v1075_v12  ;;  %v935_v21 = vunpack.c.2.s8 %v523_v8 }
  0x37   : > { %v4095_v23 = vpack.c.bf16 %v2579_v14, %v2575_v13  ;;  %v2703_v24 = vcvt.s32.f32 %v1135_v15  ;;  %v2707_v25 = vcvt.s32.f32 %v1139_v16  ;;  %v939_v26 = vunpack.c.3.s8 %v523_v8 }
  0x38   : > { %4894 = vmatpush.bf16.msra.mxu0 %v4063_v18  ;;  %v4127_v28 = vpack.c.bf16 %v2643_v20, %v2639_v19  ;;  %v2503_v29 = vcvt.s32.f32 %v935_v21  ;;  %v999_v30 = vunpack.c.2.s8 %v539_v17  ;;  %v1003_v31 = vunpack.c.3.s8 %v539_v17 }
  0x39   : > { %4907 = vmatpush.bf16.msra.mxu1 %v4095_v23  ;;  %v4159_v32 = vpack.c.bf16 %v2707_v25, %v2703_v24  ;;  %v2507_v33 = vcvt.s32.f32 %v939_v26  ;;  %v1063_v34 = vunpack.c.2.s8 %v555_v22  ;;  %v1067_v35 = vunpack.c.3.s8 %v555_v22 }
  0x3a   : > { %4920 = vmatpush.bf16.msra.mxu2 %v4127_v28  ;;  %v2567_v36 = vcvt.s32.f32 %v999_v30  ;;  %v2571_v37 = vcvt.s32.f32 %v1003_v31  ;;  %v1127_v38 = vunpack.c.2.s8 %v571_v27  ;;  %v1131_v39 = vunpack.c.3.s8 %v571_v27 }
  0x3b   : > { %4933 = vmatpush.bf16.msra.mxu3 %v4159_v32  ;;  %v4059_v40 = vpack.c.bf16 %v2507_v33, %v2503_v29  ;;  %v2631_v41 = vcvt.s32.f32 %v1063_v34  ;;  %v2635_v42 = vcvt.s32.f32 %v1067_v35  ;;  %v927_v43 = vunpack.c.0.s8 %v523_v8  ;;  %v595_v33 = vld [vmem:[%s7886_s14 + $0x260] sm:$0xff] }
  0x3c   : > { %v4091_v44 = vpack.c.bf16 %v2571_v37, %v2567_v36  ;;  %v2695_v45 = vcvt.s32.f32 %v1127_v38  ;;  %v2699_v46 = vcvt.s32.f32 %v1131_v39  ;;  %v931_v47 = vunpack.c.1.s8 %v523_v8  ;;  %v515_v8 = vld [vmem:[%s9414_s0] sm:$0xff] }
  0x3d   : > { %4895 = vmatpush.bf16.msra.mxu0 %v4059_v40  ;;  %v4123_v48 = vpack.c.bf16 %v2635_v42, %v2631_v41  ;;  %v2495_v49 = vcvt.s32.f32 %v927_v43  ;;  %v991_v50 = vunpack.c.0.s8 %v539_v17  ;;  %v995_v51 = vunpack.c.1.s8 %v539_v17  ;;  %4832 = vst [vmem:[#allocation1] ss:$9 sm:$0xff] %v515_v8  ;;  %v611_v42 = vld [vmem:[%s7886_s14 + $0x2e0] sm:$0xff] }
  0x3e   : > { %4908 = vmatpush.bf16.msra.mxu1 %v4091_v44  ;;  %v4155_v53 = vpack.c.bf16 %v2699_v46, %v2695_v45  ;;  %v2499_v54 = vcvt.s32.f32 %v931_v47  ;;  %v1055_v55 = vunpack.c.0.s8 %v555_v22  ;;  %v1059_v56 = vunpack.c.1.s8 %v555_v22  ;;  %v627_v47 = vld [vmem:[%s7886_s14 + $0x360] sm:$0xff] }
  0x3f   : > { %4921 = vmatpush.bf16.msra.mxu2 %v4123_v48  ;;  %v2559_v57 = vcvt.s32.f32 %v991_v50  ;;  %v2563_v58 = vcvt.s32.f32 %v995_v51  ;;  %v1119_v59 = vunpack.c.0.s8 %v571_v27  ;;  %v1123_v60 = vunpack.c.1.s8 %v571_v27 }
  0x40   : > { %4934 = vmatpush.bf16.msra.mxu3 %v4155_v53  ;;  %v4055_v62 = vpack.c.bf16 %v2499_v54, %v2495_v49  ;;  %v2623_v63 = vcvt.s32.f32 %v1055_v55  ;;  %v2627_v0 = vcvt.s32.f32 %v1059_v56  ;;  %v919_v1 = vunpack.c.2.s8 %v519_v52 }
  0x41   : > { %v4087_v3 = vpack.c.bf16 %v2563_v58, %v2559_v57  ;;  %v2687_v4 = vcvt.s32.f32 %v1119_v59  ;;  %v2691_v5 = vcvt.s32.f32 %v1123_v60  ;;  %v923_v6 = vunpack.c.3.s8 %v519_v52 }
  0x42   : > { %4896 = vmatpush.bf16.msra.mxu0 %v4055_v62  ;;  %v4119_v9 = vpack.c.bf16 %v2627_v0, %v2623_v63  ;;  %v2487_v10 = vcvt.s32.f32 %v919_v1  ;;  %v983_v11 = vunpack.c.2.s8 %v535_v61  ;;  %v987_v12 = vunpack.c.3.s8 %v535_v61 }
  0x43   : > { %4909 = vmatpush.bf16.msra.mxu1 %v4087_v3  ;;  %v4151_v13 = vpack.c.bf16 %v2691_v5, %v2687_v4  ;;  %v2491_v14 = vcvt.s32.f32 %v923_v6  ;;  %v1047_v15 = vunpack.c.2.s8 %v551_v2  ;;  %v1051_v16 = vunpack.c.3.s8 %v551_v2 }
  0x44   : > { %4922 = vmatpush.bf16.msra.mxu2 %v4119_v9  ;;  %v2551_v17 = vcvt.s32.f32 %v983_v11  ;;  %v2555_v18 = vcvt.s32.f32 %v987_v12  ;;  %v1111_v19 = vunpack.c.2.s8 %v567_v7  ;;  %v1115_v20 = vunpack.c.3.s8 %v567_v7  ;;  %v7911_v57 = vld [vmem:[#allocation1] sm:$0xff]  ;;  %v7913_v62 = vld [vmem:[#allocation1 + $0x9] sm:$0xff]  ;;  %v7915_v3 = vld [vmem:[#allocation1 + $0x12] sm:$0xff] }
  0x45   : > { %4935 = vmatpush.bf16.msra.mxu3 %v4151_v13  ;;  %v4051_v21 = vpack.c.bf16 %v2491_v14, %v2487_v10  ;;  %v2615_v22 = vcvt.s32.f32 %v1047_v15  ;;  %v2619_v23 = vcvt.s32.f32 %v1051_v16  ;;  %v911_v24 = vunpack.c.0.s8 %v519_v52  ;;  %v7918_v8 = vld [vmem:[#allocation1 + $0x1b] sm:$0xff] }
  0x46   : > { %v4083_v25 = vpack.c.bf16 %v2555_v18, %v2551_v17  ;;  %v2679_v26 = vcvt.s32.f32 %v1111_v19  ;;  %v2683_v27 = vcvt.s32.f32 %v1115_v20  ;;  %v915_v28 = vunpack.c.1.s8 %v519_v52  ;;  %v643_v52 = vld [vmem:[%s7886_s14 + $0x3e0] sm:$0xff] }
  0x47   : > { %4897 = vmatpush.bf16.msra.mxu0 %v4051_v21  ;;  %v4115_v29 = vpack.c.bf16 %v2619_v23, %v2615_v22  ;;  %v2479_v30 = vcvt.s32.f32 %v911_v24  ;;  %v975_v31 = vunpack.c.0.s8 %v535_v61  ;;  %v979_v32 = vunpack.c.1.s8 %v535_v61  ;;  %v591_v17 = vld [vmem:[%s7886_s14 + $0x240] sm:$0xff] }
  0x48   : > { %4910 = vmatpush.bf16.msra.mxu1 %v4083_v25  ;;  %v4147_v34 = vpack.c.bf16 %v2683_v27, %v2679_v26  ;;  %v2483_v35 = vcvt.s32.f32 %v915_v28  ;;  %v1039_v36 = vunpack.c.0.s8 %v551_v2  ;;  %v1043_v37 = vunpack.c.1.s8 %v551_v2  ;;  %v607_v26 = vld [vmem:[%s7886_s14 + $0x2c0] sm:$0xff] }
  0x49   : > { %4923 = vmatpush.bf16.msra.mxu2 %v4115_v29  ;;  %v2543_v38 = vcvt.s32.f32 %v975_v31  ;;  %v2547_v39 = vcvt.s32.f32 %v979_v32  ;;  %v1103_v40 = vunpack.c.0.s8 %v567_v7  ;;  %v1107_v41 = vunpack.c.1.s8 %v567_v7  ;;  %v623_v31 = vld [vmem:[%s7886_s14 + $0x340] sm:$0xff] }
  0x4a   : > { %4936 = vmatpush.bf16.msra.mxu3 %v4147_v34  ;;  %v4047_v43 = vpack.c.bf16 %v2483_v35, %v2479_v30  ;;  %v2607_v44 = vcvt.s32.f32 %v1039_v36  ;;  %v2611_v45 = vcvt.s32.f32 %v1043_v37  ;;  %v1223_v46 = vunpack.c.2.s8 %v595_v33  ;;  %v639_v36 = vld [vmem:[%s7886_s14 + $0x3c0] sm:$0xff] }
  0x4b   : > { %v4079_v48 = vpack.c.bf16 %v2547_v39, %v2543_v38  ;;  %v2671_v49 = vcvt.s32.f32 %v1103_v40  ;;  %v2675_v50 = vcvt.s32.f32 %v1107_v41  ;;  %v1227_v51 = vunpack.c.3.s8 %v595_v33 }
  0x4c   : > { %4898 = vmatpush.bf16.msra.mxu0 %v4047_v43  ;;  %v4111_v53 = vpack.c.bf16 %v2611_v45, %v2607_v44  ;;  %v2791_v54 = vcvt.s32.f32 %v1223_v46  ;;  %v1287_v55 = vunpack.c.2.s8 %v611_v42  ;;  %v1291_v56 = vunpack.c.3.s8 %v611_v42 }
  0x4d   : > { %4911 = vmatpush.bf16.msra.mxu1 %v4079_v48  ;;  %v4143_v58 = vpack.c.bf16 %v2675_v50, %v2671_v49  ;;  %v2795_v59 = vcvt.s32.f32 %v1227_v51  ;;  %v1351_v60 = vunpack.c.2.s8 %v627_v47  ;;  %v1355_v61 = vunpack.c.3.s8 %v627_v47 }
  0x4e   : > { %4924 = vmatpush.bf16.msra.mxu2 %v4111_v53  ;;  %v2855_v63 = vcvt.s32.f32 %v1287_v55  ;;  %v2859_v0 = vcvt.s32.f32 %v1291_v56  ;;  %v1415_v1 = vunpack.c.2.s8 %v643_v52  ;;  %v1419_v2 = vunpack.c.3.s8 %v643_v52 }
  0x4f   : > { %4937 = vmatpush.bf16.msra.mxu3 %v4143_v58  ;;  %v4203_v4 = vpack.c.bf16 %v2795_v59, %v2791_v54  ;;  %v2919_v5 = vcvt.s32.f32 %v1351_v60  ;;  %v2923_v6 = vcvt.s32.f32 %v1355_v61  ;;  %v1215_v7 = vunpack.c.0.s8 %v595_v33  ;;  %4899 = vmatmul.bf16.vlgmr.msra.gmra.mxu0 %v7911_v57 }
  0x50   : > { %v4235_v9 = vpack.c.bf16 %v2859_v0, %v2855_v63  ;;  %v2983_v10 = vcvt.s32.f32 %v1415_v1  ;;  %v2987_v11 = vcvt.s32.f32 %v1419_v2  ;;  %v1219_v12 = vunpack.c.1.s8 %v595_v33  ;;  %4912 = vmatmul.bf16.vlgmr.msra.gmra.mxu1 %v7913_v62  ;;  %v587_v63 = vld [vmem:[%s7886_s14 + $0x220] sm:$0xff] }
  0x51   : > { %4943 = vmatpush.bf16.msrb.mxu0 %v4203_v4  ;;  %v4267_v13 = vpack.c.bf16 %v2923_v6, %v2919_v5  ;;  %v2783_v14 = vcvt.s32.f32 %v1215_v7  ;;  %v1279_v15 = vunpack.c.0.s8 %v611_v42  ;;  %v1283_v16 = vunpack.c.1.s8 %v611_v42  ;;  %4925 = vmatmul.bf16.vlgmr.msra.gmra.mxu2 %v7915_v3 }
  0x52   : > { %4956 = vmatpush.bf16.msrb.mxu1 %v4235_v9  ;;  %v4299_v18 = vpack.c.bf16 %v2987_v11, %v2983_v10  ;;  %v2787_v19 = vcvt.s32.f32 %v1219_v12  ;;  %v1343_v20 = vunpack.c.0.s8 %v627_v47  ;;  %v1347_v21 = vunpack.c.1.s8 %v627_v47  ;;  %4938 = vmatmul.bf16.vlgmr.msra.gmra.mxu3 %v7918_v8  ;;  %v603_v10 = vld [vmem:[%s7886_s14 + $0x2a0] sm:$0xff] }
  0x53   : > { %4969 = vmatpush.bf16.msrb.mxu2 %v4267_v13  ;;  %v2847_v22 = vcvt.s32.f32 %v1279_v15  ;;  %v2851_v23 = vcvt.s32.f32 %v1283_v16  ;;  %v1407_v24 = vunpack.c.0.s8 %v643_v52  ;;  %v1411_v25 = vunpack.c.1.s8 %v643_v52  ;;  %v619_v15 = vld [vmem:[%s7886_s14 + $0x320] sm:$0xff] }
  0x54   : > { %4982 = vmatpush.bf16.msrb.mxu3 %v4299_v18  ;;  %v4199_v27 = vpack.c.bf16 %v2787_v19, %v2783_v14  ;;  %v2911_v28 = vcvt.s32.f32 %v1343_v20  ;;  %v2915_v29 = vcvt.s32.f32 %v1347_v21  ;;  %v1207_v30 = vunpack.c.2.s8 %v591_v17  ;;  %v635_v20 = vld [vmem:[%s7886_s14 + $0x3a0] sm:$0xff] }
  0x55   : > { %v4231_v32 = vpack.c.bf16 %v2851_v23, %v2847_v22  ;;  %v2975_v33 = vcvt.s32.f32 %v1407_v24  ;;  %v2979_v34 = vcvt.s32.f32 %v1411_v25  ;;  %v1211_v35 = vunpack.c.3.s8 %v591_v17 }
  0x56   : > { %4944 = vmatpush.bf16.msrb.mxu0 %v4199_v27  ;;  %v4263_v37 = vpack.c.bf16 %v2915_v29, %v2911_v28  ;;  %v2775_v38 = vcvt.s32.f32 %v1207_v30  ;;  %v1271_v39 = vunpack.c.2.s8 %v607_v26  ;;  %v1275_v40 = vunpack.c.3.s8 %v607_v26  ;;  %v7931_v29 = vld [vmem:[#allocation1 + $0x36] sm:$0xff]  ;;  %v516_v30 = vld [vmem:[%s9414_s0 + $0x8] sm:$0xff] }
  0x57   : > { %4957 = vmatpush.bf16.msrb.mxu1 %v4231_v32  ;;  %v4295_v41 = vpack.c.bf16 %v2979_v34, %v2975_v33  ;;  %v2779_v42 = vcvt.s32.f32 %v1211_v35  ;;  %v1335_v43 = vunpack.c.2.s8 %v623_v31  ;;  %v1339_v44 = vunpack.c.3.s8 %v623_v31  ;;  %v7936_v35 = vld [vmem:[#allocation1 + $0x24] sm:$0xff] }
  0x58   : > { %4970 = vmatpush.bf16.msrb.mxu2 %v4263_v37  ;;  %v2839_v45 = vcvt.s32.f32 %v1271_v39  ;;  %v2843_v46 = vcvt.s32.f32 %v1275_v40  ;;  %v1399_v47 = vunpack.c.2.s8 %v639_v36  ;;  %v1403_v48 = vunpack.c.3.s8 %v639_v36  ;;  %v7940_v37 = vld [vmem:[#allocation1 + $0x2d] sm:$0xff] }
  0x59   : > { %4983 = vmatpush.bf16.msrb.mxu3 %v4295_v41  ;;  %v4195_v49 = vpack.c.bf16 %v2779_v42, %v2775_v38  ;;  %v2903_v50 = vcvt.s32.f32 %v1335_v43  ;;  %v2907_v51 = vcvt.s32.f32 %v1339_v44  ;;  %v1199_v52 = vunpack.c.0.s8 %v591_v17 }
  0x5a   : > { %v4227_v53 = vpack.c.bf16 %v2843_v46, %v2839_v45  ;;  %v2967_v54 = vcvt.s32.f32 %v1399_v47  ;;  %v2971_v55 = vcvt.s32.f32 %v1403_v48  ;;  %v1203_v56 = vunpack.c.1.s8 %v591_v17 }
  0x5b   : > { %4945 = vmatpush.bf16.msrb.mxu0 %v4195_v49  ;;  %v4259_v58 = vpack.c.bf16 %v2907_v51, %v2903_v50  ;;  %v2767_v59 = vcvt.s32.f32 %v1199_v52  ;;  %v1263_v60 = vunpack.c.0.s8 %v607_v26  ;;  %v1267_v61 = vunpack.c.1.s8 %v607_v26  ;;  %v583_v50 = vld [vmem:[%s7886_s14 + $0x200] sm:$0xff] }
  0x5c   : > { %4958 = vmatpush.bf16.msrb.mxu1 %v4227_v53  ;;  %v4291_v0 = vpack.c.bf16 %v2971_v55, %v2967_v54  ;;  %v2771_v1 = vcvt.s32.f32 %v1203_v56  ;;  %v1327_v2 = vunpack.c.0.s8 %v623_v31  ;;  %v1331_v4 = vunpack.c.1.s8 %v623_v31 }
  0x5d   : > { %4971 = vmatpush.bf16.msrb.mxu2 %v4259_v58  ;;  %v2831_v5 = vcvt.s32.f32 %v1263_v60  ;;  %v2835_v6 = vcvt.s32.f32 %v1267_v61  ;;  %v1391_v7 = vunpack.c.0.s8 %v639_v36  ;;  %v1395_v9 = vunpack.c.1.s8 %v639_v36  ;;  %v7938_v36 = vld [vmem:[#allocation1 + $0x3f] sm:$0xff] }
  0x5e   : > { %4984 = vmatpush.bf16.msrb.mxu3 %v4291_v0  ;;  %v4191_v11 = vpack.c.bf16 %v2771_v1, %v2767_v59  ;;  %v2895_v12 = vcvt.s32.f32 %v1327_v2  ;;  %v2899_v13 = vcvt.s32.f32 %v1331_v4  ;;  %v1191_v14 = vunpack.c.2.s8 %v587_v63  ;;  %4842 = vst [vmem:[#allocation1] ss:$9 sm:$0xff] %v516_v30  ;;  %v599_v60 = vld [vmem:[%s7886_s14 + $0x280] sm:$0xff] }
  0x5f   : > { %v4223_v16 = vpack.c.bf16 %v2835_v6, %v2831_v5  ;;  %v2959_v17 = vcvt.s32.f32 %v1391_v7  ;;  %v2963_v18 = vcvt.s32.f32 %v1395_v9  ;;  %v1195_v19 = vunpack.c.3.s8 %v587_v63  ;;  %v615_v2 = vld [vmem:[%s7886_s14 + $0x300] sm:$0xff] }
  0x60   : > { %4946 = vmatpush.bf16.msrb.mxu0 %v4191_v11  ;;  %v4255_v21 = vpack.c.bf16 %v2899_v13, %v2895_v12  ;;  %v2759_v22 = vcvt.s32.f32 %v1191_v14  ;;  %v1255_v23 = vunpack.c.2.s8 %v603_v10  ;;  %v1259_v24 = vunpack.c.3.s8 %v603_v10  ;;  %v631_v9 = vld [vmem:[%s7886_s14 + $0x380] sm:$0xff] }
  0x61   : > { %4959 = vmatpush.bf16.msrb.mxu1 %v4223_v16  ;;  %v4287_v25 = vpack.c.bf16 %v2963_v18, %v2959_v17  ;;  %v2763_v26 = vcvt.s32.f32 %v1195_v19  ;;  %v1319_v27 = vunpack.c.2.s8 %v619_v15  ;;  %v1323_v28 = vunpack.c.3.s8 %v619_v15 }
  0x62   : > { %4972 = vmatpush.bf16.msrb.mxu2 %v4255_v21  ;;  %v2823_v31 = vcvt.s32.f32 %v1255_v23  ;;  %v2827_v32 = vcvt.s32.f32 %v1259_v24  ;;  %v1383_v33 = vunpack.c.2.s8 %v635_v20  ;;  %v1387_v34 = vunpack.c.3.s8 %v635_v20 }
  0x63   : > { %4985 = vmatpush.bf16.msrb.mxu3 %v4287_v25  ;;  %v4187_v38 = vpack.c.bf16 %v2763_v26, %v2759_v22  ;;  %v2887_v39 = vcvt.s32.f32 %v1319_v27  ;;  %v2891_v40 = vcvt.s32.f32 %v1323_v28  ;;  %v1183_v41 = vunpack.c.0.s8 %v587_v63 }
  0x64   : > { %v4219_v42 = vpack.c.bf16 %v2827_v32, %v2823_v31  ;;  %v2951_v43 = vcvt.s32.f32 %v1383_v33  ;;  %v2955_v44 = vcvt.s32.f32 %v1387_v34  ;;  %v1187_v45 = vunpack.c.1.s8 %v587_v63 }
  0x65   : > { %4947 = vmatpush.bf16.msrb.mxu0 %v4187_v38  ;;  %v4251_v46 = vpack.c.bf16 %v2891_v40, %v2887_v39  ;;  %v2751_v47 = vcvt.s32.f32 %v1183_v41  ;;  %v1247_v48 = vunpack.c.0.s8 %v603_v10  ;;  %v1251_v49 = vunpack.c.1.s8 %v603_v10  ;;  %v659_v38 = vld [vmem:[%s7886_s14 + $0x460] sm:$0xff] }
  0x66   : > { %4960 = vmatpush.bf16.msrb.mxu1 %v4219_v42  ;;  %v4283_v51 = vpack.c.bf16 %v2955_v44, %v2951_v43  ;;  %v2755_v52 = vcvt.s32.f32 %v1187_v45  ;;  %v1311_v53 = vunpack.c.0.s8 %v619_v15  ;;  %v1315_v54 = vunpack.c.1.s8 %v619_v15 }
  0x67   : > { %4973 = vmatpush.bf16.msrb.mxu2 %v4251_v46  ;;  %v2815_v55 = vcvt.s32.f32 %v1247_v48  ;;  %v2819_v56 = vcvt.s32.f32 %v1251_v49  ;;  %v1375_v58 = vunpack.c.0.s8 %v635_v20  ;;  %v1379_v59 = vunpack.c.1.s8 %v635_v20 }
  0x68   : > { %4986 = vmatpush.bf16.msrb.mxu3 %v4283_v51  ;;  %v4183_v61 = vpack.c.bf16 %v2755_v52, %v2751_v47  ;;  %v2879_v63 = vcvt.s32.f32 %v1311_v53  ;;  %v2883_v0 = vcvt.s32.f32 %v1315_v54  ;;  %v1175_v1 = vunpack.c.2.s8 %v583_v50  ;;  %v675_v47 = vld [vmem:[%s7886_s14 + $0x4e0] sm:$0xff] }
  0x69   : > { %v4215_v4 = vpack.c.bf16 %v2819_v56, %v2815_v55  ;;  %v2943_v5 = vcvt.s32.f32 %v1375_v58  ;;  %v2947_v6 = vcvt.s32.f32 %v1379_v59  ;;  %v1179_v7 = vunpack.c.3.s8 %v583_v50  ;;  %v691_v52 = vld [vmem:[%s7886_s14 + $0x560] sm:$0xff] }
  0x6a   : > { %4948 = vmatpush.bf16.msrb.mxu0 %v4183_v61  ;;  %v4247_v10 = vpack.c.bf16 %v2883_v0, %v2879_v63  ;;  %v2743_v11 = vcvt.s32.f32 %v1175_v1  ;;  %v1239_v12 = vunpack.c.2.s8 %v599_v60  ;;  %v1243_v13 = vunpack.c.3.s8 %v599_v60  ;;  %v707_v58 = vld [vmem:[%s7886_s14 + $0x5e0] sm:$0xff] }
  0x6b   : > { %4961 = vmatpush.bf16.msrb.mxu1 %v4215_v4  ;;  %v4279_v14 = vpack.c.bf16 %v2947_v6, %v2943_v5  ;;  %v2747_v15 = vcvt.s32.f32 %v1179_v7  ;;  %v1303_v16 = vunpack.c.2.s8 %v615_v2  ;;  %v1307_v17 = vunpack.c.3.s8 %v615_v2 }
  0x6c   : > { %4974 = vmatpush.bf16.msrb.mxu2 %v4247_v10  ;;  %v2807_v18 = vcvt.s32.f32 %v1239_v12  ;;  %v2811_v19 = vcvt.s32.f32 %v1243_v13  ;;  %v1367_v20 = vunpack.c.2.s8 %v631_v9  ;;  %v1371_v21 = vunpack.c.3.s8 %v631_v9 }
  0x6d   : > { %4987 = vmatpush.bf16.msrb.mxu3 %v4279_v14  ;;  %v4179_v22 = vpack.c.bf16 %v2747_v15, %v2743_v11  ;;  %v2871_v23 = vcvt.s32.f32 %v1303_v16  ;;  %v2875_v24 = vcvt.s32.f32 %v1307_v17  ;;  %v1167_v25 = vunpack.c.0.s8 %v583_v50 }
  0x6e   : > { %v4211_v26 = vpack.c.bf16 %v2811_v19, %v2807_v18  ;;  %v2935_v27 = vcvt.s32.f32 %v1367_v20  ;;  %v2939_v28 = vcvt.s32.f32 %v1371_v21  ;;  %v1171_v30 = vunpack.c.1.s8 %v583_v50 }
  0x6f   : > { %4949 = vmatpush.bf16.msrb.mxu0 %v4179_v22  ;;  %v4243_v31 = vpack.c.bf16 %v2875_v24, %v2871_v23  ;;  %v2735_v32 = vcvt.s32.f32 %v1167_v25  ;;  %v1231_v33 = vunpack.c.0.s8 %v599_v60  ;;  %v1235_v34 = vunpack.c.1.s8 %v599_v60  ;;  %v655_v22 = vld [vmem:[%s7886_s14 + $0x440] sm:$0xff] }
  0x70   : > { %4962 = vmatpush.bf16.msrb.mxu1 %v4211_v26  ;;  %v4275_v39 = vpack.c.bf16 %v2939_v28, %v2935_v27  ;;  %v2739_v40 = vcvt.s32.f32 %v1171_v30  ;;  %v1295_v41 = vunpack.c.0.s8 %v615_v2  ;;  %v1299_v42 = vunpack.c.1.s8 %v615_v2 }
  0x71   : > { %4975 = vmatpush.bf16.msrb.mxu2 %v4243_v31  ;;  %v2799_v43 = vcvt.s32.f32 %v1231_v33  ;;  %v2803_v44 = vcvt.s32.f32 %v1235_v34  ;;  %v1359_v45 = vunpack.c.0.s8 %v631_v9  ;;  %v1363_v46 = vunpack.c.1.s8 %v631_v9 }
  0x72   : > { %4988 = vmatpush.bf16.msrb.mxu3 %v4275_v39  ;;  %v4175_v48 = vpack.c.bf16 %v2739_v40, %v2735_v32  ;;  %v2863_v49 = vcvt.s32.f32 %v1295_v41  ;;  %v2867_v50 = vcvt.s32.f32 %v1299_v42  ;;  %v1479_v51 = vunpack.c.2.s8 %v659_v38  ;;  %v671_v32 = vld [vmem:[%s7886_s14 + $0x4c0] sm:$0xff] }
  0x73   : > { %v4207_v53 = vpack.c.bf16 %v2803_v44, %v2799_v43  ;;  %v2927_v54 = vcvt.s32.f32 %v1359_v45  ;;  %v2931_v55 = vcvt.s32.f32 %v1363_v46  ;;  %v1483_v56 = vunpack.c.3.s8 %v659_v38  ;;  %v687_v40 = vld [vmem:[%s7886_s14 + $0x540] sm:$0xff] }
  0x74   : > { %4950 = vmatpush.bf16.msrb.mxu0 %v4175_v48  ;;  %v4239_v59 = vpack.c.bf16 %v2867_v50, %v2863_v49  ;;  %v3047_v60 = vcvt.s32.f32 %v1479_v51  ;;  %v1543_v61 = vunpack.c.2.s8 %v675_v47  ;;  %v1547_v63 = vunpack.c.3.s8 %v675_v47  ;;  %v703_v45 = vld [vmem:[%s7886_s14 + $0x5c0] sm:$0xff] }
  0x75   : > { %4963 = vmatpush.bf16.msrb.mxu1 %v4207_v53  ;;  %v4271_v0 = vpack.c.bf16 %v2931_v55, %v2927_v54  ;;  %v3051_v1 = vcvt.s32.f32 %v1483_v56  ;;  %v1607_v2 = vunpack.c.2.s8 %v691_v52  ;;  %v1611_v4 = vunpack.c.3.s8 %v691_v52 }
  0x76   : > { %4976 = vmatpush.bf16.msrb.mxu2 %v4239_v59  ;;  %v3111_v5 = vcvt.s32.f32 %v1543_v61  ;;  %v3115_v6 = vcvt.s32.f32 %v1547_v63  ;;  %v1671_v7 = vunpack.c.2.s8 %v707_v58  ;;  %v1675_v9 = vunpack.c.3.s8 %v707_v58 }
  0x77   : > { %4989 = vmatpush.bf16.msrb.mxu3 %v4271_v0  ;;  %v4331_v10 = vpack.c.bf16 %v3051_v1, %v3047_v60  ;;  %v3175_v11 = vcvt.s32.f32 %v1607_v2  ;;  %v3179_v12 = vcvt.s32.f32 %v1611_v4  ;;  %v1471_v13 = vunpack.c.0.s8 %v659_v38  ;;  %4951 = vmatmul.bf16.vlgmr.msrb.gmra.mxu0 %v7936_v35 }
  0x78   : > { %v4363_v14 = vpack.c.bf16 %v3115_v6, %v3111_v5  ;;  %v3239_v15 = vcvt.s32.f32 %v1671_v7  ;;  %v3243_v16 = vcvt.s32.f32 %v1675_v9  ;;  %v1475_v17 = vunpack.c.1.s8 %v659_v38  ;;  %4964 = vmatmul.bf16.vlgmr.msrb.gmra.mxu1 %v7940_v37 }
  0x79   : > { %4995 = vmatpush.bf16.msra.mxu0 %v4331_v10  ;;  %v4395_v18 = vpack.c.bf16 %v3179_v12, %v3175_v11  ;;  %4977 = vmatmul.bf16.vlgmr.msrb.gmra.mxu2 %v7931_v29  ;;  %v3039_v19 = vcvt.s32.f32 %v1471_v13  ;;  %v1535_v20 = vunpack.c.0.s8 %v675_v47  ;;  %v1539_v21 = vunpack.c.1.s8 %v675_v47  ;;  %v651_v10 = vld [vmem:[%s7886_s14 + $0x420] sm:$0xff] }
  0x7a   : > { %5008 = vmatpush.bf16.msra.mxu1 %v4363_v14  ;;  %v4427_v23 = vpack.c.bf16 %v3243_v16, %v3239_v15  ;;  %v3043_v24 = vcvt.s32.f32 %v1475_v17  ;;  %v1599_v25 = vunpack.c.0.s8 %v691_v52  ;;  %v1603_v26 = vunpack.c.1.s8 %v691_v52  ;;  %4990 = vmatmul.bf16.vlgmr.msrb.gmra.mxu3 %v7938_v36 }
  0x7b   : > { %5021 = vmatpush.bf16.msra.mxu2 %v4395_v18  ;;  %v3103_v27 = vcvt.s32.f32 %v1535_v20  ;;  %v3107_v28 = vcvt.s32.f32 %v1539_v21  ;;  %v1663_v30 = vunpack.c.0.s8 %v707_v58  ;;  %v1667_v31 = vunpack.c.1.s8 %v707_v58 }
  0x7c   : > { %5034 = vmatpush.bf16.msra.mxu3 %v4427_v23  ;;  %v4327_v33 = vpack.c.bf16 %v3043_v24, %v3039_v19  ;;  %v3167_v34 = vcvt.s32.f32 %v1599_v25  ;;  %v3171_v38 = vcvt.s32.f32 %v1603_v26  ;;  %v1463_v39 = vunpack.c.2.s8 %v655_v22  ;;  %v667_v19 = vld [vmem:[%s7886_s14 + $0x4a0] sm:$0xff] }
  0x7d   : > { %v4359_v41 = vpack.c.bf16 %v3107_v28, %v3103_v27  ;;  %v3231_v42 = vcvt.s32.f32 %v1663_v30  ;;  %v3235_v43 = vcvt.s32.f32 %v1667_v31  ;;  %v1467_v44 = vunpack.c.3.s8 %v655_v22  ;;  %v683_v24 = vld [vmem:[%s7886_s14 + $0x520] sm:$0xff] }
  0x7e   : > { %4996 = vmatpush.bf16.msra.mxu0 %v4327_v33  ;;  %v4391_v46 = vpack.c.bf16 %v3171_v38, %v3167_v34  ;;  %v3031_v47 = vcvt.s32.f32 %v1463_v39  ;;  %v1527_v48 = vunpack.c.2.s8 %v671_v32  ;;  %v1531_v49 = vunpack.c.3.s8 %v671_v32  ;;  %v699_v30 = vld [vmem:[%s7886_s14 + $0x5a0] sm:$0xff] }
  0x7f   : > { %5009 = vmatpush.bf16.msra.mxu1 %v4359_v41  ;;  %v4423_v50 = vpack.c.bf16 %v3235_v43, %v3231_v42  ;;  %v3035_v51 = vcvt.s32.f32 %v1467_v44  ;;  %v1591_v52 = vunpack.c.2.s8 %v687_v40  ;;  %v1595_v53 = vunpack.c.3.s8 %v687_v40 }
  0x80   : > { %5022 = vmatpush.bf16.msra.mxu2 %v4391_v46  ;;  %v3095_v54 = vcvt.s32.f32 %v1527_v48  ;;  %v3099_v55 = vcvt.s32.f32 %v1531_v49  ;;  %v1655_v56 = vunpack.c.2.s8 %v703_v45  ;;  %v1659_v58 = vunpack.c.3.s8 %v703_v45 }
  0x81   : > { %5035 = vmatpush.bf16.msra.mxu3 %v4423_v50  ;;  %v4323_v59 = vpack.c.bf16 %v3035_v51, %v3031_v47  ;;  %v3159_v60 = vcvt.s32.f32 %v1591_v52  ;;  %v3163_v61 = vcvt.s32.f32 %v1595_v53  ;;  %v1455_v63 = vunpack.c.0.s8 %v655_v22 }
  0x82   : > { %v4355_v0 = vpack.c.bf16 %v3099_v55, %v3095_v54  ;;  %v3223_v1 = vcvt.s32.f32 %v1655_v56  ;;  %v3227_v2 = vcvt.s32.f32 %v1659_v58  ;;  %v1459_v4 = vunpack.c.1.s8 %v655_v22 }
  0x83   : > { %4997 = vmatpush.bf16.msra.mxu0 %v4323_v59  ;;  %v4387_v5 = vpack.c.bf16 %v3163_v61, %v3159_v60  ;;  %v3023_v6 = vcvt.s32.f32 %v1455_v63  ;;  %v1519_v7 = vunpack.c.0.s8 %v671_v32  ;;  %v1523_v9 = vunpack.c.1.s8 %v671_v32  ;;  %v647_v59 = vld [vmem:[%s7886_s14 + $0x400] sm:$0xff] }
  0x84   : > { %5010 = vmatpush.bf16.msra.mxu1 %v4355_v0  ;;  %v4419_v11 = vpack.c.bf16 %v3227_v2, %v3223_v1  ;;  %v3027_v12 = vcvt.s32.f32 %v1459_v4  ;;  %v1583_v13 = vunpack.c.0.s8 %v687_v40  ;;  %v1587_v14 = vunpack.c.1.s8 %v687_v40 }
  0x85   : > { %5023 = vmatpush.bf16.msra.mxu2 %v4387_v5  ;;  %v3087_v15 = vcvt.s32.f32 %v1519_v7  ;;  %v3091_v16 = vcvt.s32.f32 %v1523_v9  ;;  %v1647_v17 = vunpack.c.0.s8 %v703_v45  ;;  %v1651_v18 = vunpack.c.1.s8 %v703_v45 }
  0x86   : > { %5036 = vmatpush.bf16.msra.mxu3 %v4419_v11  ;;  %v4319_v20 = vpack.c.bf16 %v3027_v12, %v3023_v6  ;;  %v3151_v21 = vcvt.s32.f32 %v1583_v13  ;;  %v3155_v22 = vcvt.s32.f32 %v1587_v14  ;;  %v1447_v23 = vunpack.c.2.s8 %v651_v10  ;;  %v663_v6 = vld [vmem:[%s7886_s14 + $0x480] sm:$0xff] }
  0x87   : > { %v4351_v25 = vpack.c.bf16 %v3091_v16, %v3087_v15  ;;  %v3215_v26 = vcvt.s32.f32 %v1647_v17  ;;  %v3219_v27 = vcvt.s32.f32 %v1651_v18  ;;  %v1451_v28 = vunpack.c.3.s8 %v651_v10  ;;  %v679_v12 = vld [vmem:[%s7886_s14 + $0x500] sm:$0xff] }
  0x88   : > { %4998 = vmatpush.bf16.msra.mxu0 %v4319_v20  ;;  %v4383_v31 = vpack.c.bf16 %v3155_v22, %v3151_v21  ;;  %v3015_v32 = vcvt.s32.f32 %v1447_v23  ;;  %v1511_v33 = vunpack.c.2.s8 %v667_v19  ;;  %v1515_v34 = vunpack.c.3.s8 %v667_v19  ;;  %v695_v17 = vld [vmem:[%s7886_s14 + $0x580] sm:$0xff] }
  0x89   : > { %5011 = vmatpush.bf16.msra.mxu1 %v4351_v25  ;;  %v4415_v38 = vpack.c.bf16 %v3219_v27, %v3215_v26  ;;  %v3019_v39 = vcvt.s32.f32 %v1451_v28  ;;  %v1575_v40 = vunpack.c.2.s8 %v683_v24  ;;  %v1579_v41 = vunpack.c.3.s8 %v683_v24 }
  0x8a   : > { %5024 = vmatpush.bf16.msra.mxu2 %v4383_v31  ;;  %v3079_v42 = vcvt.s32.f32 %v1511_v33  ;;  %v3083_v43 = vcvt.s32.f32 %v1515_v34  ;;  %v1639_v44 = vunpack.c.2.s8 %v699_v30  ;;  %v1643_v45 = vunpack.c.3.s8 %v699_v30 }
  0x8b   : > { %5037 = vmatpush.bf16.msra.mxu3 %v4415_v38  ;;  %v4315_v46 = vpack.c.bf16 %v3019_v39, %v3015_v32  ;;  %v3143_v47 = vcvt.s32.f32 %v1575_v40  ;;  %v3147_v48 = vcvt.s32.f32 %v1579_v41  ;;  %v1439_v49 = vunpack.c.0.s8 %v651_v10 }
  0x8c   : > { %v4347_v50 = vpack.c.bf16 %v3083_v43, %v3079_v42  ;;  %v3207_v51 = vcvt.s32.f32 %v1639_v44  ;;  %v3211_v52 = vcvt.s32.f32 %v1643_v45  ;;  %v1443_v53 = vunpack.c.1.s8 %v651_v10 }
  0x8d   : > { %4999 = vmatpush.bf16.msra.mxu0 %v4315_v46  ;;  %v4379_v54 = vpack.c.bf16 %v3147_v48, %v3143_v47  ;;  %v3007_v55 = vcvt.s32.f32 %v1439_v49  ;;  %v1503_v56 = vunpack.c.0.s8 %v667_v19  ;;  %v1507_v58 = vunpack.c.1.s8 %v667_v19  ;;  %v7967_v46 = vld [vmem:[%s7886_s14 + $0x660] sm:$0xff] }
  0x8e   : > { %5012 = vmatpush.bf16.msra.mxu1 %v4347_v50  ;;  %v4411_v60 = vpack.c.bf16 %v3211_v52, %v3207_v51  ;;  %v3011_v61 = vcvt.s32.f32 %v1443_v53  ;;  %v1567_v63 = vunpack.c.0.s8 %v683_v24  ;;  %v1571_v0 = vunpack.c.1.s8 %v683_v24 }
  0x8f   : > { %5025 = vmatpush.bf16.msra.mxu2 %v4379_v54  ;;  %v3071_v1 = vcvt.s32.f32 %v1503_v56  ;;  %v3075_v2 = vcvt.s32.f32 %v1507_v58  ;;  %v1631_v4 = vunpack.c.0.s8 %v699_v30  ;;  %v1635_v5 = vunpack.c.1.s8 %v699_v30 }
  0x90   : > { %5038 = vmatpush.bf16.msra.mxu3 %v4411_v60  ;;  %v4311_v7 = vpack.c.bf16 %v3011_v61, %v3007_v55  ;;  %v3135_v9 = vcvt.s32.f32 %v1567_v63  ;;  %v3139_v10 = vcvt.s32.f32 %v1571_v0  ;;  %v1431_v11 = vunpack.c.2.s8 %v647_v59  ;;  %v739_v55 = vld [vmem:[%s7886_s14 + $0x6e0] sm:$0xff] }
  0x91   : > { %v4343_v13 = vpack.c.bf16 %v3075_v2, %v3071_v1  ;;  %v3199_v14 = vcvt.s32.f32 %v1631_v4  ;;  %v3203_v15 = vcvt.s32.f32 %v1635_v5  ;;  %v1435_v16 = vunpack.c.3.s8 %v647_v59  ;;  %v755_v61 = vld [vmem:[%s7886_s14 + $0x760] sm:$0xff] }
  0x92   : > { %5000 = vmatpush.bf16.msra.mxu0 %v4311_v7  ;;  %v4375_v18 = vpack.c.bf16 %v3139_v10, %v3135_v9  ;;  %v2999_v19 = vcvt.s32.f32 %v1431_v11  ;;  %v1495_v20 = vunpack.c.2.s8 %v663_v6  ;;  %v1499_v21 = vunpack.c.3.s8 %v663_v6  ;;  %v771_v4 = vld [vmem:[%s7886_s14 + $0x7e0] sm:$0xff] }
  0x93   : > { %5013 = vmatpush.bf16.msra.mxu1 %v4343_v13  ;;  %v4407_v22 = vpack.c.bf16 %v3203_v15, %v3199_v14  ;;  %v3003_v23 = vcvt.s32.f32 %v1435_v16  ;;  %v1559_v24 = vunpack.c.2.s8 %v679_v12  ;;  %v1563_v25 = vunpack.c.3.s8 %v679_v12  ;;  %v7974_v10 = vld [vmem:[#allocation1] sm:$0xff]  ;;  %v7976_v15 = vld [vmem:[#allocation1 + $0x9] sm:$0xff] }
  0x94   : > { %5026 = vmatpush.bf16.msra.mxu2 %v4375_v18  ;;  %v3063_v26 = vcvt.s32.f32 %v1495_v20  ;;  %v3067_v27 = vcvt.s32.f32 %v1499_v21  ;;  %v1623_v28 = vunpack.c.2.s8 %v695_v17  ;;  %v1627_v30 = vunpack.c.3.s8 %v695_v17  ;;  %v7978_v20 = vld [vmem:[#allocation1 + $0x12] sm:$0xff] }
  0x95   : > { %5039 = vmatpush.bf16.msra.mxu3 %v4407_v22  ;;  %v4307_v31 = vpack.c.bf16 %v3003_v23, %v2999_v19  ;;  %v3127_v32 = vcvt.s32.f32 %v1559_v24  ;;  %v3131_v33 = vcvt.s32.f32 %v1563_v25  ;;  %v1423_v34 = vunpack.c.0.s8 %v647_v59  ;;  %v7981_v24 = vld [vmem:[#allocation1 + $0x1b] sm:$0xff] }
  0x96   : > { %v4339_v38 = vpack.c.bf16 %v3067_v27, %v3063_v26  ;;  %v3191_v39 = vcvt.s32.f32 %v1623_v28  ;;  %v3195_v40 = vcvt.s32.f32 %v1627_v30  ;;  %v1427_v41 = vunpack.c.1.s8 %v647_v59 }
  0x97   : > { %5001 = vmatpush.bf16.msra.mxu0 %v4307_v31  ;;  %v4371_v42 = vpack.c.bf16 %v3131_v33, %v3127_v32  ;;  %v2991_v43 = vcvt.s32.f32 %v1423_v34  ;;  %v1487_v44 = vunpack.c.0.s8 %v663_v6  ;;  %v1491_v45 = vunpack.c.1.s8 %v663_v6 }
  0x98   : > { %5014 = vmatpush.bf16.msra.mxu1 %v4339_v38  ;;  %v4403_v47 = vpack.c.bf16 %v3195_v40, %v3191_v39  ;;  %v2995_v48 = vcvt.s32.f32 %v1427_v41  ;;  %v1551_v49 = vunpack.c.0.s8 %v679_v12  ;;  %v1555_v50 = vunpack.c.1.s8 %v679_v12  ;;  %v719_v38 = vld [vmem:[%s7886_s14 + $0x640] sm:$0xff] }
  0x99   : > { %5027 = vmatpush.bf16.msra.mxu2 %v4371_v42  ;;  %v3055_v51 = vcvt.s32.f32 %v1487_v44  ;;  %v3059_v52 = vcvt.s32.f32 %v1491_v45  ;;  %v1615_v53 = vunpack.c.0.s8 %v695_v17  ;;  %v1619_v54 = vunpack.c.1.s8 %v695_v17 }
  0x9a   : > { %5040 = vmatpush.bf16.msra.mxu3 %v4403_v47  ;;  %v4303_v56 = vpack.c.bf16 %v2995_v48, %v2991_v43  ;;  %v3119_v58 = vcvt.s32.f32 %v1551_v49  ;;  %v3123_v59 = vcvt.s32.f32 %v1555_v50  ;;  %v1735_v60 = vunpack.c.2.s8 %v7967_v46  ;;  %v735_v47 = vld [vmem:[%s7886_s14 + $0x6c0] sm:$0xff] }
  0x9b   : > { %v4335_v63 = vpack.c.bf16 %v3059_v52, %v3055_v51  ;;  %v3183_v0 = vcvt.s32.f32 %v1615_v53  ;;  %v3187_v1 = vcvt.s32.f32 %v1619_v54  ;;  %v1739_v2 = vunpack.c.3.s8 %v7967_v46  ;;  %v751_v52 = vld [vmem:[%s7886_s14 + $0x740] sm:$0xff] }
  0x9c   : > { %5002 = vmatpush.bf16.msra.mxu0 %v4303_v56  ;;  %v4367_v5 = vpack.c.bf16 %v3123_v59, %v3119_v58  ;;  %v3303_v6 = vcvt.s32.f32 %v1735_v60  ;;  %v1799_v7 = vunpack.c.2.s8 %v739_v55  ;;  %v1803_v9 = vunpack.c.3.s8 %v739_v55  ;;  %v767_v58 = vld [vmem:[%s7886_s14 + $0x7c0] sm:$0xff] }
  0x9d   : > { %5015 = vmatpush.bf16.msra.mxu1 %v4335_v63  ;;  %v4399_v11 = vpack.c.bf16 %v3187_v1, %v3183_v0  ;;  %v3307_v12 = vcvt.s32.f32 %v1739_v2  ;;  %v1863_v13 = vunpack.c.2.s8 %v755_v61  ;;  %v1867_v14 = vunpack.c.3.s8 %v755_v61 }
  0x9e   : > { %5028 = vmatpush.bf16.msra.mxu2 %v4367_v5  ;;  %v3367_v16 = vcvt.s32.f32 %v1799_v7  ;;  %v3371_v17 = vcvt.s32.f32 %v1803_v9  ;;  %v1927_v18 = vunpack.c.2.s8 %v771_v4  ;;  %v1931_v19 = vunpack.c.3.s8 %v771_v4 }
  0x9f   : > { %5041 = vmatpush.bf16.msra.mxu3 %v4399_v11  ;;  %v4459_v21 = vpack.c.bf16 %v3307_v12, %v3303_v6  ;;  %v3431_v22 = vcvt.s32.f32 %v1863_v13  ;;  %v3435_v23 = vcvt.s32.f32 %v1867_v14  ;;  %5003 = vmatmul.bf16.vlgmr.msra.gmra.mxu0 %v7974_v10  ;;  %v1727_v25 = vunpack.c.0.s8 %v7967_v46 }
  0xa0   : > { %v4491_v26 = vpack.c.bf16 %v3371_v17, %v3367_v16  ;;  %v3495_v27 = vcvt.s32.f32 %v1927_v18  ;;  %v3499_v28 = vcvt.s32.f32 %v1931_v19  ;;  %5016 = vmatmul.bf16.vlgmr.msra.gmra.mxu1 %v7976_v15  ;;  %v1731_v30 = vunpack.c.1.s8 %v7967_v46 }
  0xa1   : > { %5047 = vmatpush.bf16.msrb.mxu0 %v4459_v21  ;;  %v4523_v31 = vpack.c.bf16 %v3435_v23, %v3431_v22  ;;  %5029 = vmatmul.bf16.vlgmr.msra.gmra.mxu2 %v7978_v20  ;;  %v3295_v32 = vcvt.s32.f32 %v1727_v25  ;;  %v1791_v33 = vunpack.c.0.s8 %v739_v55  ;;  %v1795_v34 = vunpack.c.1.s8 %v739_v55 }
  0xa2   : > { %5060 = vmatpush.bf16.msrb.mxu1 %v4491_v26  ;;  %v4555_v39 = vpack.c.bf16 %v3499_v28, %v3495_v27  ;;  %5042 = vmatmul.bf16.vlgmr.msra.gmra.mxu3 %v7981_v24  ;;  %v3299_v40 = vcvt.s32.f32 %v1731_v30  ;;  %v1855_v41 = vunpack.c.0.s8 %v755_v61  ;;  %v1859_v42 = vunpack.c.1.s8 %v755_v61  ;;  %v715_v26 = vld [vmem:[%s7886_s14 + $0x620] sm:$0xff] }
  0xa3   : > { %5073 = vmatpush.bf16.msrb.mxu2 %v4523_v31  ;;  %v3359_v43 = vcvt.s32.f32 %v1791_v33  ;;  %v3363_v44 = vcvt.s32.f32 %v1795_v34  ;;  %v1919_v45 = vunpack.c.0.s8 %v771_v4  ;;  %v1923_v46 = vunpack.c.1.s8 %v771_v4 }
  0xa4   : > { %5086 = vmatpush.bf16.msrb.mxu3 %v4555_v39  ;;  %v4455_v48 = vpack.c.bf16 %v3299_v40, %v3295_v32  ;;  %v3423_v49 = vcvt.s32.f32 %v1855_v41  ;;  %v3427_v50 = vcvt.s32.f32 %v1859_v42  ;;  %v1719_v51 = vunpack.c.2.s8 %v719_v38 }
  0xa5   : > { %v4487_v53 = vpack.c.bf16 %v3363_v44, %v3359_v43  ;;  %v3487_v54 = vcvt.s32.f32 %v1919_v45  ;;  %v3491_v55 = vcvt.s32.f32 %v1923_v46  ;;  %v1723_v56 = vunpack.c.3.s8 %v719_v38  ;;  %v747_v44 = vld [vmem:[%s7886_s14 + $0x720] sm:$0xff] }
  0xa6   : > { %5048 = vmatpush.bf16.msrb.mxu0 %v4455_v48  ;;  %v4519_v59 = vpack.c.bf16 %v3427_v50, %v3423_v49  ;;  %v3287_v60 = vcvt.s32.f32 %v1719_v51  ;;  %v1783_v61 = vunpack.c.2.s8 %v735_v47  ;;  %v1787_v63 = vunpack.c.3.s8 %v735_v47  ;;  %v763_v49 = vld [vmem:[%s7886_s14 + $0x7a0] sm:$0xff] }
  0xa7   : > { %5061 = vmatpush.bf16.msrb.mxu1 %v4487_v53  ;;  %v4551_v0 = vpack.c.bf16 %v3491_v55, %v3487_v54  ;;  %v3291_v1 = vcvt.s32.f32 %v1723_v56  ;;  %v1847_v2 = vunpack.c.2.s8 %v751_v52  ;;  %v1851_v4 = vunpack.c.3.s8 %v751_v52 }
  0xa8   : > { %5074 = vmatpush.bf16.msrb.mxu2 %v4519_v59  ;;  %v3351_v5 = vcvt.s32.f32 %v1783_v61  ;;  %v3355_v6 = vcvt.s32.f32 %v1787_v63  ;;  %v1911_v7 = vunpack.c.2.s8 %v767_v58  ;;  %v1915_v9 = vunpack.c.3.s8 %v767_v58 }
  0xa9   : > { %5087 = vmatpush.bf16.msrb.mxu3 %v4551_v0  ;;  %v4451_v11 = vpack.c.bf16 %v3291_v1, %v3287_v60  ;;  %v3415_v12 = vcvt.s32.f32 %v1847_v2  ;;  %v3419_v13 = vcvt.s32.f32 %v1851_v4  ;;  %v1711_v14 = vunpack.c.0.s8 %v719_v38 }
  0xaa   : > { %v4483_v16 = vpack.c.bf16 %v3355_v6, %v3351_v5  ;;  %v3479_v17 = vcvt.s32.f32 %v1911_v7  ;;  %v3483_v18 = vcvt.s32.f32 %v1915_v9  ;;  %v1715_v19 = vunpack.c.1.s8 %v719_v38  ;;  %v731_v38 = vld [vmem:[%s7886_s14 + $0x6a0] sm:$0xff] }
  0xab   : > { %5049 = vmatpush.bf16.msrb.mxu0 %v4451_v11  ;;  %v4515_v21 = vpack.c.bf16 %v3419_v13, %v3415_v12  ;;  %v3279_v22 = vcvt.s32.f32 %v1711_v14  ;;  %v1775_v23 = vunpack.c.0.s8 %v735_v47  ;;  %v1779_v25 = vunpack.c.1.s8 %v735_v47 }
  0xac   : > { %5062 = vmatpush.bf16.msrb.mxu1 %v4483_v16  ;;  %v4547_v27 = vpack.c.bf16 %v3483_v18, %v3479_v17  ;;  %v3283_v28 = vcvt.s32.f32 %v1715_v19  ;;  %v1839_v30 = vunpack.c.0.s8 %v751_v52  ;;  %v1843_v31 = vunpack.c.1.s8 %v751_v52  ;;  %v711_v16 = vld [vmem:[%s7886_s14 + $0x600] sm:$0xff] }
  0xad   : > { %5075 = vmatpush.bf16.msrb.mxu2 %v4515_v21  ;;  %v3343_v32 = vcvt.s32.f32 %v1775_v23  ;;  %v3347_v33 = vcvt.s32.f32 %v1779_v25  ;;  %v1903_v34 = vunpack.c.0.s8 %v767_v58  ;;  %v1907_v39 = vunpack.c.1.s8 %v767_v58 }
  0xae   : > { %5088 = vmatpush.bf16.msrb.mxu3 %v4547_v27  ;;  %v4447_v40 = vpack.c.bf16 %v3283_v28, %v3279_v22  ;;  %v3407_v41 = vcvt.s32.f32 %v1839_v30  ;;  %v3411_v42 = vcvt.s32.f32 %v1843_v31  ;;  %v1703_v43 = vunpack.c.2.s8 %v715_v26 }
  0xaf   : > { %v4479_v45 = vpack.c.bf16 %v3347_v33, %v3343_v32  ;;  %v3471_v46 = vcvt.s32.f32 %v1903_v34  ;;  %v3475_v47 = vcvt.s32.f32 %v1907_v39  ;;  %v1707_v48 = vunpack.c.3.s8 %v715_v26  ;;  %v743_v33 = vld [vmem:[%s7886_s14 + $0x700] sm:$0xff] }
  0xb0   : > { %5050 = vmatpush.bf16.msrb.mxu0 %v4447_v40  ;;  %v4511_v50 = vpack.c.bf16 %v3411_v42, %v3407_v41  ;;  %v3271_v51 = vcvt.s32.f32 %v1703_v43  ;;  %v1767_v52 = vunpack.c.2.s8 %v731_v38  ;;  %v1771_v53 = vunpack.c.3.s8 %v731_v38  ;;  %v759_v41 = vld [vmem:[%s7886_s14 + $0x780] sm:$0xff] }
  0xb1   : > { %5063 = vmatpush.bf16.msrb.mxu1 %v4479_v45  ;;  %v4543_v54 = vpack.c.bf16 %v3475_v47, %v3471_v46  ;;  %v3275_v55 = vcvt.s32.f32 %v1707_v48  ;;  %v1831_v56 = vunpack.c.2.s8 %v747_v44  ;;  %v1835_v58 = vunpack.c.3.s8 %v747_v44 }
  0xb2   : > { %5076 = vmatpush.bf16.msrb.mxu2 %v4511_v50  ;;  %v3335_v59 = vcvt.s32.f32 %v1767_v52  ;;  %v3339_v60 = vcvt.s32.f32 %v1771_v53  ;;  %v1895_v61 = vunpack.c.2.s8 %v763_v49  ;;  %v1899_v63 = vunpack.c.3.s8 %v763_v49 }
  0xb3   : > { %5089 = vmatpush.bf16.msrb.mxu3 %v4543_v54  ;;  %v4443_v0 = vpack.c.bf16 %v3275_v55, %v3271_v51  ;;  %v3399_v1 = vcvt.s32.f32 %v1831_v56  ;;  %v3403_v2 = vcvt.s32.f32 %v1835_v58  ;;  %v1695_v4 = vunpack.c.0.s8 %v715_v26 }
  0xb4   : > { %v4475_v5 = vpack.c.bf16 %v3339_v60, %v3335_v59  ;;  %v3463_v6 = vcvt.s32.f32 %v1895_v61  ;;  %v3467_v7 = vcvt.s32.f32 %v1899_v63  ;;  %v1699_v9 = vunpack.c.1.s8 %v715_v26  ;;  %v727_v26 = vld [vmem:[%s7886_s14 + $0x680] sm:$0xff] }
  0xb5   : > { %5051 = vmatpush.bf16.msrb.mxu0 %v4443_v0  ;;  %v4507_v11 = vpack.c.bf16 %v3403_v2, %v3399_v1  ;;  %v3263_v12 = vcvt.s32.f32 %v1695_v4  ;;  %v1759_v13 = vunpack.c.0.s8 %v731_v38  ;;  %v1763_v14 = vunpack.c.1.s8 %v731_v38 }
  0xb6   : > { %5064 = vmatpush.bf16.msrb.mxu1 %v4475_v5  ;;  %v4539_v17 = vpack.c.bf16 %v3467_v7, %v3463_v6  ;;  %v3267_v18 = vcvt.s32.f32 %v1699_v9  ;;  %v1823_v19 = vunpack.c.0.s8 %v747_v44  ;;  %v1827_v21 = vunpack.c.1.s8 %v747_v44  ;;  %v8001_v5 = vld [vmem:[%s7886_s14 + $0x860] sm:$0xff] }
  0xb7   : > { %5077 = vmatpush.bf16.msrb.mxu2 %v4507_v11  ;;  %v3327_v22 = vcvt.s32.f32 %v1759_v13  ;;  %v3331_v23 = vcvt.s32.f32 %v1763_v14  ;;  %v1887_v25 = vunpack.c.0.s8 %v763_v49  ;;  %v1891_v27 = vunpack.c.1.s8 %v763_v49 }
  0xb8   : > { %5090 = vmatpush.bf16.msrb.mxu3 %v4539_v17  ;;  %v4439_v28 = vpack.c.bf16 %v3267_v18, %v3263_v12  ;;  %v3391_v30 = vcvt.s32.f32 %v1823_v19  ;;  %v3395_v31 = vcvt.s32.f32 %v1827_v21  ;;  %v1687_v32 = vunpack.c.2.s8 %v711_v16  ;;  %v803_v17 = vld [vmem:[%s7886_s14 + $0x8e0] sm:$0xff] }
  0xb9   : > { %v4471_v34 = vpack.c.bf16 %v3331_v23, %v3327_v22  ;;  %v3455_v39 = vcvt.s32.f32 %v1887_v25  ;;  %v3459_v38 = vcvt.s32.f32 %v1891_v27  ;;  %v1691_v40 = vunpack.c.3.s8 %v711_v16  ;;  %v819_v23 = vld [vmem:[%s7886_s14 + $0x960] sm:$0xff] }
  0xba   : > { %5052 = vmatpush.bf16.msrb.mxu0 %v4439_v28  ;;  %v4503_v42 = vpack.c.bf16 %v3395_v31, %v3391_v30  ;;  %v3255_v43 = vcvt.s32.f32 %v1687_v32  ;;  %v1751_v44 = vunpack.c.2.s8 %v727_v26  ;;  %v1755_v45 = vunpack.c.3.s8 %v727_v26  ;;  %v835_v30 = vld [vmem:[%s7886_s14 + $0x9e0] sm:$0xff] }
  0xbb   : > { %5065 = vmatpush.bf16.msrb.mxu1 %v4471_v34  ;;  %v4535_v46 = vpack.c.bf16 %v3459_v38, %v3455_v39  ;;  %v3259_v47 = vcvt.s32.f32 %v1691_v40  ;;  %v1815_v48 = vunpack.c.2.s8 %v743_v33  ;;  %v1819_v49 = vunpack.c.3.s8 %v743_v33  ;;  %v8008_v39 = vld [vmem:[#allocation1 + $0x24] sm:$0xff] }
  0xbc   : > { %5078 = vmatpush.bf16.msrb.mxu2 %v4503_v42  ;;  %v3319_v50 = vcvt.s32.f32 %v1751_v44  ;;  %v3323_v51 = vcvt.s32.f32 %v1755_v45  ;;  %v1879_v52 = vunpack.c.2.s8 %v759_v41  ;;  %v1883_v53 = vunpack.c.3.s8 %v759_v41 }
  0xbd   : > { %5091 = vmatpush.bf16.msrb.mxu3 %v4535_v46  ;;  %v4435_v54 = vpack.c.bf16 %v3259_v47, %v3255_v43  ;;  %v3383_v55 = vcvt.s32.f32 %v1815_v48  ;;  %v3387_v56 = vcvt.s32.f32 %v1819_v49  ;;  %v1679_v58 = vunpack.c.0.s8 %v711_v16  ;;  %v8010_v43 = vld [vmem:[#allocation1 + $0x2d] sm:$0xff]  ;;  %v8012_v48 = vld [vmem:[#allocation1 + $0x36] sm:$0xff] }
  0xbe   : > { %v4467_v59 = vpack.c.bf16 %v3323_v51, %v3319_v50  ;;  %v3447_v60 = vcvt.s32.f32 %v1879_v52  ;;  %v3451_v61 = vcvt.s32.f32 %v1883_v53  ;;  %v1683_v63 = vunpack.c.1.s8 %v711_v16  ;;  %v8015_v52 = vld [vmem:[#allocation1 + $0x3f] sm:$0xff] }
  0xbf   : > { %5053 = vmatpush.bf16.msrb.mxu0 %v4435_v54  ;;  %v4499_v0 = vpack.c.bf16 %v3387_v56, %v3383_v55  ;;  %v3247_v1 = vcvt.s32.f32 %v1679_v58  ;;  %v1743_v2 = vunpack.c.0.s8 %v727_v26  ;;  %v1747_v4 = vunpack.c.1.s8 %v727_v26 }
  0xc0   : > { %5066 = vmatpush.bf16.msrb.mxu1 %v4467_v59  ;;  %v4531_v6 = vpack.c.bf16 %v3451_v61, %v3447_v60  ;;  %v3251_v7 = vcvt.s32.f32 %v1683_v63  ;;  %v1807_v9 = vunpack.c.0.s8 %v743_v33  ;;  %v1811_v11 = vunpack.c.1.s8 %v743_v33 }
  0xc1   : > { %5079 = vmatpush.bf16.msrb.mxu2 %v4499_v0  ;;  %v3311_v12 = vcvt.s32.f32 %v1743_v2  ;;  %v3315_v13 = vcvt.s32.f32 %v1747_v4  ;;  %v1871_v14 = vunpack.c.0.s8 %v759_v41  ;;  %v1875_v16 = vunpack.c.1.s8 %v759_v41  ;;  %v783_v0 = vld [vmem:[%s7886_s14 + $0x840] sm:$0xff] }
  0xc2   : > { %5092 = vmatpush.bf16.msrb.mxu3 %v4531_v6  ;;  %v4431_v18 = vpack.c.bf16 %v3251_v7, %v3247_v1  ;;  %v3375_v19 = vcvt.s32.f32 %v1807_v9  ;;  %v3379_v21 = vcvt.s32.f32 %v1811_v11  ;;  %v1991_v22 = vunpack.c.2.s8 %v8001_v5 }
  0xc3   : > { %v4463_v25 = vpack.c.bf16 %v3315_v13, %v3311_v12  ;;  %v3439_v27 = vcvt.s32.f32 %v1871_v14  ;;  %v3443_v26 = vcvt.s32.f32 %v1875_v16  ;;  %v1995_v28 = vunpack.c.3.s8 %v8001_v5  ;;  %v799_v12 = vld [vmem:[%s7886_s14 + $0x8c0] sm:$0xff] }
  0xc4   : > { %5054 = vmatpush.bf16.msrb.mxu0 %v4431_v18  ;;  %v4495_v31 = vpack.c.bf16 %v3379_v21, %v3375_v19  ;;  %v3559_v32 = vcvt.s32.f32 %v1991_v22  ;;  %v2055_v33 = vunpack.c.2.s8 %v803_v17  ;;  %v2059_v34 = vunpack.c.3.s8 %v803_v17  ;;  %v815_v18 = vld [vmem:[%s7886_s14 + $0x940] sm:$0xff] }
  0xc5   : > { %5067 = vmatpush.bf16.msrb.mxu1 %v4463_v25  ;;  %v4527_v38 = vpack.c.bf16 %v3443_v26, %v3439_v27  ;;  %v3563_v40 = vcvt.s32.f32 %v1995_v28  ;;  %v2119_v41 = vunpack.c.2.s8 %v819_v23  ;;  %v2123_v42 = vunpack.c.3.s8 %v819_v23  ;;  %v831_v27 = vld [vmem:[%s7886_s14 + $0x9c0] sm:$0xff] }
  0xc6   : > { %5080 = vmatpush.bf16.msrb.mxu2 %v4495_v31  ;;  %v3623_v44 = vcvt.s32.f32 %v2055_v33  ;;  %v3627_v45 = vcvt.s32.f32 %v2059_v34  ;;  %v2183_v46 = vunpack.c.2.s8 %v835_v30  ;;  %v2187_v47 = vunpack.c.3.s8 %v835_v30 }
  0xc7   : > { %5093 = vmatpush.bf16.msrb.mxu3 %v4527_v38  ;;  %v4587_v49 = vpack.c.bf16 %v3563_v40, %v3559_v32  ;;  %v3687_v50 = vcvt.s32.f32 %v2119_v41  ;;  %v3691_v51 = vcvt.s32.f32 %v2123_v42  ;;  %5055 = vmatmul.bf16.vlgmr.msrb.gmra.mxu0 %v8008_v39  ;;  %v1983_v53 = vunpack.c.0.s8 %v8001_v5 }
  0xc8   : > { %v4619_v54 = vpack.c.bf16 %v3627_v45, %v3623_v44  ;;  %v3751_v55 = vcvt.s32.f32 %v2183_v46  ;;  %v3755_v56 = vcvt.s32.f32 %v2187_v47  ;;  %5068 = vmatmul.bf16.vlgmr.msrb.gmra.mxu1 %v8010_v43  ;;  %v1987_v58 = vunpack.c.1.s8 %v8001_v5 }
  0xc9   : > { %5099 = vmatpush.bf16.msra.mxu0 %v4587_v49  ;;  %v4651_v59 = vpack.c.bf16 %v3691_v51, %v3687_v50  ;;  %5081 = vmatmul.bf16.vlgmr.msrb.gmra.mxu2 %v8012_v48  ;;  %v3551_v60 = vcvt.s32.f32 %v1983_v53  ;;  %v2047_v61 = vunpack.c.0.s8 %v803_v17  ;;  %v2051_v63 = vunpack.c.1.s8 %v803_v17 }
  0xca   : > { %5112 = vmatpush.bf16.msra.mxu1 %v4619_v54  ;;  %v4683_v1 = vpack.c.bf16 %v3755_v56, %v3751_v55  ;;  %5094 = vmatmul.bf16.vlgmr.msrb.gmra.mxu3 %v8015_v52  ;;  %v3555_v2 = vcvt.s32.f32 %v1987_v58  ;;  %v2111_v4 = vunpack.c.0.s8 %v819_v23  ;;  %v2115_v6 = vunpack.c.1.s8 %v819_v23  ;;  %v517_v23 = vld [vmem:[%s9414_s0 + $0x10] sm:$0xff] }
  0xcb   : > { %5125 = vmatpush.bf16.msra.mxu2 %v4651_v59  ;;  %v3615_v5 = vcvt.s32.f32 %v2047_v61  ;;  %v3619_v7 = vcvt.s32.f32 %v2051_v63  ;;  %v2175_v9 = vunpack.c.0.s8 %v835_v30  ;;  %v2179_v11 = vunpack.c.1.s8 %v835_v30  ;;  %4852 = vst [vmem:[#allocation1] ss:$9 sm:$0xff] %v517_v23 }
  0xcc   : > { %5138 = vmatpush.bf16.msra.mxu3 %v4683_v1  ;;  %v4583_v13 = vpack.c.bf16 %v3555_v2, %v3551_v60  ;;  %v3679_v14 = vcvt.s32.f32 %v2111_v4  ;;  %v3683_v16 = vcvt.s32.f32 %v2115_v6  ;;  %v1975_v17 = vunpack.c.2.s8 %v783_v0  ;;  %v779_v60 = vld [vmem:[%s7886_s14 + $0x820] sm:$0xff] }
  0xcd   : > { %v4615_v19 = vpack.c.bf16 %v3619_v7, %v3615_v5  ;;  %v3743_v21 = vcvt.s32.f32 %v2175_v9  ;;  %v3747_v22 = vcvt.s32.f32 %v2179_v11  ;;  %v1979_v25 = vunpack.c.3.s8 %v783_v0 }
  0xce   : > { %5100 = vmatpush.bf16.msra.mxu0 %v4583_v13  ;;  %v4647_v26 = vpack.c.bf16 %v3683_v16, %v3679_v14  ;;  %v3543_v28 = vcvt.s32.f32 %v1975_v17  ;;  %v2039_v30 = vunpack.c.2.s8 %v799_v12  ;;  %v2043_v31 = vunpack.c.3.s8 %v799_v12 }
  0xcf   : > { %5113 = vmatpush.bf16.msra.mxu1 %v4615_v19  ;;  %v4679_v32 = vpack.c.bf16 %v3747_v22, %v3743_v21  ;;  %v3547_v33 = vcvt.s32.f32 %v1979_v25  ;;  %v2103_v34 = vunpack.c.2.s8 %v815_v18  ;;  %v2107_v38 = vunpack.c.3.s8 %v815_v18  ;;  %v827_v22 = vld [vmem:[%s7886_s14 + $0x9a0] sm:$0xff] }
  0xd0   : > { %5126 = vmatpush.bf16.msra.mxu2 %v4647_v26  ;;  %v3607_v40 = vcvt.s32.f32 %v2039_v30  ;;  %v3611_v41 = vcvt.s32.f32 %v2043_v31  ;;  %v2167_v42 = vunpack.c.2.s8 %v831_v27  ;;  %v2171_v44 = vunpack.c.3.s8 %v831_v27 }
  0xd1   : > { %5139 = vmatpush.bf16.msra.mxu3 %v4679_v32  ;;  %v4579_v45 = vpack.c.bf16 %v3547_v33, %v3543_v28  ;;  %v3671_v46 = vcvt.s32.f32 %v2103_v34  ;;  %v3675_v47 = vcvt.s32.f32 %v2107_v38  ;;  %v1967_v49 = vunpack.c.0.s8 %v783_v0 }
  0xd2   : > { %v4611_v50 = vpack.c.bf16 %v3611_v41, %v3607_v40  ;;  %v3735_v51 = vcvt.s32.f32 %v2167_v42  ;;  %v3739_v53 = vcvt.s32.f32 %v2171_v44  ;;  %v1971_v54 = vunpack.c.1.s8 %v783_v0  ;;  %v795_v0 = vld [vmem:[%s7886_s14 + $0x8a0] sm:$0xff] }
  0xd3   : > { %5101 = vmatpush.bf16.msra.mxu0 %v4579_v45  ;;  %v4643_v55 = vpack.c.bf16 %v3675_v47, %v3671_v46  ;;  %v3535_v56 = vcvt.s32.f32 %v1967_v49  ;;  %v2031_v58 = vunpack.c.0.s8 %v799_v12  ;;  %v2035_v59 = vunpack.c.1.s8 %v799_v12  ;;  %v811_v12 = vld [vmem:[%s7886_s14 + $0x920] sm:$0xff] }
  0xd4   : > { %5114 = vmatpush.bf16.msra.mxu1 %v4611_v50  ;;  %v4675_v61 = vpack.c.bf16 %v3739_v53, %v3735_v51  ;;  %v3539_v63 = vcvt.s32.f32 %v1971_v54  ;;  %v2095_v1 = vunpack.c.0.s8 %v815_v18  ;;  %v2099_v2 = vunpack.c.1.s8 %v815_v18 }
  0xd5   : > { %5127 = vmatpush.bf16.msra.mxu2 %v4643_v55  ;;  %v3599_v4 = vcvt.s32.f32 %v2031_v58  ;;  %v3603_v6 = vcvt.s32.f32 %v2035_v59  ;;  %v2159_v5 = vunpack.c.0.s8 %v831_v27  ;;  %v2163_v7 = vunpack.c.1.s8 %v831_v27  ;;  %v775_v55 = vld [vmem:[%s7886_s14 + $0x800] sm:$0xff] }
  0xd6   : > { %5140 = vmatpush.bf16.msra.mxu3 %v4675_v61  ;;  %v4575_v9 = vpack.c.bf16 %v3539_v63, %v3535_v56  ;;  %v3663_v11 = vcvt.s32.f32 %v2095_v1  ;;  %v3667_v13 = vcvt.s32.f32 %v2099_v2  ;;  %v1959_v14 = vunpack.c.2.s8 %v779_v60 }
  0xd7   : > { %v4607_v16 = vpack.c.bf16 %v3603_v6, %v3599_v4  ;;  %v3727_v17 = vcvt.s32.f32 %v2159_v5  ;;  %v3731_v19 = vcvt.s32.f32 %v2163_v7  ;;  %v1963_v21 = vunpack.c.3.s8 %v779_v60 }
  0xd8   : > { %5102 = vmatpush.bf16.msra.mxu0 %v4575_v9  ;;  %v4639_v18 = vpack.c.bf16 %v3667_v13, %v3663_v11  ;;  %v3527_v25 = vcvt.s32.f32 %v1959_v14  ;;  %v2023_v23 = vunpack.c.2.s8 %v795_v0  ;;  %v2027_v26 = vunpack.c.3.s8 %v795_v0 }
  0xd9   : > { %5115 = vmatpush.bf16.msra.mxu1 %v4607_v16  ;;  %v4671_v28 = vpack.c.bf16 %v3731_v19, %v3727_v17  ;;  %v3531_v27 = vcvt.s32.f32 %v1963_v21  ;;  %v2087_v30 = vunpack.c.2.s8 %v811_v12  ;;  %v2091_v31 = vunpack.c.3.s8 %v811_v12  ;;  %v823_v17 = vld [vmem:[%s7886_s14 + $0x980] sm:$0xff] }
  0xda   : > { %5128 = vmatpush.bf16.msra.mxu2 %v4639_v18  ;;  %v3591_v32 = vcvt.s32.f32 %v2023_v23  ;;  %v3595_v33 = vcvt.s32.f32 %v2027_v26  ;;  %v2151_v34 = vunpack.c.2.s8 %v827_v22  ;;  %v2155_v38 = vunpack.c.3.s8 %v827_v22 }
  0xdb   : > { %5141 = vmatpush.bf16.msra.mxu3 %v4671_v28  ;;  %v4571_v40 = vpack.c.bf16 %v3531_v27, %v3527_v25  ;;  %v3655_v41 = vcvt.s32.f32 %v2087_v30  ;;  %v3659_v42 = vcvt.s32.f32 %v2091_v31  ;;  %v1951_v44 = vunpack.c.0.s8 %v779_v60 }
  0xdc   : > { %v4603_v45 = vpack.c.bf16 %v3595_v33, %v3591_v32  ;;  %v3719_v46 = vcvt.s32.f32 %v2151_v34  ;;  %v3723_v47 = vcvt.s32.f32 %v2155_v38  ;;  %v1955_v49 = vunpack.c.1.s8 %v779_v60  ;;  %v791_v60 = vld [vmem:[%s7886_s14 + $0x880] sm:$0xff] }
  0xdd   : > { %5103 = vmatpush.bf16.msra.mxu0 %v4571_v40  ;;  %v4635_v50 = vpack.c.bf16 %v3659_v42, %v3655_v41  ;;  %v3519_v51 = vcvt.s32.f32 %v1951_v44  ;;  %v2015_v53 = vunpack.c.0.s8 %v795_v0  ;;  %v2019_v54 = vunpack.c.1.s8 %v795_v0  ;;  %v807_v0 = vld [vmem:[%s7886_s14 + $0x900] sm:$0xff] }
  0xde   : > { %5116 = vmatpush.bf16.msra.mxu1 %v4603_v45  ;;  %v4667_v56 = vpack.c.bf16 %v3723_v47, %v3719_v46  ;;  %v3523_v58 = vcvt.s32.f32 %v1955_v49  ;;  %v2079_v59 = vunpack.c.0.s8 %v811_v12  ;;  %v2083_v61 = vunpack.c.1.s8 %v811_v12 }
  0xdf   : > { %5129 = vmatpush.bf16.msra.mxu2 %v4635_v50  ;;  %v3583_v63 = vcvt.s32.f32 %v2015_v53  ;;  %v3587_v1 = vcvt.s32.f32 %v2019_v54  ;;  %v2143_v2 = vunpack.c.0.s8 %v827_v22  ;;  %v2147_v4 = vunpack.c.1.s8 %v827_v22  ;;  %v8038_v50 = vld [vmem:[%s7886_s14 + $0xa60] sm:$0xff] }
  0xe0   : > { %5142 = vmatpush.bf16.msra.mxu3 %v4667_v56  ;;  %v4567_v6 = vpack.c.bf16 %v3523_v58, %v3519_v51  ;;  %v3647_v5 = vcvt.s32.f32 %v2079_v59  ;;  %v3651_v7 = vcvt.s32.f32 %v2083_v61  ;;  %v1943_v9 = vunpack.c.2.s8 %v775_v55 }
  0xe1   : > { %v4599_v11 = vpack.c.bf16 %v3587_v1, %v3583_v63  ;;  %v3711_v13 = vcvt.s32.f32 %v2143_v2  ;;  %v3715_v14 = vcvt.s32.f32 %v2147_v4  ;;  %v1947_v16 = vunpack.c.3.s8 %v775_v55  ;;  %v867_v63 = vld [vmem:[%s7886_s14 + $0xae0] sm:$0xff] }
  0xe2   : > { %5104 = vmatpush.bf16.msra.mxu0 %v4567_v6  ;;  %v4631_v12 = vpack.c.bf16 %v3651_v7, %v3647_v5  ;;  %v3511_v19 = vcvt.s32.f32 %v1943_v9  ;;  %v2007_v21 = vunpack.c.2.s8 %v791_v60  ;;  %v2011_v18 = vunpack.c.3.s8 %v791_v60  ;;  %v883_v6 = vld [vmem:[%s7886_s14 + $0xb60] sm:$0xff] }
  0xe3   : > { %5117 = vmatpush.bf16.msra.mxu1 %v4599_v11  ;;  %v4663_v25 = vpack.c.bf16 %v3715_v14, %v3711_v13  ;;  %v3515_v22 = vcvt.s32.f32 %v1947_v16  ;;  %v2071_v23 = vunpack.c.2.s8 %v807_v0  ;;  %v2075_v26 = vunpack.c.3.s8 %v807_v0 }
  0xe4   : > { %5130 = vmatpush.bf16.msra.mxu2 %v4631_v12  ;;  %v3575_v28 = vcvt.s32.f32 %v2007_v21  ;;  %v3579_v27 = vcvt.s32.f32 %v2011_v18  ;;  %v2135_v30 = vunpack.c.2.s8 %v823_v17  ;;  %v2139_v31 = vunpack.c.3.s8 %v823_v17 }
  0xe5   : > { %5143 = vmatpush.bf16.msra.mxu3 %v4663_v25  ;;  %v4563_v32 = vpack.c.bf16 %v3515_v22, %v3511_v19  ;;  %v3639_v33 = vcvt.s32.f32 %v2071_v23  ;;  %v3643_v34 = vcvt.s32.f32 %v2075_v26  ;;  %v1935_v38 = vunpack.c.0.s8 %v775_v55  ;;  %v8047_v22 = vld [vmem:[#allocation1 + $0x9] sm:$0xff] }
  0xe6   : > { %v4595_v40 = vpack.c.bf16 %v3579_v27, %v3575_v28  ;;  %v3703_v41 = vcvt.s32.f32 %v2135_v30  ;;  %v3707_v42 = vcvt.s32.f32 %v2139_v31  ;;  %v1939_v44 = vunpack.c.1.s8 %v775_v55  ;;  %v8049_v30 = vld [vmem:[#allocation1 + $0x12] sm:$0xff] }
  0xe7   : > { %5105 = vmatpush.bf16.msra.mxu0 %v4563_v32  ;;  %v4627_v45 = vpack.c.bf16 %v3643_v34, %v3639_v33  ;;  %v3503_v46 = vcvt.s32.f32 %v1935_v38  ;;  %v1999_v47 = vunpack.c.0.s8 %v791_v60  ;;  %v2003_v49 = vunpack.c.1.s8 %v791_v60  ;;  %v8052_v34 = vld [vmem:[#allocation1 + $0x1b] sm:$0xff] }
  0xe8   : > { %5118 = vmatpush.bf16.msra.mxu1 %v4595_v40  ;;  %v4659_v51 = vpack.c.bf16 %v3707_v42, %v3703_v41  ;;  %v3507_v53 = vcvt.s32.f32 %v1939_v44  ;;  %v2063_v54 = vunpack.c.0.s8 %v807_v0  ;;  %v2067_v56 = vunpack.c.1.s8 %v807_v0  ;;  %v899_v0 = vld [vmem:[%s7886_s14 + $0xbe0] sm:$0xff] }
  0xe9   : > { %5131 = vmatpush.bf16.msra.mxu2 %v4627_v45  ;;  %v3567_v58 = vcvt.s32.f32 %v1999_v47  ;;  %v3571_v59 = vcvt.s32.f32 %v2003_v49  ;;  %v2127_v61 = vunpack.c.0.s8 %v823_v17  ;;  %v2131_v55 = vunpack.c.1.s8 %v823_v17  ;;  %v8045_v17 = vld [vmem:[#allocation1] sm:$0xff] }
  0xea   : > { %5144 = vmatpush.bf16.msra.mxu3 %v4659_v51  ;;  %v4559_v1 = vpack.c.bf16 %v3507_v53, %v3503_v46  ;;  %v3631_v2 = vcvt.s32.f32 %v2063_v54  ;;  %v3635_v4 = vcvt.s32.f32 %v2067_v56  ;;  %v2247_v60 = vunpack.c.2.s8 %v8038_v50  ;;  %v847_v51 = vld [vmem:[%s7886_s14 + $0xa40] sm:$0xff] }
  0xeb   : > { %v4591_v5 = vpack.c.bf16 %v3571_v59, %v3567_v58  ;;  %v3695_v7 = vcvt.s32.f32 %v2127_v61  ;;  %v3699_v9 = vcvt.s32.f32 %v2131_v55  ;;  %v2251_v11 = vunpack.c.3.s8 %v8038_v50  ;;  %v8060_v59 = vpop.f32.mrf.mxu0 }
  0xec   : > { %5106 = vmatpush.bf16.msra.mxu0 %v4559_v1  ;;  %v4623_v13 = vpack.c.bf16 %v3635_v4, %v3631_v2  ;;  %v3815_v14 = vcvt.s32.f32 %v2247_v60  ;;  %v2311_v16 = vunpack.c.2.s8 %v867_v63  ;;  %v2315_v12 = vunpack.c.3.s8 %v867_v63  ;;  %v863_v2 = vld [vmem:[%s7886_s14 + $0xac0] sm:$0xff] }
  0xed   : > { %5119 = vmatpush.bf16.msra.mxu1 %v4591_v5  ;;  %v4655_v19 = vpack.c.bf16 %v3699_v9, %v3695_v7  ;;  %v3819_v21 = vcvt.s32.f32 %v2251_v11  ;;  %v2375_v18 = vunpack.c.2.s8 %v883_v6  ;;  %v2379_v25 = vunpack.c.3.s8 %v883_v6  ;;  %v879_v7 = vld [vmem:[%s7886_s14 + $0xb40] sm:$0xff] }
  0xee   : > { %5132 = vmatpush.bf16.msra.mxu2 %v4623_v13  ;;  %v3879_v23 = vcvt.s32.f32 %v2311_v16  ;;  %v3883_v26 = vcvt.s32.f32 %v2315_v12  ;;  %v2439_v28 = vunpack.c.2.s8 %v899_v0  ;;  %v2443_v27 = vunpack.c.3.s8 %v899_v0 }
  0xef   : > { %5145 = vmatpush.bf16.msra.mxu3 %v4655_v19  ;;  %v4715_v31 = vpack.c.bf16 %v3819_v21, %v3815_v14  ;;  %v3943_v32 = vcvt.s32.f32 %v2375_v18  ;;  %v3947_v33 = vcvt.s32.f32 %v2379_v25  ;;  %5107 = vmatmul.bf16.vlgmr.msra.gmra.mxu0 %v8045_v17  ;;  %v2239_v38 = vunpack.c.0.s8 %v8038_v50 }
  0xf0   : > { %v4747_v40 = vpack.c.bf16 %v3883_v26, %v3879_v23  ;;  %v4007_v41 = vcvt.s32.f32 %v2439_v28  ;;  %v4011_v42 = vcvt.s32.f32 %v2443_v27  ;;  %5120 = vmatmul.bf16.vlgmr.msra.gmra.mxu1 %v8047_v22  ;;  %v2243_v44 = vunpack.c.1.s8 %v8038_v50 }
  0xf1   : > { %5151 = vmatpush.bf16.msrb.mxu0 %v4715_v31  ;;  %v4779_v45 = vpack.c.bf16 %v3947_v33, %v3943_v32  ;;  %5133 = vmatmul.bf16.vlgmr.msra.gmra.mxu2 %v8049_v30  ;;  %v3807_v46 = vcvt.s32.f32 %v2239_v38  ;;  %v2303_v47 = vunpack.c.0.s8 %v867_v63  ;;  %v2307_v49 = vunpack.c.1.s8 %v867_v63 }
  0xf2   : > { %5164 = vmatpush.bf16.msrb.mxu1 %v4747_v40  ;;  %v4811_v53 = vpack.c.bf16 %v4011_v42, %v4007_v41  ;;  %5146 = vmatmul.bf16.vlgmr.msra.gmra.mxu3 %v8052_v34  ;;  %v3811_v54 = vcvt.s32.f32 %v2243_v44  ;;  %v2367_v56 = vunpack.c.0.s8 %v883_v6  ;;  %v2371_v58 = vunpack.c.1.s8 %v883_v6  ;;  %v895_v6 = vld [vmem:[%s7886_s14 + $0xbc0] sm:$0xff] }
  0xf3   : > { %5177 = vmatpush.bf16.msrb.mxu2 %v4779_v45  ;;  %v3871_v50 = vcvt.s32.f32 %v2303_v47  ;;  %v3875_v61 = vcvt.s32.f32 %v2307_v49  ;;  %v2431_v55 = vunpack.c.0.s8 %v899_v0  ;;  %v2435_v1 = vunpack.c.1.s8 %v899_v0 }
  0xf4   : > { %5190 = vmatpush.bf16.msrb.mxu3 %v4811_v53  ;;  %v4711_v63 = vpack.c.bf16 %v3811_v54, %v3807_v46  ;;  %v3935_v4 = vcvt.s32.f32 %v2367_v56  ;;  %v3939_v60 = vcvt.s32.f32 %v2371_v58  ;;  %v2231_v5 = vunpack.c.2.s8 %v847_v51  ;;  %v4902_v46 = vpop.f32.mrf.mxu0  ;;  %v843_v56 = vld [vmem:[%s7886_s14 + $0xa20] sm:$0xff]  ;;  %v8066_v58 = vpop.f32.mrf.mxu1 }
  0xf5   : > { %v4743_v9 = vpack.c.bf16 %v3875_v61, %v3871_v50  ;;  %v3999_v11 = vcvt.s32.f32 %v2431_v55  ;;  %v4003_v13 = vcvt.s32.f32 %v2435_v1  ;;  %v2235_v14 = vunpack.c.3.s8 %v847_v51  ;;  %v8068_v50 = vpop.f32.mrf.mxu2 }
  0xf6   : > { %5152 = vmatpush.bf16.msrb.mxu0 %v4711_v63  ;;  %v4775_v16 = vpack.c.bf16 %v3939_v60, %v3935_v4  ;;  %v3799_v12 = vcvt.s32.f32 %v2231_v5  ;;  %v2295_v19 = vunpack.c.2.s8 %v863_v2  ;;  %v2299_v21 = vunpack.c.3.s8 %v863_v2 }
  0xf7   : > { %5165 = vmatpush.bf16.msrb.mxu1 %v4743_v9  ;;  %v4807_v18 = vpack.c.bf16 %v4003_v13, %v3999_v11  ;;  %v3803_v0 = vcvt.s32.f32 %v2235_v14  ;;  %v2359_v25 = vunpack.c.2.s8 %v879_v7  ;;  %v2363_v23 = vunpack.c.3.s8 %v879_v7  ;;  %v859_v9 = vld [vmem:[%s7886_s14 + $0xaa0] sm:$0xff] }
  0xf8   : > { %5178 = vmatpush.bf16.msrb.mxu2 %v4775_v16  ;;  %v3863_v26 = vcvt.s32.f32 %v2295_v19  ;;  %v3867_v28 = vcvt.s32.f32 %v2299_v21  ;;  %v2423_v27 = vunpack.c.2.s8 %v895_v6  ;;  %v2427_v31 = vunpack.c.3.s8 %v895_v6  ;;  %v875_v16 = vld [vmem:[%s7886_s14 + $0xb20] sm:$0xff] }
  0xf9   : > { %5191 = vmatpush.bf16.msrb.mxu3 %v4807_v18  ;;  %v4707_v32 = vpack.c.bf16 %v3803_v0, %v3799_v12  ;;  %v3927_v33 = vcvt.s32.f32 %v2359_v25  ;;  %v3931_v38 = vcvt.s32.f32 %v2363_v23  ;;  %v2223_v40 = vunpack.c.0.s8 %v847_v51  ;;  %v891_v0 = vld [vmem:[%s7886_s14 + $0xba0] sm:$0xff] }
  0xfa   : > { %v4739_v41 = vpack.c.bf16 %v3867_v28, %v3863_v26  ;;  %v3991_v42 = vcvt.s32.f32 %v2423_v27  ;;  %v3995_v44 = vcvt.s32.f32 %v2427_v31  ;;  %v2227_v45 = vunpack.c.1.s8 %v847_v51  ;;  %v8073_v28 = vpop.f32.mrf.mxu3 }
  0xfb   : > { %5153 = vmatpush.bf16.msrb.mxu0 %v4707_v32  ;;  %v4771_v47 = vpack.c.bf16 %v3931_v38, %v3927_v33  ;;  %v3791_v49 = vcvt.s32.f32 %v2223_v40  ;;  %v2287_v53 = vunpack.c.0.s8 %v863_v2  ;;  %v2291_v54 = vunpack.c.1.s8 %v863_v2 }
  0xfc   : > { %5166 = vmatpush.bf16.msrb.mxu1 %v4739_v41  ;;  %v4803_v61 = vpack.c.bf16 %v3995_v44, %v3991_v42  ;;  %v3795_v55 = vcvt.s32.f32 %v2227_v45  ;;  %v2351_v1 = vunpack.c.0.s8 %v879_v7  ;;  %v2355_v63 = vunpack.c.1.s8 %v879_v7 }
  0xfd   : > { %5179 = vmatpush.bf16.msrb.mxu2 %v4771_v47  ;;  %v3855_v51 = vcvt.s32.f32 %v2287_v53  ;;  %v3859_v4 = vcvt.s32.f32 %v2291_v54  ;;  %v2415_v60 = vunpack.c.0.s8 %v895_v6  ;;  %v2419_v5 = vunpack.c.1.s8 %v895_v6  ;;  %v4915_v47 = vpop.f32.mrf.mxu1 }
  0xfe   : > { %5192 = vmatpush.bf16.msrb.mxu3 %v4803_v61  ;;  %v4703_v2 = vpack.c.bf16 %v3795_v55, %v3791_v49  ;;  %v3919_v11 = vcvt.s32.f32 %v2351_v1  ;;  %v3923_v13 = vcvt.s32.f32 %v2355_v63  ;;  %v2215_v14 = vunpack.c.2.s8 %v843_v56  ;;  %v4928_v49 = vpop.f32.mrf.mxu2 }
  0xff   : > { %v4735_v12 = vpack.c.bf16 %v3859_v4, %v3855_v51  ;;  %v3983_v19 = vcvt.s32.f32 %v2415_v60  ;;  %v3987_v21 = vcvt.s32.f32 %v2419_v5  ;;  %v2219_v18 = vunpack.c.3.s8 %v843_v56  ;;  %v8076_v60 = vld [vmem:[%s7886_s14 + $0xa00] sm:$0xff] }
 0x100   : > { %5154 = vmatpush.bf16.msrb.mxu0 %v4703_v2  ;;  %v4767_v7 = vpack.c.bf16 %v3923_v13, %v3919_v11  ;;  %v3783_v25 = vcvt.s32.f32 %v2215_v14  ;;  %v2279_v23 = vunpack.c.2.s8 %v859_v9  ;;  %v2283_v26 = vunpack.c.3.s8 %v859_v9 }
 0x101   : > { %5167 = vmatpush.bf16.msrb.mxu1 %v4735_v12  ;;  %v4799_v6 = vpack.c.bf16 %v3987_v21, %v3983_v19  ;;  %v3787_v27 = vcvt.s32.f32 %v2219_v18  ;;  %v2343_v31 = vunpack.c.2.s8 %v875_v16  ;;  %v2347_v32 = vunpack.c.3.s8 %v875_v16  ;;  %v855_v21 = vld [vmem:[%s7886_s14 + $0xa80] sm:$0xff] }
 0x102   : > { %5180 = vmatpush.bf16.msrb.mxu2 %v4767_v7  ;;  %v3847_v33 = vcvt.s32.f32 %v2279_v23  ;;  %v3851_v38 = vcvt.s32.f32 %v2283_v26  ;;  %v2407_v40 = vunpack.c.2.s8 %v891_v0  ;;  %v2411_v41 = vunpack.c.3.s8 %v891_v0  ;;  %v8080_v18 = vld [vmem:[%s7886_s14 + $0xb00] sm:$0xff] }
 0x103   : > { %5193 = vmatpush.bf16.msrb.mxu3 %v4799_v6  ;;  %v4699_v42 = vpack.c.bf16 %v3787_v27, %v3783_v25  ;;  %v3911_v44 = vcvt.s32.f32 %v2343_v31  ;;  %v3915_v45 = vcvt.s32.f32 %v2347_v32  ;;  %v2207_v46 = vunpack.c.0.s8 %v843_v56  ;;  %v8084_v26 = vld [vmem:[%s7886_s14 + $0xb80] sm:$0xff]  ;;  %v8088_v27 = vld [vmem:[#allocation1 + $0x2d] sm:$0xff] }
 0x104   : > { %v4731_v53 = vpack.c.bf16 %v3851_v38, %v3847_v33  ;;  %v3975_v54 = vcvt.s32.f32 %v2407_v40  ;;  %v3979_v61 = vcvt.s32.f32 %v2411_v41  ;;  %v2211_v55 = vunpack.c.1.s8 %v843_v56  ;;  %v8086_v6 = vld [vmem:[#allocation1 + $0x24] sm:$0xff]  ;;  %v8091_v38 = vld [vmem:[#allocation1 + $0x36] sm:$0xff] }
 0x105   : > { %5155 = vmatpush.bf16.msrb.mxu0 %v4699_v42  ;;  %v4763_v1 = vpack.c.bf16 %v3915_v45, %v3911_v44  ;;  %v3775_v63 = vcvt.s32.f32 %v2207_v46  ;;  %v2271_v51 = vunpack.c.0.s8 %v859_v9  ;;  %v2275_v4 = vunpack.c.1.s8 %v859_v9  ;;  %v8093_v40 = vld [vmem:[#allocation1 + $0x3f] sm:$0xff]  ;;  %v518_v41 = vld [vmem:[%s9414_s0 + $0x18] sm:$0x1] }
 0x106   : > { %5168 = vmatpush.bf16.msrb.mxu1 %v4731_v53  ;;  %v4795_v5 = vpack.c.bf16 %v3979_v61, %v3975_v54  ;;  %v3779_v2 = vcvt.s32.f32 %v2211_v55  ;;  %v2335_v11 = vunpack.c.0.s8 %v875_v16  ;;  %v2339_v13 = vunpack.c.1.s8 %v875_v16  ;;  %v4941_v16 = vpop.f32.mrf.mxu3  ;;  %4862 = vst [vmem:[#allocation1] ss:$9 sm:$0xff] %v518_v41  ;;  %v8100_v61 = vpop.f32.mrf.mxu0 }
 0x107   : > { %5181 = vmatpush.bf16.msrb.mxu2 %v4763_v1  ;;  %v3839_v14 = vcvt.s32.f32 %v2271_v51  ;;  %v3843_v12 = vcvt.s32.f32 %v2275_v4  ;;  %v2399_v19 = vunpack.c.0.s8 %v891_v0  ;;  %v2403_v56 = vunpack.c.1.s8 %v891_v0  ;;  %v8107_v16 = vpop.f32.mrf.mxu1 }
 0x108   : > { %5194 = vmatpush.bf16.msrb.mxu3 %v4795_v5  ;;  %v4695_v7 = vpack.c.bf16 %v3779_v2, %v3775_v63  ;;  %v3903_v25 = vcvt.s32.f32 %v2335_v11  ;;  %v3907_v9 = vcvt.s32.f32 %v2339_v13  ;;  %v2199_v23 = vunpack.c.2.s8 %v8076_v60 }
 0x109   : > { %v4727_v31 = vpack.c.bf16 %v3843_v12, %v3839_v14  ;;  %v3967_v32 = vcvt.s32.f32 %v2399_v19  ;;  %v3971_v33 = vcvt.s32.f32 %v2403_v56  ;;  %v2203_v0 = vunpack.c.3.s8 %v8076_v60 }
 0x10a   : > { %5156 = vmatpush.bf16.msrb.mxu0 %v4695_v7  ;;  %v4759_v42 = vpack.c.bf16 %v3907_v9, %v3903_v25  ;;  %v3767_v44 = vcvt.s32.f32 %v2199_v23  ;;  %v2263_v45 = vunpack.c.2.s8 %v855_v21  ;;  %v2267_v46 = vunpack.c.3.s8 %v855_v21  ;;  %v907_v23 = vld [vmem:[%s7886_s14 + $0xc20] sm:$0xff] }
 0x10b   : > { %5169 = vmatpush.bf16.msrb.mxu1 %v4727_v31  ;;  %v4791_v47 = vpack.c.bf16 %v3971_v33, %v3967_v32  ;;  %v3771_v49 = vcvt.s32.f32 %v2203_v0  ;;  %v2327_v53 = vunpack.c.2.s8 %v8080_v18  ;;  %v2331_v54 = vunpack.c.3.s8 %v8080_v18 }
 0x10c   : > { %5182 = vmatpush.bf16.msrb.mxu2 %v4759_v42  ;;  %v3831_v55 = vcvt.s32.f32 %v2263_v45  ;;  %v3835_v1 = vcvt.s32.f32 %v2267_v46  ;;  %v2391_v63 = vunpack.c.2.s8 %v8084_v26  ;;  %v2395_v51 = vunpack.c.3.s8 %v8084_v26  ;;  %v548_v45 = vld [vmem:[%s7886_s14 + $0xe8] sm:$0xff] }
 0x10d   : > { %5195 = vmatpush.bf16.msrb.mxu3 %v4791_v47  ;;  %v4691_v4 = vpack.c.bf16 %v3771_v49, %v3767_v44  ;;  %v3895_v5 = vcvt.s32.f32 %v2327_v53  ;;  %v3899_v2 = vcvt.s32.f32 %v2331_v54  ;;  %v2191_v11 = vunpack.c.0.s8 %v8076_v60  ;;  %v564_v54 = vld [vmem:[%s7886_s14 + $0x168] sm:$0xff] }
 0x10e   : > { %v4723_v13 = vpack.c.bf16 %v3835_v1, %v3831_v55  ;;  %v3959_v14 = vcvt.s32.f32 %v2391_v63  ;;  %v3963_v12 = vcvt.s32.f32 %v2395_v51  ;;  %v2195_v19 = vunpack.c.1.s8 %v8076_v60  ;;  %v4954_v51 = vpop.f32.mrf.mxu0 }
 0x10f   : > { %5157 = vmatpush.bf16.msrb.mxu0 %v4691_v4  ;;  %v4755_v56 = vpack.c.bf16 %v3899_v2, %v3895_v5  ;;  %v3759_v7 = vcvt.s32.f32 %v2191_v11  ;;  %v2255_v25 = vunpack.c.0.s8 %v855_v21  ;;  %v2259_v9 = vunpack.c.1.s8 %v855_v21  ;;  %v8114_v21 = vpop.f32.mrf.mxu2  ;;  %v560_v51 = vld [vmem:[%s7886_s14 + $0x148] sm:$0xff] }
 0x110   : > { %5170 = vmatpush.bf16.msrb.mxu1 %v4723_v13  ;;  %v4787_v31 = vpack.c.bf16 %v3963_v12, %v3959_v14  ;;  %v3763_v32 = vcvt.s32.f32 %v2195_v19  ;;  %v2319_v33 = vunpack.c.0.s8 %v8080_v18  ;;  %v2323_v0 = vunpack.c.1.s8 %v8080_v18 }
 0x111   : > { %5183 = vmatpush.bf16.msrb.mxu2 %v4755_v56  ;;  %v3823_v41 = vcvt.s32.f32 %v2255_v25  ;;  %v3827_v60 = vcvt.s32.f32 %v2259_v9  ;;  %v2383_v42 = vunpack.c.0.s8 %v8084_v26  ;;  %v2387_v44 = vunpack.c.1.s8 %v8084_v26  ;;  %v8117_v26 = vpop.f32.mrf.mxu3 }
 0x112   : > { %5196 = vmatpush.bf16.msrb.mxu3 %v4787_v31  ;;  %v4687_v46 = vpack.c.bf16 %v3763_v32, %v3759_v7  ;;  %v3887_v47 = vcvt.s32.f32 %v2319_v33  ;;  %v3891_v49 = vcvt.s32.f32 %v2323_v0  ;;  %v2471_v53 = vunpack.c.2.s8 %v907_v23 }
 0x113   : > { %v4719_v55 = vpack.c.bf16 %v3827_v60, %v3823_v41  ;;  %v3951_v1 = vcvt.s32.f32 %v2383_v42  ;;  %v3955_v63 = vcvt.s32.f32 %v2387_v44  ;;  %v2475_v18 = vunpack.c.3.s8 %v907_v23  ;;  %v903_v41 = vld [vmem:[%s7886_s14 + $0xc00] sm:$0xff]  ;;  %v4967_v60 = vpop.f32.mrf.mxu1 }
 0x114   : > { %5158 = vmatpush.bf16.msrb.mxu0 %v4687_v46  ;;  %v4751_v4 = vpack.c.bf16 %v3891_v49, %v3887_v47  ;;  %v4039_v5 = vcvt.s32.f32 %v2471_v53  ;;  %v1032_v2 = vunpack.c.2.s8 %v548_v45  ;;  %v1036_v11 = vunpack.c.3.s8 %v548_v45 }
 0x115   : > { %5171 = vmatpush.bf16.msrb.mxu1 %v4719_v55  ;;  %v4783_v13 = vpack.c.bf16 %v3955_v63, %v3951_v1  ;;  %v4043_v14 = vcvt.s32.f32 %v2475_v18  ;;  %v1096_v12 = vunpack.c.2.s8 %v564_v54  ;;  %v1100_v19 = vunpack.c.3.s8 %v564_v54  ;;  %v544_v55 = vld [vmem:[%s7886_s14 + $0xc8] sm:$0xff] }
 0x116   : > { %5184 = vmatpush.bf16.msrb.mxu2 %v4751_v4  ;;  %v2600_v56 = vcvt.s32.f32 %v1032_v2  ;;  %v2604_v7 = vcvt.s32.f32 %v1036_v11  ;;  %v4914_v25 = vadd.f32 %v8066_v58, %v8060_v59  ;;  %v2463_v9 = vunpack.c.0.s8 %v907_v23 }
 0x117   : > { %5197 = vmatpush.bf16.msrb.mxu3 %v4783_v13  ;;  %v4827_v31 = vpack.c.bf16 %v4043_v14, %v4039_v5  ;;  %v2664_v32 = vcvt.s32.f32 %v1096_v12  ;;  %v2668_v33 = vcvt.s32.f32 %v1100_v19  ;;  %5159 = vmatmul.bf16.vlgmr.msrb.gmra.mxu0 %v8086_v6  ;;  %v2467_v0 = vunpack.c.1.s8 %v907_v23  ;;  %v4980_v23 = vpop.f32.mrf.mxu2 }
 0x118   : > { %v4108_v42 = vpack.c.bf16 %v2604_v7, %v2600_v56  ;;  %5172 = vmatmul.bf16.vlgmr.msrb.gmra.mxu1 %v8088_v27  ;;  %v4927_v44 = vadd.f32 %v8068_v50, %v4914_v25  ;;  %v4031_v46 = vcvt.s32.f32 %v2463_v9  ;;  %v1024_v47 = vunpack.c.0.s8 %v548_v45 }
 0x119   : > { %5207 = vmatpush.bf16.msra.mxu1 %v4827_v31  ;;  %v4140_v59 = vpack.c.bf16 %v2668_v33, %v2664_v32  ;;  %5185 = vmatmul.bf16.vlgmr.msrb.gmra.mxu2 %v8091_v38  ;;  %v4035_v58 = vcvt.s32.f32 %v2467_v0  ;;  %v1028_v49 = vunpack.c.1.s8 %v548_v45  ;;  %v1088_v53 = vunpack.c.0.s8 %v564_v54  ;;  %v580_v45 = vld [vmem:[%s7886_s14 + $0x1e8] sm:$0xff]  ;;  %v4993_v56 = vpop.f32.mrf.mxu3 }
 0x11a   : > { %5229 = vmatpush.bf16.msra.mxu2 %v4108_v42  ;;  %5198 = vmatmul.bf16.vlgmr.msrb.gmra.mxu3 %v8093_v40  ;;  %v2592_v1 = vcvt.s32.f32 %v1024_v47  ;;  %v1092_v63 = vunpack.c.1.s8 %v564_v54  ;;  %v8129_v50 = vadd.f32 %v8073_v28, %v4927_v44  ;;  %v2455_v18 = vunpack.c.2.s8 %v903_v41 }
 0x11b   : > { %5242 = vmatpush.bf16.msra.mxu3 %v4140_v59  ;;  %v4823_v4 = vpack.c.bf16 %v4035_v58, %v4031_v46  ;;  %v2596_v5 = vcvt.s32.f32 %v1028_v49  ;;  %v2656_v2 = vcvt.s32.f32 %v1088_v53  ;;  %v2459_v11 = vunpack.c.3.s8 %v903_v41 }
 0x11c   : > { %v2660_v13 = vcvt.s32.f32 %v1092_v63  ;;  %v4023_v14 = vcvt.s32.f32 %v2455_v18  ;;  %v1016_v12 = vunpack.c.2.s8 %v544_v55  ;;  %v1020_v19 = vunpack.c.3.s8 %v544_v55 }
 0x11d   : > { %5208 = vmatpush.bf16.msra.mxu1 %v4823_v4  ;;  %v4104_v7 = vpack.c.bf16 %v2596_v5, %v2592_v1  ;;  %v4027_v25 = vcvt.s32.f32 %v2459_v11  ;;  %v1080_v54 = vunpack.c.2.s8 %v560_v51  ;;  %v1084_v9 = vunpack.c.3.s8 %v560_v51 }
 0x11e   : > { %v4136_v28 = vpack.c.bf16 %v2660_v13, %v2656_v2  ;;  %v2584_v31 = vcvt.s32.f32 %v1016_v12  ;;  %v2588_v32 = vcvt.s32.f32 %v1020_v19  ;;  %v1160_v33 = vunpack.c.2.s8 %v580_v45  ;;  %v532_v2 = vld [vmem:[%s7886_s14 + $0x68] sm:$0xff] }
 0x11f   : > { %5230 = vmatpush.bf16.msra.mxu2 %v4104_v7  ;;  %v4819_v0 = vpack.c.bf16 %v4027_v25, %v4023_v14  ;;  %v2648_v60 = vcvt.s32.f32 %v1080_v54  ;;  %v2652_v42 = vcvt.s32.f32 %v1084_v9  ;;  %v1164_v44 = vunpack.c.3.s8 %v580_v45  ;;  %v8135_v19 = vld [vmem:[%s7886_s14 + $0xa8] sm:$0xff] }
 0x120   : > { %5243 = vmatpush.bf16.msra.mxu3 %v4136_v28  ;;  %v4100_v46 = vpack.c.bf16 %v2588_v32, %v2584_v31  ;;  %v2728_v47 = vcvt.s32.f32 %v1160_v33  ;;  %v2447_v59 = vunpack.c.0.s8 %v903_v41  ;;  %v2451_v58 = vunpack.c.1.s8 %v903_v41  ;;  %v576_v31 = vld [vmem:[%s7886_s14 + $0x1c8] sm:$0xff] }
 0x121   : > { %5209 = vmatpush.bf16.msra.mxu1 %v4819_v0  ;;  %v4132_v49 = vpack.c.bf16 %v2652_v42, %v2648_v60  ;;  %v2732_v53 = vcvt.s32.f32 %v1164_v44  ;;  %v1008_v23 = vunpack.c.0.s8 %v544_v55  ;;  %v1012_v1 = vunpack.c.1.s8 %v544_v55  ;;  %v556_v55 = vld [vmem:[%s7886_s14 + $0x128] sm:$0xff] }
 0x122   : > { %v4015_v63 = vcvt.s32.f32 %v2447_v59  ;;  %v4019_v18 = vcvt.s32.f32 %v2451_v58  ;;  %v1072_v4 = vunpack.c.0.s8 %v560_v51  ;;  %v1076_v5 = vunpack.c.1.s8 %v560_v51 }
 0x123   : > { %5231 = vmatpush.bf16.msra.mxu2 %v4100_v46  ;;  %v4172_v11 = vpack.c.bf16 %v2732_v53, %v2728_v47  ;;  %v2576_v13 = vcvt.s32.f32 %v1008_v23  ;;  %v2580_v14 = vcvt.s32.f32 %v1012_v1  ;;  %v1152_v12 = vunpack.c.0.s8 %v580_v45 }
 0x124   : > { %5244 = vmatpush.bf16.msra.mxu3 %v4132_v49  ;;  %v4815_v41 = vpack.c.bf16 %v4019_v18, %v4015_v63  ;;  %v2640_v56 = vcvt.s32.f32 %v1072_v4  ;;  %v2644_v7 = vcvt.s32.f32 %v1076_v5  ;;  %v1156_v25 = vunpack.c.1.s8 %v580_v45  ;;  %v4863_v18 = vld [vmem:[#allocation1] sm:$0xff] }
 0x125   : > { %5255 = vmatpush.bf16.msra.mxu0 %v4172_v11  ;;  %v4096_v54 = vpack.c.bf16 %v2580_v14, %v2576_v13  ;;  %v2720_v9 = vcvt.s32.f32 %v1152_v12  ;;  %v968_v28 = vunpack.c.2.s8 %v532_v2  ;;  %v972_v51 = vunpack.c.3.s8 %v532_v2 }
 0x126   : > { %5210 = vmatpush.bf16.msra.mxu1 %v4815_v41  ;;  %v4128_v32 = vpack.c.bf16 %v2644_v7, %v2640_v56  ;;  %v2724_v33 = vcvt.s32.f32 %v1156_v25  ;;  %v4953_v0 = vadd.f32 %v8100_v61, %v8129_v50  ;;  %v1000_v60 = vunpack.c.2.s8 %v8135_v19 }
 0x127   : > { %5232 = vmatpush.bf16.msra.mxu2 %v4096_v54  ;;  %v2536_v42 = vcvt.s32.f32 %v968_v28  ;;  %v2540_v44 = vcvt.s32.f32 %v972_v51  ;;  %v1004_v45 = vunpack.c.3.s8 %v8135_v19  ;;  %v1064_v46 = vunpack.c.2.s8 %v556_v55  ;;  %v528_v28 = vld [vmem:[%s7886_s14 + $0x48] sm:$0xff] }
 0x128   : > { %5245 = vmatpush.bf16.msra.mxu3 %v4128_v32  ;;  %v4168_v47 = vpack.c.bf16 %v2724_v33, %v2720_v9  ;;  %v2568_v59 = vcvt.s32.f32 %v1000_v60  ;;  %v1068_v58 = vunpack.c.3.s8 %v556_v55  ;;  %v1144_v49 = vunpack.c.2.s8 %v576_v31  ;;  %v8150_v60 = vpop.f32.mrf.mxu0 }
 0x129   : > { %v4076_v53 = vpack.c.bf16 %v2540_v44, %v2536_v42  ;;  %v2572_v23 = vcvt.s32.f32 %v1004_v45  ;;  %v2632_v1 = vcvt.s32.f32 %v1064_v46  ;;  %v1148_v63 = vunpack.c.3.s8 %v576_v31  ;;  %7551 = vmatmul.msk.bf16.vlgmr.msra.gmra.mxu1 %vm4888_vm0, %v4863_v18  ;;  %v552_v46 = vld [vmem:[%s7886_s14 + $0x108] sm:$0xff] }
 0x12a   : > { %5256 = vmatpush.bf16.msra.mxu0 %v4168_v47  ;;  %v2636_v61 = vcvt.s32.f32 %v1068_v58  ;;  %v2712_v50 = vcvt.s32.f32 %v1144_v49  ;;  %v4966_v4 = vadd.f32 %v8107_v16, %v4953_v0  ;;  %v960_v5 = vunpack.c.0.s8 %v532_v2  ;;  %v536_v0 = vld [vmem:[%s7886_s14 + $0x88] sm:$0xff] }
 0x12b   : > { %5216 = vmatpush.bf16.msrb.mxu1 %v4076_v53  ;;  %v4092_v11 = vpack.c.bf16 %v2572_v23, %v2568_v59  ;;  %v2716_v13 = vcvt.s32.f32 %v1148_v63  ;;  %v964_v14 = vunpack.c.1.s8 %v532_v2  ;;  %v992_v7 = vunpack.c.0.s8 %v8135_v19  ;;  %v572_v23 = vld [vmem:[%s7886_s14 + $0x1a8] sm:$0xff] }
 0x12c   : > { %v4124_v12 = vpack.c.bf16 %v2636_v61, %v2632_v1  ;;  %v2528_v41 = vcvt.s32.f32 %v960_v5  ;;  %v4979_v56 = vadd.f32 %v8114_v21, %v4966_v4  ;;  %v996_v16 = vunpack.c.1.s8 %v8135_v19 }
 0x12d   : > { %5233 = vmatpush.bf16.msra.mxu2 %v4092_v11  ;;  %v4164_v25 = vpack.c.bf16 %v2716_v13, %v2712_v50  ;;  %v2532_v54 = vcvt.s32.f32 %v964_v14  ;;  %v1056_v9 = vunpack.c.0.s8 %v556_v55  ;;  %v2560_v2 = vcvt.s32.f32 %v992_v7  ;;  %v8157_v11 = vpop.f32.mrf.mxu1 }
 0x12e   : > { %5246 = vmatpush.bf16.msra.mxu3 %v4124_v12  ;;  %v1060_v51 = vunpack.c.1.s8 %v556_v55  ;;  %v1136_v32 = vunpack.c.0.s8 %v576_v31  ;;  %v1140_v33 = vunpack.c.1.s8 %v576_v31  ;;  %v2564_v42 = vcvt.s32.f32 %v996_v16 }
 0x12f   : > { %5257 = vmatpush.bf16.msra.mxu0 %v4164_v25  ;;  %v4072_v21 = vpack.c.bf16 %v2532_v54, %v2528_v41  ;;  %v2624_v44 = vcvt.s32.f32 %v1056_v9  ;;  %v8153_v45 = vadd.f32 %v8117_v26, %v4979_v56  ;;  %v952_v58 = vunpack.c.2.s8 %v528_v28 }
 0x130   : > { %v2628_v19 = vcvt.s32.f32 %v1060_v51  ;;  %v2704_v47 = vcvt.s32.f32 %v1136_v32  ;;  %v2708_v59 = vcvt.s32.f32 %v1140_v33  ;;  %v4088_v55 = vpack.c.bf16 %v2564_v42, %v2560_v2  ;;  %v5006_v32 = vpop.f32.mrf.mxu0 }
 0x131   : > { %5217 = vmatpush.bf16.msrb.mxu1 %v4072_v21  ;;  %v956_v49 = vunpack.c.3.s8 %v528_v28  ;;  %v984_v31 = vunpack.c.2.s8 %v536_v0  ;;  %v988_v53 = vunpack.c.3.s8 %v536_v0  ;;  %v2520_v18 = vcvt.s32.f32 %v952_v58 }
 0x132   : > { %v4120_v1 = vpack.c.bf16 %v2628_v19, %v2624_v44  ;;  %v4160_v63 = vpack.c.bf16 %v2708_v59, %v2704_v47  ;;  %v1048_v61 = vunpack.c.2.s8 %v552_v46  ;;  %5234 = vmatpush.bf16.msra.mxu2 %v4088_v55  ;;  %v1052_v5 = vunpack.c.3.s8 %v552_v46  ;;  %v524_v19 = vld [vmem:[%s7886_s14 + $0x28] sm:$0xff] }
 0x133   : > { %v2524_v50 = vcvt.s32.f32 %v956_v49  ;;  %v2552_v4 = vcvt.s32.f32 %v984_v31  ;;  %v2556_v26 = vcvt.s32.f32 %v988_v53  ;;  %v1128_v14 = vunpack.c.2.s8 %v572_v23  ;;  %v612_v49 = vld [vmem:[%s7886_s14 + $0x2e8] sm:$0xff] }
 0x134   : > { %5247 = vmatpush.bf16.msra.mxu3 %v4120_v1  ;;  %5258 = vmatpush.bf16.msra.mxu0 %v4160_v63  ;;  %v2616_v13 = vcvt.s32.f32 %v1048_v61  ;;  %v1132_v12 = vunpack.c.3.s8 %v572_v23  ;;  %v944_v41 = vunpack.c.0.s8 %v528_v28  ;;  %v2620_v25 = vcvt.s32.f32 %v1052_v5 }
 0x135   : > { %v4068_v56 = vpack.c.bf16 %v2524_v50, %v2520_v18  ;;  %v4084_v7 = vpack.c.bf16 %v2556_v26, %v2552_v4  ;;  %v948_v54 = vunpack.c.1.s8 %v528_v28  ;;  %v2696_v16 = vcvt.s32.f32 %v1128_v14  ;;  %v8161_v28 = vpop.f32.mrf.mxu2  ;;  %v628_v18 = vld [vmem:[%s7886_s14 + $0x368] sm:$0xff] }
 0x136   : > { %v2700_v9 = vcvt.s32.f32 %v1132_v12  ;;  %v2512_v2 = vcvt.s32.f32 %v944_v41  ;;  %v976_v51 = vunpack.c.0.s8 %v536_v0  ;;  %v4116_v33 = vpack.c.bf16 %v2620_v25, %v2616_v13  ;;  %v568_v14 = vld [vmem:[%s7886_s14 + $0x188] sm:$0xff]  ;;  %v8165_v12 = vpop.f32.mrf.mxu3  ;;  %v5019_v41 = vpop.f32.mrf.mxu1 }
 0x137   : > { %5218 = vmatpush.bf16.msrb.mxu1 %v4068_v56  ;;  %5235 = vmatpush.bf16.msra.mxu2 %v4084_v7  ;;  %v2516_v21 = vcvt.s32.f32 %v948_v54  ;;  %v980_v42 = vunpack.c.1.s8 %v536_v0  ;;  %v1040_v44 = vunpack.c.0.s8 %v552_v46  ;;  %v1044_v58 = vunpack.c.1.s8 %v552_v46 }
 0x138   : > { %v4156_v47 = vpack.c.bf16 %v2700_v9, %v2696_v16  ;;  %v2544_v59 = vcvt.s32.f32 %v976_v51  ;;  %v1120_v55 = vunpack.c.0.s8 %v572_v23  ;;  %5248 = vmatpush.bf16.msra.mxu3 %v4116_v33  ;;  %v1124_v63 = vunpack.c.1.s8 %v572_v23 }
 0x139   : > { %v4064_v31 = vpack.c.bf16 %v2516_v21, %v2512_v2  ;;  %v2548_v53 = vcvt.s32.f32 %v980_v42  ;;  %v2608_v1 = vcvt.s32.f32 %v1040_v44  ;;  %v2612_v61 = vcvt.s32.f32 %v1044_v58 }
 0x13a   : > { %5259 = vmatpush.bf16.msra.mxu0 %v4156_v47  ;;  %v2688_v50 = vcvt.s32.f32 %v1120_v55  ;;  %v936_v0 = vunpack.c.2.s8 %v524_v19  ;;  %v940_v4 = vunpack.c.3.s8 %v524_v19  ;;  %v2692_v5 = vcvt.s32.f32 %v1124_v63 }
 0x13b   : > { %5219 = vmatpush.bf16.msrb.mxu1 %v4064_v31  ;;  %v4080_v26 = vpack.c.bf16 %v2548_v53, %v2544_v59  ;;  %v1288_v46 = vunpack.c.2.s8 %v612_v49  ;;  %v1292_v13 = vunpack.c.3.s8 %v612_v49  ;;  %v4112_v56 = vpack.c.bf16 %v2612_v61, %v2608_v1 }
 0x13c   : > { %v2504_v7 = vcvt.s32.f32 %v936_v0  ;;  %v2508_v25 = vcvt.s32.f32 %v940_v4  ;;  %v1352_v54 = vunpack.c.2.s8 %v628_v18  ;;  %v4152_v23 = vpack.c.bf16 %v2692_v5, %v2688_v50  ;;  %v520_v4 = vld [vmem:[%s7886_s14 + $0x8] sm:$0xff] }
 0x13d   : > { %5236 = vmatpush.bf16.msra.mxu2 %v4080_v26  ;;  %v2856_v16 = vcvt.s32.f32 %v1288_v46  ;;  %v2860_v9 = vcvt.s32.f32 %v1292_v13  ;;  %v1356_v2 = vunpack.c.3.s8 %v628_v18  ;;  %5249 = vmatpush.bf16.msra.mxu3 %v4112_v56  ;;  %v1112_v33 = vunpack.c.2.s8 %v568_v14  ;;  %v5032_v1 = vpop.f32.mrf.mxu2  ;;  %v608_v13 = vld [vmem:[%s7886_s14 + $0x2c8] sm:$0xff] }
 0x13e   : > { %v4060_v51 = vpack.c.bf16 %v2508_v25, %v2504_v7  ;;  %v2920_v32 = vcvt.s32.f32 %v1352_v54  ;;  %v1116_v21 = vunpack.c.3.s8 %v568_v14  ;;  %5260 = vmatpush.bf16.msra.mxu0 %v4152_v23  ;;  %v928_v47 = vunpack.c.0.s8 %v524_v19  ;;  %v624_v25 = vld [vmem:[%s7886_s14 + $0x348] sm:$0xff]  ;;  %v5045_v54 = vpop.f32.mrf.mxu3 }
 0x13f   : > { %v4236_v42 = vpack.c.bf16 %v2860_v9, %v2856_v16  ;;  %v2924_v44 = vcvt.s32.f32 %v1356_v2  ;;  %v932_v59 = vunpack.c.1.s8 %v524_v19  ;;  %v2680_v58 = vcvt.s32.f32 %v1112_v33 }
 0x140   : > { %5220 = vmatpush.bf16.msrb.mxu1 %v4060_v51  ;;  %v2684_v55 = vcvt.s32.f32 %v1116_v21  ;;  %v1280_v31 = vunpack.c.0.s8 %v612_v49  ;;  %v1284_v53 = vunpack.c.1.s8 %v612_v49  ;;  %5237 = vmatmul.bf16.vlgmr.msra.gmra.mxu2 %v7913_v62  ;;  %v2496_v61 = vcvt.s32.f32 %v928_v47 }
 0x141   : > { %5281 = vmatpush.bf16.msrb.mxu2 %v4236_v42  ;;  %v4268_v63 = vpack.c.bf16 %v2924_v44, %v2920_v32  ;;  %v2500_v50 = vcvt.s32.f32 %v932_v59  ;;  %v1344_v0 = vunpack.c.0.s8 %v628_v18  ;;  %5250 = vmatmul.bf16.vlgmr.msra.gmra.mxu3 %v7915_v3  ;;  %v1348_v46 = vunpack.c.1.s8 %v628_v18  ;;  %v644_v18 = vld [vmem:[%s7886_s14 + $0x3e8] sm:$0xff] }
 0x142   : > { %v4148_v26 = vpack.c.bf16 %v2684_v55, %v2680_v58  ;;  %v2848_v19 = vcvt.s32.f32 %v1280_v31  ;;  %v2852_v5 = vcvt.s32.f32 %v1284_v53  ;;  %v1104_v56 = vunpack.c.0.s8 %v568_v14 }
 0x143   : > { %5294 = vmatpush.bf16.msrb.mxu3 %v4268_v63  ;;  %v4056_v41 = vpack.c.bf16 %v2500_v50, %v2496_v61  ;;  %v2912_v49 = vcvt.s32.f32 %v1344_v0  ;;  %v1108_v7 = vunpack.c.1.s8 %v568_v14  ;;  %v2916_v16 = vcvt.s32.f32 %v1348_v46 }
 0x144   : > { %5261 = vmatpush.bf16.msra.mxu0 %v4148_v26  ;;  %v4232_v23 = vpack.c.bf16 %v2852_v5, %v2848_v19  ;;  %v920_v9 = vunpack.c.2.s8 %v520_v4  ;;  %v924_v2 = vunpack.c.3.s8 %v520_v4  ;;  %v2672_v51 = vcvt.s32.f32 %v1104_v56 }
 0x145   : > { %5221 = vmatpush.bf16.msrb.mxu1 %v4056_v41  ;;  %v2676_v32 = vcvt.s32.f32 %v1108_v7  ;;  %v1272_v33 = vunpack.c.2.s8 %v608_v13  ;;  %v1276_v21 = vunpack.c.3.s8 %v608_v13  ;;  %v4264_v42 = vpack.c.bf16 %v2916_v16, %v2912_v49  ;;  %v596_v16 = vld [vmem:[%s7886_s14 + $0x268] sm:$0xff] }
 0x146   : > { %5282 = vmatpush.bf16.msrb.mxu2 %v4232_v23  ;;  %v2488_v44 = vcvt.s32.f32 %v920_v9  ;;  %v2492_v47 = vcvt.s32.f32 %v924_v2  ;;  %v1336_v59 = vunpack.c.2.s8 %v624_v25  ;;  %v1340_v31 = vunpack.c.3.s8 %v624_v25 }
 0x147   : > { %v4144_v58 = vpack.c.bf16 %v2676_v32, %v2672_v51  ;;  %v2840_v14 = vcvt.s32.f32 %v1272_v33  ;;  %v2844_v55 = vcvt.s32.f32 %v1276_v21  ;;  %5295 = vmatpush.bf16.msrb.mxu3 %v4264_v42  ;;  %v1416_v63 = vunpack.c.2.s8 %v644_v18  ;;  %v604_v21 = vld [vmem:[%s7886_s14 + $0x2a8] sm:$0xff] }
 0x148   : > { %v4052_v53 = vpack.c.bf16 %v2492_v47, %v2488_v44  ;;  %v2904_v1 = vcvt.s32.f32 %v1336_v59  ;;  %v1420_v61 = vunpack.c.3.s8 %v644_v18  ;;  %v2908_v0 = vcvt.s32.f32 %v1340_v31  ;;  %v620_v59 = vld [vmem:[%s7886_s14 + $0x328] sm:$0xff] }
 0x149   : > { %5262 = vmatpush.bf16.msra.mxu0 %v4144_v58  ;;  %v4228_v50 = vpack.c.bf16 %v2844_v55, %v2840_v14  ;;  %v5005_v26 = vadd.f32 %v8150_v60, %v8153_v45  ;;  %v912_v19 = vunpack.c.0.s8 %v520_v4  ;;  %v2984_v5 = vcvt.s32.f32 %v1416_v63  ;;  %v640_v31 = vld [vmem:[%s7886_s14 + $0x3c8] sm:$0xff] }
 0x14a   : > { %5222 = vmatpush.bf16.msrb.mxu1 %v4052_v53  ;;  %v2988_v46 = vcvt.s32.f32 %v1420_v61  ;;  %v916_v41 = vunpack.c.1.s8 %v520_v4  ;;  %v1264_v49 = vunpack.c.0.s8 %v608_v13  ;;  %v4260_v56 = vpack.c.bf16 %v2908_v0, %v2904_v1 }
 0x14b   : > { %5283 = vmatpush.bf16.msrb.mxu2 %v4228_v50  ;;  %v2480_v7 = vcvt.s32.f32 %v912_v19  ;;  %v1268_v54 = vunpack.c.1.s8 %v608_v13  ;;  %v1328_v23 = vunpack.c.0.s8 %v624_v25  ;;  %v1332_v32 = vunpack.c.1.s8 %v624_v25 }
 0x14c   : > { %v4300_v9 = vpack.c.bf16 %v2988_v46, %v2984_v5  ;;  %v2484_v2 = vcvt.s32.f32 %v916_v41  ;;  %v2832_v51 = vcvt.s32.f32 %v1264_v49  ;;  %5263 = vmatmul.bf16.vlgmr.msra.gmra.mxu0 %v7918_v8  ;;  %5296 = vmatpush.bf16.msrb.mxu3 %v4260_v56  ;;  %v1408_v4 = vunpack.c.0.s8 %v644_v18 }
 0x14d   : > { %v2836_v60 = vcvt.s32.f32 %v1268_v54  ;;  %v2896_v45 = vcvt.s32.f32 %v1328_v23  ;;  %v1412_v33 = vunpack.c.1.s8 %v644_v18  ;;  %v2900_v44 = vcvt.s32.f32 %v1332_v32 }
 0x14e   : > { %5307 = vmatpush.bf16.msrb.mxu0 %v4300_v9  ;;  %v4048_v42 = vpack.c.bf16 %v2484_v2, %v2480_v7  ;;  %v5018_v13 = vadd.f32 %v8157_v11, %v5005_v26  ;;  %v1224_v47 = vunpack.c.2.s8 %v596_v16  ;;  %v2976_v14 = vcvt.s32.f32 %v1408_v4  ;;  %v592_v4 = vld [vmem:[%s7886_s14 + $0x248] sm:$0xff] }
 0x14f   : > { %v4224_v58 = vpack.c.bf16 %v2836_v60, %v2832_v51  ;;  %v2980_v55 = vcvt.s32.f32 %v1412_v33  ;;  %v1228_v25 = vunpack.c.3.s8 %v596_v16  ;;  %v4256_v53 = vpack.c.bf16 %v2900_v44, %v2896_v45 }
 0x150   : > { %5223 = vmatpush.bf16.msrb.mxu1 %v4048_v42  ;;  %v2792_v1 = vcvt.s32.f32 %v1224_v47  ;;  %v1256_v63 = vunpack.c.2.s8 %v604_v21  ;;  %v1260_v61 = vunpack.c.3.s8 %v604_v21  ;;  %v1320_v0 = vunpack.c.2.s8 %v620_v59 }
 0x151   : > { %5284 = vmatpush.bf16.msrb.mxu2 %v4224_v58  ;;  %v4296_v18 = vpack.c.bf16 %v2980_v55, %v2976_v14  ;;  %v2796_v50 = vcvt.s32.f32 %v1228_v25  ;;  %v1324_v19 = vunpack.c.3.s8 %v620_v59  ;;  %5297 = vmatpush.bf16.msrb.mxu3 %v4256_v53  ;;  %v1400_v26 = vunpack.c.2.s8 %v640_v31  ;;  %v600_v55 = vld [vmem:[%s7886_s14 + $0x288] sm:$0xff]  ;;  %v8188_v25 = vpop.f32.mrf.mxu0 }
 0x152   : > { %v2824_v5 = vcvt.s32.f32 %v1256_v63  ;;  %v2828_v11 = vcvt.s32.f32 %v1260_v61  ;;  %v1404_v46 = vunpack.c.3.s8 %v640_v31  ;;  %v2888_v49 = vcvt.s32.f32 %v1320_v0  ;;  %v616_v63 = vld [vmem:[%s7886_s14 + $0x308] sm:$0xff] }
 0x153   : > { %5308 = vmatpush.bf16.msrb.mxu0 %v4296_v18  ;;  %v4204_v41 = vpack.c.bf16 %v2796_v50, %v2792_v1  ;;  %v2892_v56 = vcvt.s32.f32 %v1324_v19  ;;  %v5031_v7 = vadd.f32 %v8161_v28, %v5018_v13  ;;  %5224 = vmatmul.bf16.vlgmr.msrb.gmra.mxu1 %v7911_v57  ;;  %v2968_v23 = vcvt.s32.f32 %v1400_v26  ;;  %v636_v0 = vld [vmem:[%s7886_s14 + $0x3a8] sm:$0xff] }
 0x154   : > { %v4220_v54 = vpack.c.bf16 %v2828_v11, %v2824_v5  ;;  %v2972_v9 = vcvt.s32.f32 %v1404_v46  ;;  %v1216_v2 = vunpack.c.0.s8 %v596_v16  ;;  %v1220_v32 = vunpack.c.1.s8 %v596_v16 }
 0x155   : > { %5268 = vmatpush.bf16.msra.mxu1 %v4204_v41  ;;  %v4252_v51 = vpack.c.bf16 %v2892_v56, %v2888_v49  ;;  %v8184_v60 = vadd.f32 %v8165_v12, %v5031_v7  ;;  %v1248_v45 = vunpack.c.0.s8 %v604_v21  ;;  %v1252_v28 = vunpack.c.1.s8 %v604_v21 }
 0x156   : > { %5285 = vmatpush.bf16.msrb.mxu2 %v4220_v54  ;;  %v4292_v33 = vpack.c.bf16 %v2972_v9, %v2968_v23  ;;  %v2784_v42 = vcvt.s32.f32 %v1216_v2  ;;  %v1312_v44 = vunpack.c.0.s8 %v620_v59  ;;  %v2788_v13 = vcvt.s32.f32 %v1220_v32  ;;  %v8192_v23 = vpop.f32.mrf.mxu1 }
 0x157   : > { %5298 = vmatpush.bf16.msrb.mxu3 %v4252_v51  ;;  %v2816_v47 = vcvt.s32.f32 %v1248_v45  ;;  %v1316_v58 = vunpack.c.1.s8 %v620_v59  ;;  %v1392_v14 = vunpack.c.0.s8 %v640_v31  ;;  %v2820_v12 = vcvt.s32.f32 %v1252_v28 }
 0x158   : > { %5309 = vmatpush.bf16.msrb.mxu0 %v4292_v33  ;;  %v2880_v16 = vcvt.s32.f32 %v1312_v44  ;;  %v1396_v53 = vunpack.c.1.s8 %v640_v31  ;;  %v1208_v1 = vunpack.c.2.s8 %v592_v4  ;;  %v4200_v61 = vpack.c.bf16 %v2788_v13, %v2784_v42 }
 0x159   : > { %v2884_v18 = vcvt.s32.f32 %v1316_v58  ;;  %v2960_v50 = vcvt.s32.f32 %v1392_v14  ;;  %v1212_v21 = vunpack.c.3.s8 %v592_v4  ;;  %v4216_v19 = vpack.c.bf16 %v2820_v12, %v2816_v47  ;;  %v5058_v14 = vpop.f32.mrf.mxu0 }
 0x15a   : > { %v2964_v5 = vcvt.s32.f32 %v1396_v53  ;;  %v2776_v11 = vcvt.s32.f32 %v1208_v1  ;;  %v1240_v26 = vunpack.c.2.s8 %v600_v55  ;;  %5269 = vmatpush.bf16.msra.mxu1 %v4200_v61  ;;  %v1244_v41 = vunpack.c.3.s8 %v600_v55  ;;  %v588_v61 = vld [vmem:[%s7886_s14 + $0x228] sm:$0xff] }
 0x15b   : > { %v4248_v59 = vpack.c.bf16 %v2884_v18, %v2880_v16  ;;  %v2780_v46 = vcvt.s32.f32 %v1212_v21  ;;  %v1304_v49 = vunpack.c.2.s8 %v616_v63  ;;  %5286 = vmatpush.bf16.msrb.mxu2 %v4216_v19  ;;  %v1308_v31 = vunpack.c.3.s8 %v616_v63 }
 0x15c   : > { %v4288_v56 = vpack.c.bf16 %v2964_v5, %v2960_v50  ;;  %v2808_v7 = vcvt.s32.f32 %v1240_v26  ;;  %v1384_v54 = vunpack.c.2.s8 %v636_v0  ;;  %v2812_v2 = vcvt.s32.f32 %v1244_v41  ;;  %v676_v5 = vld [vmem:[%s7886_s14 + $0x4e8] sm:$0xff] }
 0x15d   : > { %5299 = vmatpush.bf16.msrb.mxu3 %v4248_v59  ;;  %v4196_v9 = vpack.c.bf16 %v2780_v46, %v2776_v11  ;;  %v2872_v51 = vcvt.s32.f32 %v1304_v49  ;;  %v1388_v32 = vunpack.c.3.s8 %v636_v0  ;;  %v2876_v45 = vcvt.s32.f32 %v1308_v31  ;;  %v692_v46 = vld [vmem:[%s7886_s14 + $0x568] sm:$0xff] }
 0x15e   : > { %5310 = vmatpush.bf16.msrb.mxu0 %v4288_v56  ;;  %v2952_v33 = vcvt.s32.f32 %v1384_v54  ;;  %v1200_v42 = vunpack.c.0.s8 %v592_v4  ;;  %v1204_v28 = vunpack.c.1.s8 %v592_v4  ;;  %v4212_v44 = vpack.c.bf16 %v2812_v2, %v2808_v7  ;;  %v8196_v4 = vpop.f32.mrf.mxu2  ;;  %v632_v2 = vld [vmem:[%s7886_s14 + $0x388] sm:$0xff] }
 0x15f   : > { %5270 = vmatpush.bf16.msra.mxu1 %v4196_v9  ;;  %v2956_v13 = vcvt.s32.f32 %v1388_v32  ;;  %v1232_v47 = vunpack.c.0.s8 %v600_v55  ;;  %v1236_v58 = vunpack.c.1.s8 %v600_v55  ;;  %v4244_v12 = vpack.c.bf16 %v2876_v45, %v2872_v51  ;;  %v8200_v51 = vpop.f32.mrf.mxu3  ;;  %v5071_v32 = vpop.f32.mrf.mxu1 }
 0x160   : > { %v2768_v16 = vcvt.s32.f32 %v1200_v42  ;;  %v2772_v53 = vcvt.s32.f32 %v1204_v28  ;;  %v1296_v1 = vunpack.c.0.s8 %v616_v63  ;;  %5287 = vmatpush.bf16.msrb.mxu2 %v4212_v44  ;;  %v1300_v19 = vunpack.c.1.s8 %v616_v63 }
 0x161   : > { %v4284_v18 = vpack.c.bf16 %v2956_v13, %v2952_v33  ;;  %v2800_v50 = vcvt.s32.f32 %v1232_v47  ;;  %v2804_v21 = vcvt.s32.f32 %v1236_v58  ;;  %5300 = vmatpush.bf16.msrb.mxu3 %v4244_v12  ;;  %v1376_v55 = vunpack.c.0.s8 %v636_v0 }
 0x162   : > { %v4192_v11 = vpack.c.bf16 %v2772_v53, %v2768_v16  ;;  %v2864_v26 = vcvt.s32.f32 %v1296_v1  ;;  %v1380_v59 = vunpack.c.1.s8 %v636_v0  ;;  %v2868_v49 = vcvt.s32.f32 %v1300_v19 }
 0x163   : > { %5311 = vmatpush.bf16.msrb.mxu0 %v4284_v18  ;;  %v4208_v41 = vpack.c.bf16 %v2804_v21, %v2800_v50  ;;  %v1192_v56 = vunpack.c.2.s8 %v588_v61  ;;  %v1196_v7 = vunpack.c.3.s8 %v588_v61  ;;  %v2944_v31 = vcvt.s32.f32 %v1376_v55 }
 0x164   : > { %5271 = vmatpush.bf16.msra.mxu1 %v4192_v11  ;;  %v2948_v54 = vcvt.s32.f32 %v1380_v59  ;;  %v1544_v9 = vunpack.c.2.s8 %v676_v5  ;;  %v1548_v63 = vunpack.c.3.s8 %v676_v5  ;;  %v4240_v45 = vpack.c.bf16 %v2868_v49, %v2864_v26 }
 0x165   : > { %5288 = vmatpush.bf16.msrb.mxu2 %v4208_v41  ;;  %v2760_v33 = vcvt.s32.f32 %v1192_v56  ;;  %v2764_v42 = vcvt.s32.f32 %v1196_v7  ;;  %v1608_v0 = vunpack.c.2.s8 %v692_v46  ;;  %v1612_v47 = vunpack.c.3.s8 %v692_v46  ;;  %v584_v7 = vld [vmem:[%s7886_s14 + $0x208] sm:$0xff] }
 0x166   : > { %v4280_v28 = vpack.c.bf16 %v2948_v54, %v2944_v31  ;;  %v3112_v44 = vcvt.s32.f32 %v1544_v9  ;;  %v3116_v13 = vcvt.s32.f32 %v1548_v63  ;;  %5301 = vmatpush.bf16.msrb.mxu3 %v4240_v45  ;;  %v1368_v12 = vunpack.c.2.s8 %v632_v2  ;;  %v5084_v55 = vpop.f32.mrf.mxu2  ;;  %v672_v63 = vld [vmem:[%s7886_s14 + $0x4c8] sm:$0xff] }
 0x167   : > { %v4188_v58 = vpack.c.bf16 %v2764_v42, %v2760_v33  ;;  %v3176_v14 = vcvt.s32.f32 %v1608_v0  ;;  %v1372_v16 = vunpack.c.3.s8 %v632_v2  ;;  %v3180_v1 = vcvt.s32.f32 %v1612_v47  ;;  %v688_v42 = vld [vmem:[%s7886_s14 + $0x548] sm:$0xff]  ;;  %v5097_v0 = vpop.f32.mrf.mxu3 }
 0x168   : > { %5312 = vmatpush.bf16.msrb.mxu0 %v4280_v28  ;;  %v4364_v53 = vpack.c.bf16 %v3116_v13, %v3112_v44  ;;  %v1184_v18 = vunpack.c.0.s8 %v588_v61  ;;  %v1188_v50 = vunpack.c.1.s8 %v588_v61  ;;  %5289 = vmatmul.bf16.vlgmr.msrb.gmra.mxu2 %v7940_v37  ;;  %v2936_v21 = vcvt.s32.f32 %v1368_v12 }
 0x169   : > { %5272 = vmatpush.bf16.msra.mxu1 %v4188_v58  ;;  %v2940_v19 = vcvt.s32.f32 %v1372_v16  ;;  %v1536_v11 = vunpack.c.0.s8 %v676_v5  ;;  %v1540_v26 = vunpack.c.1.s8 %v676_v5  ;;  %v4396_v59 = vpack.c.bf16 %v3180_v1, %v3176_v14  ;;  %5302 = vmatmul.bf16.vlgmr.msrb.gmra.mxu3 %v7931_v29 }
 0x16a   : > { %5333 = vmatpush.bf16.msra.mxu2 %v4364_v53  ;;  %v2752_v41 = vcvt.s32.f32 %v1184_v18  ;;  %v2756_v49 = vcvt.s32.f32 %v1188_v50  ;;  %v1600_v56 = vunpack.c.0.s8 %v692_v46  ;;  %v1604_v9 = vunpack.c.1.s8 %v692_v46  ;;  %v708_v46 = vld [vmem:[%s7886_s14 + $0x5e8] sm:$0xff] }
 0x16b   : > { %v4276_v31 = vpack.c.bf16 %v2940_v19, %v2936_v21  ;;  %v3104_v61 = vcvt.s32.f32 %v1536_v11  ;;  %v3108_v54 = vcvt.s32.f32 %v1540_v26  ;;  %5346 = vmatpush.bf16.msra.mxu3 %v4396_v59  ;;  %v1360_v5 = vunpack.c.0.s8 %v632_v2 }
 0x16c   : > { %v4184_v32 = vpack.c.bf16 %v2756_v49, %v2752_v41  ;;  %v3168_v45 = vcvt.s32.f32 %v1600_v56  ;;  %v1364_v33 = vunpack.c.1.s8 %v632_v2  ;;  %v3172_v44 = vcvt.s32.f32 %v1604_v9 }
 0x16d   : > { %5313 = vmatpush.bf16.msrb.mxu0 %v4276_v31  ;;  %v4360_v28 = vpack.c.bf16 %v3108_v54, %v3104_v61  ;;  %v1176_v13 = vunpack.c.2.s8 %v584_v7  ;;  %v1180_v47 = vunpack.c.3.s8 %v584_v7  ;;  %v2928_v58 = vcvt.s32.f32 %v1360_v5 }
 0x16e   : > { %5273 = vmatpush.bf16.msra.mxu1 %v4184_v32  ;;  %v2932_v14 = vcvt.s32.f32 %v1364_v33  ;;  %v1528_v12 = vunpack.c.2.s8 %v672_v63  ;;  %v1532_v16 = vunpack.c.3.s8 %v672_v63  ;;  %v4392_v53 = vpack.c.bf16 %v3172_v44, %v3168_v45  ;;  %v660_v44 = vld [vmem:[%s7886_s14 + $0x468] sm:$0xff] }
 0x16f   : > { %5334 = vmatpush.bf16.msra.mxu2 %v4360_v28  ;;  %v2744_v1 = vcvt.s32.f32 %v1176_v13  ;;  %v2748_v18 = vcvt.s32.f32 %v1180_v47  ;;  %v1592_v50 = vunpack.c.2.s8 %v688_v42  ;;  %v1596_v11 = vunpack.c.3.s8 %v688_v42 }
 0x170   : > { %v4272_v21 = vpack.c.bf16 %v2932_v14, %v2928_v58  ;;  %v3096_v2 = vcvt.s32.f32 %v1528_v12  ;;  %v3100_v19 = vcvt.s32.f32 %v1532_v16  ;;  %5347 = vmatpush.bf16.msra.mxu3 %v4392_v53  ;;  %v1672_v59 = vunpack.c.2.s8 %v708_v46  ;;  %v668_v16 = vld [vmem:[%s7886_s14 + $0x4a8] sm:$0xff] }
 0x171   : > { %v4180_v26 = vpack.c.bf16 %v2748_v18, %v2744_v1  ;;  %v3160_v55 = vcvt.s32.f32 %v1592_v50  ;;  %v1676_v41 = vunpack.c.3.s8 %v708_v46  ;;  %v3164_v56 = vcvt.s32.f32 %v1596_v11  ;;  %v684_v50 = vld [vmem:[%s7886_s14 + $0x528] sm:$0xff] }
 0x172   : > { %5314 = vmatpush.bf16.msrb.mxu0 %v4272_v21  ;;  %v4356_v49 = vpack.c.bf16 %v3100_v19, %v3096_v2  ;;  %v5057_v31 = vadd.f32 %v8188_v25, %v8184_v60  ;;  %v1168_v61 = vunpack.c.0.s8 %v584_v7  ;;  %v3240_v54 = vcvt.s32.f32 %v1672_v59  ;;  %v704_v11 = vld [vmem:[%s7886_s14 + $0x5c8] sm:$0xff] }
 0x173   : > { %5274 = vmatpush.bf16.msra.mxu1 %v4180_v26  ;;  %v3244_v9 = vcvt.s32.f32 %v1676_v41  ;;  %v1172_v32 = vunpack.c.1.s8 %v584_v7  ;;  %v1520_v45 = vunpack.c.0.s8 %v672_v63  ;;  %v4388_v5 = vpack.c.bf16 %v3164_v56, %v3160_v55 }
 0x174   : > { %5335 = vmatpush.bf16.msra.mxu2 %v4356_v49  ;;  %v2736_v33 = vcvt.s32.f32 %v1168_v61  ;;  %v1524_v0 = vunpack.c.1.s8 %v672_v63  ;;  %v1584_v28 = vunpack.c.0.s8 %v688_v42  ;;  %v1588_v14 = vunpack.c.1.s8 %v688_v42 }
 0x175   : > { %v4428_v13 = vpack.c.bf16 %v3244_v9, %v3240_v54  ;;  %v2740_v47 = vcvt.s32.f32 %v1172_v32  ;;  %v3088_v58 = vcvt.s32.f32 %v1520_v45  ;;  %5315 = vmatmul.bf16.vlgmr.msrb.gmra.mxu0 %v7938_v36  ;;  %5348 = vmatpush.bf16.msra.mxu3 %v4388_v5  ;;  %v1664_v7 = vunpack.c.0.s8 %v708_v46 }
 0x176   : > { %v3092_v60 = vcvt.s32.f32 %v1524_v0  ;;  %v3152_v25 = vcvt.s32.f32 %v1584_v28  ;;  %v1668_v12 = vunpack.c.1.s8 %v708_v46  ;;  %v3156_v1 = vcvt.s32.f32 %v1588_v14 }
 0x177   : > { %5359 = vmatpush.bf16.msra.mxu0 %v4428_v13  ;;  %v4176_v53 = vpack.c.bf16 %v2740_v47, %v2736_v33  ;;  %v5070_v63 = vadd.f32 %v8192_v23, %v5057_v31  ;;  %v1480_v18 = vunpack.c.2.s8 %v660_v44  ;;  %v3232_v2 = vcvt.s32.f32 %v1664_v7  ;;  %v656_v7 = vld [vmem:[%s7886_s14 + $0x448] sm:$0xff] }
 0x178   : > { %v4352_v21 = vpack.c.bf16 %v3092_v60, %v3088_v58  ;;  %v3236_v19 = vcvt.s32.f32 %v1668_v12  ;;  %v1484_v42 = vunpack.c.3.s8 %v660_v44  ;;  %v4384_v26 = vpack.c.bf16 %v3156_v1, %v3152_v25 }
 0x179   : > { %5275 = vmatpush.bf16.msra.mxu1 %v4176_v53  ;;  %v3048_v55 = vcvt.s32.f32 %v1480_v18  ;;  %v1512_v59 = vunpack.c.2.s8 %v668_v16  ;;  %v1516_v41 = vunpack.c.3.s8 %v668_v16  ;;  %v1576_v56 = vunpack.c.2.s8 %v684_v50 }
 0x17a   : > { %5336 = vmatpush.bf16.msra.mxu2 %v4352_v21  ;;  %v4424_v46 = vpack.c.bf16 %v3236_v19, %v3232_v2  ;;  %v3052_v49 = vcvt.s32.f32 %v1484_v42  ;;  %v1580_v61 = vunpack.c.3.s8 %v684_v50  ;;  %5349 = vmatpush.bf16.msra.mxu3 %v4384_v26  ;;  %v1656_v31 = vunpack.c.2.s8 %v704_v11  ;;  %v664_v19 = vld [vmem:[%s7886_s14 + $0x488] sm:$0xff]  ;;  %v8223_v42 = vpop.f32.mrf.mxu0 }
 0x17b   : > { %v3080_v54 = vcvt.s32.f32 %v1512_v59  ;;  %v3084_v23 = vcvt.s32.f32 %v1516_v41  ;;  %v1660_v9 = vunpack.c.3.s8 %v704_v11  ;;  %v3144_v45 = vcvt.s32.f32 %v1576_v56  ;;  %v680_v59 = vld [vmem:[%s7886_s14 + $0x508] sm:$0xff] }
 0x17c   : > { %5360 = vmatpush.bf16.msra.mxu0 %v4424_v46  ;;  %v4332_v32 = vpack.c.bf16 %v3052_v49, %v3048_v55  ;;  %v3148_v5 = vcvt.s32.f32 %v1580_v61  ;;  %v5083_v33 = vadd.f32 %v8196_v4, %v5070_v63  ;;  %5276 = vmatmul.bf16.vlgmr.msra.gmra.mxu1 %v7936_v35  ;;  %v3224_v28 = vcvt.s32.f32 %v1656_v31  ;;  %v700_v56 = vld [vmem:[%s7886_s14 + $0x5a8] sm:$0xff] }
 0x17d   : > { %v4348_v0 = vpack.c.bf16 %v3084_v23, %v3080_v54  ;;  %v3228_v13 = vcvt.s32.f32 %v1660_v9  ;;  %v1472_v47 = vunpack.c.0.s8 %v660_v44  ;;  %v1476_v14 = vunpack.c.1.s8 %v660_v44 }
 0x17e   : > { %5320 = vmatpush.bf16.msrb.mxu1 %v4332_v32  ;;  %v4380_v58 = vpack.c.bf16 %v3148_v5, %v3144_v45  ;;  %v8219_v60 = vadd.f32 %v8200_v51, %v5083_v33  ;;  %v1504_v25 = vunpack.c.0.s8 %v668_v16  ;;  %v1508_v4 = vunpack.c.1.s8 %v668_v16 }
 0x17f   : > { %5337 = vmatpush.bf16.msra.mxu2 %v4348_v0  ;;  %v4420_v12 = vpack.c.bf16 %v3228_v13, %v3224_v28  ;;  %v3040_v53 = vcvt.s32.f32 %v1472_v47  ;;  %v1568_v1 = vunpack.c.0.s8 %v684_v50  ;;  %v3044_v63 = vcvt.s32.f32 %v1476_v14  ;;  %v8227_v28 = vpop.f32.mrf.mxu1 }
 0x180   : > { %5350 = vmatpush.bf16.msra.mxu3 %v4380_v58  ;;  %v3072_v18 = vcvt.s32.f32 %v1504_v25  ;;  %v1572_v21 = vunpack.c.1.s8 %v684_v50  ;;  %v1648_v2 = vunpack.c.0.s8 %v704_v11  ;;  %v3076_v51 = vcvt.s32.f32 %v1508_v4 }
 0x181   : > { %5361 = vmatpush.bf16.msra.mxu0 %v4420_v12  ;;  %v3136_v44 = vcvt.s32.f32 %v1568_v1  ;;  %v1652_v26 = vunpack.c.1.s8 %v704_v11  ;;  %v1464_v55 = vunpack.c.2.s8 %v656_v7  ;;  %v4328_v41 = vpack.c.bf16 %v3044_v63, %v3040_v53 }
 0x182   : > { %v3140_v46 = vcvt.s32.f32 %v1572_v21  ;;  %v3216_v49 = vcvt.s32.f32 %v1648_v2  ;;  %v1468_v16 = vunpack.c.3.s8 %v656_v7  ;;  %v4344_v61 = vpack.c.bf16 %v3076_v51, %v3072_v18  ;;  %v5110_v2 = vpop.f32.mrf.mxu0 }
 0x183   : > { %v3220_v54 = vcvt.s32.f32 %v1652_v26  ;;  %v3032_v23 = vcvt.s32.f32 %v1464_v55  ;;  %v1496_v31 = vunpack.c.2.s8 %v664_v19  ;;  %5321 = vmatpush.bf16.msrb.mxu1 %v4328_v41  ;;  %v1500_v32 = vunpack.c.3.s8 %v664_v19  ;;  %v652_v41 = vld [vmem:[%s7886_s14 + $0x428] sm:$0xff] }
 0x184   : > { %v4376_v50 = vpack.c.bf16 %v3140_v46, %v3136_v44  ;;  %v3036_v9 = vcvt.s32.f32 %v1468_v16  ;;  %v1560_v45 = vunpack.c.2.s8 %v680_v59  ;;  %5338 = vmatpush.bf16.msra.mxu2 %v4344_v61  ;;  %v1564_v11 = vunpack.c.3.s8 %v680_v59 }
 0x185   : > { %v4416_v5 = vpack.c.bf16 %v3220_v54, %v3216_v49  ;;  %v3064_v33 = vcvt.s32.f32 %v1496_v31  ;;  %v1640_v0 = vunpack.c.2.s8 %v700_v56  ;;  %v3068_v47 = vcvt.s32.f32 %v1500_v32  ;;  %v740_v54 = vld [vmem:[%s7886_s14 + $0x6e8] sm:$0xff] }
 0x186   : > { %5351 = vmatpush.bf16.msra.mxu3 %v4376_v50  ;;  %v4324_v13 = vpack.c.bf16 %v3036_v9, %v3032_v23  ;;  %v3128_v58 = vcvt.s32.f32 %v1560_v45  ;;  %v1644_v14 = vunpack.c.3.s8 %v700_v56  ;;  %v3132_v25 = vcvt.s32.f32 %v1564_v11  ;;  %v756_v9 = vld [vmem:[%s7886_s14 + $0x768] sm:$0xff] }
 0x187   : > { %5362 = vmatpush.bf16.msra.mxu0 %v4416_v5  ;;  %v3208_v12 = vcvt.s32.f32 %v1640_v0  ;;  %v1456_v53 = vunpack.c.0.s8 %v656_v7  ;;  %v1460_v4 = vunpack.c.1.s8 %v656_v7  ;;  %v4340_v1 = vpack.c.bf16 %v3068_v47, %v3064_v33  ;;  %v8231_v7 = vpop.f32.mrf.mxu2  ;;  %v696_v47 = vld [vmem:[%s7886_s14 + $0x588] sm:$0xff] }
 0x188   : > { %5322 = vmatpush.bf16.msrb.mxu1 %v4324_v13  ;;  %v3212_v63 = vcvt.s32.f32 %v1644_v14  ;;  %v1488_v18 = vunpack.c.0.s8 %v664_v19  ;;  %v1492_v21 = vunpack.c.1.s8 %v664_v19  ;;  %v4372_v51 = vpack.c.bf16 %v3132_v25, %v3128_v58  ;;  %v8235_v58 = vpop.f32.mrf.mxu3  ;;  %v5123_v14 = vpop.f32.mrf.mxu1 }
 0x189   : > { %v3024_v44 = vcvt.s32.f32 %v1456_v53  ;;  %v3028_v26 = vcvt.s32.f32 %v1460_v4  ;;  %v1552_v55 = vunpack.c.0.s8 %v680_v59  ;;  %5339 = vmatpush.bf16.msra.mxu2 %v4340_v1  ;;  %v1556_v61 = vunpack.c.1.s8 %v680_v59 }
 0x18a   : > { %v4412_v46 = vpack.c.bf16 %v3212_v63, %v3208_v12  ;;  %v3056_v49 = vcvt.s32.f32 %v1488_v18  ;;  %v3060_v16 = vcvt.s32.f32 %v1492_v21  ;;  %5352 = vmatpush.bf16.msra.mxu3 %v4372_v51  ;;  %v1632_v19 = vunpack.c.0.s8 %v700_v56 }
 0x18b   : > { %v4320_v23 = vpack.c.bf16 %v3028_v26, %v3024_v44  ;;  %v3120_v31 = vcvt.s32.f32 %v1552_v55  ;;  %v1636_v50 = vunpack.c.1.s8 %v700_v56  ;;  %v3124_v45 = vcvt.s32.f32 %v1556_v61 }
 0x18c   : > { %5363 = vmatpush.bf16.msra.mxu0 %v4412_v46  ;;  %v4336_v32 = vpack.c.bf16 %v3060_v16, %v3056_v49  ;;  %v1448_v5 = vunpack.c.2.s8 %v652_v41  ;;  %v1452_v33 = vunpack.c.3.s8 %v652_v41  ;;  %v3200_v11 = vcvt.s32.f32 %v1632_v19 }
 0x18d   : > { %5323 = vmatpush.bf16.msrb.mxu1 %v4320_v23  ;;  %v3204_v0 = vcvt.s32.f32 %v1636_v50  ;;  %v1800_v13 = vunpack.c.2.s8 %v740_v54  ;;  %v1804_v59 = vunpack.c.3.s8 %v740_v54  ;;  %v4368_v25 = vpack.c.bf16 %v3124_v45, %v3120_v31 }
 0x18e   : > { %5340 = vmatpush.bf16.msra.mxu2 %v4336_v32  ;;  %v3016_v12 = vcvt.s32.f32 %v1448_v5  ;;  %v3020_v53 = vcvt.s32.f32 %v1452_v33  ;;  %v1864_v56 = vunpack.c.2.s8 %v756_v9  ;;  %v1868_v18 = vunpack.c.3.s8 %v756_v9  ;;  %v648_v33 = vld [vmem:[%s7886_s14 + $0x408] sm:$0xff] }
 0x18f   : > { %v4408_v4 = vpack.c.bf16 %v3204_v0, %v3200_v11  ;;  %v3368_v1 = vcvt.s32.f32 %v1800_v13  ;;  %v3372_v63 = vcvt.s32.f32 %v1804_v59  ;;  %5353 = vmatpush.bf16.msra.mxu3 %v4368_v25  ;;  %v1624_v51 = vunpack.c.2.s8 %v696_v47  ;;  %v5136_v19 = vpop.f32.mrf.mxu2  ;;  %v736_v59 = vld [vmem:[%s7886_s14 + $0x6c8] sm:$0xff] }
 0x190   : > { %v4316_v21 = vpack.c.bf16 %v3020_v53, %v3016_v12  ;;  %v3432_v2 = vcvt.s32.f32 %v1864_v56  ;;  %v1628_v44 = vunpack.c.3.s8 %v696_v47  ;;  %v3436_v55 = vcvt.s32.f32 %v1868_v18  ;;  %v752_v53 = vld [vmem:[%s7886_s14 + $0x748] sm:$0xff]  ;;  %v5149_v56 = vpop.f32.mrf.mxu3 }
 0x191   : > { %5364 = vmatpush.bf16.msra.mxu0 %v4408_v4  ;;  %v4492_v26 = vpack.c.bf16 %v3372_v63, %v3368_v1  ;;  %v1440_v46 = vunpack.c.0.s8 %v652_v41  ;;  %v1444_v49 = vunpack.c.1.s8 %v652_v41  ;;  %5341 = vmatmul.bf16.vlgmr.msra.gmra.mxu2 %v7976_v15  ;;  %v3192_v16 = vcvt.s32.f32 %v1624_v51 }
 0x192   : > { %5324 = vmatpush.bf16.msrb.mxu1 %v4316_v21  ;;  %v3196_v61 = vcvt.s32.f32 %v1628_v44  ;;  %v1792_v23 = vunpack.c.0.s8 %v740_v54  ;;  %v1796_v31 = vunpack.c.1.s8 %v740_v54  ;;  %v4524_v50 = vpack.c.bf16 %v3436_v55, %v3432_v2  ;;  %5354 = vmatmul.bf16.vlgmr.msra.gmra.mxu3 %v7978_v20 }
 0x193   : > { %5385 = vmatpush.bf16.msrb.mxu2 %v4492_v26  ;;  %v3008_v32 = vcvt.s32.f32 %v1440_v46  ;;  %v3012_v45 = vcvt.s32.f32 %v1444_v49  ;;  %v1856_v5 = vunpack.c.0.s8 %v756_v9  ;;  %v1860_v13 = vunpack.c.1.s8 %v756_v9  ;;  %v772_v9 = vld [vmem:[%s7886_s14 + $0x7e8] sm:$0xff] }
 0x194   : > { %v4404_v11 = vpack.c.bf16 %v3196_v61, %v3192_v16  ;;  %v3360_v41 = vcvt.s32.f32 %v1792_v23  ;;  %v3364_v0 = vcvt.s32.f32 %v1796_v31  ;;  %5398 = vmatpush.bf16.msrb.mxu3 %v4524_v50  ;;  %v1616_v54 = vunpack.c.0.s8 %v696_v47 }
 0x195   : > { %v4312_v14 = vpack.c.bf16 %v3012_v45, %v3008_v32  ;;  %v3424_v25 = vcvt.s32.f32 %v1856_v5  ;;  %v1620_v12 = vunpack.c.1.s8 %v696_v47  ;;  %v3428_v1 = vcvt.s32.f32 %v1860_v13 }
 0x196   : > { %5365 = vmatpush.bf16.msra.mxu0 %v4404_v11  ;;  %v4488_v4 = vpack.c.bf16 %v3364_v0, %v3360_v41  ;;  %v1432_v63 = vunpack.c.2.s8 %v648_v33  ;;  %v1436_v18 = vunpack.c.3.s8 %v648_v33  ;;  %v3184_v21 = vcvt.s32.f32 %v1616_v54 }
 0x197   : > { %5325 = vmatpush.bf16.msrb.mxu1 %v4312_v14  ;;  %v3188_v2 = vcvt.s32.f32 %v1620_v12  ;;  %v1784_v51 = vunpack.c.2.s8 %v736_v59  ;;  %v1788_v44 = vunpack.c.3.s8 %v736_v59  ;;  %v4520_v26 = vpack.c.bf16 %v3428_v1, %v3424_v25  ;;  %v724_v1 = vld [vmem:[%s7886_s14 + $0x668] sm:$0xff] }
 0x198   : > { %5386 = vmatpush.bf16.msrb.mxu2 %v4488_v4  ;;  %v3000_v55 = vcvt.s32.f32 %v1432_v63  ;;  %v3004_v46 = vcvt.s32.f32 %v1436_v18  ;;  %v1848_v49 = vunpack.c.2.s8 %v752_v53  ;;  %v1852_v23 = vunpack.c.3.s8 %v752_v53 }
 0x199   : > { %v4400_v16 = vpack.c.bf16 %v3188_v2, %v3184_v21  ;;  %v3352_v47 = vcvt.s32.f32 %v1784_v51  ;;  %v3356_v61 = vcvt.s32.f32 %v1788_v44  ;;  %5399 = vmatpush.bf16.msrb.mxu3 %v4520_v26  ;;  %v1928_v50 = vunpack.c.2.s8 %v772_v9  ;;  %v732_v44 = vld [vmem:[%s7886_s14 + $0x6a8] sm:$0xff] }
 0x19a   : > { %v4308_v31 = vpack.c.bf16 %v3004_v46, %v3000_v55  ;;  %v3416_v19 = vcvt.s32.f32 %v1848_v49  ;;  %v1932_v32 = vunpack.c.3.s8 %v772_v9  ;;  %v3420_v5 = vcvt.s32.f32 %v1852_v23  ;;  %v748_v49 = vld [vmem:[%s7886_s14 + $0x728] sm:$0xff] }
 0x19b   : > { %5366 = vmatpush.bf16.msra.mxu0 %v4400_v16  ;;  %v4484_v45 = vpack.c.bf16 %v3356_v61, %v3352_v47  ;;  %v5109_v11 = vadd.f32 %v8223_v42, %v8219_v60  ;;  %v1424_v41 = vunpack.c.0.s8 %v648_v33  ;;  %v3496_v0 = vcvt.s32.f32 %v1928_v50  ;;  %v768_v23 = vld [vmem:[%s7886_s14 + $0x7c8] sm:$0xff] }
 0x19c   : > { %5326 = vmatpush.bf16.msrb.mxu1 %v4308_v31  ;;  %v3500_v13 = vcvt.s32.f32 %v1932_v32  ;;  %v1428_v14 = vunpack.c.1.s8 %v648_v33  ;;  %v1776_v25 = vunpack.c.0.s8 %v736_v59  ;;  %v4516_v54 = vpack.c.bf16 %v3420_v5, %v3416_v19 }
 0x19d   : > { %5387 = vmatpush.bf16.msrb.mxu2 %v4484_v45  ;;  %v2992_v12 = vcvt.s32.f32 %v1424_v41  ;;  %v1780_v56 = vunpack.c.1.s8 %v736_v59  ;;  %v1840_v4 = vunpack.c.0.s8 %v752_v53  ;;  %v1844_v2 = vunpack.c.1.s8 %v752_v53 }
 0x19e   : > { %v4556_v63 = vpack.c.bf16 %v3500_v13, %v3496_v0  ;;  %v2996_v18 = vcvt.s32.f32 %v1428_v14  ;;  %v3344_v21 = vcvt.s32.f32 %v1776_v25  ;;  %5367 = vmatmul.bf16.vlgmr.msra.gmra.mxu0 %v7981_v24  ;;  %5400 = vmatpush.bf16.msrb.mxu3 %v4516_v54  ;;  %v1920_v33 = vunpack.c.0.s8 %v772_v9 }
 0x19f   : > { %v3348_v60 = vcvt.s32.f32 %v1780_v56  ;;  %v3408_v42 = vcvt.s32.f32 %v1840_v4  ;;  %v1924_v51 = vunpack.c.1.s8 %v772_v9  ;;  %v3412_v55 = vcvt.s32.f32 %v1844_v2 }
 0x1a0   : > { %5411 = vmatpush.bf16.msrb.mxu0 %v4556_v63  ;;  %v4304_v26 = vpack.c.bf16 %v2996_v18, %v2992_v12  ;;  %v5122_v59 = vadd.f32 %v8227_v28, %v5109_v11  ;;  %v1736_v46 = vunpack.c.2.s8 %v724_v1  ;;  %v3488_v47 = vcvt.s32.f32 %v1920_v33  ;;  %v720_v33 = vld [vmem:[%s7886_s14 + $0x648] sm:$0xff] }
 0x1a1   : > { %v4480_v16 = vpack.c.bf16 %v3348_v60, %v3344_v21  ;;  %v3492_v61 = vcvt.s32.f32 %v1924_v51  ;;  %v1740_v53 = vunpack.c.3.s8 %v724_v1  ;;  %v4512_v31 = vpack.c.bf16 %v3412_v55, %v3408_v42 }
 0x1a2   : > { %5327 = vmatpush.bf16.msrb.mxu1 %v4304_v26  ;;  %v3304_v19 = vcvt.s32.f32 %v1736_v46  ;;  %v1768_v50 = vunpack.c.2.s8 %v732_v44  ;;  %v1772_v32 = vunpack.c.3.s8 %v732_v44  ;;  %v1832_v5 = vunpack.c.2.s8 %v748_v49 }
 0x1a3   : > { %5388 = vmatpush.bf16.msrb.mxu2 %v4480_v16  ;;  %v4552_v9 = vpack.c.bf16 %v3492_v61, %v3488_v47  ;;  %v3308_v45 = vcvt.s32.f32 %v1740_v53  ;;  %v1836_v41 = vunpack.c.3.s8 %v748_v49  ;;  %5401 = vmatpush.bf16.msrb.mxu3 %v4512_v31  ;;  %v1912_v11 = vunpack.c.2.s8 %v768_v23  ;;  %v728_v61 = vld [vmem:[%s7886_s14 + $0x688] sm:$0xff]  ;;  %v8258_v53 = vpop.f32.mrf.mxu0 }
 0x1a4   : > { %v3336_v0 = vcvt.s32.f32 %v1768_v50  ;;  %v3340_v28 = vcvt.s32.f32 %v1772_v32  ;;  %v1916_v13 = vunpack.c.3.s8 %v768_v23  ;;  %v3400_v25 = vcvt.s32.f32 %v1832_v5  ;;  %v744_v32 = vld [vmem:[%s7886_s14 + $0x708] sm:$0xff] }
 0x1a5   : > { %5412 = vmatpush.bf16.msrb.mxu0 %v4552_v9  ;;  %v4460_v14 = vpack.c.bf16 %v3308_v45, %v3304_v19  ;;  %5328 = vmatmul.bf16.vlgmr.msrb.gmra.mxu1 %v7974_v10  ;;  %v3404_v54 = vcvt.s32.f32 %v1836_v41  ;;  %v5135_v12 = vadd.f32 %v8231_v7, %v5122_v59  ;;  %v3480_v4 = vcvt.s32.f32 %v1912_v11  ;;  %v764_v41 = vld [vmem:[%s7886_s14 + $0x7a8] sm:$0xff] }
 0x1a6   : > { %v4476_v56 = vpack.c.bf16 %v3340_v28, %v3336_v0  ;;  %v3484_v63 = vcvt.s32.f32 %v1916_v13  ;;  %v1728_v18 = vunpack.c.0.s8 %v724_v1  ;;  %v1732_v2 = vunpack.c.1.s8 %v724_v1  ;;  %v8260_v1 = vpop.f32.mrf.mxu1 }
 0x1a7   : > { %5372 = vmatpush.bf16.msra.mxu1 %v4460_v14  ;;  %v4508_v21 = vpack.c.bf16 %v3404_v54, %v3400_v25  ;;  %v8254_v60 = vadd.f32 %v8235_v58, %v5135_v12  ;;  %v1760_v42 = vunpack.c.0.s8 %v732_v44  ;;  %v1764_v55 = vunpack.c.1.s8 %v732_v44 }
 0x1a8   : > { %5389 = vmatpush.bf16.msrb.mxu2 %v4476_v56  ;;  %v4548_v51 = vpack.c.bf16 %v3484_v63, %v3480_v4  ;;  %v3296_v26 = vcvt.s32.f32 %v1728_v18  ;;  %v1824_v46 = vunpack.c.0.s8 %v748_v49  ;;  %v3300_v7 = vcvt.s32.f32 %v1732_v2 }
 0x1a9   : > { %5402 = vmatpush.bf16.msrb.mxu3 %v4508_v21  ;;  %v3328_v59 = vcvt.s32.f32 %v1760_v42  ;;  %v1828_v16 = vunpack.c.1.s8 %v748_v49  ;;  %v1904_v47 = vunpack.c.0.s8 %v768_v23  ;;  %v3332_v58 = vcvt.s32.f32 %v1764_v55 }
 0x1aa   : > { %5413 = vmatpush.bf16.msrb.mxu0 %v4548_v51  ;;  %v3392_v31 = vcvt.s32.f32 %v1824_v46  ;;  %v1908_v19 = vunpack.c.1.s8 %v768_v23  ;;  %v1720_v50 = vunpack.c.2.s8 %v720_v33  ;;  %v4456_v9 = vpack.c.bf16 %v3300_v7, %v3296_v26 }
 0x1ab   : > { %v3396_v44 = vcvt.s32.f32 %v1828_v16  ;;  %v3472_v45 = vcvt.s32.f32 %v1904_v47  ;;  %v1724_v5 = vunpack.c.3.s8 %v720_v33  ;;  %v4472_v0 = vpack.c.bf16 %v3332_v58, %v3328_v59  ;;  %v5162_v58 = vpop.f32.mrf.mxu0 }
 0x1ac   : > { %v3476_v28 = vcvt.s32.f32 %v1908_v19  ;;  %v3288_v49 = vcvt.s32.f32 %v1720_v50  ;;  %v1752_v11 = vunpack.c.2.s8 %v728_v61  ;;  %5373 = vmatpush.bf16.msra.mxu1 %v4456_v9  ;;  %v1756_v25 = vunpack.c.3.s8 %v728_v61 }
 0x1ad   : > { %v4504_v13 = vpack.c.bf16 %v3396_v44, %v3392_v31  ;;  %v3292_v14 = vcvt.s32.f32 %v1724_v5  ;;  %v1816_v54 = vunpack.c.2.s8 %v744_v32  ;;  %5390 = vmatpush.bf16.msrb.mxu2 %v4472_v0  ;;  %v1820_v23 = vunpack.c.3.s8 %v744_v32  ;;  %v716_v44 = vld [vmem:[%s7886_s14 + $0x628] sm:$0xff] }
 0x1ae   : > { %v4544_v12 = vpack.c.bf16 %v3476_v28, %v3472_v45  ;;  %v3320_v56 = vcvt.s32.f32 %v1752_v11  ;;  %v1896_v4 = vunpack.c.2.s8 %v764_v41  ;;  %v3324_v18 = vcvt.s32.f32 %v1756_v25  ;;  %v5175_v47 = vpop.f32.mrf.mxu1  ;;  %v8267_v25 = vpop.f32.mrf.mxu2 }
 0x1af   : > { %5403 = vmatpush.bf16.msrb.mxu3 %v4504_v13  ;;  %v4452_v63 = vpack.c.bf16 %v3292_v14, %v3288_v49  ;;  %v3384_v21 = vcvt.s32.f32 %v1816_v54  ;;  %v1900_v2 = vunpack.c.3.s8 %v764_v41  ;;  %v3388_v42 = vcvt.s32.f32 %v1820_v23  ;;  %v820_v14 = vld [vmem:[%s7886_s14 + $0x968] sm:$0xff] }
 0x1b0   : > { %5414 = vmatpush.bf16.msrb.mxu0 %v4544_v12  ;;  %v3464_v51 = vcvt.s32.f32 %v1896_v4  ;;  %v1712_v26 = vunpack.c.0.s8 %v720_v33  ;;  %v1716_v55 = vunpack.c.1.s8 %v720_v33  ;;  %v4468_v46 = vpack.c.bf16 %v3324_v18, %v3320_v56  ;;  %v804_v33 = vld [vmem:[%s7886_s14 + $0x8e8] sm:$0xff]  ;;  %v8269_v4 = vpop.f32.mrf.mxu3 }
 0x1b1   : > { %5374 = vmatpush.bf16.msra.mxu1 %v4452_v63  ;;  %v3468_v7 = vcvt.s32.f32 %v1900_v2  ;;  %v1744_v59 = vunpack.c.0.s8 %v728_v61  ;;  %v1748_v16 = vunpack.c.1.s8 %v728_v61  ;;  %v4500_v31 = vpack.c.bf16 %v3388_v42, %v3384_v21  ;;  %v760_v2 = vld [vmem:[%s7886_s14 + $0x788] sm:$0xff] }
 0x1b2   : > { %v3280_v19 = vcvt.s32.f32 %v1712_v26  ;;  %v3284_v50 = vcvt.s32.f32 %v1716_v55  ;;  %v1808_v9 = vunpack.c.0.s8 %v744_v32  ;;  %5391 = vmatpush.bf16.msrb.mxu2 %v4468_v46  ;;  %v1812_v28 = vunpack.c.1.s8 %v744_v32 }
 0x1b3   : > { %v4540_v45 = vpack.c.bf16 %v3468_v7, %v3464_v51  ;;  %v3312_v5 = vcvt.s32.f32 %v1744_v59  ;;  %v3316_v0 = vcvt.s32.f32 %v1748_v16  ;;  %5404 = vmatpush.bf16.msrb.mxu3 %v4500_v31  ;;  %v1888_v13 = vunpack.c.0.s8 %v764_v41 }
 0x1b4   : > { %v4448_v49 = vpack.c.bf16 %v3284_v50, %v3280_v19  ;;  %v3376_v11 = vcvt.s32.f32 %v1808_v9  ;;  %v1892_v61 = vunpack.c.1.s8 %v764_v41  ;;  %v3380_v12 = vcvt.s32.f32 %v1812_v28 }
 0x1b5   : > { %5415 = vmatpush.bf16.msrb.mxu0 %v4540_v45  ;;  %v4464_v54 = vpack.c.bf16 %v3316_v0, %v3312_v5  ;;  %v1704_v56 = vunpack.c.2.s8 %v716_v44  ;;  %v1708_v23 = vunpack.c.3.s8 %v716_v44  ;;  %v3456_v63 = vcvt.s32.f32 %v1888_v13 }
 0x1b6   : > { %5375 = vmatpush.bf16.msra.mxu1 %v4448_v49  ;;  %v3460_v32 = vcvt.s32.f32 %v1892_v61  ;;  %v2056_v18 = vunpack.c.2.s8 %v804_v33  ;;  %v2060_v21 = vunpack.c.3.s8 %v804_v33  ;;  %v4496_v42 = vpack.c.bf16 %v3380_v12, %v3376_v11  ;;  %v712_v12 = vld [vmem:[%s7886_s14 + $0x608] sm:$0xff] }
 0x1b7   : > { %5392 = vmatpush.bf16.msrb.mxu2 %v4464_v54  ;;  %v3272_v51 = vcvt.s32.f32 %v1704_v56  ;;  %v3276_v41 = vcvt.s32.f32 %v1708_v23  ;;  %v2120_v26 = vunpack.c.2.s8 %v820_v14  ;;  %v2124_v59 = vunpack.c.3.s8 %v820_v14  ;;  %v5188_v56 = vpop.f32.mrf.mxu2 }
 0x1b8   : > { %v4536_v55 = vpack.c.bf16 %v3460_v32, %v3456_v63  ;;  %v3624_v46 = vcvt.s32.f32 %v2056_v18  ;;  %v3628_v7 = vcvt.s32.f32 %v2060_v21  ;;  %5405 = vmatpush.bf16.msrb.mxu3 %v4496_v42  ;;  %v1880_v58 = vunpack.c.2.s8 %v760_v2  ;;  %v800_v18 = vld [vmem:[%s7886_s14 + $0x8c8] sm:$0xff]  ;;  %v5201_v21 = vpop.f32.mrf.mxu3 }
 0x1b9   : > { %v4444_v16 = vpack.c.bf16 %v3276_v41, %v3272_v51  ;;  %v3688_v47 = vcvt.s32.f32 %v2120_v26  ;;  %v1884_v31 = vunpack.c.3.s8 %v760_v2  ;;  %v3692_v50 = vcvt.s32.f32 %v2124_v59  ;;  %v816_v26 = vld [vmem:[%s7886_s14 + $0x948] sm:$0xff] }
 0x1ba   : > { %5416 = vmatpush.bf16.msrb.mxu0 %v4536_v55  ;;  %v4620_v19 = vpack.c.bf16 %v3628_v7, %v3624_v46  ;;  %v1696_v9 = vunpack.c.0.s8 %v716_v44  ;;  %v1700_v45 = vunpack.c.1.s8 %v716_v44  ;;  %5393 = vmatmul.bf16.vlgmr.msrb.gmra.mxu2 %v8010_v43  ;;  %v3448_v5 = vcvt.s32.f32 %v1880_v58 }
 0x1bb   : > { %5376 = vmatpush.bf16.msra.mxu1 %v4444_v16  ;;  %v3452_v0 = vcvt.s32.f32 %v1884_v31  ;;  %v2048_v28 = vunpack.c.0.s8 %v804_v33  ;;  %v2052_v49 = vunpack.c.1.s8 %v804_v33  ;;  %v4652_v11 = vpack.c.bf16 %v3692_v50, %v3688_v47  ;;  %5406 = vmatmul.bf16.vlgmr.msrb.gmra.mxu3 %v8012_v48  ;;  %v8277_v16 = vpop.f32.mrf.mxu1 }
 0x1bc   : > { %5437 = vmatpush.bf16.msra.mxu2 %v4620_v19  ;;  %v3264_v13 = vcvt.s32.f32 %v1696_v9  ;;  %v3268_v61 = vcvt.s32.f32 %v1700_v45  ;;  %v2112_v54 = vunpack.c.0.s8 %v820_v14  ;;  %v2116_v32 = vunpack.c.1.s8 %v820_v14  ;;  %v836_v19 = vld [vmem:[%s7886_s14 + $0x9e8] sm:$0xff] }
 0x1bd   : > { %v4532_v23 = vpack.c.bf16 %v3452_v0, %v3448_v5  ;;  %v3616_v44 = vcvt.s32.f32 %v2048_v28  ;;  %v3620_v63 = vcvt.s32.f32 %v2052_v49  ;;  %5450 = vmatpush.bf16.msra.mxu3 %v4652_v11  ;;  %v1872_v51 = vunpack.c.0.s8 %v760_v2 }
 0x1be   : > { %v4440_v42 = vpack.c.bf16 %v3268_v61, %v3264_v13  ;;  %v3680_v33 = vcvt.s32.f32 %v2112_v54  ;;  %v1876_v41 = vunpack.c.1.s8 %v760_v2  ;;  %v3684_v46 = vcvt.s32.f32 %v2116_v32 }
 0x1bf   : > { %5417 = vmatpush.bf16.msrb.mxu0 %v4532_v23  ;;  %v4616_v55 = vpack.c.bf16 %v3620_v63, %v3616_v44  ;;  %v1688_v7 = vunpack.c.2.s8 %v712_v12  ;;  %v1692_v59 = vunpack.c.3.s8 %v712_v12  ;;  %v3440_v47 = vcvt.s32.f32 %v1872_v51 }
 0x1c0   : > { %5377 = vmatpush.bf16.msra.mxu1 %v4440_v42  ;;  %v3444_v58 = vcvt.s32.f32 %v1876_v41  ;;  %v2040_v14 = vunpack.c.2.s8 %v800_v18  ;;  %v2044_v31 = vunpack.c.3.s8 %v800_v18  ;;  %v4648_v50 = vpack.c.bf16 %v3684_v46, %v3680_v33 }
 0x1c1   : > { %5438 = vmatpush.bf16.msra.mxu2 %v4616_v55  ;;  %v3256_v9 = vcvt.s32.f32 %v1688_v7  ;;  %v3260_v45 = vcvt.s32.f32 %v1692_v59  ;;  %v2104_v5 = vunpack.c.2.s8 %v816_v26  ;;  %v2108_v49 = vunpack.c.3.s8 %v816_v26  ;;  %v788_v7 = vld [vmem:[%s7886_s14 + $0x868] sm:$0xff] }
 0x1c2   : > { %v4528_v2 = vpack.c.bf16 %v3444_v58, %v3440_v47  ;;  %v3608_v0 = vcvt.s32.f32 %v2040_v14  ;;  %v3612_v28 = vcvt.s32.f32 %v2044_v31  ;;  %5451 = vmatpush.bf16.msra.mxu3 %v4648_v50  ;;  %v2184_v61 = vunpack.c.2.s8 %v836_v19 }
 0x1c3   : > { %v4436_v11 = vpack.c.bf16 %v3260_v45, %v3256_v9  ;;  %v3672_v13 = vcvt.s32.f32 %v2104_v5  ;;  %v2188_v54 = vunpack.c.3.s8 %v836_v19  ;;  %v3676_v23 = vcvt.s32.f32 %v2108_v49  ;;  %v796_v9 = vld [vmem:[%s7886_s14 + $0x8a8] sm:$0xff] }
 0x1c4   : > { %5418 = vmatpush.bf16.msrb.mxu0 %v4528_v2  ;;  %v4612_v56 = vpack.c.bf16 %v3612_v28, %v3608_v0  ;;  %v5161_v44 = vadd.f32 %v8258_v53, %v8254_v60  ;;  %v1680_v63 = vunpack.c.0.s8 %v712_v12  ;;  %v3752_v32 = vcvt.s32.f32 %v2184_v61  ;;  %v5214_v60 = vpop.f32.mrf.mxu1  ;;  %v812_v2 = vld [vmem:[%s7886_s14 + $0x928] sm:$0xff] }
 0x1c5   : > { %5378 = vmatpush.bf16.msra.mxu1 %v4436_v11  ;;  %v3756_v21 = vcvt.s32.f32 %v2188_v54  ;;  %v1684_v42 = vunpack.c.1.s8 %v712_v12  ;;  %v2032_v33 = vunpack.c.0.s8 %v800_v18  ;;  %v4644_v51 = vpack.c.bf16 %v3676_v23, %v3672_v13  ;;  %v832_v13 = vld [vmem:[%s7886_s14 + $0x9c8] sm:$0xff] }
 0x1c6   : > { %5439 = vmatpush.bf16.msra.mxu2 %v4612_v56  ;;  %v5174_v41 = vadd.f32 %v8260_v1, %v5161_v44  ;;  %v3248_v55 = vcvt.s32.f32 %v1680_v63  ;;  %v2036_v46 = vunpack.c.1.s8 %v800_v18  ;;  %v2096_v14 = vunpack.c.0.s8 %v816_v26 }
 0x1c7   : > { %v4684_v59 = vpack.c.bf16 %v3756_v21, %v3752_v32  ;;  %v3252_v47 = vcvt.s32.f32 %v1684_v42  ;;  %v3600_v58 = vcvt.s32.f32 %v2032_v33  ;;  %5419 = vmatmul.bf16.vlgmr.msrb.gmra.mxu0 %v8015_v52  ;;  %5452 = vmatpush.bf16.msra.mxu3 %v4644_v51  ;;  %v2100_v12 = vunpack.c.1.s8 %v816_v26 }
 0x1c8   : > { %v3604_v53 = vcvt.s32.f32 %v2036_v46  ;;  %v2176_v31 = vunpack.c.0.s8 %v836_v19  ;;  %v2180_v50 = vunpack.c.1.s8 %v836_v19  ;;  %v3664_v45 = vcvt.s32.f32 %v2096_v14 }
 0x1c9   : > { %5463 = vmatpush.bf16.msra.mxu0 %v4684_v59  ;;  %v4432_v1 = vpack.c.bf16 %v3252_v47, %v3248_v55  ;;  %v1992_v18 = vunpack.c.2.s8 %v788_v7  ;;  %v1996_v5 = vunpack.c.3.s8 %v788_v7  ;;  %v3668_v28 = vcvt.s32.f32 %v2100_v12 }
 0x1ca   : > { %v4608_v0 = vpack.c.bf16 %v3604_v53, %v3600_v58  ;;  %v3744_v49 = vcvt.s32.f32 %v2176_v31  ;;  %v3748_v11 = vcvt.s32.f32 %v2180_v50  ;;  %v2024_v56 = vunpack.c.2.s8 %v796_v9 }
 0x1cb   : > { %5379 = vmatpush.bf16.msra.mxu1 %v4432_v1  ;;  %v3560_v61 = vcvt.s32.f32 %v1992_v18  ;;  %v3564_v54 = vcvt.s32.f32 %v1996_v5  ;;  %v2028_v23 = vunpack.c.3.s8 %v796_v9  ;;  %v4640_v26 = vpack.c.bf16 %v3668_v28, %v3664_v45 }
 0x1cc   : > { %5440 = vmatpush.bf16.msra.mxu2 %v4608_v0  ;;  %v4680_v19 = vpack.c.bf16 %v3748_v11, %v3744_v49  ;;  %v2088_v44 = vunpack.c.2.s8 %v812_v2  ;;  %v2092_v63 = vunpack.c.3.s8 %v812_v2  ;;  %v3592_v21 = vcvt.s32.f32 %v2024_v56  ;;  %v792_v49 = vld [vmem:[%s7886_s14 + $0x888] sm:$0xff] }
 0x1cd   : > { %v4588_v32 = vpack.c.bf16 %v3564_v54, %v3560_v61  ;;  %v3596_v42 = vcvt.s32.f32 %v2028_v23  ;;  %v2168_v33 = vunpack.c.2.s8 %v832_v13  ;;  %5453 = vmatpush.bf16.msra.mxu3 %v4640_v26  ;;  %v2172_v46 = vunpack.c.3.s8 %v832_v13 }
 0x1ce   : > { %5464 = vmatpush.bf16.msra.mxu0 %v4680_v19  ;;  %v3656_v51 = vcvt.s32.f32 %v2088_v44  ;;  %v3660_v55 = vcvt.s32.f32 %v2092_v63  ;;  %v5187_v59 = vadd.f32 %v8267_v25, %v5174_v41  ;;  %v1984_v14 = vunpack.c.0.s8 %v788_v7  ;;  %5380 = vmatmul.bf16.vlgmr.msra.gmra.mxu1 %v8008_v39  ;;  %v784_v41 = vld [vmem:[%s7886_s14 + $0x848] sm:$0xff] }
 0x1cf   : > { %5424 = vmatpush.bf16.msrb.mxu1 %v4588_v32  ;;  %v4604_v47 = vpack.c.bf16 %v3596_v42, %v3592_v21  ;;  %v3736_v58 = vcvt.s32.f32 %v2168_v33  ;;  %v1988_v60 = vunpack.c.1.s8 %v788_v7  ;;  %v3740_v12 = vcvt.s32.f32 %v2172_v46  ;;  %v828_v42 = vld [vmem:[%s7886_s14 + $0x9a8] sm:$0xff] }
 0x1d0   : > { %v4636_v53 = vpack.c.bf16 %v3660_v55, %v3656_v51  ;;  %v5200_v31 = vadd.f32 %v8269_v4, %v5187_v59  ;;  %v2016_v50 = vunpack.c.0.s8 %v796_v9  ;;  %v3552_v1 = vcvt.s32.f32 %v1984_v14  ;;  %v808_v4 = vld [vmem:[%s7886_s14 + $0x908] sm:$0xff] }
 0x1d1   : > { %5441 = vmatpush.bf16.msra.mxu2 %v4604_v47  ;;  %v3556_v45 = vcvt.s32.f32 %v1988_v60  ;;  %v2020_v18 = vunpack.c.1.s8 %v796_v9  ;;  %v2080_v25 = vunpack.c.0.s8 %v812_v2  ;;  %v4676_v5 = vpack.c.bf16 %v3740_v12, %v3736_v58 }
 0x1d2   : > { %5454 = vmatpush.bf16.msra.mxu3 %v4636_v53  ;;  %v3584_v0 = vcvt.s32.f32 %v2016_v50  ;;  %v2084_v28 = vunpack.c.1.s8 %v812_v2  ;;  %v2160_v7 = vunpack.c.0.s8 %v832_v13  ;;  %v2164_v56 = vunpack.c.1.s8 %v832_v13 }
 0x1d3   : > { %v4584_v11 = vpack.c.bf16 %v3556_v45, %v3552_v1  ;;  %v3588_v61 = vcvt.s32.f32 %v2020_v18  ;;  %v3648_v54 = vcvt.s32.f32 %v2080_v25  ;;  %5465 = vmatpush.bf16.msra.mxu0 %v4676_v5  ;;  %v1976_v19 = vunpack.c.2.s8 %v784_v41 }
 0x1d4   : > { %v3652_v23 = vcvt.s32.f32 %v2084_v28  ;;  %v3728_v26 = vcvt.s32.f32 %v2160_v7  ;;  %v1980_v44 = vunpack.c.3.s8 %v784_v41  ;;  %v3732_v63 = vcvt.s32.f32 %v2164_v56 }
 0x1d5   : > { %5425 = vmatpush.bf16.msrb.mxu1 %v4584_v11  ;;  %v4600_v9 = vpack.c.bf16 %v3588_v61, %v3584_v0  ;;  %v2008_v32 = vunpack.c.2.s8 %v792_v49  ;;  %v2012_v21 = vunpack.c.3.s8 %v792_v49  ;;  %v3544_v33 = vcvt.s32.f32 %v1976_v19  ;;  %v780_v61 = vld [vmem:[%s7886_s14 + $0x828] sm:$0xff] }
 0x1d6   : > { %v4632_v2 = vpack.c.bf16 %v3652_v23, %v3648_v54  ;;  %v3548_v51 = vcvt.s32.f32 %v1980_v44  ;;  %v2072_v55 = vunpack.c.2.s8 %v808_v4  ;;  %v4672_v46 = vpack.c.bf16 %v3732_v63, %v3728_v26  ;;  %v868_v26 = vld [vmem:[%s7886_s14 + $0xae8] sm:$0xff] }
 0x1d7   : > { %5442 = vmatpush.bf16.msra.mxu2 %v4600_v9  ;;  %v3576_v59 = vcvt.s32.f32 %v2008_v32  ;;  %v3580_v13 = vcvt.s32.f32 %v2012_v21  ;;  %v2076_v47 = vunpack.c.3.s8 %v808_v4  ;;  %v2152_v60 = vunpack.c.2.s8 %v828_v42  ;;  %v884_v21 = vld [vmem:[%s7886_s14 + $0xb68] sm:$0xff] }
 0x1d8   : > { %5455 = vmatpush.bf16.msra.mxu3 %v4632_v2  ;;  %v4580_v58 = vpack.c.bf16 %v3548_v51, %v3544_v33  ;;  %v3640_v14 = vcvt.s32.f32 %v2072_v55  ;;  %v2156_v53 = vunpack.c.3.s8 %v828_v42  ;;  %5466 = vmatpush.bf16.msra.mxu0 %v4672_v46  ;;  %v1968_v1 = vunpack.c.0.s8 %v784_v41 }
 0x1d9   : > { %v4596_v12 = vpack.c.bf16 %v3580_v13, %v3576_v59  ;;  %v3644_v50 = vcvt.s32.f32 %v2076_v47  ;;  %v1972_v45 = vunpack.c.1.s8 %v784_v41  ;;  %v3720_v18 = vcvt.s32.f32 %v2152_v60 }
 0x1da   : > { %5426 = vmatpush.bf16.msrb.mxu1 %v4580_v58  ;;  %v3724_v25 = vcvt.s32.f32 %v2156_v53  ;;  %v8296_v5 = vadd.f32 %v8277_v16, %v5200_v31  ;;  %v3536_v28 = vcvt.s32.f32 %v1968_v1  ;;  %v2000_v11 = vunpack.c.0.s8 %v792_v49 }
 0x1db   : > { %5443 = vmatpush.bf16.msra.mxu2 %v4596_v12  ;;  %v4628_v0 = vpack.c.bf16 %v3644_v50, %v3640_v14  ;;  %v3540_v7 = vcvt.s32.f32 %v1972_v45  ;;  %v2004_v56 = vunpack.c.1.s8 %v792_v49  ;;  %v2064_v23 = vunpack.c.0.s8 %v808_v4  ;;  %v824_v49 = vld [vmem:[%s7886_s14 + $0x988] sm:$0xff] }
 0x1dc   : > { %v4668_v54 = vpack.c.bf16 %v3724_v25, %v3720_v18  ;;  %v3568_v19 = vcvt.s32.f32 %v2000_v11  ;;  %v2068_v44 = vunpack.c.1.s8 %v808_v4  ;;  %v2144_v9 = vunpack.c.0.s8 %v828_v42 }
 0x1dd   : > { %5456 = vmatpush.bf16.msra.mxu3 %v4628_v0  ;;  %v4576_v41 = vpack.c.bf16 %v3540_v7, %v3536_v28  ;;  %v3572_v16 = vcvt.s32.f32 %v2004_v56  ;;  %v3632_v31 = vcvt.s32.f32 %v2064_v23  ;;  %v2148_v63 = vunpack.c.1.s8 %v828_v42 }
 0x1de   : > { %5467 = vmatpush.bf16.msra.mxu0 %v4668_v54  ;;  %v1960_v32 = vunpack.c.2.s8 %v780_v61  ;;  %v3636_v2 = vcvt.s32.f32 %v2068_v44  ;;  %v3712_v33 = vcvt.s32.f32 %v2144_v9  ;;  %v1964_v51 = vunpack.c.3.s8 %v780_v61 }
 0x1df   : > { %5427 = vmatpush.bf16.msrb.mxu1 %v4576_v41  ;;  %v2312_v55 = vunpack.c.2.s8 %v868_v26  ;;  %v4592_v46 = vpack.c.bf16 %v3572_v16, %v3568_v19  ;;  %v3716_v59 = vcvt.s32.f32 %v2148_v63  ;;  %v2316_v47 = vunpack.c.3.s8 %v868_v26 }
 0x1e0   : > { %v3528_v13 = vcvt.s32.f32 %v1960_v32  ;;  %v4624_v58 = vpack.c.bf16 %v3636_v2, %v3632_v31  ;;  %v3532_v14 = vcvt.s32.f32 %v1964_v51  ;;  %v2376_v60 = vunpack.c.2.s8 %v884_v21  ;;  %v776_v31 = vld [vmem:[%s7886_s14 + $0x808] sm:$0xff] }
 0x1e1   : > { %v3880_v4 = vcvt.s32.f32 %v2312_v55  ;;  %5444 = vmatpush.bf16.msra.mxu2 %v4592_v46  ;;  %v4664_v53 = vpack.c.bf16 %v3716_v59, %v3712_v33  ;;  %v3884_v12 = vcvt.s32.f32 %v2316_v47  ;;  %v2380_v42 = vunpack.c.3.s8 %v884_v21  ;;  %v864_v33 = vld [vmem:[%s7886_s14 + $0xac8] sm:$0xff] }
 0x1e2   : > { %v2136_v50 = vunpack.c.2.s8 %v824_v49  ;;  %5457 = vmatpush.bf16.msra.mxu3 %v4624_v58  ;;  %v4572_v1 = vpack.c.bf16 %v3532_v14, %v3528_v13  ;;  %v3944_v45 = vcvt.s32.f32 %v2376_v60  ;;  %v2140_v18 = vunpack.c.3.s8 %v824_v49  ;;  %v880_v59 = vld [vmem:[%s7886_s14 + $0xb48] sm:$0xff] }
 0x1e3   : > { %v1952_v25 = vunpack.c.0.s8 %v780_v61  ;;  %5468 = vmatpush.bf16.msra.mxu0 %v4664_v53  ;;  %v4748_v0 = vpack.c.bf16 %v3884_v12, %v3880_v4  ;;  %v3948_v28 = vcvt.s32.f32 %v2380_v42  ;;  %v1956_v11 = vunpack.c.1.s8 %v780_v61  ;;  %v900_v14 = vld [vmem:[%s7886_s14 + $0xbe8] sm:$0xff] }
 0x1e4   : > { %v3704_v7 = vcvt.s32.f32 %v2136_v50  ;;  %5428 = vmatpush.bf16.msrb.mxu1 %v4572_v1  ;;  %v3708_v54 = vcvt.s32.f32 %v2140_v18  ;;  %v2304_v23 = vunpack.c.0.s8 %v868_v26  ;;  %v2308_v41 = vunpack.c.1.s8 %v868_v26  ;;  %5445 = vmatmul.bf16.vlgmr.msra.gmra.mxu2 %v8047_v22 }
 0x1e5   : > { %v3520_v56 = vcvt.s32.f32 %v1952_v25  ;;  %5489 = vmatpush.bf16.msrb.mxu2 %v4748_v0  ;;  %v4780_v19 = vpack.c.bf16 %v3948_v28, %v3944_v45  ;;  %v3524_v44 = vcvt.s32.f32 %v1956_v11  ;;  %v2368_v9 = vunpack.c.0.s8 %v884_v21  ;;  %5458 = vmatmul.bf16.vlgmr.msra.gmra.mxu3 %v8049_v30 }
 0x1e6   : > { %v2372_v16 = vunpack.c.1.s8 %v884_v21  ;;  %v4660_v63 = vpack.c.bf16 %v3708_v54, %v3704_v7  ;;  %v3872_v61 = vcvt.s32.f32 %v2304_v23  ;;  %v3876_v32 = vcvt.s32.f32 %v2308_v41 }
 0x1e7   : > { %v2128_v2 = vunpack.c.0.s8 %v824_v49  ;;  %5502 = vmatpush.bf16.msrb.mxu3 %v4780_v19  ;;  %v4568_v51 = vpack.c.bf16 %v3524_v44, %v3520_v56  ;;  %v3936_v26 = vcvt.s32.f32 %v2368_v9  ;;  %v2132_v46 = vunpack.c.1.s8 %v824_v49 }
 0x1e8   : > { %v3940_v55 = vcvt.s32.f32 %v2372_v16  ;;  %5469 = vmatpush.bf16.msra.mxu0 %v4660_v63  ;;  %v4744_v13 = vpack.c.bf16 %v3876_v32, %v3872_v61  ;;  %v1944_v58 = vunpack.c.2.s8 %v776_v31  ;;  %v1948_v21 = vunpack.c.3.s8 %v776_v31 }
 0x1e9   : > { %v3696_v47 = vcvt.s32.f32 %v2128_v2  ;;  %5429 = vmatpush.bf16.msrb.mxu1 %v4568_v51  ;;  %v3700_v60 = vcvt.s32.f32 %v2132_v46  ;;  %v2296_v53 = vunpack.c.2.s8 %v864_v33  ;;  %v2300_v12 = vunpack.c.3.s8 %v864_v33 }
 0x1ea   : > { %v4776_v4 = vpack.c.bf16 %v3940_v55, %v3936_v26  ;;  %5490 = vmatpush.bf16.msrb.mxu2 %v4744_v13  ;;  %v3512_v42 = vcvt.s32.f32 %v1944_v58  ;;  %v3516_v50 = vcvt.s32.f32 %v1948_v21  ;;  %v2360_v1 = vunpack.c.2.s8 %v880_v59  ;;  %v852_v26 = vld [vmem:[%s7886_s14 + $0xa68] sm:$0xff] }
 0x1eb   : > { %v2364_v45 = vunpack.c.3.s8 %v880_v59  ;;  %v4656_v18 = vpack.c.bf16 %v3700_v60, %v3696_v47  ;;  %v3864_v49 = vcvt.s32.f32 %v2296_v53  ;;  %v3868_v25 = vcvt.s32.f32 %v2300_v12  ;;  %v876_v60 = vld [vmem:[%s7886_s14 + $0xb28] sm:$0xff] }
 0x1ec   : > { %5503 = vmatpush.bf16.msrb.mxu3 %v4776_v4  ;;  %v2440_v0 = vunpack.c.2.s8 %v900_v14  ;;  %v4564_v28 = vpack.c.bf16 %v3516_v50, %v3512_v42  ;;  %v3928_v7 = vcvt.s32.f32 %v2360_v1  ;;  %v2444_v54 = vunpack.c.3.s8 %v900_v14  ;;  %v896_v50 = vld [vmem:[%s7886_s14 + $0xbc8] sm:$0xff] }
 0x1ed   : > { %v3932_v11 = vcvt.s32.f32 %v2364_v45  ;;  %5470 = vmatpush.bf16.msra.mxu0 %v4656_v18  ;;  %v4740_v56 = vpack.c.bf16 %v3868_v25, %v3864_v49  ;;  %v1936_v41 = vunpack.c.0.s8 %v776_v31  ;;  %v1940_v19 = vunpack.c.1.s8 %v776_v31  ;;  %v860_v31 = vld [vmem:[%s7886_s14 + $0xaa8] sm:$0xff] }
 0x1ee   : > { %v4008_v23 = vcvt.s32.f32 %v2440_v0  ;;  %5430 = vmatpush.bf16.msrb.mxu1 %v4564_v28  ;;  %v4012_v9 = vcvt.s32.f32 %v2444_v54  ;;  %v2288_v16 = vunpack.c.0.s8 %v864_v33  ;;  %v2292_v63 = vunpack.c.1.s8 %v864_v33 }
 0x1ef   : > { %v4772_v44 = vpack.c.bf16 %v3932_v11, %v3928_v7  ;;  %5491 = vmatpush.bf16.msrb.mxu2 %v4740_v56  ;;  %v3504_v61 = vcvt.s32.f32 %v1936_v41  ;;  %v3508_v32 = vcvt.s32.f32 %v1940_v19  ;;  %v2352_v2 = vunpack.c.0.s8 %v880_v59 }
 0x1f0   : > { %v2356_v51 = vunpack.c.1.s8 %v880_v59  ;;  %v4812_v55 = vpack.c.bf16 %v4012_v9, %v4008_v23  ;;  %v3856_v46 = vcvt.s32.f32 %v2288_v16  ;;  %v3860_v13 = vcvt.s32.f32 %v2292_v63  ;;  %5471 = vmatmul.bf16.vlgmr.msra.gmra.mxu0 %v8052_v34 }
 0x1f1   : > { %5504 = vmatpush.bf16.msrb.mxu3 %v4772_v44  ;;  %v2432_v47 = vunpack.c.0.s8 %v900_v14  ;;  %v4560_v58 = vpack.c.bf16 %v3508_v32, %v3504_v61  ;;  %v3920_v21 = vcvt.s32.f32 %v2352_v2  ;;  %v2436_v33 = vunpack.c.1.s8 %v900_v14 }
 0x1f2   : > { %v3924_v4 = vcvt.s32.f32 %v2356_v51  ;;  %5515 = vmatpush.bf16.msrb.mxu0 %v4812_v55  ;;  %v4736_v53 = vpack.c.bf16 %v3860_v13, %v3856_v46  ;;  %v2248_v42 = vunpack.c.2.s8 %v852_v26  ;;  %v2252_v59 = vunpack.c.3.s8 %v852_v26 }
 0x1f3   : > { %v4000_v12 = vcvt.s32.f32 %v2432_v47  ;;  %5431 = vmatpush.bf16.msrb.mxu1 %v4560_v58  ;;  %v4004_v45 = vcvt.s32.f32 %v2436_v33  ;;  %v2280_v18 = vunpack.c.2.s8 %v860_v31  ;;  %v2284_v49 = vunpack.c.3.s8 %v860_v31 }
 0x1f4   : > { %v4768_v1 = vpack.c.bf16 %v3924_v4, %v3920_v21  ;;  %5492 = vmatpush.bf16.msrb.mxu2 %v4736_v53  ;;  %v3816_v25 = vcvt.s32.f32 %v2248_v42  ;;  %v3820_v0 = vcvt.s32.f32 %v2252_v59  ;;  %v2344_v28 = vunpack.c.2.s8 %v876_v60  ;;  %v848_v21 = vld [vmem:[%s7886_s14 + $0xa48] sm:$0xff]  ;;  %v8316_v42 = vpop.f32.mrf.mxu1 }
 0x1f5   : > { %v2348_v7 = vunpack.c.3.s8 %v876_v60  ;;  %v4808_v11 = vpack.c.bf16 %v4004_v45, %v4000_v12  ;;  %v3848_v14 = vcvt.s32.f32 %v2280_v18  ;;  %v3852_v54 = vcvt.s32.f32 %v2284_v49  ;;  %v872_v18 = vld [vmem:[%s7886_s14 + $0xb08] sm:$0xff] }
 0x1f6   : > { %5505 = vmatpush.bf16.msrb.mxu3 %v4768_v1  ;;  %v2424_v56 = vunpack.c.2.s8 %v896_v50  ;;  %v4716_v23 = vpack.c.bf16 %v3820_v0, %v3816_v25  ;;  %5432 = vmatmul.bf16.vlgmr.msrb.gmra.mxu1 %v8045_v17  ;;  %v3912_v41 = vcvt.s32.f32 %v2344_v28  ;;  %v2428_v44 = vunpack.c.3.s8 %v896_v50  ;;  %v892_v28 = vld [vmem:[%s7886_s14 + $0xba8] sm:$0xff] }
 0x1f7   : > { %v3916_v19 = vcvt.s32.f32 %v2348_v7  ;;  %5516 = vmatpush.bf16.msrb.mxu0 %v4808_v11  ;;  %v4732_v9 = vpack.c.bf16 %v3852_v54, %v3848_v14  ;;  %v2240_v63 = vunpack.c.0.s8 %v852_v26  ;;  %v2244_v61 = vunpack.c.1.s8 %v852_v26  ;;  %v856_v26 = vld [vmem:[%s7886_s14 + $0xa88] sm:$0xff] }
 0x1f8   : > { %v3992_v16 = vcvt.s32.f32 %v2424_v56  ;;  %5476 = vmatpush.bf16.msra.mxu1 %v4716_v23  ;;  %v3996_v2 = vcvt.s32.f32 %v2428_v44  ;;  %v2272_v51 = vunpack.c.0.s8 %v860_v31  ;;  %v2276_v55 = vunpack.c.1.s8 %v860_v31 }
 0x1f9   : > { %v4764_v32 = vpack.c.bf16 %v3916_v19, %v3912_v41  ;;  %5493 = vmatpush.bf16.msrb.mxu2 %v4732_v9  ;;  %v3808_v46 = vcvt.s32.f32 %v2240_v63  ;;  %v3812_v13 = vcvt.s32.f32 %v2244_v61  ;;  %v2336_v47 = vunpack.c.0.s8 %v876_v60 }
 0x1fa   : > { %v2340_v58 = vunpack.c.1.s8 %v876_v60  ;;  %v4804_v4 = vpack.c.bf16 %v3996_v2, %v3992_v16  ;;  %v3840_v33 = vcvt.s32.f32 %v2272_v51  ;;  %v3844_v53 = vcvt.s32.f32 %v2276_v55  ;;  %v8320_v51 = vpop.f32.mrf.mxu2  ;;  %v8322_v55 = vpop.f32.mrf.mxu3 }
 0x1fb   : > { %5506 = vmatpush.bf16.msrb.mxu3 %v4764_v32  ;;  %v2416_v12 = vunpack.c.0.s8 %v896_v50  ;;  %v4712_v59 = vpack.c.bf16 %v3812_v13, %v3808_v46  ;;  %v3904_v1 = vcvt.s32.f32 %v2336_v47  ;;  %v2420_v31 = vunpack.c.1.s8 %v896_v50 }
 0x1fc   : > { %v3908_v45 = vcvt.s32.f32 %v2340_v58  ;;  %5517 = vmatpush.bf16.msrb.mxu0 %v4804_v4  ;;  %v4728_v49 = vpack.c.bf16 %v3844_v53, %v3840_v33  ;;  %v2232_v0 = vunpack.c.2.s8 %v848_v21  ;;  %v2236_v60 = vunpack.c.3.s8 %v848_v21 }
 0x1fd   : > { %v3984_v25 = vcvt.s32.f32 %v2416_v12  ;;  %5477 = vmatpush.bf16.msra.mxu1 %v4712_v59  ;;  %v3988_v11 = vcvt.s32.f32 %v2420_v31  ;;  %v2264_v14 = vunpack.c.2.s8 %v856_v26  ;;  %v2268_v54 = vunpack.c.3.s8 %v856_v26  ;;  %v5227_v59 = vpop.f32.mrf.mxu1 }
 0x1fe   : > { %v4760_v7 = vpack.c.bf16 %v3908_v45, %v3904_v1  ;;  %5494 = vmatpush.bf16.msrb.mxu2 %v4728_v49  ;;  %v3800_v56 = vcvt.s32.f32 %v2232_v0  ;;  %v3804_v23 = vcvt.s32.f32 %v2236_v60  ;;  %v2328_v41 = vunpack.c.2.s8 %v872_v18 }
 0x1ff   : > { %v2332_v19 = vunpack.c.3.s8 %v872_v18  ;;  %v4800_v44 = vpack.c.bf16 %v3988_v11, %v3984_v25  ;;  %v3832_v50 = vcvt.s32.f32 %v2264_v14  ;;  %v3836_v9 = vcvt.s32.f32 %v2268_v54  ;;  %v844_v25 = vld [vmem:[%s7886_s14 + $0xa28] sm:$0xff]  ;;  %v533_v11 = vld [vmem:[%s7886_s14 + $0x70] sm:$0xff] }
 0x200   : > { %5507 = vmatpush.bf16.msrb.mxu3 %v4760_v7  ;;  %v2408_v16 = vunpack.c.2.s8 %v892_v28  ;;  %v4708_v63 = vpack.c.bf16 %v3804_v23, %v3800_v56  ;;  %v3896_v61 = vcvt.s32.f32 %v2328_v41  ;;  %v2412_v2 = vunpack.c.3.s8 %v892_v28  ;;  %v8327_v41 = vpop.f32.mrf.mxu0 }
 0x201   : > { %v3900_v32 = vcvt.s32.f32 %v2332_v19  ;;  %5518 = vmatpush.bf16.msrb.mxu0 %v4800_v44  ;;  %v4724_v46 = vpack.c.bf16 %v3836_v9, %v3832_v50  ;;  %v2224_v47 = vunpack.c.0.s8 %v848_v21  ;;  %v2228_v58 = vunpack.c.1.s8 %v848_v21  ;;  %v888_v9 = vld [vmem:[%s7886_s14 + $0xb88] sm:$0xff] }
 0x202   : > { %v3976_v13 = vcvt.s32.f32 %v2408_v16  ;;  %5478 = vmatpush.bf16.msra.mxu1 %v4708_v63  ;;  %v3980_v33 = vcvt.s32.f32 %v2412_v2  ;;  %v2256_v53 = vunpack.c.0.s8 %v856_v26  ;;  %v2260_v12 = vunpack.c.1.s8 %v856_v26  ;;  %v549_v26 = vld [vmem:[%s7886_s14 + $0xf0] sm:$0xff] }
 0x203   : > { %v4756_v4 = vpack.c.bf16 %v3900_v32, %v3896_v61  ;;  %5495 = vmatpush.bf16.msrb.mxu2 %v4724_v46  ;;  %v3792_v1 = vcvt.s32.f32 %v2224_v47  ;;  %v3796_v45 = vcvt.s32.f32 %v2228_v58  ;;  %v2320_v31 = vunpack.c.0.s8 %v872_v18  ;;  %v5253_v58 = vpop.f32.mrf.mxu3 }
 0x204   : > { %v2324_v49 = vunpack.c.1.s8 %v872_v18  ;;  %v4796_v0 = vpack.c.bf16 %v3980_v33, %v3976_v13  ;;  %v3824_v60 = vcvt.s32.f32 %v2256_v53  ;;  %v3828_v7 = vcvt.s32.f32 %v2260_v12 }
 0x205   : > { %5508 = vmatpush.bf16.msrb.mxu3 %v4756_v4  ;;  %v2400_v21 = vunpack.c.0.s8 %v892_v28  ;;  %v4704_v14 = vpack.c.bf16 %v3796_v45, %v3792_v1  ;;  %v3888_v54 = vcvt.s32.f32 %v2320_v31  ;;  %v2404_v23 = vunpack.c.1.s8 %v892_v28  ;;  %v5240_v28 = vpop.f32.mrf.mxu2 }
 0x206   : > { %v3892_v56 = vcvt.s32.f32 %v2324_v49  ;;  %5519 = vmatpush.bf16.msrb.mxu0 %v4796_v0  ;;  %v4720_v19 = vpack.c.bf16 %v3828_v7, %v3824_v60  ;;  %v2216_v50 = vunpack.c.2.s8 %v844_v25  ;;  %v2220_v18 = vunpack.c.3.s8 %v844_v25  ;;  %v545_v28 = vld [vmem:[%s7886_s14 + $0xd0] sm:$0xff] }
 0x207   : > { %v3968_v44 = vcvt.s32.f32 %v2400_v21  ;;  %5479 = vmatpush.bf16.msra.mxu1 %v4704_v14  ;;  %v3972_v63 = vcvt.s32.f32 %v2404_v23  ;;  %v969_v61 = vunpack.c.2.s8 %v533_v11  ;;  %v973_v32 = vunpack.c.3.s8 %v533_v11 }
 0x208   : > { %v4752_v16 = vpack.c.bf16 %v3892_v56, %v3888_v54  ;;  %5496 = vmatpush.bf16.msrb.mxu2 %v4720_v19  ;;  %v3784_v2 = vcvt.s32.f32 %v2216_v50  ;;  %v3788_v46 = vcvt.s32.f32 %v2220_v18  ;;  %v1033_v13 = vunpack.c.2.s8 %v549_v26  ;;  %v840_v18 = vld [vmem:[%s7886_s14 + $0xa08] sm:$0xff] }
 0x209   : > { %v1037_v47 = vunpack.c.3.s8 %v549_v26  ;;  %v4792_v4 = vpack.c.bf16 %v3972_v63, %v3968_v44  ;;  %v2537_v33 = vcvt.s32.f32 %v969_v61  ;;  %v2541_v53 = vcvt.s32.f32 %v973_v32 }
 0x20a   : > { %5509 = vmatpush.bf16.msrb.mxu3 %v4752_v16  ;;  %v2392_v12 = vunpack.c.2.s8 %v888_v9  ;;  %v4700_v59 = vpack.c.bf16 %v3788_v46, %v3784_v2  ;;  %v2601_v1 = vcvt.s32.f32 %v1033_v13  ;;  %v2396_v31 = vunpack.c.3.s8 %v888_v9  ;;  %v5266_v16 = vpop.f32.mrf.mxu0  ;;  %v529_v2 = vld [vmem:[%s7886_s14 + $0x50] sm:$0xff] }
 0x20b   : > { %v2605_v45 = vcvt.s32.f32 %v1037_v47  ;;  %5520 = vmatpush.bf16.msrb.mxu0 %v4792_v4  ;;  %v4077_v49 = vpack.c.bf16 %v2541_v53, %v2537_v33  ;;  %v2208_v60 = vunpack.c.0.s8 %v844_v25  ;;  %v2212_v7 = vunpack.c.1.s8 %v844_v25  ;;  %5497 = vmatmul.bf16.vlgmr.msrb.gmra.mxu2 %v8088_v27 }
 0x20c   : > { %v3960_v0 = vcvt.s32.f32 %v2392_v12  ;;  %5480 = vmatpush.bf16.msra.mxu1 %v4700_v59  ;;  %v3964_v14 = vcvt.s32.f32 %v2396_v31  ;;  %v961_v54 = vunpack.c.0.s8 %v533_v11  ;;  %v965_v56 = vunpack.c.1.s8 %v533_v11  ;;  %v8336_v31 = vpop.f32.mrf.mxu1 }
 0x20d   : > { %v4109_v21 = vpack.c.bf16 %v2605_v45, %v2601_v1  ;;  %5510 = vmatmul.bf16.vlgmr.msrb.gmra.mxu3 %v8091_v38  ;;  %5541 = vmatpush.bf16.msra.mxu2 %v4077_v49  ;;  %v3776_v23 = vcvt.s32.f32 %v2208_v60  ;;  %v3780_v19 = vcvt.s32.f32 %v2212_v7  ;;  %v1025_v44 = vunpack.c.0.s8 %v549_v26 }
 0x20e   : > { %v1029_v50 = vunpack.c.1.s8 %v549_v26  ;;  %v4788_v25 = vpack.c.bf16 %v3964_v14, %v3960_v0  ;;  %v2529_v63 = vcvt.s32.f32 %v961_v54  ;;  %v2533_v61 = vcvt.s32.f32 %v965_v56  ;;  %v565_v26 = vld [vmem:[%s7886_s14 + $0x170] sm:$0xff] }
 0x20f   : > { %5554 = vmatpush.bf16.msra.mxu3 %v4109_v21  ;;  %v2384_v32 = vunpack.c.0.s8 %v888_v9  ;;  %v4696_v46 = vpack.c.bf16 %v3780_v19, %v3776_v23  ;;  %v2593_v13 = vcvt.s32.f32 %v1025_v44  ;;  %v2388_v47 = vunpack.c.1.s8 %v888_v9 }
 0x210   : > { %v2597_v11 = vcvt.s32.f32 %v1029_v50  ;;  %5521 = vmatpush.bf16.msrb.mxu0 %v4788_v25  ;;  %v4073_v58 = vpack.c.bf16 %v2533_v61, %v2529_v63  ;;  %v2200_v33 = vunpack.c.2.s8 %v840_v18  ;;  %v2204_v53 = vunpack.c.3.s8 %v840_v18 }
 0x211   : > { %v3952_v4 = vcvt.s32.f32 %v2384_v32  ;;  %5481 = vmatpush.bf16.msra.mxu1 %v4696_v46  ;;  %v3956_v59 = vcvt.s32.f32 %v2388_v47  ;;  %v953_v1 = vunpack.c.2.s8 %v529_v2  ;;  %v957_v45 = vunpack.c.3.s8 %v529_v2 }
 0x212   : > { %v4105_v12 = vpack.c.bf16 %v2597_v11, %v2593_v13  ;;  %5542 = vmatpush.bf16.msra.mxu2 %v4073_v58  ;;  %v3768_v49 = vcvt.s32.f32 %v2200_v33  ;;  %v3772_v0 = vcvt.s32.f32 %v2204_v53  ;;  %v1017_v60 = vunpack.c.2.s8 %v545_v28  ;;  %v908_v33 = vld [vmem:[%s7886_s14 + $0xc28] sm:$0xff] }
 0x213   : > { %v1021_v7 = vunpack.c.3.s8 %v545_v28  ;;  %v4784_v9 = vpack.c.bf16 %v3956_v59, %v3952_v4  ;;  %v2521_v21 = vcvt.s32.f32 %v953_v1  ;;  %v2525_v14 = vcvt.s32.f32 %v957_v45  ;;  %v8340_v45 = vld [vmem:[%s7886_s14 + $0x30] sm:$0xff] }
 0x214   : > { %5555 = vmatpush.bf16.msra.mxu3 %v4105_v12  ;;  %v1097_v54 = vunpack.c.2.s8 %v565_v26  ;;  %v4692_v56 = vpack.c.bf16 %v3772_v0, %v3768_v49  ;;  %v2585_v23 = vcvt.s32.f32 %v1017_v60  ;;  %v1101_v44 = vunpack.c.3.s8 %v565_v26 }
 0x215   : > { %v2589_v19 = vcvt.s32.f32 %v1021_v7  ;;  %5522 = vmatpush.bf16.msrb.mxu0 %v4784_v9  ;;  %v4069_v50 = vpack.c.bf16 %v2525_v14, %v2521_v21  ;;  %v2192_v25 = vunpack.c.0.s8 %v840_v18  ;;  %v2196_v63 = vunpack.c.1.s8 %v840_v18  ;;  %v8343_v18 = vpop.f32.mrf.mxu2  ;;  %v541_v7 = vld [vmem:[%s7886_s14 + $0xb0] sm:$0xff]  ;;  %v8346_v9 = vpop.f32.mrf.mxu3 }
 0x216   : > { %v2665_v16 = vcvt.s32.f32 %v1097_v54  ;;  %5482 = vmatpush.bf16.msra.mxu1 %v4692_v56  ;;  %v2669_v32 = vcvt.s32.f32 %v1101_v44  ;;  %v945_v46 = vunpack.c.0.s8 %v529_v2  ;;  %v949_v13 = vunpack.c.1.s8 %v529_v2 }
 0x217   : > { %v4101_v61 = vpack.c.bf16 %v2589_v19, %v2585_v23  ;;  %5543 = vmatpush.bf16.msra.mxu2 %v4069_v50  ;;  %v3760_v11 = vcvt.s32.f32 %v2192_v25  ;;  %v3764_v47 = vcvt.s32.f32 %v2196_v63  ;;  %v1009_v58 = vunpack.c.0.s8 %v545_v28 }
 0x218   : > { %v1013_v4 = vunpack.c.1.s8 %v545_v28  ;;  %v4141_v53 = vpack.c.bf16 %v2669_v32, %v2665_v16  ;;  %v2513_v12 = vcvt.s32.f32 %v945_v46  ;;  %v2517_v59 = vcvt.s32.f32 %v949_v13  ;;  %5523 = vmatmul.bf16.vlgmr.msrb.gmra.mxu0 %v8093_v40  ;;  %v5279_v28 = vpop.f32.mrf.mxu1  ;;  %v561_v16 = vld [vmem:[%s7886_s14 + $0x150] sm:$0xff] }
 0x219   : > { %5556 = vmatpush.bf16.msra.mxu3 %v4101_v61  ;;  %v1089_v1 = vunpack.c.0.s8 %v565_v26  ;;  %v4688_v49 = vpack.c.bf16 %v3764_v47, %v3760_v11  ;;  %v2577_v2 = vcvt.s32.f32 %v1009_v58  ;;  %v1093_v60 = vunpack.c.1.s8 %v565_v26  ;;  %v8354_v47 = vpop.f32.mrf.mxu0 }
 0x21a   : > { %v2581_v0 = vcvt.s32.f32 %v1013_v4  ;;  %5567 = vmatpush.bf16.msra.mxu0 %v4141_v53  ;;  %v4065_v21 = vpack.c.bf16 %v2517_v59, %v2513_v12  ;;  %v2472_v54 = vunpack.c.2.s8 %v908_v33  ;;  %v2476_v56 = vunpack.c.3.s8 %v908_v33 }
 0x21b   : > { %v2657_v14 = vcvt.s32.f32 %v1089_v1  ;;  %5483 = vmatpush.bf16.msra.mxu1 %v4688_v49  ;;  %v2661_v19 = vcvt.s32.f32 %v1093_v60  ;;  %v5239_v44 = vadd.f32 %v8320_v51, %v8316_v42  ;;  %v937_v50 = vunpack.c.2.s8 %v8340_v45 }
 0x21c   : > { %v4097_v23 = vpack.c.bf16 %v2581_v0, %v2577_v2  ;;  %5544 = vmatpush.bf16.msra.mxu2 %v4065_v21  ;;  %v4040_v26 = vcvt.s32.f32 %v2472_v54  ;;  %v4044_v25 = vcvt.s32.f32 %v2476_v56  ;;  %v941_v63 = vunpack.c.3.s8 %v8340_v45  ;;  %v904_v56 = vld [vmem:[%s7886_s14 + $0xc08] sm:$0xff] }
 0x21d   : > { %v1001_v61 = vunpack.c.2.s8 %v541_v7  ;;  %v4137_v32 = vpack.c.bf16 %v2661_v19, %v2657_v14  ;;  %v5252_v46 = vadd.f32 %v8322_v55, %v5239_v44  ;;  %v2505_v13 = vcvt.s32.f32 %v937_v50  ;;  %v5292_v60 = vpop.f32.mrf.mxu2 }
 0x21e   : > { %5557 = vmatpush.bf16.msra.mxu3 %v4097_v23  ;;  %v1005_v11 = vunpack.c.3.s8 %v541_v7  ;;  %v4828_v58 = vpack.c.bf16 %v4044_v25, %v4040_v26  ;;  %5484 = vmatmul.bf16.vlgmr.msra.gmra.mxu1 %v8086_v6  ;;  %v2509_v42 = vcvt.s32.f32 %v941_v63  ;;  %v1081_v4 = vunpack.c.2.s8 %v561_v16  ;;  %v5305_v23 = vpop.f32.mrf.mxu3  ;;  %v8364_v26 = vld [vmem:[%s7886_s14 + $0x10] sm:$0xff] }
 0x21f   : > { %v2569_v51 = vcvt.s32.f32 %v1001_v61  ;;  %5568 = vmatpush.bf16.msra.mxu0 %v4137_v32  ;;  %v1085_v12 = vunpack.c.3.s8 %v561_v16  ;;  %v2464_v59 = vunpack.c.0.s8 %v908_v33  ;;  %v2468_v1 = vunpack.c.1.s8 %v908_v33  ;;  %v8371_v23 = vld [vmem:[%s7886_s14 + $0x1f0] sm:$0xff] }
 0x220   : > { %v2573_v53 = vcvt.s32.f32 %v1005_v11  ;;  %5532 = vmatpush.bf16.msrb.mxu1 %v4828_v58  ;;  %v4061_v49 = vpack.c.bf16 %v2509_v42, %v2505_v13  ;;  %v2649_v55 = vcvt.s32.f32 %v1081_v4  ;;  %v8358_v2 = vadd.f32 %v8327_v41, %v5252_v46  ;;  %v537_v58 = vld [vmem:[%s7886_s14 + $0x90] sm:$0xff] }
 0x221   : > { %v929_v0 = vunpack.c.0.s8 %v8340_v45  ;;  %v2653_v21 = vcvt.s32.f32 %v1085_v12  ;;  %v4032_v14 = vcvt.s32.f32 %v2464_v59  ;;  %v4036_v54 = vcvt.s32.f32 %v2468_v1  ;;  %v557_v4 = vld [vmem:[%s7886_s14 + $0x130] sm:$0xff] }
 0x222   : > { %v4093_v28 = vpack.c.bf16 %v2573_v53, %v2569_v51  ;;  %5545 = vmatpush.bf16.msra.mxu2 %v4061_v49  ;;  %v933_v33 = vunpack.c.1.s8 %v8340_v45  ;;  %v993_v44 = vunpack.c.0.s8 %v541_v7  ;;  %v997_v50 = vunpack.c.1.s8 %v541_v7  ;;  %v5318_v53 = vpop.f32.mrf.mxu0 }
 0x223   : > { %v2497_v19 = vcvt.s32.f32 %v929_v0  ;;  %v4133_v41 = vpack.c.bf16 %v2653_v21, %v2649_v55  ;;  %v4824_v25 = vpack.c.bf16 %v4036_v54, %v4032_v14  ;;  %v1073_v63 = vunpack.c.0.s8 %v561_v16 }
 0x224   : > { %5558 = vmatpush.bf16.msra.mxu3 %v4093_v28  ;;  %v1077_v61 = vunpack.c.1.s8 %v561_v16  ;;  %v2501_v32 = vcvt.s32.f32 %v933_v33  ;;  %v2561_v46 = vcvt.s32.f32 %v993_v44  ;;  %v2565_v13 = vcvt.s32.f32 %v997_v50 }
 0x225   : > { %v2456_v11 = vunpack.c.2.s8 %v904_v56  ;;  %5569 = vmatpush.bf16.msra.mxu0 %v4133_v41  ;;  %5533 = vmatpush.bf16.msrb.mxu1 %v4824_v25  ;;  %v2641_v42 = vcvt.s32.f32 %v1073_v63  ;;  %v2460_v51 = vunpack.c.3.s8 %v904_v56  ;;  %v921_v7 = vunpack.c.2.s8 %v8364_v26 }
 0x226   : > { %v2645_v45 = vcvt.s32.f32 %v1077_v61  ;;  %v4057_v12 = vpack.c.bf16 %v2501_v32, %v2497_v19  ;;  %v4089_v59 = vpack.c.bf16 %v2565_v13, %v2561_v46  ;;  %v925_v16 = vunpack.c.3.s8 %v8364_v26 }
 0x227   : > { %v4024_v1 = vcvt.s32.f32 %v2456_v11  ;;  %v4028_v55 = vcvt.s32.f32 %v2460_v51  ;;  %v2489_v0 = vcvt.s32.f32 %v921_v7  ;;  %v985_v60 = vunpack.c.2.s8 %v537_v58  ;;  %v8379_v7 = vld [vmem:[%s7886_s14 + $0x270] sm:$0xff] }
 0x228   : > { %v4129_v49 = vpack.c.bf16 %v2645_v45, %v2641_v42  ;;  %5546 = vmatpush.bf16.msra.mxu2 %v4057_v12  ;;  %5559 = vmatpush.bf16.msra.mxu3 %v4089_v59  ;;  %v2493_v28 = vcvt.s32.f32 %v925_v16  ;;  %v989_v21 = vunpack.c.3.s8 %v537_v58  ;;  %v1065_v14 = vunpack.c.2.s8 %v557_v4 }
 0x229   : > { %v1069_v54 = vunpack.c.3.s8 %v557_v4  ;;  %v4820_v33 = vpack.c.bf16 %v4028_v55, %v4024_v1  ;;  %v2553_v44 = vcvt.s32.f32 %v985_v60  ;;  %v2448_v19 = vunpack.c.0.s8 %v904_v56  ;;  %v613_v60 = vld [vmem:[%s7886_s14 + $0x2f0] sm:$0xff] }
 0x22a   : > { %5570 = vmatpush.bf16.msra.mxu0 %v4129_v49  ;;  %v2452_v50 = vunpack.c.1.s8 %v904_v56  ;;  %v4053_v41 = vpack.c.bf16 %v2493_v28, %v2489_v0  ;;  %v2557_v25 = vcvt.s32.f32 %v989_v21  ;;  %v2633_v63 = vcvt.s32.f32 %v1065_v14 }
 0x22b   : > { %v2637_v61 = vcvt.s32.f32 %v1069_v54  ;;  %5534 = vmatpush.bf16.msrb.mxu1 %v4820_v33  ;;  %v4016_v32 = vcvt.s32.f32 %v2448_v19  ;;  %v1161_v13 = vunpack.c.2.s8 %v8371_v23  ;;  %v1165_v11 = vunpack.c.3.s8 %v8371_v23 }
 0x22c   : > { %v4020_v46 = vcvt.s32.f32 %v2452_v50  ;;  %5547 = vmatpush.bf16.msra.mxu2 %v4053_v41  ;;  %v4085_v42 = vpack.c.bf16 %v2557_v25, %v2553_v44  ;;  %v5278_v51 = vadd.f32 %v8336_v31, %v8358_v2  ;;  %v913_v56 = vunpack.c.0.s8 %v8364_v26 }
 0x22d   : > { %v4125_v45 = vpack.c.bf16 %v2637_v61, %v2633_v63  ;;  %v2729_v12 = vcvt.s32.f32 %v1161_v13  ;;  %v2733_v59 = vcvt.s32.f32 %v1165_v11  ;;  %v917_v1 = vunpack.c.1.s8 %v8364_v26 }
 0x22e   : > { %v4816_v53 = vpack.c.bf16 %v4020_v46, %v4016_v32  ;;  %5560 = vmatpush.bf16.msra.mxu3 %v4085_v42  ;;  %v2481_v16 = vcvt.s32.f32 %v913_v56  ;;  %v977_v49 = vunpack.c.0.s8 %v537_v58  ;;  %v981_v55 = vunpack.c.1.s8 %v537_v58  ;;  %v553_v58 = vld [vmem:[%s7886_s14 + $0x110] sm:$0xff]  ;;  %v7667_v46 = vld [vmem:[#allocation1] sm:$0xff] }
 0x22f   : > { %5571 = vmatpush.bf16.msra.mxu0 %v4125_v45  ;;  %v1057_v0 = vunpack.c.0.s8 %v557_v4  ;;  %v4173_v28 = vpack.c.bf16 %v2733_v59, %v2729_v12  ;;  %v2485_v31 = vcvt.s32.f32 %v917_v1  ;;  %v1061_v2 = vunpack.c.1.s8 %v557_v4  ;;  %v8391_v59 = vpop.f32.mrf.mxu1 }
 0x230   : > { %5535 = vmatpush.bf16.msrb.mxu1 %v4816_v53  ;;  %v1225_v21 = vunpack.c.2.s8 %v8379_v7  ;;  %v2545_v14 = vcvt.s32.f32 %v977_v49  ;;  %v2549_v54 = vcvt.s32.f32 %v981_v55  ;;  %v1229_v44 = vunpack.c.3.s8 %v8379_v7  ;;  %v8395_v49 = vld [vmem:[%s7886_s14 + $0x1d0] sm:$0xff] }
 0x231   : > { %v2625_v33 = vcvt.s32.f32 %v1057_v0  ;;  %v4049_v26 = vpack.c.bf16 %v2485_v31, %v2481_v16  ;;  %v2629_v19 = vcvt.s32.f32 %v1061_v2  ;;  %v1289_v41 = vunpack.c.2.s8 %v613_v60 }
 0x232   : > { %v2793_v50 = vcvt.s32.f32 %v1225_v21  ;;  %v4081_v25 = vpack.c.bf16 %v2549_v54, %v2545_v14  ;;  %v2797_v63 = vcvt.s32.f32 %v1229_v44  ;;  %v1293_v61 = vunpack.c.3.s8 %v613_v60  ;;  %v593_v14 = vld [vmem:[%s7886_s14 + $0x250] sm:$0xff] }
 0x233   : > { %v5291_v32 = vadd.f32 %v8343_v18, %v5278_v51  ;;  %7552 = vmatmul.msk.bf16.vlgmr.msrb.gmra.mxu1 %vm4888_vm0, %v7667_v46  ;;  %5548 = vmatpush.bf16.msra.mxu2 %v4049_v26  ;;  %v4121_v4 = vpack.c.bf16 %v2629_v19, %v2625_v33  ;;  %v2857_v13 = vcvt.s32.f32 %v1289_v41  ;;  %v1153_v11 = vunpack.c.0.s8 %v8371_v23  ;;  %v609_v41 = vld [vmem:[%s7886_s14 + $0x2d0] sm:$0xff] }
 0x234   : > { %5580 = vmatpush.bf16.msra.mxu1 %v4173_v28  ;;  %v1157_v42 = vunpack.c.1.s8 %v8371_v23  ;;  %5561 = vmatpush.bf16.msra.mxu3 %v4081_v25  ;;  %v4205_v45 = vpack.c.bf16 %v2797_v63, %v2793_v50  ;;  %v2861_v56 = vcvt.s32.f32 %v1293_v61  ;;  %v1049_v12 = vunpack.c.2.s8 %v553_v58  ;;  %v8407_v25 = vpop.f32.mrf.mxu2 }
 0x235   : > { %v5304_v53 = vadd.f32 %v8346_v9, %v5291_v32  ;;  %5572 = vmatpush.bf16.msra.mxu0 %v4121_v4  ;;  %v2721_v18 = vcvt.s32.f32 %v1153_v11  ;;  %v1053_v1 = vunpack.c.3.s8 %v553_v58  ;;  %v1217_v16 = vunpack.c.0.s8 %v8379_v7  ;;  %v629_v4 = vld [vmem:[%s7886_s14 + $0x370] sm:$0xff] }
 0x236   : > { %v2725_v51 = vcvt.s32.f32 %v1157_v42  ;;  %v4237_v55 = vpack.c.bf16 %v2861_v56, %v2857_v13  ;;  %v2617_v23 = vcvt.s32.f32 %v1049_v12  ;;  %v1221_v0 = vunpack.c.1.s8 %v8379_v7  ;;  %5549 = vmatmul.bf16.vlgmr.msra.gmra.mxu2 %v7911_v57 }
 0x237   : > { %5593 = vmatpush.bf16.msrb.mxu2 %v4205_v45  ;;  %v1281_v28 = vunpack.c.0.s8 %v613_v60  ;;  %v2621_v9 = vcvt.s32.f32 %v1053_v1  ;;  %v2785_v2 = vcvt.s32.f32 %v1217_v16  ;;  %v1285_v21 = vunpack.c.1.s8 %v613_v60  ;;  %5562 = vmatmul.bf16.vlgmr.msra.gmra.mxu3 %v7913_v62  ;;  %v8410_v45 = vpop.f32.mrf.mxu3 }
 0x238   : > { %v4169_v31 = vpack.c.bf16 %v2725_v51, %v2721_v18  ;;  %5606 = vmatpush.bf16.msrb.mxu3 %v4237_v55  ;;  %v2789_v54 = vcvt.s32.f32 %v1221_v0  ;;  %v8402_v44 = vadd.f32 %v8354_v47, %v5304_v53  ;;  %v1145_v7 = vunpack.c.2.s8 %v8395_v49  ;;  %v5331_v51 = vpop.f32.mrf.mxu1 }
 0x239   : > { %v2849_v33 = vcvt.s32.f32 %v1281_v28  ;;  %v4117_v26 = vpack.c.bf16 %v2621_v9, %v2617_v23  ;;  %v2853_v19 = vcvt.s32.f32 %v1285_v21  ;;  %v1149_v50 = vunpack.c.3.s8 %v8395_v49  ;;  %v605_v51 = vld [vmem:[%s7886_s14 + $0x2b0] sm:$0xff] }
 0x23a   : > { %5581 = vmatpush.bf16.msra.mxu1 %v4169_v31  ;;  %v1041_v60 = vunpack.c.0.s8 %v553_v58  ;;  %v4201_v63 = vpack.c.bf16 %v2789_v54, %v2785_v2  ;;  %v2713_v61 = vcvt.s32.f32 %v1145_v7  ;;  %v1045_v32 = vunpack.c.1.s8 %v553_v58 }
 0x23b   : > { %v1209_v46 = vunpack.c.2.s8 %v593_v14  ;;  %5573 = vmatpush.bf16.msra.mxu0 %v4117_v26  ;;  %v4233_v13 = vpack.c.bf16 %v2853_v19, %v2849_v33  ;;  %v2717_v47 = vcvt.s32.f32 %v1149_v50  ;;  %v1213_v42 = vunpack.c.3.s8 %v593_v14  ;;  %v573_v50 = vld [vmem:[%s7886_s14 + $0x1b0] sm:$0xff] }
 0x23c   : > { %v2609_v11 = vcvt.s32.f32 %v1041_v60  ;;  %5594 = vmatpush.bf16.msrb.mxu2 %v4201_v63  ;;  %v2613_v56 = vcvt.s32.f32 %v1045_v32  ;;  %v1273_v12 = vunpack.c.2.s8 %v609_v41  ;;  %v1277_v18 = vunpack.c.3.s8 %v609_v41 }
 0x23d   : > { %v2777_v53 = vcvt.s32.f32 %v1209_v46  ;;  %5607 = vmatpush.bf16.msrb.mxu3 %v4233_v13  ;;  %v4165_v1 = vpack.c.bf16 %v2717_v47, %v2713_v61  ;;  %v2781_v16 = vcvt.s32.f32 %v1213_v42  ;;  %v1353_v55 = vunpack.c.2.s8 %v629_v4  ;;  %v8415_v46 = vpop.f32.mrf.mxu0  ;;  %v5344_v13 = vpop.f32.mrf.mxu2 }
 0x23e   : > { %v1357_v58 = vunpack.c.3.s8 %v629_v4  ;;  %v4113_v23 = vpack.c.bf16 %v2613_v56, %v2609_v11  ;;  %v2841_v0 = vcvt.s32.f32 %v1273_v12  ;;  %v2845_v28 = vcvt.s32.f32 %v1277_v18  ;;  %v589_v56 = vld [vmem:[%s7886_s14 + $0x230] sm:$0xff] }
 0x23f   : > { %v1137_v31 = vunpack.c.0.s8 %v8395_v49  ;;  %5582 = vmatpush.bf16.msra.mxu1 %v4165_v1  ;;  %v4197_v9 = vpack.c.bf16 %v2781_v16, %v2777_v53  ;;  %v2921_v2 = vcvt.s32.f32 %v1353_v55  ;;  %v1141_v54 = vunpack.c.1.s8 %v8395_v49  ;;  %v5357_v1 = vpop.f32.mrf.mxu3 }
 0x240   : > { %v2925_v21 = vcvt.s32.f32 %v1357_v58  ;;  %5574 = vmatpush.bf16.msra.mxu0 %v4113_v23  ;;  %v4229_v33 = vpack.c.bf16 %v2845_v28, %v2841_v0  ;;  %v1201_v26 = vunpack.c.0.s8 %v593_v14  ;;  %v1205_v19 = vunpack.c.1.s8 %v593_v14  ;;  %v625_v23 = vld [vmem:[%s7886_s14 + $0x350] sm:$0xff] }
 0x241   : > { %v2705_v7 = vcvt.s32.f32 %v1137_v31  ;;  %5595 = vmatpush.bf16.msrb.mxu2 %v4197_v9  ;;  %v2709_v63 = vcvt.s32.f32 %v1141_v54  ;;  %v1265_v61 = vunpack.c.0.s8 %v609_v41  ;;  %v1269_v32 = vunpack.c.1.s8 %v609_v41  ;;  %v569_v1 = vld [vmem:[%s7886_s14 + $0x190] sm:$0xff] }
 0x242   : > { %v4269_v60 = vpack.c.bf16 %v2925_v21, %v2921_v2  ;;  %5608 = vmatpush.bf16.msrb.mxu3 %v4229_v33  ;;  %v2769_v47 = vcvt.s32.f32 %v1201_v26  ;;  %v2773_v49 = vcvt.s32.f32 %v1205_v19  ;;  %v1345_v11 = vunpack.c.0.s8 %v629_v4 }
 0x243   : > { %v1349_v42 = vunpack.c.1.s8 %v629_v4  ;;  %v4161_v53 = vpack.c.bf16 %v2709_v63, %v2705_v7  ;;  %v2833_v14 = vcvt.s32.f32 %v1265_v61  ;;  %v2837_v12 = vcvt.s32.f32 %v1269_v32  ;;  %5575 = vmatmul.bf16.vlgmr.msra.gmra.mxu0 %v7915_v3 }
 0x244   : > { %5619 = vmatpush.bf16.msrb.mxu0 %v4269_v60  ;;  %v1129_v18 = vunpack.c.2.s8 %v573_v50  ;;  %v4193_v16 = vpack.c.bf16 %v2773_v49, %v2769_v47  ;;  %v2913_v55 = vcvt.s32.f32 %v1345_v11  ;;  %v1133_v58 = vunpack.c.3.s8 %v573_v50 }
 0x245   : > { %v2917_v41 = vcvt.s32.f32 %v1349_v42  ;;  %5583 = vmatpush.bf16.msra.mxu1 %v4161_v53  ;;  %v4225_v0 = vpack.c.bf16 %v2837_v12, %v2833_v14  ;;  %v1193_v31 = vunpack.c.2.s8 %v589_v56  ;;  %v1197_v4 = vunpack.c.3.s8 %v589_v56  ;;  %v5370_v42 = vpop.f32.mrf.mxu0 }
 0x246   : > { %v2697_v28 = vcvt.s32.f32 %v1129_v18  ;;  %5596 = vmatpush.bf16.msrb.mxu2 %v4193_v16  ;;  %v2701_v2 = vcvt.s32.f32 %v1133_v58  ;;  %v1257_v21 = vunpack.c.2.s8 %v605_v51  ;;  %v1261_v54 = vunpack.c.3.s8 %v605_v51 }
 0x247   : > { %v4265_v9 = vpack.c.bf16 %v2917_v41, %v2913_v55  ;;  %5609 = vmatpush.bf16.msrb.mxu3 %v4225_v0  ;;  %v2761_v33 = vcvt.s32.f32 %v1193_v31  ;;  %v2765_v7 = vcvt.s32.f32 %v1197_v4  ;;  %v1337_v26 = vunpack.c.2.s8 %v625_v23  ;;  %v585_v4 = vld [vmem:[%s7886_s14 + $0x210] sm:$0xff] }
 0x248   : > { %v1341_v19 = vunpack.c.3.s8 %v625_v23  ;;  %v4157_v60 = vpack.c.bf16 %v2701_v2, %v2697_v28  ;;  %v2825_v63 = vcvt.s32.f32 %v1257_v21  ;;  %v2829_v61 = vcvt.s32.f32 %v1261_v54 }
 0x249   : > { %5620 = vmatpush.bf16.msrb.mxu0 %v4265_v9  ;;  %v1121_v32 = vunpack.c.0.s8 %v573_v50  ;;  %v4189_v13 = vpack.c.bf16 %v2765_v7, %v2761_v33  ;;  %v2905_v47 = vcvt.s32.f32 %v1337_v26  ;;  %v1125_v11 = vunpack.c.1.s8 %v573_v50 }
 0x24a   : > { %v2909_v49 = vcvt.s32.f32 %v1341_v19  ;;  %5584 = vmatpush.bf16.msra.mxu1 %v4157_v60  ;;  %v4221_v53 = vpack.c.bf16 %v2829_v61, %v2825_v63  ;;  %v1185_v12 = vunpack.c.0.s8 %v589_v56  ;;  %v1189_v18 = vunpack.c.1.s8 %v589_v56  ;;  %v601_v56 = vld [vmem:[%s7886_s14 + $0x290] sm:$0xff] }
 0x24b   : > { %v2689_v14 = vcvt.s32.f32 %v1121_v32  ;;  %5597 = vmatpush.bf16.msrb.mxu2 %v4189_v13  ;;  %v2693_v55 = vcvt.s32.f32 %v1125_v11  ;;  %v1249_v41 = vunpack.c.0.s8 %v605_v51  ;;  %v1253_v58 = vunpack.c.1.s8 %v605_v51  ;;  %v621_v60 = vld [vmem:[%s7886_s14 + $0x330] sm:$0xff] }
 0x24c   : > { %v4261_v16 = vpack.c.bf16 %v2909_v49, %v2905_v47  ;;  %5610 = vmatpush.bf16.msrb.mxu3 %v4221_v53  ;;  %v2753_v0 = vcvt.s32.f32 %v1185_v12  ;;  %v2757_v28 = vcvt.s32.f32 %v1189_v18  ;;  %v1329_v31 = vunpack.c.0.s8 %v625_v23  ;;  %v8428_v12 = vld [vmem:[%s7886_s14 + $0x3f0] sm:$0xff] }
 0x24d   : > { %v1333_v50 = vunpack.c.1.s8 %v625_v23  ;;  %v4153_v9 = vpack.c.bf16 %v2693_v55, %v2689_v14  ;;  %v2817_v2 = vcvt.s32.f32 %v1249_v41  ;;  %v2821_v21 = vcvt.s32.f32 %v1253_v58 }
 0x24e   : > { %5621 = vmatpush.bf16.msrb.mxu0 %v4261_v16  ;;  %v1113_v54 = vunpack.c.2.s8 %v569_v1  ;;  %v4185_v33 = vpack.c.bf16 %v2757_v28, %v2753_v0  ;;  %v2897_v7 = vcvt.s32.f32 %v1329_v31  ;;  %v1117_v19 = vunpack.c.3.s8 %v569_v1 }
 0x24f   : > { %v2901_v26 = vcvt.s32.f32 %v1333_v50  ;;  %5585 = vmatpush.bf16.msra.mxu1 %v4153_v9  ;;  %v4217_v51 = vpack.c.bf16 %v2821_v21, %v2817_v2  ;;  %v5330_v61 = vadd.f32 %v8391_v59, %v8402_v44  ;;  %v1177_v23 = vunpack.c.2.s8 %v585_v4 }
 0x250   : > { %v2681_v63 = vcvt.s32.f32 %v1113_v54  ;;  %5598 = vmatpush.bf16.msrb.mxu2 %v4185_v33  ;;  %v2685_v13 = vcvt.s32.f32 %v1117_v19  ;;  %v1181_v47 = vunpack.c.3.s8 %v585_v4  ;;  %v1241_v49 = vunpack.c.2.s8 %v601_v56 }
 0x251   : > { %v4257_v32 = vpack.c.bf16 %v2901_v26, %v2897_v7  ;;  %5611 = vmatpush.bf16.msrb.mxu3 %v4217_v51  ;;  %v2745_v11 = vcvt.s32.f32 %v1177_v23  ;;  %v1245_v42 = vunpack.c.3.s8 %v601_v56  ;;  %v1321_v53 = vunpack.c.2.s8 %v621_v60 }
 0x252   : > { %v1325_v14 = vunpack.c.3.s8 %v621_v60  ;;  %v4149_v18 = vpack.c.bf16 %v2685_v13, %v2681_v63  ;;  %v2749_v16 = vcvt.s32.f32 %v1181_v47  ;;  %v2809_v55 = vcvt.s32.f32 %v1241_v49 }
 0x253   : > { %5622 = vmatpush.bf16.msrb.mxu0 %v4257_v32  ;;  %v1105_v41 = vunpack.c.0.s8 %v569_v1  ;;  %v2813_v58 = vcvt.s32.f32 %v1245_v42  ;;  %v2889_v59 = vcvt.s32.f32 %v1321_v53  ;;  %v1109_v0 = vunpack.c.1.s8 %v569_v1  ;;  %v661_v1 = vld [vmem:[%s7886_s14 + $0x470] sm:$0xff] }
 0x254   : > { %v2893_v44 = vcvt.s32.f32 %v1325_v14  ;;  %5586 = vmatpush.bf16.msra.mxu1 %v4149_v18  ;;  %v4181_v28 = vpack.c.bf16 %v2749_v16, %v2745_v11  ;;  %v5343_v50 = vadd.f32 %v8407_v25, %v5330_v61  ;;  %v1417_v9 = vunpack.c.2.s8 %v8428_v12  ;;  %v677_v11 = vld [vmem:[%s7886_s14 + $0x4f0] sm:$0xff] }
 0x255   : > { %v2673_v31 = vcvt.s32.f32 %v1105_v41  ;;  %v4213_v2 = vpack.c.bf16 %v2813_v58, %v2809_v55  ;;  %v2677_v54 = vcvt.s32.f32 %v1109_v0  ;;  %v1421_v33 = vunpack.c.3.s8 %v8428_v12  ;;  %v617_v41 = vld [vmem:[%s7886_s14 + $0x310] sm:$0xff] }
 0x256   : > { %v4253_v21 = vpack.c.bf16 %v2893_v44, %v2889_v59  ;;  %5599 = vmatpush.bf16.msrb.mxu2 %v4181_v28  ;;  %v2985_v7 = vcvt.s32.f32 %v1417_v9  ;;  %v5356_v26 = vadd.f32 %v8410_v45, %v5343_v50  ;;  %v1169_v19 = vunpack.c.0.s8 %v585_v4 }
 0x257   : > { %v1173_v51 = vunpack.c.1.s8 %v585_v4  ;;  %5612 = vmatpush.bf16.msrb.mxu3 %v4213_v2  ;;  %v4145_v63 = vpack.c.bf16 %v2677_v54, %v2673_v31  ;;  %v2989_v23 = vcvt.s32.f32 %v1421_v33  ;;  %v1233_v25 = vunpack.c.0.s8 %v601_v56  ;;  %v8443_v54 = vpop.f32.mrf.mxu1 }
 0x258   : > { %5623 = vmatpush.bf16.msrb.mxu0 %v4253_v21  ;;  %v1237_v61 = vunpack.c.1.s8 %v601_v56  ;;  %v2737_v32 = vcvt.s32.f32 %v1169_v19  ;;  %v1313_v47 = vunpack.c.0.s8 %v621_v60  ;;  %v1317_v49 = vunpack.c.1.s8 %v621_v60 }
 0x259   : > { %v2741_v13 = vcvt.s32.f32 %v1173_v51  ;;  %5587 = vmatpush.bf16.msra.mxu1 %v4145_v63  ;;  %v4301_v42 = vpack.c.bf16 %v2989_v23, %v2985_v7  ;;  %v2801_v53 = vcvt.s32.f32 %v1233_v25  ;;  %v1481_v45 = vunpack.c.2.s8 %v661_v1  ;;  %v8446_v63 = vld [vmem:[%s7886_s14 + $0x3d0] sm:$0xff] }
 0x25a   : > { %v2805_v14 = vcvt.s32.f32 %v1237_v61  ;;  %v2881_v4 = vcvt.s32.f32 %v1313_v47  ;;  %v2885_v16 = vcvt.s32.f32 %v1317_v49  ;;  %v1485_v55 = vunpack.c.3.s8 %v661_v1 }
 0x25b   : > { %v4177_v18 = vpack.c.bf16 %v2741_v13, %v2737_v32  ;;  %v3049_v59 = vcvt.s32.f32 %v1481_v45  ;;  %v1545_v44 = vunpack.c.2.s8 %v677_v11  ;;  %v1549_v56 = vunpack.c.3.s8 %v677_v11 }
 0x25c   : > { %v4209_v58 = vpack.c.bf16 %v2805_v14, %v2801_v53  ;;  %v4249_v0 = vpack.c.bf16 %v2885_v16, %v2881_v4  ;;  %v3053_v60 = vcvt.s32.f32 %v1485_v55  ;;  %v8438_v28 = vadd.f32 %v8415_v46, %v5356_v26  ;;  %5588 = vmatmul.bf16.vlgmr.msra.gmra.mxu1 %v7918_v8  ;;  %v657_v14 = vld [vmem:[%s7886_s14 + $0x450] sm:$0xff]  ;;  %v8454_v55 = vpop.f32.mrf.mxu2 }
 0x25d   : > { %5632 = vmatpush.bf16.msrb.mxu1 %v4301_v42  ;;  %5600 = vmatpush.bf16.msrb.mxu2 %v4177_v18  ;;  %v1409_v31 = vunpack.c.0.s8 %v8428_v12  ;;  %v3113_v50 = vcvt.s32.f32 %v1545_v44  ;;  %v3117_v9 = vcvt.s32.f32 %v1549_v56  ;;  %v1413_v2 = vunpack.c.1.s8 %v8428_v12  ;;  %v673_v16 = vld [vmem:[%s7886_s14 + $0x4d0] sm:$0xff] }
 0x25e   : > { %5613 = vmatpush.bf16.msrb.mxu3 %v4209_v58  ;;  %v1305_v21 = vunpack.c.2.s8 %v617_v41  ;;  %5624 = vmatpush.bf16.msrb.mxu0 %v4249_v0  ;;  %v4333_v33 = vpack.c.bf16 %v3053_v60, %v3049_v59  ;;  %v1309_v19 = vunpack.c.3.s8 %v617_v41  ;;  %v1473_v51 = vunpack.c.0.s8 %v661_v1  ;;  %v693_v56 = vld [vmem:[%s7886_s14 + $0x570] sm:$0xff] }
 0x25f   : > { %v2977_v7 = vcvt.s32.f32 %v1409_v31  ;;  %v4365_v46 = vpack.c.bf16 %v3117_v9, %v3113_v50  ;;  %v2981_v26 = vcvt.s32.f32 %v1413_v2  ;;  %v1477_v25 = vunpack.c.1.s8 %v661_v1  ;;  %v8457_v9 = vpop.f32.mrf.mxu3 }
 0x260   : > { %v2873_v23 = vcvt.s32.f32 %v1305_v21  ;;  %5601 = vmatmul.bf16.vlgmr.msrb.gmra.mxu2 %v7936_v35  ;;  %v2877_v12 = vcvt.s32.f32 %v1309_v19  ;;  %v3041_v61 = vcvt.s32.f32 %v1473_v51  ;;  %v1537_v32 = vunpack.c.0.s8 %v677_v11  ;;  %v5383_v19 = vpop.f32.mrf.mxu1 }
 0x261   : > { %5645 = vmatpush.bf16.msra.mxu2 %v4333_v33  ;;  %v1541_v13 = vunpack.c.1.s8 %v677_v11  ;;  %5614 = vmatmul.bf16.vlgmr.msrb.gmra.mxu3 %v7940_v37  ;;  %v4297_v47 = vpack.c.bf16 %v2981_v26, %v2977_v7  ;;  %v3045_v49 = vcvt.s32.f32 %v1477_v25  ;;  %v1401_v42 = vunpack.c.2.s8 %v8446_v63  ;;  %v669_v19 = vld [vmem:[%s7886_s14 + $0x4b0] sm:$0xff] }
 0x262   : > { %5658 = vmatpush.bf16.msra.mxu3 %v4365_v46  ;;  %v1405_v53 = vunpack.c.3.s8 %v8446_v63  ;;  %v4245_v1 = vpack.c.bf16 %v2877_v12, %v2873_v23  ;;  %v3105_v45 = vcvt.s32.f32 %v1537_v32  ;;  %v1297_v4 = vunpack.c.0.s8 %v617_v41 }
 0x263   : > { %v3109_v18 = vcvt.s32.f32 %v1541_v13  ;;  %5633 = vmatpush.bf16.msrb.mxu1 %v4297_v47  ;;  %v4329_v11 = vpack.c.bf16 %v3045_v49, %v3041_v61  ;;  %v2969_v58 = vcvt.s32.f32 %v1401_v42  ;;  %v1301_v44 = vunpack.c.1.s8 %v617_v41 }
 0x264   : > { %v2973_v59 = vcvt.s32.f32 %v1405_v53  ;;  %5625 = vmatpush.bf16.msrb.mxu0 %v4245_v1  ;;  %v2865_v60 = vcvt.s32.f32 %v1297_v4  ;;  %v1465_v31 = vunpack.c.2.s8 %v657_v14  ;;  %v1469_v50 = vunpack.c.3.s8 %v657_v14 }
 0x265   : > { %v4361_v0 = vpack.c.bf16 %v3109_v18, %v3105_v45  ;;  %5646 = vmatpush.bf16.msra.mxu2 %v4329_v11  ;;  %v2869_v21 = vcvt.s32.f32 %v1301_v44  ;;  %v1529_v33 = vunpack.c.2.s8 %v673_v16  ;;  %v1533_v7 = vunpack.c.3.s8 %v673_v16  ;;  %v637_v18 = vld [vmem:[%s7886_s14 + $0x3b0] sm:$0xff]  ;;  %v8462_v44 = vpop.f32.mrf.mxu0 }
 0x266   : > { %v4293_v2 = vpack.c.bf16 %v2973_v59, %v2969_v58  ;;  %v3033_v51 = vcvt.s32.f32 %v1465_v31  ;;  %v3037_v46 = vcvt.s32.f32 %v1469_v50  ;;  %v1609_v26 = vunpack.c.2.s8 %v693_v56 }
 0x267   : > { %5659 = vmatpush.bf16.msra.mxu3 %v4361_v0  ;;  %v1613_v41 = vunpack.c.3.s8 %v693_v56  ;;  %v4241_v23 = vpack.c.bf16 %v2869_v21, %v2865_v60  ;;  %v3097_v25 = vcvt.s32.f32 %v1529_v33  ;;  %v3101_v12 = vcvt.s32.f32 %v1533_v7  ;;  %v5396_v0 = vpop.f32.mrf.mxu2 }
 0x268   : > { %5634 = vmatpush.bf16.msrb.mxu1 %v4293_v2  ;;  %v1393_v61 = vunpack.c.0.s8 %v8446_v63  ;;  %v4325_v32 = vpack.c.bf16 %v3037_v46, %v3033_v51  ;;  %v3177_v13 = vcvt.s32.f32 %v1609_v26  ;;  %v1397_v49 = vunpack.c.1.s8 %v8446_v63  ;;  %v653_v2 = vld [vmem:[%s7886_s14 + $0x430] sm:$0xff]  ;;  %v5409_v51 = vpop.f32.mrf.mxu3 }
 0x269   : > { %v3181_v47 = vcvt.s32.f32 %v1613_v41  ;;  %5626 = vmatpush.bf16.msrb.mxu0 %v4241_v23  ;;  %v4357_v42 = vpack.c.bf16 %v3101_v12, %v3097_v25  ;;  %v1457_v1 = vunpack.c.0.s8 %v657_v14  ;;  %v1461_v45 = vunpack.c.1.s8 %v657_v14  ;;  %v689_v23 = vld [vmem:[%s7886_s14 + $0x550] sm:$0xff] }
 0x26a   : > { %v2961_v53 = vcvt.s32.f32 %v1393_v61  ;;  %5647 = vmatpush.bf16.msra.mxu2 %v4325_v32  ;;  %v2965_v11 = vcvt.s32.f32 %v1397_v49  ;;  %v1521_v58 = vunpack.c.0.s8 %v673_v16  ;;  %v1525_v59 = vunpack.c.1.s8 %v673_v16  ;;  %v633_v51 = vld [vmem:[%s7886_s14 + $0x390] sm:$0xff] }
 0x26b   : > { %v4397_v4 = vpack.c.bf16 %v3181_v47, %v3177_v13  ;;  %5660 = vmatpush.bf16.msra.mxu3 %v4357_v42  ;;  %v3025_v60 = vcvt.s32.f32 %v1457_v1  ;;  %v3029_v63 = vcvt.s32.f32 %v1461_v45  ;;  %v1601_v31 = vunpack.c.0.s8 %v693_v56 }
 0x26c   : > { %v1605_v50 = vunpack.c.1.s8 %v693_v56  ;;  %v4289_v21 = vpack.c.bf16 %v2965_v11, %v2961_v53  ;;  %v3089_v14 = vcvt.s32.f32 %v1521_v58  ;;  %v3093_v33 = vcvt.s32.f32 %v1525_v59  ;;  %5627 = vmatmul.bf16.vlgmr.msrb.gmra.mxu0 %v7931_v29 }
 0x26d   : > { %5671 = vmatpush.bf16.msra.mxu0 %v4397_v4  ;;  %v1385_v7 = vunpack.c.2.s8 %v637_v18  ;;  %v4321_v46 = vpack.c.bf16 %v3029_v63, %v3025_v60  ;;  %v3169_v26 = vcvt.s32.f32 %v1601_v31  ;;  %v1389_v41 = vunpack.c.3.s8 %v637_v18 }
 0x26e   : > { %v3173_v16 = vcvt.s32.f32 %v1605_v50  ;;  %5635 = vmatpush.bf16.msrb.mxu1 %v4289_v21  ;;  %v4353_v25 = vpack.c.bf16 %v3093_v33, %v3089_v14  ;;  %v1449_v61 = vunpack.c.2.s8 %v653_v2  ;;  %v1453_v56 = vunpack.c.3.s8 %v653_v2  ;;  %v5422_v50 = vpop.f32.mrf.mxu0 }
 0x26f   : > { %v2953_v12 = vcvt.s32.f32 %v1385_v7  ;;  %5648 = vmatpush.bf16.msra.mxu2 %v4321_v46  ;;  %v2957_v13 = vcvt.s32.f32 %v1389_v41  ;;  %v1513_v47 = vunpack.c.2.s8 %v669_v19  ;;  %v1517_v49 = vunpack.c.3.s8 %v669_v19 }
 0x270   : > { %v4393_v32 = vpack.c.bf16 %v3173_v16, %v3169_v26  ;;  %5661 = vmatpush.bf16.msra.mxu3 %v4353_v25  ;;  %v3017_v42 = vcvt.s32.f32 %v1449_v61  ;;  %v3021_v53 = vcvt.s32.f32 %v1453_v56  ;;  %v1593_v1 = vunpack.c.2.s8 %v689_v23  ;;  %v649_v56 = vld [vmem:[%s7886_s14 + $0x410] sm:$0xff] }
 0x271   : > { %v1597_v45 = vunpack.c.3.s8 %v689_v23  ;;  %v4285_v4 = vpack.c.bf16 %v2957_v13, %v2953_v12  ;;  %v3081_v11 = vcvt.s32.f32 %v1513_v47  ;;  %v3085_v58 = vcvt.s32.f32 %v1517_v49 }
 0x272   : > { %5672 = vmatpush.bf16.msra.mxu0 %v4393_v32  ;;  %v1377_v59 = vunpack.c.0.s8 %v637_v18  ;;  %v4317_v0 = vpack.c.bf16 %v3021_v53, %v3017_v42  ;;  %v3161_v60 = vcvt.s32.f32 %v1593_v1  ;;  %v1381_v31 = vunpack.c.1.s8 %v637_v18 }
 0x273   : > { %v3165_v63 = vcvt.s32.f32 %v1597_v45  ;;  %5636 = vmatpush.bf16.msrb.mxu1 %v4285_v4  ;;  %v4349_v21 = vpack.c.bf16 %v3085_v58, %v3081_v11  ;;  %v1441_v33 = vunpack.c.0.s8 %v653_v2  ;;  %v1445_v7 = vunpack.c.1.s8 %v653_v2  ;;  %v665_v2 = vld [vmem:[%s7886_s14 + $0x490] sm:$0xff] }
 0x274   : > { %v2945_v14 = vcvt.s32.f32 %v1377_v59  ;;  %5649 = vmatpush.bf16.msra.mxu2 %v4317_v0  ;;  %v2949_v26 = vcvt.s32.f32 %v1381_v31  ;;  %v1505_v16 = vunpack.c.0.s8 %v669_v19  ;;  %v1509_v41 = vunpack.c.1.s8 %v669_v19  ;;  %v685_v4 = vld [vmem:[%s7886_s14 + $0x530] sm:$0xff] }
 0x275   : > { %v4389_v46 = vpack.c.bf16 %v3165_v63, %v3161_v60  ;;  %5662 = vmatpush.bf16.msra.mxu3 %v4349_v21  ;;  %v3009_v25 = vcvt.s32.f32 %v1441_v33  ;;  %v3013_v12 = vcvt.s32.f32 %v1445_v7  ;;  %v1585_v61 = vunpack.c.0.s8 %v689_v23  ;;  %v8475_v33 = vld [vmem:[%s7886_s14 + $0x5f0] sm:$0xff] }
 0x276   : > { %v1589_v18 = vunpack.c.1.s8 %v689_v23  ;;  %v4281_v32 = vpack.c.bf16 %v2949_v26, %v2945_v14  ;;  %v3073_v13 = vcvt.s32.f32 %v1505_v16  ;;  %v3077_v47 = vcvt.s32.f32 %v1509_v41 }
 0x277   : > { %5673 = vmatpush.bf16.msra.mxu0 %v4389_v46  ;;  %v1369_v49 = vunpack.c.2.s8 %v633_v51  ;;  %v4313_v42 = vpack.c.bf16 %v3013_v12, %v3009_v25  ;;  %v3153_v53 = vcvt.s32.f32 %v1585_v61  ;;  %v1373_v45 = vunpack.c.3.s8 %v633_v51 }
 0x278   : > { %v3157_v1 = vcvt.s32.f32 %v1589_v18  ;;  %5637 = vmatpush.bf16.msrb.mxu1 %v4281_v32  ;;  %v4345_v19 = vpack.c.bf16 %v3077_v47, %v3073_v13  ;;  %v5382_v58 = vadd.f32 %v8443_v54, %v8438_v28  ;;  %v1433_v23 = vunpack.c.2.s8 %v649_v56 }
 0x279   : > { %v2937_v11 = vcvt.s32.f32 %v1369_v49  ;;  %5650 = vmatpush.bf16.msra.mxu2 %v4313_v42  ;;  %v2941_v0 = vcvt.s32.f32 %v1373_v45  ;;  %v1437_v60 = vunpack.c.3.s8 %v649_v56  ;;  %v1497_v63 = vunpack.c.2.s8 %v665_v2 }
 0x27a   : > { %v4385_v59 = vpack.c.bf16 %v3157_v1, %v3153_v53  ;;  %5663 = vmatpush.bf16.msra.mxu3 %v4345_v19  ;;  %v3001_v31 = vcvt.s32.f32 %v1433_v23  ;;  %v1501_v50 = vunpack.c.3.s8 %v665_v2  ;;  %v1577_v21 = vunpack.c.2.s8 %v685_v4 }
 0x27b   : > { %v1581_v14 = vunpack.c.3.s8 %v685_v4  ;;  %v4277_v7 = vpack.c.bf16 %v2941_v0, %v2937_v11  ;;  %v3005_v46 = vcvt.s32.f32 %v1437_v60  ;;  %v3065_v26 = vcvt.s32.f32 %v1497_v63 }
 0x27c   : > { %5674 = vmatpush.bf16.msra.mxu0 %v4385_v59  ;;  %v1361_v16 = vunpack.c.0.s8 %v633_v51  ;;  %v3069_v41 = vcvt.s32.f32 %v1501_v50  ;;  %v3145_v28 = vcvt.s32.f32 %v1577_v21  ;;  %v1365_v25 = vunpack.c.1.s8 %v633_v51  ;;  %v725_v51 = vld [vmem:[%s7886_s14 + $0x670] sm:$0xff] }
 0x27d   : > { %v3149_v54 = vcvt.s32.f32 %v1581_v14  ;;  %5638 = vmatpush.bf16.msrb.mxu1 %v4277_v7  ;;  %v4309_v12 = vpack.c.bf16 %v3005_v46, %v3001_v31  ;;  %v5395_v18 = vadd.f32 %v8454_v55, %v5382_v58  ;;  %v1673_v32 = vunpack.c.2.s8 %v8475_v33  ;;  %v741_v31 = vld [vmem:[%s7886_s14 + $0x6f0] sm:$0xff] }
 0x27e   : > { %v2929_v61 = vcvt.s32.f32 %v1361_v16  ;;  %v4341_v13 = vpack.c.bf16 %v3069_v41, %v3065_v26  ;;  %v2933_v49 = vcvt.s32.f32 %v1365_v25  ;;  %v1677_v42 = vunpack.c.3.s8 %v8475_v33  ;;  %v681_v16 = vld [vmem:[%s7886_s14 + $0x510] sm:$0xff] }
 0x27f   : > { %v4381_v47 = vpack.c.bf16 %v3149_v54, %v3145_v28  ;;  %5651 = vmatpush.bf16.msra.mxu2 %v4309_v12  ;;  %v3241_v53 = vcvt.s32.f32 %v1673_v32  ;;  %v5408_v1 = vadd.f32 %v8457_v9, %v5395_v18  ;;  %v1425_v45 = vunpack.c.0.s8 %v649_v56 }
 0x280   : > { %v1429_v19 = vunpack.c.1.s8 %v649_v56  ;;  %5664 = vmatpush.bf16.msra.mxu3 %v4341_v13  ;;  %v4273_v11 = vpack.c.bf16 %v2933_v49, %v2929_v61  ;;  %v3245_v23 = vcvt.s32.f32 %v1677_v42  ;;  %v1489_v55 = vunpack.c.0.s8 %v665_v2  ;;  %v8490_v49 = vpop.f32.mrf.mxu1 }
 0x281   : > { %5675 = vmatpush.bf16.msra.mxu0 %v4381_v47  ;;  %v1493_v58 = vunpack.c.1.s8 %v665_v2  ;;  %v2993_v59 = vcvt.s32.f32 %v1425_v45  ;;  %v1569_v60 = vunpack.c.0.s8 %v685_v4  ;;  %v1573_v63 = vunpack.c.1.s8 %v685_v4 }
 0x282   : > { %v2997_v0 = vcvt.s32.f32 %v1429_v19  ;;  %5639 = vmatpush.bf16.msrb.mxu1 %v4273_v11  ;;  %v4429_v50 = vpack.c.bf16 %v3245_v23, %v3241_v53  ;;  %v3057_v21 = vcvt.s32.f32 %v1489_v55  ;;  %v1737_v9 = vunpack.c.2.s8 %v725_v51  ;;  %v8493_v11 = vld [vmem:[%s7886_s14 + $0x5d0] sm:$0xff] }
 0x283   : > { %v3061_v14 = vcvt.s32.f32 %v1493_v58  ;;  %v3137_v56 = vcvt.s32.f32 %v1569_v60  ;;  %v3141_v46 = vcvt.s32.f32 %v1573_v63  ;;  %v1741_v26 = vunpack.c.3.s8 %v725_v51 }
 0x284   : > { %v4305_v7 = vpack.c.bf16 %v2997_v0, %v2993_v59  ;;  %v3305_v28 = vcvt.s32.f32 %v1737_v9  ;;  %v1801_v54 = vunpack.c.2.s8 %v741_v31  ;;  %v1805_v2 = vunpack.c.3.s8 %v741_v31 }
 0x285   : > { %v4337_v41 = vpack.c.bf16 %v3061_v14, %v3057_v21  ;;  %5640 = vmatmul.bf16.vlgmr.msrb.gmra.mxu1 %v7938_v36  ;;  %v4377_v4 = vpack.c.bf16 %v3141_v46, %v3137_v56  ;;  %v3309_v25 = vcvt.s32.f32 %v1741_v26  ;;  %v8486_v12 = vadd.f32 %v8462_v44, %v5408_v1  ;;  %v721_v14 = vld [vmem:[%s7886_s14 + $0x650] sm:$0xff]  ;;  %v8501_v26 = vpop.f32.mrf.mxu2 }
 0x286   : > { %5684 = vmatpush.bf16.msra.mxu1 %v4429_v50  ;;  %5652 = vmatpush.bf16.msra.mxu2 %v4305_v7  ;;  %v1665_v61 = vunpack.c.0.s8 %v8475_v33  ;;  %v3369_v18 = vcvt.s32.f32 %v1801_v54  ;;  %v3373_v32 = vcvt.s32.f32 %v1805_v2  ;;  %v1669_v13 = vunpack.c.1.s8 %v8475_v33  ;;  %v737_v46 = vld [vmem:[%s7886_s14 + $0x6d0] sm:$0xff] }
 0x287   : > { %5665 = vmatpush.bf16.msra.mxu3 %v4337_v41  ;;  %v1561_v47 = vunpack.c.2.s8 %v681_v16  ;;  %5676 = vmatpush.bf16.msra.mxu0 %v4377_v4  ;;  %v4461_v42 = vpack.c.bf16 %v3309_v25, %v3305_v28  ;;  %v1565_v45 = vunpack.c.3.s8 %v681_v16  ;;  %v1729_v19 = vunpack.c.0.s8 %v725_v51  ;;  %v757_v2 = vld [vmem:[%s7886_s14 + $0x770] sm:$0xff] }
 0x288   : > { %v3233_v53 = vcvt.s32.f32 %v1665_v61  ;;  %v4493_v23 = vpack.c.bf16 %v3373_v32, %v3369_v18  ;;  %v3237_v44 = vcvt.s32.f32 %v1669_v13  ;;  %v1733_v55 = vunpack.c.1.s8 %v725_v51  ;;  %v8504_v32 = vpop.f32.mrf.mxu3 }
 0x289   : > { %5653 = vmatmul.bf16.vlgmr.msra.gmra.mxu2 %v7974_v10  ;;  %v3129_v1 = vcvt.s32.f32 %v1561_v47  ;;  %v3133_v33 = vcvt.s32.f32 %v1565_v45  ;;  %v3297_v58 = vcvt.s32.f32 %v1729_v19  ;;  %v1793_v59 = vunpack.c.0.s8 %v741_v31  ;;  %v5435_v45 = vpop.f32.mrf.mxu1 }
 0x28a   : > { %5697 = vmatpush.bf16.msrb.mxu2 %v4461_v42  ;;  %5666 = vmatmul.bf16.vlgmr.msra.gmra.mxu3 %v7976_v15  ;;  %v1797_v0 = vunpack.c.1.s8 %v741_v31  ;;  %v4425_v60 = vpack.c.bf16 %v3237_v44, %v3233_v53  ;;  %v3301_v63 = vcvt.s32.f32 %v1733_v55  ;;  %v1657_v50 = vunpack.c.2.s8 %v8493_v11  ;;  %v733_v45 = vld [vmem:[%s7886_s14 + $0x6b0] sm:$0xff] }
 0x28b   : > { %5710 = vmatpush.bf16.msrb.mxu3 %v4493_v23  ;;  %v1661_v21 = vunpack.c.3.s8 %v8493_v11  ;;  %v4373_v9 = vpack.c.bf16 %v3133_v33, %v3129_v1  ;;  %v3361_v7 = vcvt.s32.f32 %v1793_v59  ;;  %v1553_v56 = vunpack.c.0.s8 %v681_v16 }
 0x28c   : > { %v3365_v51 = vcvt.s32.f32 %v1797_v0  ;;  %5685 = vmatpush.bf16.msra.mxu1 %v4425_v60  ;;  %v4457_v41 = vpack.c.bf16 %v3301_v63, %v3297_v58  ;;  %v3225_v28 = vcvt.s32.f32 %v1657_v50  ;;  %v1557_v54 = vunpack.c.1.s8 %v681_v16 }
 0x28d   : > { %v3229_v31 = vcvt.s32.f32 %v1661_v21  ;;  %5677 = vmatpush.bf16.msra.mxu0 %v4373_v9  ;;  %v3121_v25 = vcvt.s32.f32 %v1553_v56  ;;  %v1721_v61 = vunpack.c.2.s8 %v721_v14  ;;  %v1725_v18 = vunpack.c.3.s8 %v721_v14 }
 0x28e   : > { %v4489_v4 = vpack.c.bf16 %v3365_v51, %v3361_v7  ;;  %5698 = vmatpush.bf16.msrb.mxu2 %v4457_v41  ;;  %v3125_v47 = vcvt.s32.f32 %v1557_v54  ;;  %v1785_v42 = vunpack.c.2.s8 %v737_v46  ;;  %v1789_v53 = vunpack.c.3.s8 %v737_v46  ;;  %v701_v51 = vld [vmem:[%s7886_s14 + $0x5b0] sm:$0xff]  ;;  %v8509_v54 = vpop.f32.mrf.mxu0 }
 0x28f   : > { %v4421_v13 = vpack.c.bf16 %v3229_v31, %v3225_v28  ;;  %v3289_v19 = vcvt.s32.f32 %v1721_v61  ;;  %v3293_v23 = vcvt.s32.f32 %v1725_v18  ;;  %v1865_v44 = vunpack.c.2.s8 %v757_v2 }
 0x290   : > { %5711 = vmatpush.bf16.msrb.mxu3 %v4489_v4  ;;  %v1869_v16 = vunpack.c.3.s8 %v757_v2  ;;  %v4369_v1 = vpack.c.bf16 %v3125_v47, %v3121_v25  ;;  %v3353_v55 = vcvt.s32.f32 %v1785_v42  ;;  %v3357_v33 = vcvt.s32.f32 %v1789_v53  ;;  %v5448_v4 = vpop.f32.mrf.mxu2 }
 0x291   : > { %5686 = vmatpush.bf16.msra.mxu1 %v4421_v13  ;;  %v1649_v58 = vunpack.c.0.s8 %v8493_v11  ;;  %v4453_v59 = vpack.c.bf16 %v3293_v23, %v3289_v19  ;;  %v3433_v0 = vcvt.s32.f32 %v1865_v44  ;;  %v1653_v63 = vunpack.c.1.s8 %v8493_v11  ;;  %v717_v13 = vld [vmem:[%s7886_s14 + $0x630] sm:$0xff]  ;;  %v5461_v19 = vpop.f32.mrf.mxu3 }
 0x292   : > { %v3437_v60 = vcvt.s32.f32 %v1869_v16  ;;  %5678 = vmatpush.bf16.msra.mxu0 %v4369_v1  ;;  %v4485_v50 = vpack.c.bf16 %v3357_v33, %v3353_v55  ;;  %v1713_v9 = vunpack.c.0.s8 %v721_v14  ;;  %v1717_v7 = vunpack.c.1.s8 %v721_v14  ;;  %v753_v1 = vld [vmem:[%s7886_s14 + $0x750] sm:$0xff] }
 0x293   : > { %v3217_v21 = vcvt.s32.f32 %v1649_v58  ;;  %5699 = vmatpush.bf16.msrb.mxu2 %v4453_v59  ;;  %v3221_v41 = vcvt.s32.f32 %v1653_v63  ;;  %v1777_v28 = vunpack.c.0.s8 %v737_v46  ;;  %v1781_v31 = vunpack.c.1.s8 %v737_v46  ;;  %v697_v19 = vld [vmem:[%s7886_s14 + $0x590] sm:$0xff] }
 0x294   : > { %v4525_v56 = vpack.c.bf16 %v3437_v60, %v3433_v0  ;;  %5712 = vmatpush.bf16.msrb.mxu3 %v4485_v50  ;;  %v3281_v25 = vcvt.s32.f32 %v1713_v9  ;;  %v3285_v61 = vcvt.s32.f32 %v1717_v7  ;;  %v1857_v11 = vunpack.c.0.s8 %v757_v2 }
 0x295   : > { %v1861_v18 = vunpack.c.1.s8 %v757_v2  ;;  %v4417_v47 = vpack.c.bf16 %v3221_v41, %v3217_v21  ;;  %v3345_v14 = vcvt.s32.f32 %v1777_v28  ;;  %v3349_v42 = vcvt.s32.f32 %v1781_v31  ;;  %5679 = vmatmul.bf16.vlgmr.msra.gmra.mxu0 %v7978_v20 }
 0x296   : > { %5723 = vmatpush.bf16.msrb.mxu0 %v4525_v56  ;;  %v1641_v53 = vunpack.c.2.s8 %v701_v51  ;;  %v4449_v46 = vpack.c.bf16 %v3285_v61, %v3281_v25  ;;  %v3425_v23 = vcvt.s32.f32 %v1857_v11  ;;  %v1645_v16 = vunpack.c.3.s8 %v701_v51 }
 0x297   : > { %v3429_v44 = vcvt.s32.f32 %v1861_v18  ;;  %5687 = vmatpush.bf16.msra.mxu1 %v4417_v47  ;;  %v4481_v55 = vpack.c.bf16 %v3349_v42, %v3345_v14  ;;  %v1705_v58 = vunpack.c.2.s8 %v717_v13  ;;  %v1709_v2 = vunpack.c.3.s8 %v717_v13  ;;  %v5474_v18 = vpop.f32.mrf.mxu0 }
 0x298   : > { %v3209_v33 = vcvt.s32.f32 %v1641_v53  ;;  %5700 = vmatpush.bf16.msrb.mxu2 %v4449_v46  ;;  %v3213_v0 = vcvt.s32.f32 %v1645_v16  ;;  %v1769_v60 = vunpack.c.2.s8 %v733_v45  ;;  %v1773_v63 = vunpack.c.3.s8 %v733_v45 }
 0x299   : > { %v4521_v59 = vpack.c.bf16 %v3429_v44, %v3425_v23  ;;  %5713 = vmatpush.bf16.msrb.mxu3 %v4481_v55  ;;  %v3273_v50 = vcvt.s32.f32 %v1705_v58  ;;  %v3277_v21 = vcvt.s32.f32 %v1709_v2  ;;  %v1849_v9 = vunpack.c.2.s8 %v753_v1  ;;  %v713_v2 = vld [vmem:[%s7886_s14 + $0x610] sm:$0xff] }
 0x29a   : > { %v1853_v7 = vunpack.c.3.s8 %v753_v1  ;;  %v4413_v56 = vpack.c.bf16 %v3213_v0, %v3209_v33  ;;  %v3337_v41 = vcvt.s32.f32 %v1769_v60  ;;  %v3341_v28 = vcvt.s32.f32 %v1773_v63 }
 0x29b   : > { %5724 = vmatpush.bf16.msrb.mxu0 %v4521_v59  ;;  %v1633_v31 = vunpack.c.0.s8 %v701_v51  ;;  %v4445_v4 = vpack.c.bf16 %v3277_v21, %v3273_v50  ;;  %v3417_v25 = vcvt.s32.f32 %v1849_v9  ;;  %v1637_v11 = vunpack.c.1.s8 %v701_v51 }
 0x29c   : > { %v3421_v61 = vcvt.s32.f32 %v1853_v7  ;;  %5688 = vmatpush.bf16.msra.mxu1 %v4413_v56  ;;  %v4477_v47 = vpack.c.bf16 %v3341_v28, %v3337_v41  ;;  %v1697_v42 = vunpack.c.0.s8 %v717_v13  ;;  %v1701_v53 = vunpack.c.1.s8 %v717_v13  ;;  %v729_v13 = vld [vmem:[%s7886_s14 + $0x690] sm:$0xff] }
 0x29d   : > { %v3201_v14 = vcvt.s32.f32 %v1633_v31  ;;  %5701 = vmatpush.bf16.msrb.mxu2 %v4445_v4  ;;  %v3205_v23 = vcvt.s32.f32 %v1637_v11  ;;  %v1761_v44 = vunpack.c.0.s8 %v733_v45  ;;  %v1765_v16 = vunpack.c.1.s8 %v733_v45  ;;  %v749_v56 = vld [vmem:[%s7886_s14 + $0x730] sm:$0xff] }
 0x29e   : > { %v4517_v46 = vpack.c.bf16 %v3421_v61, %v3417_v25  ;;  %5714 = vmatpush.bf16.msrb.mxu3 %v4477_v47  ;;  %v3265_v55 = vcvt.s32.f32 %v1697_v42  ;;  %v3269_v33 = vcvt.s32.f32 %v1701_v53  ;;  %v1841_v58 = vunpack.c.0.s8 %v753_v1  ;;  %v8522_v42 = vld [vmem:[%s7886_s14 + $0x7f0] sm:$0xff] }
 0x29f   : > { %v1845_v51 = vunpack.c.1.s8 %v753_v1  ;;  %v4409_v59 = vpack.c.bf16 %v3205_v23, %v3201_v14  ;;  %v3329_v0 = vcvt.s32.f32 %v1761_v44  ;;  %v3333_v60 = vcvt.s32.f32 %v1765_v16 }
 0x2a0   : > { %5725 = vmatpush.bf16.msrb.mxu0 %v4517_v46  ;;  %v1625_v63 = vunpack.c.2.s8 %v697_v19  ;;  %v4441_v50 = vpack.c.bf16 %v3269_v33, %v3265_v55  ;;  %v3409_v21 = vcvt.s32.f32 %v1841_v58  ;;  %v1629_v7 = vunpack.c.3.s8 %v697_v19 }
 0x2a1   : > { %v3413_v9 = vcvt.s32.f32 %v1845_v51  ;;  %5689 = vmatpush.bf16.msra.mxu1 %v4409_v59  ;;  %v4473_v45 = vpack.c.bf16 %v3333_v60, %v3329_v0  ;;  %v5434_v28 = vadd.f32 %v8490_v49, %v8486_v12  ;;  %v1689_v1 = vunpack.c.2.s8 %v713_v2 }
 0x2a2   : > { %v3193_v41 = vcvt.s32.f32 %v1625_v63  ;;  %5702 = vmatpush.bf16.msrb.mxu2 %v4441_v50  ;;  %v3197_v4 = vcvt.s32.f32 %v1629_v7  ;;  %v1693_v25 = vunpack.c.3.s8 %v713_v2  ;;  %v1753_v61 = vunpack.c.2.s8 %v729_v13 }
 0x2a3   : > { %v4513_v31 = vpack.c.bf16 %v3413_v9, %v3409_v21  ;;  %5715 = vmatpush.bf16.msrb.mxu3 %v4473_v45  ;;  %v3257_v11 = vcvt.s32.f32 %v1689_v1  ;;  %v1757_v18 = vunpack.c.3.s8 %v729_v13  ;;  %v1833_v47 = vunpack.c.2.s8 %v749_v56 }
 0x2a4   : > { %v1837_v14 = vunpack.c.3.s8 %v749_v56  ;;  %v4405_v53 = vpack.c.bf16 %v3197_v4, %v3193_v41  ;;  %v3261_v46 = vcvt.s32.f32 %v1693_v25  ;;  %v3321_v23 = vcvt.s32.f32 %v1753_v61 }
 0x2a5   : > { %5726 = vmatpush.bf16.msrb.mxu0 %v4513_v31  ;;  %v1617_v44 = vunpack.c.0.s8 %v697_v19  ;;  %v3325_v16 = vcvt.s32.f32 %v1757_v18  ;;  %v3401_v12 = vcvt.s32.f32 %v1833_v47  ;;  %v1621_v55 = vunpack.c.1.s8 %v697_v19  ;;  %v789_v19 = vld [vmem:[%s7886_s14 + $0x870] sm:$0xff] }
 0x2a6   : > { %v3405_v49 = vcvt.s32.f32 %v1837_v14  ;;  %5690 = vmatpush.bf16.msra.mxu1 %v4405_v53  ;;  %v4437_v33 = vpack.c.bf16 %v3261_v46, %v3257_v11  ;;  %v5447_v51 = vadd.f32 %v8501_v26, %v5434_v28  ;;  %v1929_v59 = vunpack.c.2.s8 %v8522_v42  ;;  %v805_v11 = vld [vmem:[%s7886_s14 + $0x8f0] sm:$0xff] }
 0x2a7   : > { %v3185_v58 = vcvt.s32.f32 %v1617_v44  ;;  %v4469_v0 = vpack.c.bf16 %v3325_v16, %v3321_v23  ;;  %v3189_v63 = vcvt.s32.f32 %v1621_v55  ;;  %v1933_v50 = vunpack.c.3.s8 %v8522_v42  ;;  %v745_v44 = vld [vmem:[%s7886_s14 + $0x710] sm:$0xff] }
 0x2a8   : > { %v4509_v60 = vpack.c.bf16 %v3405_v49, %v3401_v12  ;;  %5703 = vmatpush.bf16.msrb.mxu2 %v4437_v33  ;;  %v3497_v21 = vcvt.s32.f32 %v1929_v59  ;;  %v5460_v9 = vadd.f32 %v8504_v32, %v5447_v51  ;;  %v1681_v7 = vunpack.c.0.s8 %v713_v2 }
 0x2a9   : > { %v1685_v45 = vunpack.c.1.s8 %v713_v2  ;;  %5716 = vmatpush.bf16.msrb.mxu3 %v4469_v0  ;;  %v4401_v41 = vpack.c.bf16 %v3189_v63, %v3185_v58  ;;  %v3501_v1 = vcvt.s32.f32 %v1933_v50  ;;  %v1745_v26 = vunpack.c.0.s8 %v729_v13  ;;  %v8537_v63 = vpop.f32.mrf.mxu1 }
 0x2aa   : > { %5727 = vmatpush.bf16.msrb.mxu0 %v4509_v60  ;;  %v1749_v28 = vunpack.c.1.s8 %v729_v13  ;;  %v3249_v31 = vcvt.s32.f32 %v1681_v7  ;;  %v1825_v25 = vunpack.c.0.s8 %v749_v56  ;;  %v1829_v61 = vunpack.c.1.s8 %v749_v56 }
 0x2ab   : > { %v3253_v4 = vcvt.s32.f32 %v1685_v45  ;;  %5691 = vmatpush.bf16.msra.mxu1 %v4401_v41  ;;  %v4557_v18 = vpack.c.bf16 %v3501_v1, %v3497_v21  ;;  %v3313_v47 = vcvt.s32.f32 %v1745_v26  ;;  %v1993_v32 = vunpack.c.2.s8 %v789_v19  ;;  %v8540_v41 = vld [vmem:[%s7886_s14 + $0x7d0] sm:$0xff] }
 0x2ac   : > { %v3317_v14 = vcvt.s32.f32 %v1749_v28  ;;  %v3393_v2 = vcvt.s32.f32 %v1825_v25  ;;  %v3397_v46 = vcvt.s32.f32 %v1829_v61  ;;  %v1997_v23 = vunpack.c.3.s8 %v789_v19 }
 0x2ad   : > { %v4433_v53 = vpack.c.bf16 %v3253_v4, %v3249_v31  ;;  %v3561_v12 = vcvt.s32.f32 %v1993_v32  ;;  %v2057_v49 = vunpack.c.2.s8 %v805_v11  ;;  %v2061_v13 = vunpack.c.3.s8 %v805_v11 }
 0x2ae   : > { %v4465_v16 = vpack.c.bf16 %v3317_v14, %v3313_v47  ;;  %5692 = vmatmul.bf16.vlgmr.msra.gmra.mxu1 %v7981_v24  ;;  %v4505_v56 = vpack.c.bf16 %v3397_v46, %v3393_v2  ;;  %v3565_v55 = vcvt.s32.f32 %v1997_v23  ;;  %v8533_v33 = vadd.f32 %v8509_v54, %v5460_v9  ;;  %v785_v14 = vld [vmem:[%s7886_s14 + $0x850] sm:$0xff]  ;;  %v8548_v23 = vpop.f32.mrf.mxu2 }
 0x2af   : > { %5736 = vmatpush.bf16.msrb.mxu1 %v4557_v18  ;;  %5704 = vmatpush.bf16.msrb.mxu2 %v4433_v53  ;;  %v1921_v58 = vunpack.c.0.s8 %v8522_v42  ;;  %v3625_v51 = vcvt.s32.f32 %v2057_v49  ;;  %v3629_v59 = vcvt.s32.f32 %v2061_v13  ;;  %v1925_v0 = vunpack.c.1.s8 %v8522_v42  ;;  %v801_v46 = vld [vmem:[%s7886_s14 + $0x8d0] sm:$0xff] }
 0x2b0   : > { %5717 = vmatpush.bf16.msrb.mxu3 %v4465_v16  ;;  %v1817_v60 = vunpack.c.2.s8 %v745_v44  ;;  %5728 = vmatpush.bf16.msrb.mxu0 %v4505_v56  ;;  %v4589_v50 = vpack.c.bf16 %v3565_v55, %v3561_v12  ;;  %v1821_v7 = vunpack.c.3.s8 %v745_v44  ;;  %v1985_v45 = vunpack.c.0.s8 %v789_v19  ;;  %v821_v13 = vld [vmem:[%s7886_s14 + $0x970] sm:$0xff] }
 0x2b1   : > { %v3489_v21 = vcvt.s32.f32 %v1921_v58  ;;  %v4621_v1 = vpack.c.bf16 %v3629_v59, %v3625_v51  ;;  %v3493_v54 = vcvt.s32.f32 %v1925_v0  ;;  %v1989_v26 = vunpack.c.1.s8 %v789_v19  ;;  %v8551_v59 = vpop.f32.mrf.mxu3 }
 0x2b2   : > { %5705 = vmatmul.bf16.vlgmr.msrb.gmra.mxu2 %v8008_v39  ;;  %v3385_v9 = vcvt.s32.f32 %v1817_v60  ;;  %v3389_v42 = vcvt.s32.f32 %v1821_v7  ;;  %v3553_v28 = vcvt.s32.f32 %v1985_v45  ;;  %v2049_v31 = vunpack.c.0.s8 %v805_v11  ;;  %v5487_v7 = vpop.f32.mrf.mxu1 }
 0x2b3   : > { %5749 = vmatpush.bf16.msra.mxu2 %v4589_v50  ;;  %5718 = vmatmul.bf16.vlgmr.msrb.gmra.mxu3 %v8010_v43  ;;  %v2053_v4 = vunpack.c.1.s8 %v805_v11  ;;  %v4553_v25 = vpack.c.bf16 %v3493_v54, %v3489_v21  ;;  %v3557_v61 = vcvt.s32.f32 %v1989_v26  ;;  %v1913_v18 = vunpack.c.2.s8 %v8540_v41  ;;  %v797_v7 = vld [vmem:[%s7886_s14 + $0x8b0] sm:$0xff] }
 0x2b4   : > { %5762 = vmatpush.bf16.msra.mxu3 %v4621_v1  ;;  %v1917_v47 = vunpack.c.3.s8 %v8540_v41  ;;  %v4501_v32 = vpack.c.bf16 %v3389_v42, %v3385_v9  ;;  %v3617_v53 = vcvt.s32.f32 %v2049_v31  ;;  %v1809_v2 = vunpack.c.0.s8 %v745_v44 }
 0x2b5   : > { %v3621_v19 = vcvt.s32.f32 %v2053_v4  ;;  %5737 = vmatpush.bf16.msrb.mxu1 %v4553_v25  ;;  %v4585_v16 = vpack.c.bf16 %v3557_v61, %v3553_v28  ;;  %v3481_v12 = vcvt.s32.f32 %v1913_v18  ;;  %v1813_v49 = vunpack.c.1.s8 %v745_v44 }
 0x2b6   : > { %v3485_v11 = vcvt.s32.f32 %v1917_v47  ;;  %5729 = vmatpush.bf16.msrb.mxu0 %v4501_v32  ;;  %v3377_v55 = vcvt.s32.f32 %v1809_v2  ;;  %v1977_v58 = vunpack.c.2.s8 %v785_v14  ;;  %v1981_v51 = vunpack.c.3.s8 %v785_v14 }
 0x2b7   : > { %v4617_v56 = vpack.c.bf16 %v3621_v19, %v3617_v53  ;;  %5750 = vmatpush.bf16.msra.mxu2 %v4585_v16  ;;  %v3381_v60 = vcvt.s32.f32 %v1813_v49  ;;  %v2041_v50 = vunpack.c.2.s8 %v801_v46  ;;  %v2045_v21 = vunpack.c.3.s8 %v801_v46  ;;  %v765_v19 = vld [vmem:[%s7886_s14 + $0x7b0] sm:$0xff]  ;;  %v8556_v49 = vpop.f32.mrf.mxu0 }
 0x2b8   : > { %v4549_v0 = vpack.c.bf16 %v3485_v11, %v3481_v12  ;;  %v3545_v45 = vcvt.s32.f32 %v1977_v58  ;;  %v3549_v1 = vcvt.s32.f32 %v1981_v51  ;;  %v2121_v54 = vunpack.c.2.s8 %v821_v13 }
 0x2b9   : > { %5763 = vmatpush.bf16.msra.mxu3 %v4617_v56  ;;  %v2125_v44 = vunpack.c.3.s8 %v821_v13  ;;  %v4497_v9 = vpack.c.bf16 %v3381_v60, %v3377_v55  ;;  %v3609_v26 = vcvt.s32.f32 %v2041_v50  ;;  %v3613_v42 = vcvt.s32.f32 %v2045_v21  ;;  %v5500_v56 = vpop.f32.mrf.mxu2 }
 0x2ba   : > { %5738 = vmatpush.bf16.msrb.mxu1 %v4549_v0  ;;  %v1905_v28 = vunpack.c.0.s8 %v8540_v41  ;;  %v4581_v31 = vpack.c.bf16 %v3549_v1, %v3545_v45  ;;  %v3689_v4 = vcvt.s32.f32 %v2121_v54  ;;  %v1909_v61 = vunpack.c.1.s8 %v8540_v41  ;;  %v781_v0 = vld [vmem:[%s7886_s14 + $0x830] sm:$0xff]  ;;  %v5513_v45 = vpop.f32.mrf.mxu3 }
 0x2bb   : > { %v3693_v25 = vcvt.s32.f32 %v2125_v44  ;;  %5730 = vmatpush.bf16.msrb.mxu0 %v4497_v9  ;;  %v4613_v18 = vpack.c.bf16 %v3613_v42, %v3609_v26  ;;  %v1969_v32 = vunpack.c.0.s8 %v785_v14  ;;  %v1973_v53 = vunpack.c.1.s8 %v785_v14  ;;  %v817_v9 = vld [vmem:[%s7886_s14 + $0x950] sm:$0xff] }
 0x2bc   : > { %v3473_v47 = vcvt.s32.f32 %v1905_v28  ;;  %5751 = vmatpush.bf16.msra.mxu2 %v4581_v31  ;;  %v3477_v16 = vcvt.s32.f32 %v1909_v61  ;;  %v2033_v12 = vunpack.c.0.s8 %v801_v46  ;;  %v2037_v11 = vunpack.c.1.s8 %v801_v46  ;;  %v761_v45 = vld [vmem:[%s7886_s14 + $0x790] sm:$0xff] }
 0x2bd   : > { %v4653_v2 = vpack.c.bf16 %v3693_v25, %v3689_v4  ;;  %5764 = vmatpush.bf16.msra.mxu3 %v4613_v18  ;;  %v3537_v55 = vcvt.s32.f32 %v1969_v32  ;;  %v3541_v58 = vcvt.s32.f32 %v1973_v53  ;;  %v2113_v41 = vunpack.c.0.s8 %v821_v13 }
 0x2be   : > { %v2117_v51 = vunpack.c.1.s8 %v821_v13  ;;  %v4545_v60 = vpack.c.bf16 %v3477_v16, %v3473_v47  ;;  %v3601_v14 = vcvt.s32.f32 %v2033_v12  ;;  %v3605_v50 = vcvt.s32.f32 %v2037_v11  ;;  %5731 = vmatmul.bf16.vlgmr.msrb.gmra.mxu0 %v8012_v48 }
 0x2bf   : > { %5775 = vmatpush.bf16.msra.mxu0 %v4653_v2  ;;  %v1897_v21 = vunpack.c.2.s8 %v765_v19  ;;  %v4577_v46 = vpack.c.bf16 %v3541_v58, %v3537_v55  ;;  %v3681_v1 = vcvt.s32.f32 %v2113_v41  ;;  %v1901_v44 = vunpack.c.3.s8 %v765_v19 }
 0x2c0   : > { %v3685_v54 = vcvt.s32.f32 %v2117_v51  ;;  %5739 = vmatpush.bf16.msrb.mxu1 %v4545_v60  ;;  %v4609_v26 = vpack.c.bf16 %v3605_v50, %v3601_v14  ;;  %v1961_v28 = vunpack.c.2.s8 %v781_v0  ;;  %v1965_v13 = vunpack.c.3.s8 %v781_v0  ;;  %v5526_v51 = vpop.f32.mrf.mxu0 }
 0x2c1   : > { %v3465_v42 = vcvt.s32.f32 %v1897_v21  ;;  %5752 = vmatpush.bf16.msra.mxu2 %v4577_v46  ;;  %v3469_v4 = vcvt.s32.f32 %v1901_v44  ;;  %v2025_v25 = vunpack.c.2.s8 %v797_v7  ;;  %v2029_v61 = vunpack.c.3.s8 %v797_v7 }
 0x2c2   : > { %v4649_v31 = vpack.c.bf16 %v3685_v54, %v3681_v1  ;;  %5765 = vmatpush.bf16.msra.mxu3 %v4609_v26  ;;  %v3529_v18 = vcvt.s32.f32 %v1961_v28  ;;  %v3533_v47 = vcvt.s32.f32 %v1965_v13  ;;  %v2105_v32 = vunpack.c.2.s8 %v817_v9  ;;  %v777_v13 = vld [vmem:[%s7886_s14 + $0x810] sm:$0xff] }
 0x2c3   : > { %v2109_v53 = vunpack.c.3.s8 %v817_v9  ;;  %v4541_v2 = vpack.c.bf16 %v3469_v4, %v3465_v42  ;;  %v3593_v16 = vcvt.s32.f32 %v2025_v25  ;;  %v3597_v12 = vcvt.s32.f32 %v2029_v61 }
 0x2c4   : > { %5776 = vmatpush.bf16.msra.mxu0 %v4649_v31  ;;  %v1889_v11 = vunpack.c.0.s8 %v765_v19  ;;  %v4573_v56 = vpack.c.bf16 %v3533_v47, %v3529_v18  ;;  %v3673_v55 = vcvt.s32.f32 %v2105_v32  ;;  %v1893_v41 = vunpack.c.1.s8 %v765_v19 }
 0x2c5   : > { %v3677_v58 = vcvt.s32.f32 %v2109_v53  ;;  %5740 = vmatpush.bf16.msrb.mxu1 %v4541_v2  ;;  %v4605_v60 = vpack.c.bf16 %v3597_v12, %v3593_v16  ;;  %v1953_v50 = vunpack.c.0.s8 %v781_v0  ;;  %v1957_v21 = vunpack.c.1.s8 %v781_v0  ;;  %v793_v0 = vld [vmem:[%s7886_s14 + $0x890] sm:$0xff]  ;;  %v8566_v16 = vpop.f32.mrf.mxu1 }
 0x2c6   : > { %v3457_v14 = vcvt.s32.f32 %v1889_v11  ;;  %5753 = vmatpush.bf16.msra.mxu2 %v4573_v56  ;;  %v3461_v1 = vcvt.s32.f32 %v1893_v41  ;;  %v2017_v54 = vunpack.c.0.s8 %v797_v7  ;;  %v2021_v44 = vunpack.c.1.s8 %v797_v7  ;;  %v813_v2 = vld [vmem:[%s7886_s14 + $0x930] sm:$0xff] }
 0x2c7   : > { %v4645_v46 = vpack.c.bf16 %v3677_v58, %v3673_v55  ;;  %5766 = vmatpush.bf16.msra.mxu3 %v4605_v60  ;;  %v3521_v26 = vcvt.s32.f32 %v1953_v50  ;;  %v3525_v42 = vcvt.s32.f32 %v1957_v21  ;;  %v2097_v28 = vunpack.c.0.s8 %v817_v9  ;;  %v8571_v21 = vld [vmem:[%s7886_s14 + $0x9f0] sm:$0xff] }
 0x2c8   : > { %v2101_v19 = vunpack.c.1.s8 %v817_v9  ;;  %v4537_v31 = vpack.c.bf16 %v3461_v1, %v3457_v14  ;;  %v3585_v4 = vcvt.s32.f32 %v2017_v54  ;;  %v3589_v25 = vcvt.s32.f32 %v2021_v44 }
 0x2c9   : > { %5777 = vmatpush.bf16.msra.mxu0 %v4645_v46  ;;  %v1881_v61 = vunpack.c.2.s8 %v761_v45  ;;  %v4569_v18 = vpack.c.bf16 %v3525_v42, %v3521_v26  ;;  %v3665_v47 = vcvt.s32.f32 %v2097_v28  ;;  %v1885_v53 = vunpack.c.3.s8 %v761_v45 }
 0x2ca   : > { %v3669_v32 = vcvt.s32.f32 %v2101_v19  ;;  %5741 = vmatpush.bf16.msrb.mxu1 %v4537_v31  ;;  %v4601_v7 = vpack.c.bf16 %v3589_v25, %v3585_v4  ;;  %v5486_v9 = vadd.f32 %v8537_v63, %v8533_v33  ;;  %v1945_v11 = vunpack.c.2.s8 %v777_v13 }
 0x2cb   : > { %v3449_v12 = vcvt.s32.f32 %v1881_v61  ;;  %5754 = vmatpush.bf16.msra.mxu2 %v4569_v18  ;;  %v3453_v55 = vcvt.s32.f32 %v1885_v53  ;;  %v1949_v58 = vunpack.c.3.s8 %v777_v13  ;;  %v2009_v41 = vunpack.c.2.s8 %v793_v0 }
 0x2cc   : > { %v4641_v56 = vpack.c.bf16 %v3669_v32, %v3665_v47  ;;  %5767 = vmatpush.bf16.msra.mxu3 %v4601_v7  ;;  %v3513_v51 = vcvt.s32.f32 %v1945_v11  ;;  %v2013_v60 = vunpack.c.3.s8 %v793_v0  ;;  %v2089_v14 = vunpack.c.2.s8 %v813_v2 }
 0x2cd   : > { %v2093_v50 = vunpack.c.3.s8 %v813_v2  ;;  %v4533_v46 = vpack.c.bf16 %v3453_v55, %v3449_v12  ;;  %v3517_v1 = vcvt.s32.f32 %v1949_v58  ;;  %v3577_v54 = vcvt.s32.f32 %v2009_v41  ;;  %v5539_v11 = vpop.f32.mrf.mxu1 }
 0x2ce   : > { %5778 = vmatpush.bf16.msra.mxu0 %v4641_v56  ;;  %v1873_v44 = vunpack.c.0.s8 %v761_v45  ;;  %v3581_v26 = vcvt.s32.f32 %v2013_v60  ;;  %v3657_v33 = vcvt.s32.f32 %v2089_v14  ;;  %v1877_v42 = vunpack.c.1.s8 %v761_v45  ;;  %v853_v45 = vld [vmem:[%s7886_s14 + $0xa70] sm:$0xff] }
 0x2cf   : > { %v3661_v63 = vcvt.s32.f32 %v2093_v50  ;;  %5742 = vmatpush.bf16.msrb.mxu1 %v4533_v46  ;;  %v4565_v28 = vpack.c.bf16 %v3517_v1, %v3513_v51  ;;  %v5499_v31 = vadd.f32 %v8548_v23, %v5486_v9  ;;  %v2185_v4 = vunpack.c.2.s8 %v8571_v21  ;;  %v869_v14 = vld [vmem:[%s7886_s14 + $0xaf0] sm:$0xff] }
 0x2d0   : > { %v3441_v19 = vcvt.s32.f32 %v1873_v44  ;;  %v4597_v25 = vpack.c.bf16 %v3581_v26, %v3577_v54  ;;  %v3445_v18 = vcvt.s32.f32 %v1877_v42  ;;  %v2189_v47 = vunpack.c.3.s8 %v8571_v21 }
 0x2d1   : > { %v4637_v61 = vpack.c.bf16 %v3661_v63, %v3657_v33  ;;  %5755 = vmatpush.bf16.msra.mxu2 %v4565_v28  ;;  %v3753_v32 = vcvt.s32.f32 %v2185_v4  ;;  %v5512_v53 = vadd.f32 %v8551_v59, %v5499_v31  ;;  %v1937_v7 = vunpack.c.0.s8 %v777_v13  ;;  %v809_v33 = vld [vmem:[%s7886_s14 + $0x910] sm:$0xff] }
 0x2d2   : > { %v1941_v12 = vunpack.c.1.s8 %v777_v13  ;;  %5768 = vmatpush.bf16.msra.mxu3 %v4597_v25  ;;  %v4529_v56 = vpack.c.bf16 %v3445_v18, %v3441_v19  ;;  %v3757_v23 = vcvt.s32.f32 %v2189_v47  ;;  %v2001_v9 = vunpack.c.0.s8 %v793_v0 }
 0x2d3   : > { %5779 = vmatpush.bf16.msra.mxu0 %v4637_v61  ;;  %v2005_v55 = vunpack.c.1.s8 %v793_v0  ;;  %v3505_v58 = vcvt.s32.f32 %v1937_v7  ;;  %v2081_v51 = vunpack.c.0.s8 %v813_v2  ;;  %v2085_v60 = vunpack.c.1.s8 %v813_v2 }
 0x2d4   : > { %v3509_v41 = vcvt.s32.f32 %v1941_v12  ;;  %5743 = vmatpush.bf16.msrb.mxu1 %v4529_v56  ;;  %v4685_v50 = vpack.c.bf16 %v3757_v23, %v3753_v32  ;;  %v3569_v46 = vcvt.s32.f32 %v2001_v9  ;;  %v2249_v1 = vunpack.c.2.s8 %v853_v45  ;;  %v833_v56 = vld [vmem:[%s7886_s14 + $0x9d0] sm:$0xff] }
 0x2d5   : > { %v3573_v59 = vcvt.s32.f32 %v2005_v55  ;;  %v3649_v54 = vcvt.s32.f32 %v2081_v51  ;;  %v3653_v44 = vcvt.s32.f32 %v2085_v60  ;;  %v2253_v26 = vunpack.c.3.s8 %v853_v45 }
 0x2d6   : > { %v4561_v13 = vpack.c.bf16 %v3509_v41, %v3505_v58  ;;  %v3817_v42 = vcvt.s32.f32 %v2249_v1  ;;  %v2313_v28 = vunpack.c.2.s8 %v869_v14  ;;  %v2317_v0 = vunpack.c.3.s8 %v869_v14 }
 0x2d7   : > { %v4593_v63 = vpack.c.bf16 %v3573_v59, %v3569_v46  ;;  %5744 = vmatmul.bf16.vlgmr.msrb.gmra.mxu1 %v8015_v52  ;;  %v4633_v2 = vpack.c.bf16 %v3653_v44, %v3649_v54  ;;  %v3821_v19 = vcvt.s32.f32 %v2253_v26  ;;  %v8582_v31 = vadd.f32 %v8556_v49, %v5512_v53  ;;  %v849_v59 = vld [vmem:[%s7886_s14 + $0xa50] sm:$0xff] }
 0x2d8   : > { %5788 = vmatpush.bf16.msra.mxu1 %v4685_v50  ;;  %5756 = vmatpush.bf16.msra.mxu2 %v4561_v13  ;;  %v2177_v4 = vunpack.c.0.s8 %v8571_v21  ;;  %v3881_v25 = vcvt.s32.f32 %v2313_v28  ;;  %v3885_v61 = vcvt.s32.f32 %v2317_v0  ;;  %v2181_v18 = vunpack.c.1.s8 %v8571_v21  ;;  %v885_v0 = vld [vmem:[%s7886_s14 + $0xb70] sm:$0xff] }
 0x2d9   : > { %5769 = vmatpush.bf16.msra.mxu3 %v4593_v63  ;;  %v2073_v47 = vunpack.c.2.s8 %v809_v33  ;;  %5780 = vmatpush.bf16.msra.mxu0 %v4633_v2  ;;  %v4717_v32 = vpack.c.bf16 %v3821_v19, %v3817_v42  ;;  %v2077_v12 = vunpack.c.3.s8 %v809_v33  ;;  %v2241_v11 = vunpack.c.0.s8 %v853_v45 }
 0x2da   : > { %v3745_v7 = vcvt.s32.f32 %v2177_v4  ;;  %v4749_v23 = vpack.c.bf16 %v3885_v61, %v3881_v25  ;;  %v3749_v9 = vcvt.s32.f32 %v2181_v18  ;;  %v2245_v53 = vunpack.c.1.s8 %v853_v45  ;;  %v865_v45 = vld [vmem:[%s7886_s14 + $0xad0] sm:$0xff] }
 0x2db   : > { %5757 = vmatmul.bf16.vlgmr.msra.gmra.mxu2 %v8045_v17  ;;  %v3641_v49 = vcvt.s32.f32 %v2073_v47  ;;  %v3645_v55 = vcvt.s32.f32 %v2077_v12  ;;  %v3809_v21 = vcvt.s32.f32 %v2241_v11  ;;  %v2305_v58 = vunpack.c.0.s8 %v869_v14 }
 0x2dc   : > { %5801 = vmatpush.bf16.msrb.mxu2 %v4717_v32  ;;  %5770 = vmatmul.bf16.vlgmr.msra.gmra.mxu3 %v8047_v22  ;;  %v2309_v41 = vunpack.c.1.s8 %v869_v14  ;;  %v4681_v51 = vpack.c.bf16 %v3749_v9, %v3745_v7  ;;  %v3813_v60 = vcvt.s32.f32 %v2245_v53  ;;  %v2169_v50 = vunpack.c.2.s8 %v833_v56 }
 0x2dd   : > { %5814 = vmatpush.bf16.msrb.mxu3 %v4749_v23  ;;  %v2173_v46 = vunpack.c.3.s8 %v833_v56  ;;  %v4629_v1 = vpack.c.bf16 %v3645_v55, %v3641_v49  ;;  %v3873_v13 = vcvt.s32.f32 %v2305_v58  ;;  %v2065_v44 = vunpack.c.0.s8 %v809_v33 }
 0x2de   : > { %v3877_v54 = vcvt.s32.f32 %v2309_v41  ;;  %5789 = vmatpush.bf16.msra.mxu1 %v4681_v51  ;;  %v4713_v26 = vpack.c.bf16 %v3813_v60, %v3809_v21  ;;  %v3737_v63 = vcvt.s32.f32 %v2169_v50  ;;  %v2069_v28 = vunpack.c.1.s8 %v809_v33 }
 0x2df   : > { %v3741_v42 = vcvt.s32.f32 %v2173_v46  ;;  %5781 = vmatpush.bf16.msra.mxu0 %v4629_v1  ;;  %v3633_v2 = vcvt.s32.f32 %v2065_v44  ;;  %v2233_v19 = vunpack.c.2.s8 %v849_v59  ;;  %v2237_v4 = vunpack.c.3.s8 %v849_v59 }
 0x2e0   : > { %v4745_v14 = vpack.c.bf16 %v3877_v54, %v3873_v13  ;;  %5802 = vmatpush.bf16.msrb.mxu2 %v4713_v26  ;;  %v3637_v61 = vcvt.s32.f32 %v2069_v28  ;;  %v2297_v18 = vunpack.c.2.s8 %v865_v45  ;;  %v2301_v47 = vunpack.c.3.s8 %v865_v45  ;;  %v829_v54 = vld [vmem:[%s7886_s14 + $0x9b0] sm:$0xff] }
 0x2e1   : > { %v4677_v25 = vpack.c.bf16 %v3741_v42, %v3737_v63  ;;  %v3801_v32 = vcvt.s32.f32 %v2233_v19  ;;  %v3805_v7 = vcvt.s32.f32 %v2237_v4  ;;  %v2377_v12 = vunpack.c.2.s8 %v885_v0  ;;  %v845_v42 = vld [vmem:[%s7886_s14 + $0xa30] sm:$0xff] }
 0x2e2   : > { %5815 = vmatpush.bf16.msrb.mxu3 %v4745_v14  ;;  %v2381_v11 = vunpack.c.3.s8 %v885_v0  ;;  %v4625_v23 = vpack.c.bf16 %v3637_v61, %v3633_v2  ;;  %v3865_v9 = vcvt.s32.f32 %v2297_v18  ;;  %v3869_v33 = vcvt.s32.f32 %v2301_v47  ;;  %v881_v47 = vld [vmem:[%s7886_s14 + $0xb50] sm:$0xff] }
 0x2e3   : > { %5790 = vmatpush.bf16.msra.mxu1 %v4677_v25  ;;  %v2161_v49 = vunpack.c.0.s8 %v833_v56  ;;  %v4709_v53 = vpack.c.bf16 %v3805_v7, %v3801_v32  ;;  %v3945_v55 = vcvt.s32.f32 %v2377_v12  ;;  %v2165_v58 = vunpack.c.1.s8 %v833_v56 }
 0x2e4   : > { %v3949_v21 = vcvt.s32.f32 %v2381_v11  ;;  %5782 = vmatpush.bf16.msra.mxu0 %v4625_v23  ;;  %v4741_v41 = vpack.c.bf16 %v3869_v33, %v3865_v9  ;;  %v8594_v60 = vadd.f32 %v8566_v16, %v8582_v31  ;;  %v2225_v1 = vunpack.c.0.s8 %v849_v59  ;;  %v861_v16 = vld [vmem:[%s7886_s14 + $0xab0] sm:$0xff] }
 0x2e5   : > { %v3729_v51 = vcvt.s32.f32 %v2161_v49  ;;  %5803 = vmatpush.bf16.msrb.mxu2 %v4709_v53  ;;  %v3733_v46 = vcvt.s32.f32 %v2165_v58  ;;  %v2229_v13 = vunpack.c.1.s8 %v849_v59  ;;  %v2289_v44 = vunpack.c.0.s8 %v865_v45 }
 0x2e6   : > { %v4781_v50 = vpack.c.bf16 %v3949_v21, %v3945_v55  ;;  %5816 = vmatpush.bf16.msrb.mxu3 %v4741_v41  ;;  %v2293_v26 = vunpack.c.1.s8 %v865_v45  ;;  %v2369_v63 = vunpack.c.0.s8 %v885_v0  ;;  %v3793_v28 = vcvt.s32.f32 %v2225_v1 }
 0x2e7   : > { %v4673_v56 = vpack.c.bf16 %v3733_v46, %v3729_v51  ;;  %v3797_v14 = vcvt.s32.f32 %v2229_v13  ;;  %v2373_v2 = vunpack.c.1.s8 %v885_v0  ;;  %5783 = vmatmul.bf16.vlgmr.msra.gmra.mxu0 %v8049_v30  ;;  %v3857_v31 = vcvt.s32.f32 %v2289_v44 }
 0x2e8   : > { %5827 = vmatpush.bf16.msrb.mxu0 %v4781_v50  ;;  %v3861_v19 = vcvt.s32.f32 %v2293_v26  ;;  %v3937_v4 = vcvt.s32.f32 %v2369_v63  ;;  %v2153_v25 = vunpack.c.2.s8 %v829_v54  ;;  %v2157_v18 = vunpack.c.3.s8 %v829_v54 }
 0x2e9   : > { %5791 = vmatpush.bf16.msra.mxu1 %v4673_v56  ;;  %v4705_v59 = vpack.c.bf16 %v3797_v14, %v3793_v28  ;;  %v3941_v61 = vcvt.s32.f32 %v2373_v2  ;;  %v2217_v45 = vunpack.c.2.s8 %v845_v42  ;;  %v2221_v12 = vunpack.c.3.s8 %v845_v42  ;;  %v825_v14 = vld [vmem:[%s7886_s14 + $0x990] sm:$0xff] }
 0x2ea   : > { %v4737_v32 = vpack.c.bf16 %v3861_v19, %v3857_v31  ;;  %v3721_v7 = vcvt.s32.f32 %v2153_v25  ;;  %v2281_v11 = vunpack.c.2.s8 %v861_v16  ;;  %v3725_v0 = vcvt.s32.f32 %v2157_v18  ;;  %v8603_v25 = vld [vmem:[%s7886_s14 + $0xa10] sm:$0xff] }
 0x2eb   : > { %5804 = vmatpush.bf16.msrb.mxu2 %v4705_v59  ;;  %v4777_v23 = vpack.c.bf16 %v3941_v61, %v3937_v4  ;;  %v3785_v9 = vcvt.s32.f32 %v2217_v45  ;;  %v2285_v33 = vunpack.c.3.s8 %v861_v16  ;;  %v3789_v49 = vcvt.s32.f32 %v2221_v12  ;;  %v857_v12 = vld [vmem:[%s7886_s14 + $0xa90] sm:$0xff] }
 0x2ec   : > { %5817 = vmatpush.bf16.msrb.mxu3 %v4737_v32  ;;  %v3849_v53 = vcvt.s32.f32 %v2281_v11  ;;  %v2361_v55 = vunpack.c.2.s8 %v881_v47  ;;  %v2365_v21 = vunpack.c.3.s8 %v881_v47  ;;  %v4669_v58 = vpack.c.bf16 %v3725_v0, %v3721_v7 }
 0x2ed   : > { %5828 = vmatpush.bf16.msrb.mxu0 %v4777_v23  ;;  %v3853_v41 = vcvt.s32.f32 %v2285_v33  ;;  %v2145_v51 = vunpack.c.0.s8 %v829_v54  ;;  %v2149_v50 = vunpack.c.1.s8 %v829_v54  ;;  %v4701_v46 = vpack.c.bf16 %v3789_v49, %v3785_v9  ;;  %v877_v9 = vld [vmem:[%s7886_s14 + $0xb30] sm:$0xff] }
 0x2ee   : > { %v3929_v1 = vcvt.s32.f32 %v2361_v55  ;;  %v3933_v13 = vcvt.s32.f32 %v2365_v21  ;;  %v2209_v44 = vunpack.c.0.s8 %v845_v42  ;;  %5792 = vmatpush.bf16.msra.mxu1 %v4669_v58  ;;  %v2213_v28 = vunpack.c.1.s8 %v845_v42 }
 0x2ef   : > { %v4733_v26 = vpack.c.bf16 %v3853_v41, %v3849_v53  ;;  %v3713_v63 = vcvt.s32.f32 %v2145_v51  ;;  %v3717_v56 = vcvt.s32.f32 %v2149_v50  ;;  %5805 = vmatpush.bf16.msrb.mxu2 %v4701_v46  ;;  %v2273_v19 = vunpack.c.0.s8 %v861_v16  ;;  %v8610_v51 = vld [vmem:[%s7886_s14 + $0xbf0] sm:$0xff] }
 0x2f0   : > { %v4773_v2 = vpack.c.bf16 %v3933_v13, %v3929_v1  ;;  %v3777_v31 = vcvt.s32.f32 %v2209_v44  ;;  %v2277_v4 = vunpack.c.1.s8 %v861_v16  ;;  %v3781_v59 = vcvt.s32.f32 %v2213_v28  ;;  %v8612_v44 = vpop.f32.mrf.mxu2 }
 0x2f1   : > { %5818 = vmatpush.bf16.msrb.mxu3 %v4733_v26  ;;  %v4665_v54 = vpack.c.bf16 %v3717_v56, %v3713_v63  ;;  %v2353_v61 = vunpack.c.0.s8 %v881_v47  ;;  %v2357_v18 = vunpack.c.1.s8 %v881_v47  ;;  %v3841_v45 = vcvt.s32.f32 %v2273_v19 }
 0x2f2   : > { %5829 = vmatpush.bf16.msrb.mxu0 %v4773_v2  ;;  %v3845_v32 = vcvt.s32.f32 %v2277_v4  ;;  %v2137_v7 = vunpack.c.2.s8 %v825_v14  ;;  %v2141_v42 = vunpack.c.3.s8 %v825_v14  ;;  %v4697_v11 = vpack.c.bf16 %v3781_v59, %v3777_v31 }
 0x2f3   : > { %5793 = vmatpush.bf16.msra.mxu1 %v4665_v54  ;;  %v3921_v23 = vcvt.s32.f32 %v2353_v61  ;;  %v3925_v0 = vcvt.s32.f32 %v2357_v18  ;;  %v2201_v16 = vunpack.c.2.s8 %v8603_v25  ;;  %v2205_v55 = vunpack.c.3.s8 %v8603_v25  ;;  %v8615_v54 = vpop.f32.mrf.mxu3 }
 0x2f4   : > { %v4729_v33 = vpack.c.bf16 %v3845_v32, %v3841_v45  ;;  %v3705_v49 = vcvt.s32.f32 %v2137_v7  ;;  %v3709_v53 = vcvt.s32.f32 %v2141_v42  ;;  %5806 = vmatpush.bf16.msrb.mxu2 %v4697_v11  ;;  %v2265_v58 = vunpack.c.2.s8 %v857_v12  ;;  %v8621_v11 = vld [vmem:[%s7886_s14 + $0x78] sm:$0xff] }
 0x2f5   : > { %v4769_v47 = vpack.c.bf16 %v3925_v0, %v3921_v23  ;;  %v3769_v21 = vcvt.s32.f32 %v2201_v16  ;;  %v2269_v41 = vunpack.c.3.s8 %v857_v12  ;;  %v3773_v46 = vcvt.s32.f32 %v2205_v55 }
 0x2f6   : > { %5819 = vmatpush.bf16.msrb.mxu3 %v4729_v33  ;;  %v4661_v50 = vpack.c.bf16 %v3709_v53, %v3705_v49  ;;  %v2345_v1 = vunpack.c.2.s8 %v877_v9  ;;  %v2349_v13 = vunpack.c.3.s8 %v877_v9  ;;  %v3833_v26 = vcvt.s32.f32 %v2265_v58  ;;  %v8623_v49 = vpop.f32.mrf.mxu0 }
 0x2f7   : > { %5830 = vmatpush.bf16.msrb.mxu0 %v4769_v47  ;;  %v3837_v63 = vcvt.s32.f32 %v2269_v41  ;;  %v2129_v56 = vunpack.c.0.s8 %v825_v14  ;;  %v2133_v28 = vunpack.c.1.s8 %v825_v14  ;;  %v4693_v2 = vpack.c.bf16 %v3773_v46, %v3769_v21  ;;  %v909_v46 = vld [vmem:[%s7886_s14 + $0xc30] sm:$0xff] }
 0x2f8   : > { %5794 = vmatpush.bf16.msra.mxu1 %v4661_v50  ;;  %v3913_v31 = vcvt.s32.f32 %v2345_v1  ;;  %v3917_v19 = vcvt.s32.f32 %v2349_v13  ;;  %v2441_v4 = vunpack.c.2.s8 %v8610_v51  ;;  %v2445_v45 = vunpack.c.3.s8 %v8610_v51 }
 0x2f9   : > { %v4725_v59 = vpack.c.bf16 %v3837_v63, %v3833_v26  ;;  %v3697_v61 = vcvt.s32.f32 %v2129_v56  ;;  %v3701_v18 = vcvt.s32.f32 %v2133_v28  ;;  %5807 = vmatpush.bf16.msrb.mxu2 %v4693_v2  ;;  %v2193_v42 = vunpack.c.0.s8 %v8603_v25  ;;  %v873_v63 = vld [vmem:[%s7886_s14 + $0xb10] sm:$0xff]  ;;  %v5552_v56 = vpop.f32.mrf.mxu2 }
 0x2fa   : > { %v4765_v32 = vpack.c.bf16 %v3917_v19, %v3913_v31  ;;  %v4009_v7 = vcvt.s32.f32 %v2441_v4  ;;  %v2197_v14 = vunpack.c.1.s8 %v8603_v25  ;;  %v4013_v0 = vcvt.s32.f32 %v2445_v45 }
 0x2fb   : > { %5820 = vmatpush.bf16.msrb.mxu3 %v4725_v59  ;;  %v4657_v23 = vpack.c.bf16 %v3701_v18, %v3697_v61  ;;  %v2257_v16 = vunpack.c.0.s8 %v857_v12  ;;  %v2261_v33 = vunpack.c.1.s8 %v857_v12  ;;  %v3761_v53 = vcvt.s32.f32 %v2193_v42  ;;  %v8632_v18 = vpop.f32.mrf.mxu1  ;;  %v5565_v45 = vpop.f32.mrf.mxu3 }
 0x2fc   : > { %5831 = vmatpush.bf16.msrb.mxu0 %v4765_v32  ;;  %v3765_v55 = vcvt.s32.f32 %v2197_v14  ;;  %v2337_v47 = vunpack.c.0.s8 %v877_v9  ;;  %v2341_v21 = vunpack.c.1.s8 %v877_v9  ;;  %v4813_v58 = vpack.c.bf16 %v4013_v0, %v4009_v7 }
 0x2fd   : > { %5795 = vmatpush.bf16.msra.mxu1 %v4657_v23  ;;  %v3825_v41 = vcvt.s32.f32 %v2257_v16  ;;  %v3829_v25 = vcvt.s32.f32 %v2261_v33  ;;  %v970_v50 = vunpack.c.2.s8 %v8621_v11  ;;  %v974_v12 = vunpack.c.3.s8 %v8621_v11  ;;  %v897_v23 = vld [vmem:[%s7886_s14 + $0xbd0] sm:$0xff] }
 0x2fe   : > { %v4689_v1 = vpack.c.bf16 %v3765_v55, %v3761_v53  ;;  %v3905_v13 = vcvt.s32.f32 %v2337_v47  ;;  %v3909_v26 = vcvt.s32.f32 %v2341_v21  ;;  %v2433_v9 = vunpack.c.0.s8 %v8610_v51 }
 0x2ff   : > { %v4721_v28 = vpack.c.bf16 %v3829_v25, %v3825_v41  ;;  %v2538_v2 = vcvt.s32.f32 %v970_v50  ;;  %v2437_v31 = vunpack.c.1.s8 %v8610_v51  ;;  %v2542_v4 = vcvt.s32.f32 %v974_v12 }
 0x300   : > { %5796 = vmatmul.bf16.vlgmr.msra.gmra.mxu1 %v8052_v34  ;;  %5808 = vmatpush.bf16.msrb.mxu2 %v4689_v1  ;;  %v4761_v19 = vpack.c.bf16 %v3909_v26, %v3905_v13  ;;  %v2473_v59 = vunpack.c.2.s8 %v909_v46  ;;  %v2477_v61 = vunpack.c.3.s8 %v909_v46  ;;  %v4001_v32 = vcvt.s32.f32 %v2433_v9  ;;  %v530_v13 = vld [vmem:[%s7886_s14 + $0x58] sm:$0xff] }
 0x301   : > { %5840 = vmatpush.bf16.msrb.mxu1 %v4813_v58  ;;  %5821 = vmatpush.bf16.msrb.mxu3 %v4721_v28  ;;  %v4005_v7 = vcvt.s32.f32 %v2437_v31  ;;  %v2329_v42 = vunpack.c.2.s8 %v873_v63  ;;  %v2333_v14 = vunpack.c.3.s8 %v873_v63  ;;  %v4078_v0 = vpack.c.bf16 %v2542_v4, %v2538_v2  ;;  %v5578_v58 = vpop.f32.mrf.mxu0 }
 0x302   : > { %5832 = vmatpush.bf16.msrb.mxu0 %v4761_v19  ;;  %v4041_v51 = vcvt.s32.f32 %v2473_v59  ;;  %v4045_v16 = vcvt.s32.f32 %v2477_v61  ;;  %v962_v33 = vunpack.c.0.s8 %v8621_v11  ;;  %v966_v21 = vunpack.c.1.s8 %v8621_v11  ;;  %v550_v19 = vld [vmem:[%s7886_s14 + $0xf8] sm:$0xff] }
 0x303   : > { %v4809_v53 = vpack.c.bf16 %v4005_v7, %v4001_v32  ;;  %5809 = vmatmul.bf16.vlgmr.msrb.gmra.mxu2 %v8086_v6  ;;  %v3897_v55 = vcvt.s32.f32 %v2329_v42  ;;  %v3901_v47 = vcvt.s32.f32 %v2333_v14  ;;  %v2425_v50 = vunpack.c.2.s8 %v897_v23 }
 0x304   : > { %v4829_v41 = vpack.c.bf16 %v4045_v16, %v4041_v51  ;;  %v2530_v25 = vcvt.s32.f32 %v962_v33  ;;  %v2429_v1 = vunpack.c.3.s8 %v897_v23  ;;  %5822 = vmatmul.bf16.vlgmr.msrb.gmra.mxu3 %v8088_v27  ;;  %v2534_v12 = vcvt.s32.f32 %v966_v21  ;;  %v5591_v51 = vpop.f32.mrf.mxu1 }
 0x305   : > { %5866 = vmatpush.bf16.msra.mxu3 %v4078_v0  ;;  %5841 = vmatpush.bf16.msrb.mxu1 %v4809_v53  ;;  %v4757_v26 = vpack.c.bf16 %v3901_v47, %v3897_v55  ;;  %v2465_v56 = vunpack.c.0.s8 %v909_v46  ;;  %v2469_v28 = vunpack.c.1.s8 %v909_v46  ;;  %v3993_v2 = vcvt.s32.f32 %v2425_v50  ;;  %v905_v0 = vld [vmem:[%s7886_s14 + $0xc10] sm:$0xff] }
 0x306   : > { %5857 = vmatpush.bf16.msra.mxu2 %v4829_v41  ;;  %v3997_v9 = vcvt.s32.f32 %v2429_v1  ;;  %v2321_v11 = vunpack.c.0.s8 %v873_v63  ;;  %v2325_v31 = vunpack.c.1.s8 %v873_v63  ;;  %v4074_v4 = vpack.c.bf16 %v2534_v12, %v2530_v25 }
 0x307   : > { %5833 = vmatpush.bf16.msrb.mxu0 %v4757_v26  ;;  %v4033_v59 = vcvt.s32.f32 %v2465_v56  ;;  %v4037_v61 = vcvt.s32.f32 %v2469_v28  ;;  %v954_v45 = vunpack.c.2.s8 %v530_v13  ;;  %v958_v14 = vunpack.c.3.s8 %v530_v13  ;;  %v893_v28 = vld [vmem:[%s7886_s14 + $0xbb0] sm:$0xff] }
 0x308   : > { %v4805_v32 = vpack.c.bf16 %v3997_v9, %v3993_v2  ;;  %v3889_v7 = vcvt.s32.f32 %v2321_v11  ;;  %v3893_v42 = vcvt.s32.f32 %v2325_v31  ;;  %v1034_v33 = vunpack.c.2.s8 %v550_v19  ;;  %v8643_v2 = vpop.f32.mrf.mxu2 }
 0x309   : > { %5867 = vmatpush.bf16.msra.mxu3 %v4074_v4  ;;  %v4825_v46 = vpack.c.bf16 %v4037_v61, %v4033_v59  ;;  %v2522_v16 = vcvt.s32.f32 %v954_v45  ;;  %v1038_v53 = vunpack.c.3.s8 %v550_v19  ;;  %v2526_v55 = vcvt.s32.f32 %v958_v14 }
 0x30a   : > { %5842 = vmatpush.bf16.msrb.mxu1 %v4805_v32  ;;  %v4753_v63 = vpack.c.bf16 %v3893_v42, %v3889_v7  ;;  %v2417_v47 = vunpack.c.0.s8 %v897_v23  ;;  %v2421_v21 = vunpack.c.1.s8 %v897_v23  ;;  %v2602_v58 = vcvt.s32.f32 %v1034_v33  ;;  %v8646_v32 = vld [vmem:[%s7886_s14 + $0x1f8] sm:$0xff] }
 0x30b   : > { %5858 = vmatpush.bf16.msra.mxu2 %v4825_v46  ;;  %v2606_v41 = vcvt.s32.f32 %v1038_v53  ;;  %v2457_v25 = vunpack.c.2.s8 %v905_v0  ;;  %v2461_v50 = vunpack.c.3.s8 %v905_v0  ;;  %v4070_v1 = vpack.c.bf16 %v2526_v55, %v2522_v16  ;;  %v8648_v46 = vpop.f32.mrf.mxu3 }
 0x30c   : > { %5834 = vmatpush.bf16.msrb.mxu0 %v4753_v63  ;;  %v3985_v26 = vcvt.s32.f32 %v2417_v47  ;;  %v3989_v12 = vcvt.s32.f32 %v2421_v21  ;;  %v946_v56 = vunpack.c.0.s8 %v530_v13  ;;  %v950_v4 = vunpack.c.1.s8 %v530_v13  ;;  %v526_v63 = vld [vmem:[%s7886_s14 + $0x38] sm:$0xff] }
 0x30d   : > { %v4110_v9 = vpack.c.bf16 %v2606_v41, %v2602_v58  ;;  %v4025_v11 = vcvt.s32.f32 %v2457_v25  ;;  %v4029_v31 = vcvt.s32.f32 %v2461_v50  ;;  %5868 = vmatpush.bf16.msra.mxu3 %v4070_v1  ;;  %v1026_v61 = vunpack.c.0.s8 %v550_v19  ;;  %v546_v58 = vld [vmem:[%s7886_s14 + $0xd8] sm:$0xff] }
 0x30e   : > { %v4801_v23 = vpack.c.bf16 %v3989_v12, %v3985_v26  ;;  %v2514_v59 = vcvt.s32.f32 %v946_v56  ;;  %v1030_v45 = vunpack.c.1.s8 %v550_v19  ;;  %v2518_v42 = vcvt.s32.f32 %v950_v4  ;;  %v8655_v26 = vpop.f32.mrf.mxu0 }
 0x30f   : > { %v4821_v7 = vpack.c.bf16 %v4029_v31, %v4025_v11  ;;  %v2409_v14 = vunpack.c.2.s8 %v893_v28  ;;  %v2413_v51 = vunpack.c.3.s8 %v893_v28  ;;  %5835 = vmatmul.bf16.vlgmr.msrb.gmra.mxu0 %v8091_v38  ;;  %v2594_v13 = vcvt.s32.f32 %v1026_v61 }
 0x310   : > { %5879 = vmatpush.bf16.msra.mxu0 %v4110_v9  ;;  %5843 = vmatpush.bf16.msrb.mxu1 %v4801_v23  ;;  %v2598_v16 = vcvt.s32.f32 %v1030_v45  ;;  %v2449_v33 = vunpack.c.0.s8 %v905_v0  ;;  %v2453_v53 = vunpack.c.1.s8 %v905_v0  ;;  %v4066_v19 = vpack.c.bf16 %v2518_v42, %v2514_v59  ;;  %v5604_v59 = vpop.f32.mrf.mxu2 }
 0x311   : > { %5859 = vmatpush.bf16.msra.mxu2 %v4821_v7  ;;  %v3977_v55 = vcvt.s32.f32 %v2409_v14  ;;  %v3981_v47 = vcvt.s32.f32 %v2413_v51  ;;  %v1162_v21 = vunpack.c.2.s8 %v8646_v32  ;;  %v1166_v1 = vunpack.c.3.s8 %v8646_v32 }
 0x312   : > { %v4106_v41 = vpack.c.bf16 %v2598_v16, %v2594_v13  ;;  %v4017_v25 = vcvt.s32.f32 %v2449_v33  ;;  %v4021_v50 = vcvt.s32.f32 %v2453_v53  ;;  %5869 = vmatpush.bf16.msra.mxu3 %v4066_v19  ;;  %v5564_v0 = vadd.f32 %v8615_v54, %v8612_v44  ;;  %v8660_v44 = vpop.f32.mrf.mxu1 }
 0x313   : > { %v4797_v12 = vpack.c.bf16 %v3981_v47, %v3977_v55  ;;  %v2730_v56 = vcvt.s32.f32 %v1162_v21  ;;  %v938_v9 = vunpack.c.2.s8 %v526_v63  ;;  %v2734_v31 = vcvt.s32.f32 %v1166_v1  ;;  %v5617_v55 = vpop.f32.mrf.mxu3 }
 0x314   : > { %5880 = vmatpush.bf16.msra.mxu0 %v4106_v41  ;;  %v4817_v11 = vpack.c.bf16 %v4021_v50, %v4017_v25  ;;  %v942_v4 = vunpack.c.3.s8 %v526_v63  ;;  %v1018_v23 = vunpack.c.2.s8 %v546_v58  ;;  %v1022_v45 = vunpack.c.3.s8 %v546_v58  ;;  %v889_v25 = vld [vmem:[%s7886_s14 + $0xb90] sm:$0xff] }
 0x315   : > { %5844 = vmatpush.bf16.msrb.mxu1 %v4797_v12  ;;  %v2506_v61 = vcvt.s32.f32 %v938_v9  ;;  %v2401_v7 = vunpack.c.0.s8 %v893_v28  ;;  %v2405_v42 = vunpack.c.1.s8 %v893_v28  ;;  %v4174_v14 = vpack.c.bf16 %v2734_v31, %v2730_v56  ;;  %v8666_v56 = vld [vmem:[%s7886_s14 + $0x1d8] sm:$0xff] }
 0x316   : > { %5860 = vmatpush.bf16.msra.mxu2 %v4817_v11  ;;  %v2510_v51 = vcvt.s32.f32 %v942_v4  ;;  %v2586_v13 = vcvt.s32.f32 %v1018_v23  ;;  %v5577_v16 = vadd.f32 %v8623_v49, %v5564_v0  ;;  %v2590_v54 = vcvt.s32.f32 %v1022_v45  ;;  %v7668_v0 = vld [vmem:[#allocation1] sm:$0xff]  ;;  %v5630_v23 = vpop.f32.mrf.mxu0 }
 0x317   : > { %v3969_v33 = vcvt.s32.f32 %v2401_v7  ;;  %v3973_v53 = vcvt.s32.f32 %v2405_v42  ;;  %v1154_v19 = vunpack.c.0.s8 %v8646_v32  ;;  %v1158_v28 = vunpack.c.1.s8 %v8646_v32  ;;  %v522_v32 = vld [vmem:[%s7886_s14 + $0x18] sm:$0xff] }
 0x318   : > { %v4062_v47 = vpack.c.bf16 %v2510_v51, %v2506_v61  ;;  %v930_v21 = vunpack.c.0.s8 %v526_v63  ;;  %v934_v41 = vunpack.c.1.s8 %v526_v63  ;;  %v4102_v50 = vpack.c.bf16 %v2590_v54, %v2586_v13  ;;  %v542_v7 = vld [vmem:[%s7886_s14 + $0xb8] sm:$0xff] }
 0x319   : > { %v4793_v1 = vpack.c.bf16 %v3973_v53, %v3969_v33  ;;  %v2722_v49 = vcvt.s32.f32 %v1154_v19  ;;  %v1010_v12 = vunpack.c.0.s8 %v546_v58  ;;  %7553 = vmatmul.msk.bf16.vlgmr.msra.gmra.mxu2 %vm4888_vm0, %v7668_v0  ;;  %v2726_v9 = vcvt.s32.f32 %v1158_v28 }
 0x31a   : > { %5905 = vmatpush.bf16.msrb.mxu2 %v4174_v14  ;;  %5870 = vmatpush.bf16.msra.mxu3 %v4062_v47  ;;  %v2498_v11 = vcvt.s32.f32 %v930_v21  ;;  %v2502_v31 = vcvt.s32.f32 %v934_v41  ;;  %v1014_v4 = vunpack.c.1.s8 %v546_v58  ;;  %v8671_v59 = vadd.f32 %v8632_v18, %v5577_v16  ;;  %v8677_v47 = vld [vmem:[%s7886_s14 + $0x178] sm:$0xff]  ;;  %v5643_v28 = vpop.f32.mrf.mxu1 }
 0x31b   : > { %5881 = vmatpush.bf16.msra.mxu0 %v4102_v50  ;;  %5845 = vmatpush.bf16.msrb.mxu1 %v4793_v1  ;;  %v2578_v63 = vcvt.s32.f32 %v1010_v12  ;;  %v2393_v61 = vunpack.c.2.s8 %v889_v25  ;;  %v2397_v45 = vunpack.c.3.s8 %v889_v25  ;;  %v4170_v42 = vpack.c.bf16 %v2726_v9, %v2722_v49 }
 0x31c   : > { %v4058_v14 = vpack.c.bf16 %v2502_v31, %v2498_v11  ;;  %v2582_v51 = vcvt.s32.f32 %v1014_v4  ;;  %v1146_v13 = vunpack.c.2.s8 %v8666_v56  ;;  %v1150_v58 = vunpack.c.3.s8 %v8666_v56 }
 0x31d   : > { %v3961_v54 = vcvt.s32.f32 %v2393_v61  ;;  %v3965_v33 = vcvt.s32.f32 %v2397_v45  ;;  %v922_v53 = vunpack.c.2.s8 %v522_v32  ;;  %v926_v18 = vunpack.c.3.s8 %v522_v32 }
 0x31e   : > { %5906 = vmatpush.bf16.msrb.mxu2 %v4170_v42  ;;  %5871 = vmatpush.bf16.msra.mxu3 %v4058_v14  ;;  %v4098_v19 = vpack.c.bf16 %v2582_v51, %v2578_v63  ;;  %v2714_v55 = vcvt.s32.f32 %v1146_v13  ;;  %v1002_v16 = vunpack.c.2.s8 %v542_v7  ;;  %v2718_v41 = vcvt.s32.f32 %v1150_v58 }
 0x31f   : > { %v4789_v21 = vpack.c.bf16 %v3965_v33, %v3961_v54  ;;  %v2490_v50 = vcvt.s32.f32 %v922_v53  ;;  %v1006_v1 = vunpack.c.3.s8 %v542_v7  ;;  %v2494_v49 = vcvt.s32.f32 %v926_v18  ;;  %v598_v33 = vld [vmem:[%s7886_s14 + $0x278] sm:$0xff] }
 0x320   : > { %5882 = vmatpush.bf16.msra.mxu0 %v4098_v19  ;;  %v2570_v12 = vcvt.s32.f32 %v1002_v16  ;;  %v2385_v0 = vunpack.c.0.s8 %v889_v25  ;;  %v2389_v9 = vunpack.c.1.s8 %v889_v25  ;;  %v4166_v11 = vpack.c.bf16 %v2718_v41, %v2714_v55  ;;  %v8684_v55 = vpop.f32.mrf.mxu2 }
 0x321   : > { %5846 = vmatpush.bf16.msrb.mxu1 %v4789_v21  ;;  %v2574_v31 = vcvt.s32.f32 %v1006_v1  ;;  %v1098_v4 = vunpack.c.2.s8 %v8677_v47  ;;  %v1102_v23 = vunpack.c.3.s8 %v8677_v47  ;;  %v4054_v63 = vpack.c.bf16 %v2494_v49, %v2490_v50  ;;  %v574_v49 = vld [vmem:[%s7886_s14 + $0x1b8] sm:$0xff] }
 0x322   : > { %v3953_v61 = vcvt.s32.f32 %v2385_v0  ;;  %v3957_v45 = vcvt.s32.f32 %v2389_v9  ;;  %v1138_v42 = vunpack.c.0.s8 %v8666_v56  ;;  %5907 = vmatpush.bf16.msrb.mxu2 %v4166_v11  ;;  %v1142_v54 = vunpack.c.1.s8 %v8666_v56  ;;  %v538_v11 = vld [vmem:[%s7886_s14 + $0x98] sm:$0xff] }
 0x323   : > { %v4094_v14 = vpack.c.bf16 %v2574_v31, %v2570_v12  ;;  %v2666_v51 = vcvt.s32.f32 %v1098_v4  ;;  %v2670_v13 = vcvt.s32.f32 %v1102_v23  ;;  %5872 = vmatpush.bf16.msra.mxu3 %v4054_v63  ;;  %v914_v53 = vunpack.c.0.s8 %v522_v32  ;;  %v8690_v31 = vpop.f32.mrf.mxu3 }
 0x324   : > { %v4785_v25 = vpack.c.bf16 %v3957_v45, %v3953_v61  ;;  %v2706_v58 = vcvt.s32.f32 %v1138_v42  ;;  %v918_v19 = vunpack.c.1.s8 %v522_v32  ;;  %v2710_v16 = vcvt.s32.f32 %v1142_v54 }
 0x325   : > { %5883 = vmatpush.bf16.msra.mxu0 %v4094_v14  ;;  %v4142_v18 = vpack.c.bf16 %v2670_v13, %v2666_v51  ;;  %v994_v28 = vunpack.c.0.s8 %v542_v7  ;;  %v998_v21 = vunpack.c.1.s8 %v542_v7  ;;  %v2482_v41 = vcvt.s32.f32 %v914_v53  ;;  %v8695_v51 = vpop.f32.mrf.mxu0 }
 0x326   : > { %5847 = vmatpush.bf16.msrb.mxu1 %v4785_v25  ;;  %v2486_v50 = vcvt.s32.f32 %v918_v19  ;;  %v1226_v1 = vunpack.c.2.s8 %v598_v33  ;;  %v1230_v56 = vunpack.c.3.s8 %v598_v33  ;;  %v4162_v12 = vpack.c.bf16 %v2710_v16, %v2706_v58  ;;  %v562_v25 = vld [vmem:[%s7886_s14 + $0x158] sm:$0xff] }
 0x327   : > { %v2562_v0 = vcvt.s32.f32 %v994_v28  ;;  %v2566_v9 = vcvt.s32.f32 %v998_v21  ;;  %v5603_v32 = vadd.f32 %v8643_v2, %v8671_v59  ;;  %v1090_v63 = vunpack.c.0.s8 %v8677_v47 }
 0x328   : > { %v4050_v4 = vpack.c.bf16 %v2486_v50, %v2482_v41  ;;  %v2794_v23 = vcvt.s32.f32 %v1226_v1  ;;  %v2798_v7 = vcvt.s32.f32 %v1230_v56  ;;  %5908 = vmatpush.bf16.msrb.mxu2 %v4162_v12  ;;  %v1094_v45 = vunpack.c.1.s8 %v8677_v47  ;;  %v5656_v41 = vpop.f32.mrf.mxu2 }
 0x329   : > { %5848 = vmatmul.bf16.vlgmr.msrb.gmra.mxu1 %v8093_v40  ;;  %v4090_v61 = vpack.c.bf16 %v2566_v9, %v2562_v0  ;;  %v1130_v42 = vunpack.c.2.s8 %v574_v49  ;;  %v1134_v14 = vunpack.c.3.s8 %v574_v49  ;;  %v2658_v59 = vcvt.s32.f32 %v1090_v63 }
 0x32a   : > { %5892 = vmatpush.bf16.msra.mxu1 %v4142_v18  ;;  %5873 = vmatpush.bf16.msra.mxu3 %v4050_v4  ;;  %v4206_v2 = vpack.c.bf16 %v2798_v7, %v2794_v23  ;;  %v5616_v13 = vadd.f32 %v8648_v46, %v5603_v32  ;;  %v986_v54 = vunpack.c.2.s8 %v538_v11  ;;  %v2662_v58 = vcvt.s32.f32 %v1094_v45  ;;  %v594_v4 = vld [vmem:[%s7886_s14 + $0x258] sm:$0xff] }
 0x32b   : > { %5884 = vmatpush.bf16.msra.mxu0 %v4090_v61  ;;  %v2698_v53 = vcvt.s32.f32 %v1130_v42  ;;  %v2702_v19 = vcvt.s32.f32 %v1134_v14  ;;  %v990_v18 = vunpack.c.3.s8 %v538_v11  ;;  %v1218_v47 = vunpack.c.0.s8 %v598_v33  ;;  %v5669_v61 = vpop.f32.mrf.mxu3 }
 0x32c   : > { %v2554_v16 = vcvt.s32.f32 %v986_v54  ;;  %v1222_v28 = vunpack.c.1.s8 %v598_v33  ;;  %v5629_v21 = vadd.f32 %v8655_v26, %v5616_v13  ;;  %v4138_v50 = vpack.c.bf16 %v2662_v58, %v2658_v59  ;;  %v614_v26 = vld [vmem:[%s7886_s14 + $0x2f8] sm:$0xff] }
 0x32d   : > { %v4158_v1 = vpack.c.bf16 %v2702_v19, %v2698_v53  ;;  %v2558_v56 = vcvt.s32.f32 %v990_v18  ;;  %v1082_v46 = vunpack.c.2.s8 %v562_v25  ;;  %5874 = vmatmul.bf16.vlgmr.msra.gmra.mxu3 %v7911_v57  ;;  %v2786_v12 = vcvt.s32.f32 %v1218_v47  ;;  %v5682_v58 = vpop.f32.mrf.mxu0 }
 0x32e   : > { %5918 = vmatpush.bf16.msrb.mxu3 %v4206_v2  ;;  %v2790_v0 = vcvt.s32.f32 %v1222_v28  ;;  %v1086_v9 = vunpack.c.3.s8 %v562_v25  ;;  %v1122_v32 = vunpack.c.0.s8 %v574_v49  ;;  %5893 = vmatpush.bf16.msra.mxu1 %v4138_v50  ;;  %v1126_v33 = vunpack.c.1.s8 %v574_v49 }
 0x32f   : > { %5909 = vmatpush.bf16.msrb.mxu2 %v4158_v1  ;;  %v4086_v23 = vpack.c.bf16 %v2558_v56, %v2554_v16  ;;  %v2650_v7 = vcvt.s32.f32 %v1082_v46  ;;  %v978_v63 = vunpack.c.0.s8 %v538_v11  ;;  %v982_v2 = vunpack.c.1.s8 %v538_v11  ;;  %v570_v16 = vld [vmem:[%s7886_s14 + $0x198] sm:$0xff] }
 0x330   : > { %v4202_v45 = vpack.c.bf16 %v2790_v0, %v2786_v12  ;;  %v2654_v42 = vcvt.s32.f32 %v1086_v9  ;;  %v2690_v14 = vcvt.s32.f32 %v1122_v32  ;;  %v2694_v57 = vcvt.s32.f32 %v1126_v33  ;;  %v558_v33 = vld [vmem:[%s7886_s14 + $0x138] sm:$0xff] }
 0x331   : > { %5885 = vmatpush.bf16.msra.mxu0 %v4086_v23  ;;  %v2546_v59 = vcvt.s32.f32 %v978_v63  ;;  %v8704_v13 = vadd.f32 %v8660_v44, %v5629_v21  ;;  %v1210_v54 = vunpack.c.2.s8 %v594_v4  ;;  %v2550_v19 = vcvt.s32.f32 %v982_v2 }
 0x332   : > { %5919 = vmatpush.bf16.msrb.mxu3 %v4202_v45  ;;  %v4134_v53 = vpack.c.bf16 %v2654_v42, %v2650_v7  ;;  %v1214_v49 = vunpack.c.3.s8 %v594_v4  ;;  %v1290_v18 = vunpack.c.2.s8 %v614_v26  ;;  %v4154_v47 = vpack.c.bf16 %v2694_v57, %v2690_v14 }
 0x333   : > { %v2778_v28 = vcvt.s32.f32 %v1210_v54  ;;  %v1294_v41 = vunpack.c.3.s8 %v614_v26  ;;  %v1074_v50 = vunpack.c.0.s8 %v562_v25  ;;  %v4082_v11 = vpack.c.bf16 %v2550_v19, %v2546_v59  ;;  %v646_v59 = vld [vmem:[%s7886_s14 + $0x3f8] sm:$0xff] }
 0x334   : > { %5894 = vmatpush.bf16.msra.mxu1 %v4134_v53  ;;  %v2782_v1 = vcvt.s32.f32 %v1214_v49  ;;  %v2858_v56 = vcvt.s32.f32 %v1290_v18  ;;  %v1078_v46 = vunpack.c.1.s8 %v562_v25  ;;  %5910 = vmatpush.bf16.msrb.mxu2 %v4154_v47  ;;  %v1114_v12 = vunpack.c.2.s8 %v570_v16  ;;  %v590_v49 = vld [vmem:[%s7886_s14 + $0x238] sm:$0xff] }
 0x335   : > { %v2862_v44 = vcvt.s32.f32 %v1294_v41  ;;  %v2642_v21 = vcvt.s32.f32 %v1074_v50  ;;  %v1118_v0 = vunpack.c.3.s8 %v570_v16  ;;  %5886 = vmatpush.bf16.msra.mxu0 %v4082_v11  ;;  %v1202_v23 = vunpack.c.0.s8 %v594_v4 }
 0x336   : > { %v4198_v9 = vpack.c.bf16 %v2782_v1, %v2778_v28  ;;  %v2646_v32 = vcvt.s32.f32 %v1078_v46  ;;  %v1206_v7 = vunpack.c.1.s8 %v594_v4  ;;  %v2682_v61 = vcvt.s32.f32 %v1114_v12  ;;  %v610_v1 = vld [vmem:[%s7886_s14 + $0x2d8] sm:$0xff] }
 0x337   : > { %v4238_v63 = vpack.c.bf16 %v2862_v44, %v2858_v56  ;;  %v2686_v45 = vcvt.s32.f32 %v1118_v0  ;;  %v1282_v42 = vunpack.c.0.s8 %v614_v26  ;;  %v2770_v25 = vcvt.s32.f32 %v1202_v23 }
 0x338   : > { %5920 = vmatpush.bf16.msrb.mxu3 %v4198_v9  ;;  %v4130_v14 = vpack.c.bf16 %v2646_v32, %v2642_v21  ;;  %v2774_v2 = vcvt.s32.f32 %v1206_v7  ;;  %v1286_v57 = vunpack.c.1.s8 %v614_v26  ;;  %v1066_v53 = vunpack.c.2.s8 %v558_v33  ;;  %5887 = vmatmul.bf16.vlgmr.msra.gmra.mxu0 %v7913_v62 }
 0x339   : > { %5931 = vmatpush.bf16.msrb.mxu0 %v4238_v63  ;;  %v4150_v54 = vpack.c.bf16 %v2686_v45, %v2682_v61  ;;  %v2850_v58 = vcvt.s32.f32 %v1282_v42  ;;  %v1070_v19 = vunpack.c.3.s8 %v558_v33  ;;  %v1106_v47 = vunpack.c.0.s8 %v570_v16 }
 0x33a   : > { %5895 = vmatpush.bf16.msra.mxu1 %v4130_v14  ;;  %v4194_v4 = vpack.c.bf16 %v2774_v2, %v2770_v25  ;;  %v2854_v18 = vcvt.s32.f32 %v1286_v57  ;;  %v1110_v28 = vunpack.c.1.s8 %v570_v16  ;;  %v2634_v41 = vcvt.s32.f32 %v1066_v53  ;;  %v8714_v14 = vpop.f32.mrf.mxu1 }
 0x33b   : > { %5911 = vmatpush.bf16.msrb.mxu2 %v4150_v54  ;;  %v2638_v50 = vcvt.s32.f32 %v1070_v19  ;;  %v1418_v11 = vunpack.c.2.s8 %v646_v59  ;;  %v1422_v26 = vunpack.c.3.s8 %v646_v59  ;;  %v2674_v46 = vcvt.s32.f32 %v1106_v47 }
 0x33c   : > { %5921 = vmatpush.bf16.msrb.mxu3 %v4194_v4  ;;  %v4234_v56 = vpack.c.bf16 %v2854_v18, %v2850_v58  ;;  %v2678_v44 = vcvt.s32.f32 %v1110_v28  ;;  %v1194_v21 = vunpack.c.2.s8 %v590_v49  ;;  %v1198_v32 = vunpack.c.3.s8 %v590_v49  ;;  %v554_v18 = vld [vmem:[%s7886_s14 + $0x118] sm:$0xff] }
 0x33d   : > { %v4126_v12 = vpack.c.bf16 %v2638_v50, %v2634_v41  ;;  %v2986_v0 = vcvt.s32.f32 %v1418_v11  ;;  %v2990_v9 = vcvt.s32.f32 %v1422_v26  ;;  %v1274_v7 = vunpack.c.2.s8 %v610_v1  ;;  %v642_v26 = vld [vmem:[%s7886_s14 + $0x3d8] sm:$0xff] }
 0x33e   : > { %5932 = vmatpush.bf16.msrb.mxu0 %v4234_v56  ;;  %v4146_v23 = vpack.c.bf16 %v2678_v44, %v2674_v46  ;;  %v2762_v16 = vcvt.s32.f32 %v1194_v21  ;;  %v1278_v62 = vunpack.c.3.s8 %v610_v1  ;;  %v2766_v61 = vcvt.s32.f32 %v1198_v32  ;;  %v586_v44 = vld [vmem:[%s7886_s14 + $0x218] sm:$0xff] }
 0x33f   : > { %5896 = vmatpush.bf16.msra.mxu1 %v4126_v12  ;;  %v4302_v63 = vpack.c.bf16 %v2990_v9, %v2986_v0  ;;  %v5655_v45 = vadd.f32 %v8684_v55, %v8704_v13  ;;  %v1058_v42 = vunpack.c.0.s8 %v558_v33  ;;  %v2842_v25 = vcvt.s32.f32 %v1274_v7  ;;  %v8725_v32 = vld [vmem:[%s7886_s14 + $0x2b8] sm:$0xff] }
 0x340   : > { %5912 = vmatpush.bf16.msrb.mxu2 %v4146_v23  ;;  %v2846_v2 = vcvt.s32.f32 %v1278_v62  ;;  %v1062_v57 = vunpack.c.1.s8 %v558_v33  ;;  %v1410_v54 = vunpack.c.0.s8 %v646_v59  ;;  %v4190_v58 = vpack.c.bf16 %v2766_v61, %v2762_v16 }
 0x341   : > { %v2626_v53 = vcvt.s32.f32 %v1058_v42  ;;  %v1414_v19 = vunpack.c.1.s8 %v646_v59  ;;  %v5668_v4 = vadd.f32 %v8690_v31, %v5655_v45  ;;  %v1186_v13 = vunpack.c.0.s8 %v590_v49 }
 0x342   : > { %v4230_v47 = vpack.c.bf16 %v2846_v2, %v2842_v25  ;;  %v2630_v28 = vcvt.s32.f32 %v1062_v57  ;;  %v2978_v55 = vcvt.s32.f32 %v1410_v54  ;;  %5922 = vmatpush.bf16.msrb.mxu3 %v4190_v58  ;;  %v1190_v50 = vunpack.c.1.s8 %v590_v49  ;;  %v8729_v2 = vld [vmem:[%s7886_s14 + $0x378] sm:$0xff] }
 0x343   : > { %v2982_v41 = vcvt.s32.f32 %v1414_v19  ;;  %v1266_v11 = vunpack.c.0.s8 %v610_v1  ;;  %v1270_v33 = vunpack.c.1.s8 %v610_v1  ;;  %5913 = vmatmul.bf16.vlgmr.msrb.gmra.mxu2 %v7918_v8  ;;  %v2754_v59 = vcvt.s32.f32 %v1186_v13 }
 0x344   : > { %5957 = vmatpush.bf16.msra.mxu2 %v4302_v63  ;;  %5933 = vmatpush.bf16.msrb.mxu0 %v4230_v47  ;;  %v4122_v56 = vpack.c.bf16 %v2630_v28, %v2626_v53  ;;  %v8721_v31 = vadd.f32 %v8695_v51, %v5668_v4  ;;  %v1050_v46 = vunpack.c.2.s8 %v554_v18  ;;  %v2758_v12 = vcvt.s32.f32 %v1190_v50  ;;  %v5695_v63 = vpop.f32.mrf.mxu1 }
 0x345   : > { %v4298_v21 = vpack.c.bf16 %v2982_v41, %v2978_v55  ;;  %v2834_v0 = vcvt.s32.f32 %v1266_v11  ;;  %v2838_v9 = vcvt.s32.f32 %v1270_v33  ;;  %v1054_v49 = vunpack.c.3.s8 %v554_v18 }
 0x346   : > { %5897 = vmatpush.bf16.msra.mxu1 %v4122_v56  ;;  %v2618_v1 = vcvt.s32.f32 %v1050_v46  ;;  %v1402_v23 = vunpack.c.2.s8 %v642_v26  ;;  %v1406_v8 = vunpack.c.3.s8 %v642_v26  ;;  %v4186_v16 = vpack.c.bf16 %v2758_v12, %v2754_v59 }
 0x347   : > { %v4226_v7 = vpack.c.bf16 %v2838_v9, %v2834_v0  ;;  %v1178_v62 = vunpack.c.2.s8 %v586_v44  ;;  %v1182_v51 = vunpack.c.3.s8 %v586_v44  ;;  %v2622_v61 = vcvt.s32.f32 %v1054_v49  ;;  %v8735_v9 = vpop.f32.mrf.mxu2 }
 0x348   : > { %5958 = vmatpush.bf16.msra.mxu2 %v4298_v21  ;;  %v2970_v45 = vcvt.s32.f32 %v1402_v23  ;;  %v2974_v42 = vcvt.s32.f32 %v1406_v8  ;;  %v1258_v25 = vunpack.c.2.s8 %v8725_v32  ;;  %5923 = vmatpush.bf16.msrb.mxu3 %v4186_v16  ;;  %v1262_v58 = vunpack.c.3.s8 %v8725_v32 }
 0x349   : > { %5934 = vmatpush.bf16.msrb.mxu0 %v4226_v7  ;;  %v2746_v57 = vcvt.s32.f32 %v1178_v62  ;;  %v2750_v54 = vcvt.s32.f32 %v1182_v51  ;;  %v1042_v53 = vunpack.c.0.s8 %v554_v18  ;;  %v4118_v19 = vpack.c.bf16 %v2622_v61, %v2618_v1  ;;  %v638_v51 = vld [vmem:[%s7886_s14 + $0x3b8] sm:$0xff] }
 0x34a   : > { %v4294_v4 = vpack.c.bf16 %v2974_v42, %v2970_v45  ;;  %v2826_v47 = vcvt.s32.f32 %v1258_v25  ;;  %v1046_v28 = vunpack.c.1.s8 %v554_v18  ;;  %v2830_v13 = vcvt.s32.f32 %v1262_v58  ;;  %v662_v18 = vld [vmem:[%s7886_s14 + $0x478] sm:$0xff]  ;;  %v8741_v25 = vpop.f32.mrf.mxu3 }
 0x34b   : > { %v4182_v55 = vpack.c.bf16 %v2750_v54, %v2746_v57  ;;  %v2610_v41 = vcvt.s32.f32 %v1042_v53  ;;  %v1354_v50 = vunpack.c.2.s8 %v8729_v2  ;;  %5898 = vmatpush.bf16.msra.mxu1 %v4118_v19  ;;  %v1358_v33 = vunpack.c.3.s8 %v8729_v2  ;;  %v602_v42 = vld [vmem:[%s7886_s14 + $0x298] sm:$0xff] }
 0x34c   : > { %5959 = vmatpush.bf16.msra.mxu2 %v4294_v4  ;;  %v2614_v11 = vcvt.s32.f32 %v1046_v28  ;;  %v1394_v56 = vunpack.c.0.s8 %v642_v26  ;;  %v1398_v59 = vunpack.c.1.s8 %v642_v26  ;;  %v4222_v46 = vpack.c.bf16 %v2830_v13, %v2826_v47  ;;  %v8745_v28 = vpop.f32.mrf.mxu0 }
 0x34d   : > { %5924 = vmatpush.bf16.msrb.mxu3 %v4182_v55  ;;  %v2922_v21 = vcvt.s32.f32 %v1354_v50  ;;  %v1170_v12 = vunpack.c.0.s8 %v586_v44  ;;  %v1174_v0 = vunpack.c.1.s8 %v586_v44  ;;  %v2926_v1 = vcvt.s32.f32 %v1358_v33 }
 0x34e   : > { %v4114_v49 = vpack.c.bf16 %v2614_v11, %v2610_v41  ;;  %v2962_v23 = vcvt.s32.f32 %v1394_v56  ;;  %v2966_v8 = vcvt.s32.f32 %v1398_v59  ;;  %5935 = vmatpush.bf16.msrb.mxu0 %v4222_v46  ;;  %v1250_v62 = vunpack.c.0.s8 %v8725_v32  ;;  %v8748_v11 = vld [vmem:[%s7886_s14 + $0x358] sm:$0xff] }
 0x34f   : > { %v2738_v16 = vcvt.s32.f32 %v1170_v12  ;;  %v2742_v7 = vcvt.s32.f32 %v1174_v0  ;;  %v1254_v26 = vunpack.c.1.s8 %v8725_v32  ;;  %v4270_v63 = vpack.c.bf16 %v2926_v1, %v2922_v21 }
 0x350   : > { %5899 = vmatpush.bf16.msra.mxu1 %v4114_v49  ;;  %v4290_v61 = vpack.c.bf16 %v2966_v8, %v2962_v23  ;;  %v1482_v44 = vunpack.c.2.s8 %v662_v18  ;;  %v1486_v45 = vunpack.c.3.s8 %v662_v18  ;;  %v2818_v54 = vcvt.s32.f32 %v1250_v62  ;;  %v5708_v49 = vpop.f32.mrf.mxu2 }
 0x351   : > { %v4178_v57 = vpack.c.bf16 %v2742_v7, %v2738_v16  ;;  %v2822_v58 = vcvt.s32.f32 %v1254_v26  ;;  %v1346_v53 = vunpack.c.0.s8 %v8729_v2  ;;  %v1350_v32 = vunpack.c.1.s8 %v8729_v2 }
 0x352   : > { %5960 = vmatpush.bf16.msra.mxu2 %v4290_v61  ;;  %v3050_v19 = vcvt.s32.f32 %v1482_v44  ;;  %v3054_v4 = vcvt.s32.f32 %v1486_v45  ;;  %v1386_v47 = vunpack.c.2.s8 %v638_v51  ;;  %v1390_v41 = vunpack.c.3.s8 %v638_v51 }
 0x353   : > { %5925 = vmatpush.bf16.msrb.mxu3 %v4178_v57  ;;  %v4218_v55 = vpack.c.bf16 %v2822_v58, %v2818_v54  ;;  %v2914_v13 = vcvt.s32.f32 %v1346_v53  ;;  %v1242_v50 = vunpack.c.2.s8 %v602_v42  ;;  %5900 = vmatmul.bf16.vlgmr.msra.gmra.mxu1 %v7915_v3  ;;  %v2918_v56 = vcvt.s32.f32 %v1350_v32  ;;  %v678_v57 = vld [vmem:[%s7886_s14 + $0x4f8] sm:$0xff]  ;;  %v5721_v54 = vpop.f32.mrf.mxu3 }
 0x354   : > { %5944 = vmatpush.bf16.msrb.mxu1 %v4270_v63  ;;  %v4334_v33 = vpack.c.bf16 %v3054_v4, %v3050_v19  ;;  %v2954_v59 = vcvt.s32.f32 %v1386_v47  ;;  %v1246_v46 = vunpack.c.3.s8 %v602_v42  ;;  %v2958_v21 = vcvt.s32.f32 %v1390_v41  ;;  %v658_v63 = vld [vmem:[%s7886_s14 + $0x458] sm:$0xff] }
 0x355   : > { %5936 = vmatpush.bf16.msrb.mxu0 %v4218_v55  ;;  %v2810_v2 = vcvt.s32.f32 %v1242_v50  ;;  %v1474_v12 = vunpack.c.0.s8 %v662_v18  ;;  %v1478_v0 = vunpack.c.1.s8 %v662_v18  ;;  %v4266_v1 = vpack.c.bf16 %v2918_v56, %v2914_v13  ;;  %v5734_v13 = vpop.f32.mrf.mxu0  ;;  %v634_v56 = vld [vmem:[%s7886_s14 + $0x398] sm:$0xff] }
 0x356   : > { %v2814_v23 = vcvt.s32.f32 %v1246_v46  ;;  %v1338_v8 = vunpack.c.2.s8 %v8748_v11  ;;  %v1342_v16 = vunpack.c.3.s8 %v8748_v11  ;;  %v4286_v3 = vpack.c.bf16 %v2958_v21, %v2954_v59  ;;  %5926 = vmatmul.bf16.vlgmr.msrb.gmra.mxu3 %v7936_v35 }
 0x357   : > { %5970 = vmatpush.bf16.msra.mxu3 %v4334_v33  ;;  %v3042_v7 = vcvt.s32.f32 %v1474_v12  ;;  %v3046_v62 = vcvt.s32.f32 %v1478_v0  ;;  %v1378_v26 = vunpack.c.0.s8 %v638_v51  ;;  %v1382_v45 = vunpack.c.1.s8 %v638_v51 }
 0x358   : > { %5945 = vmatpush.bf16.msrb.mxu1 %v4266_v1  ;;  %v4214_v61 = vpack.c.bf16 %v2814_v23, %v2810_v2  ;;  %v2906_v44 = vcvt.s32.f32 %v1338_v8  ;;  %v2910_v18 = vcvt.s32.f32 %v1342_v16  ;;  %5961 = vmatpush.bf16.msra.mxu2 %v4286_v3  ;;  %v1234_v19 = vunpack.c.0.s8 %v602_v42 }
 0x359   : > { %v4330_v58 = vpack.c.bf16 %v3046_v62, %v3042_v7  ;;  %v2946_v53 = vcvt.s32.f32 %v1378_v26  ;;  %v1238_v4 = vunpack.c.1.s8 %v602_v42  ;;  %v2950_v47 = vcvt.s32.f32 %v1382_v45  ;;  %v622_v62 = vld [vmem:[%s7886_s14 + $0x338] sm:$0xff] }
 0x35a   : > { %5937 = vmatpush.bf16.msrb.mxu0 %v4214_v61  ;;  %v4262_v32 = vpack.c.bf16 %v2910_v18, %v2906_v44  ;;  %v8758_v55 = vadd.f32 %v8714_v14, %v8721_v31  ;;  %v1466_v35 = vunpack.c.2.s8 %v658_v63  ;;  %v2802_v41 = vcvt.s32.f32 %v1234_v19 }
 0x35b   : > { %5971 = vmatpush.bf16.msra.mxu3 %v4330_v58  ;;  %v2806_v51 = vcvt.s32.f32 %v1238_v4  ;;  %v1470_v50 = vunpack.c.3.s8 %v658_v63  ;;  %v1546_v33 = vunpack.c.2.s8 %v678_v57  ;;  %v4282_v59 = vpack.c.bf16 %v2950_v47, %v2946_v53  ;;  %v710_v53 = vld [vmem:[%s7886_s14 + $0x5f8] sm:$0xff] }
 0x35c   : > { %5946 = vmatpush.bf16.msrb.mxu1 %v4262_v32  ;;  %v3034_v46 = vcvt.s32.f32 %v1466_v35  ;;  %v1550_v21 = vunpack.c.3.s8 %v678_v57  ;;  %v1330_v42 = vunpack.c.0.s8 %v8748_v11  ;;  %v1334_v14 = vunpack.c.1.s8 %v8748_v11  ;;  %v654_v35 = vld [vmem:[%s7886_s14 + $0x438] sm:$0xff] }
 0x35d   : > { %v4210_v2 = vpack.c.bf16 %v2806_v51, %v2802_v41  ;;  %v3038_v12 = vcvt.s32.f32 %v1470_v50  ;;  %v3114_v0 = vcvt.s32.f32 %v1546_v33  ;;  %5962 = vmatpush.bf16.msra.mxu2 %v4282_v59  ;;  %v1370_v1 = vunpack.c.2.s8 %v634_v56 }
 0x35e   : > { %v3118_v31 = vcvt.s32.f32 %v1550_v21  ;;  %v2898_v49 = vcvt.s32.f32 %v1330_v42  ;;  %v1374_v23 = vunpack.c.3.s8 %v634_v56  ;;  %v2902_v16 = vcvt.s32.f32 %v1334_v14 }
 0x35f   : > { %5938 = vmatpush.bf16.msrb.mxu0 %v4210_v2  ;;  %v4326_v8 = vpack.c.bf16 %v3038_v12, %v3034_v46  ;;  %v1458_v3 = vunpack.c.0.s8 %v658_v63  ;;  %v1462_v7 = vunpack.c.1.s8 %v658_v63  ;;  %v2938_v61 = vcvt.s32.f32 %v1370_v1  ;;  %v674_v46 = vld [vmem:[%s7886_s14 + $0x4d8] sm:$0xff] }
 0x360   : > { %v4366_v26 = vpack.c.bf16 %v3118_v31, %v3114_v0  ;;  %v2942_v44 = vcvt.s32.f32 %v1374_v23  ;;  %v1538_v18 = vunpack.c.0.s8 %v678_v57  ;;  %v4258_v45 = vpack.c.bf16 %v2902_v16, %v2898_v49 }
 0x361   : > { %5972 = vmatpush.bf16.msra.mxu3 %v4326_v8  ;;  %v3026_v11 = vcvt.s32.f32 %v1458_v3  ;;  %v3030_v54 = vcvt.s32.f32 %v1462_v7  ;;  %v1542_v58 = vunpack.c.1.s8 %v678_v57  ;;  %v1322_v32 = vunpack.c.2.s8 %v622_v62 }
 0x362   : > { %v4278_v19 = vpack.c.bf16 %v2942_v44, %v2938_v61  ;;  %v3106_v4 = vcvt.s32.f32 %v1538_v18  ;;  %v1326_v47 = vunpack.c.3.s8 %v622_v62  ;;  %5947 = vmatpush.bf16.msrb.mxu1 %v4258_v45  ;;  %v1362_v41 = vunpack.c.0.s8 %v634_v56  ;;  %5939 = vmatmul.bf16.vlgmr.msrb.gmra.mxu0 %v7940_v37 }
 0x363   : > { %5983 = vmatpush.bf16.msra.mxu0 %v4366_v26  ;;  %v4322_v63 = vpack.c.bf16 %v3030_v54, %v3026_v11  ;;  %v3110_v13 = vcvt.s32.f32 %v1542_v58  ;;  %v1366_v51 = vunpack.c.1.s8 %v634_v56  ;;  %v2890_v50 = vcvt.s32.f32 %v1322_v32  ;;  %v8770_v26 = vpop.f32.mrf.mxu1 }
 0x364   : > { %5963 = vmatpush.bf16.msra.mxu2 %v4278_v19  ;;  %v2894_v33 = vcvt.s32.f32 %v1326_v47  ;;  %v1674_v59 = vunpack.c.2.s8 %v710_v53  ;;  %v1678_v57 = vunpack.c.3.s8 %v710_v53  ;;  %v2930_v42 = vcvt.s32.f32 %v1362_v41 }
 0x365   : > { %5973 = vmatpush.bf16.msra.mxu3 %v4322_v63  ;;  %v4362_v21 = vpack.c.bf16 %v3110_v13, %v3106_v4  ;;  %v2934_v2 = vcvt.s32.f32 %v1366_v51  ;;  %v1450_v12 = vunpack.c.2.s8 %v654_v35  ;;  %v1454_v49 = vunpack.c.3.s8 %v654_v35  ;;  %v618_v4 = vld [vmem:[%s7886_s14 + $0x318] sm:$0xff] }
 0x366   : > { %v4254_v0 = vpack.c.bf16 %v2894_v33, %v2890_v50  ;;  %v3242_v14 = vcvt.s32.f32 %v1674_v59  ;;  %v3246_v31 = vcvt.s32.f32 %v1678_v57  ;;  %v1530_v23 = vunpack.c.2.s8 %v674_v46  ;;  %v706_v51 = vld [vmem:[%s7886_s14 + $0x5d8] sm:$0xff] }
 0x367   : > { %5984 = vmatpush.bf16.msra.mxu0 %v4362_v21  ;;  %v4274_v1 = vpack.c.bf16 %v2934_v2, %v2930_v42  ;;  %v3018_v56 = vcvt.s32.f32 %v1450_v12  ;;  %v1534_v37 = vunpack.c.3.s8 %v674_v46  ;;  %v3022_v16 = vcvt.s32.f32 %v1454_v49  ;;  %v650_v59 = vld [vmem:[%s7886_s14 + $0x418] sm:$0xff] }
 0x368   : > { %5948 = vmatpush.bf16.msrb.mxu1 %v4254_v0  ;;  %v4430_v8 = vpack.c.bf16 %v3246_v31, %v3242_v14  ;;  %v5707_v3 = vadd.f32 %v8735_v9, %v8758_v55  ;;  %v1314_v7 = vunpack.c.0.s8 %v622_v62  ;;  %v3098_v61 = vcvt.s32.f32 %v1530_v23  ;;  %v8781_v12 = vld [vmem:[%s7886_s14 + $0x4b8] sm:$0xff] }
 0x369   : > { %5964 = vmatpush.bf16.msra.mxu2 %v4274_v1  ;;  %v3102_v44 = vcvt.s32.f32 %v1534_v37  ;;  %v1318_v18 = vunpack.c.1.s8 %v622_v62  ;;  %v1666_v45 = vunpack.c.0.s8 %v710_v53  ;;  %v4318_v11 = vpack.c.bf16 %v3022_v16, %v3018_v56  ;;  %v8785_v16 = vld [vmem:[%s7886_s14 + $0x578] sm:$0xff] }
 0x36a   : > { %v2882_v54 = vcvt.s32.f32 %v1314_v7  ;;  %v1670_v58 = vunpack.c.1.s8 %v710_v53  ;;  %v5720_v19 = vadd.f32 %v8741_v25, %v5707_v3  ;;  %v1442_v55 = vunpack.c.0.s8 %v654_v35 }
 0x36b   : > { %v4358_v32 = vpack.c.bf16 %v3102_v44, %v3098_v61  ;;  %v2886_v47 = vcvt.s32.f32 %v1318_v18  ;;  %v3234_v9 = vcvt.s32.f32 %v1666_v45  ;;  %5974 = vmatpush.bf16.msra.mxu3 %v4318_v11  ;;  %v1446_v13 = vunpack.c.1.s8 %v654_v35  ;;  %v5747_v1 = vpop.f32.mrf.mxu1 }
 0x36c   : > { %v3238_v63 = vcvt.s32.f32 %v1670_v58  ;;  %v1522_v41 = vunpack.c.0.s8 %v674_v46  ;;  %v1526_v62 = vunpack.c.1.s8 %v674_v46  ;;  %5965 = vmatmul.bf16.vlgmr.msra.gmra.mxu2 %v7938_v36  ;;  %v3010_v53 = vcvt.s32.f32 %v1442_v55  ;;  %v8797_v1 = vpop.f32.mrf.mxu3 }
 0x36d   : > { %6009 = vmatpush.bf16.msrb.mxu2 %v4430_v8  ;;  %5985 = vmatpush.bf16.msra.mxu0 %v4358_v32  ;;  %v4250_v50 = vpack.c.bf16 %v2886_v47, %v2882_v54  ;;  %v8777_v25 = vadd.f32 %v8745_v28, %v5720_v19  ;;  %v1306_v33 = vunpack.c.2.s8 %v618_v4  ;;  %v3014_v21 = vcvt.s32.f32 %v1446_v13 }
 0x36e   : > { %v4426_v57 = vpack.c.bf16 %v3238_v63, %v3234_v9  ;;  %v3090_v42 = vcvt.s32.f32 %v1522_v41  ;;  %v3094_v2 = vcvt.s32.f32 %v1526_v62  ;;  %v1310_v35 = vunpack.c.3.s8 %v618_v4 }
 0x36f   : > { %5949 = vmatpush.bf16.msrb.mxu1 %v4250_v50  ;;  %v2874_v46 = vcvt.s32.f32 %v1306_v33  ;;  %v1658_v0 = vunpack.c.2.s8 %v706_v51  ;;  %v1662_v36 = vunpack.c.3.s8 %v706_v51  ;;  %v4314_v14 = vpack.c.bf16 %v3014_v21, %v3010_v53  ;;  %v8791_v33 = vpop.f32.mrf.mxu2 }
 0x370   : > { %v4354_v31 = vpack.c.bf16 %v3094_v2, %v3090_v42  ;;  %v1434_v49 = vunpack.c.2.s8 %v650_v59  ;;  %v1438_v28 = vunpack.c.3.s8 %v650_v59  ;;  %v2878_v56 = vcvt.s32.f32 %v1310_v35 }
 0x371   : > { %6010 = vmatpush.bf16.msrb.mxu2 %v4426_v57  ;;  %v3226_v23 = vcvt.s32.f32 %v1658_v0  ;;  %v3230_v37 = vcvt.s32.f32 %v1662_v36  ;;  %v1514_v8 = vunpack.c.2.s8 %v8781_v12  ;;  %5975 = vmatpush.bf16.msra.mxu3 %v4314_v14  ;;  %v1518_v61 = vunpack.c.3.s8 %v8781_v12  ;;  %v702_v36 = vld [vmem:[%s7886_s14 + $0x5b8] sm:$0xff] }
 0x372   : > { %5986 = vmatpush.bf16.msra.mxu0 %v4354_v31  ;;  %v3002_v3 = vcvt.s32.f32 %v1434_v49  ;;  %v3006_v7 = vcvt.s32.f32 %v1438_v28  ;;  %v1298_v44 = vunpack.c.0.s8 %v618_v4  ;;  %v4246_v18 = vpack.c.bf16 %v2878_v56, %v2874_v46  ;;  %v666_v28 = vld [vmem:[%s7886_s14 + $0x498] sm:$0xff] }
 0x373   : > { %v4422_v45 = vpack.c.bf16 %v3230_v37, %v3226_v23  ;;  %v3082_v11 = vcvt.s32.f32 %v1514_v8  ;;  %v1302_v54 = vunpack.c.1.s8 %v618_v4  ;;  %v3086_v19 = vcvt.s32.f32 %v1518_v61  ;;  %v726_v4 = vld [vmem:[%s7886_s14 + $0x678] sm:$0xff] }
 0x374   : > { %v4310_v58 = vpack.c.bf16 %v3006_v7, %v3002_v3  ;;  %v2866_v32 = vcvt.s32.f32 %v1298_v44  ;;  %v1610_v47 = vunpack.c.2.s8 %v8785_v16  ;;  %5950 = vmatpush.bf16.msrb.mxu1 %v4246_v18  ;;  %v1614_v55 = vunpack.c.3.s8 %v8785_v16  ;;  %v8801_v44 = vpop.f32.mrf.mxu0 }
 0x375   : > { %6011 = vmatpush.bf16.msrb.mxu2 %v4422_v45  ;;  %v2870_v9 = vcvt.s32.f32 %v1302_v54  ;;  %v1650_v63 = vunpack.c.0.s8 %v706_v51  ;;  %v1654_v13 = vunpack.c.1.s8 %v706_v51  ;;  %v4350_v41 = vpack.c.bf16 %v3086_v19, %v3082_v11 }
 0x376   : > { %5976 = vmatpush.bf16.msra.mxu3 %v4310_v58  ;;  %v3178_v62 = vcvt.s32.f32 %v1610_v47  ;;  %v1426_v50 = vunpack.c.0.s8 %v650_v59  ;;  %v1430_v53 = vunpack.c.1.s8 %v650_v59  ;;  %v3182_v21 = vcvt.s32.f32 %v1614_v55  ;;  %v690_v58 = vld [vmem:[%s7886_s14 + $0x558] sm:$0xff] }
 0x377   : > { %v4242_v57 = vpack.c.bf16 %v2870_v9, %v2866_v32  ;;  %v3218_v42 = vcvt.s32.f32 %v1650_v63  ;;  %v3222_v2 = vcvt.s32.f32 %v1654_v13  ;;  %5987 = vmatpush.bf16.msra.mxu0 %v4350_v41  ;;  %v1506_v0 = vunpack.c.0.s8 %v8781_v12  ;;  %v5760_v41 = vpop.f32.mrf.mxu2 }
 0x378   : > { %v2994_v35 = vcvt.s32.f32 %v1426_v50  ;;  %v2998_v46 = vcvt.s32.f32 %v1430_v53  ;;  %v1510_v51 = vunpack.c.1.s8 %v8781_v12  ;;  %v4398_v14 = vpack.c.bf16 %v3182_v21, %v3178_v62 }
 0x379   : > { %5951 = vmatpush.bf16.msrb.mxu1 %v4242_v57  ;;  %v4418_v31 = vpack.c.bf16 %v3222_v2, %v3218_v42  ;;  %v1738_v59 = vunpack.c.2.s8 %v726_v4  ;;  %v1742_v49 = vunpack.c.3.s8 %v726_v4  ;;  %v3074_v23 = vcvt.s32.f32 %v1506_v0 }
 0x37a   : > { %v4306_v56 = vpack.c.bf16 %v2998_v46, %v2994_v35  ;;  %v3078_v37 = vcvt.s32.f32 %v1510_v51  ;;  %v1602_v8 = vunpack.c.0.s8 %v8785_v16  ;;  %v1606_v12 = vunpack.c.1.s8 %v8785_v16  ;;  %v722_v35 = vld [vmem:[%s7886_s14 + $0x658] sm:$0xff] }
 0x37b   : > { %6012 = vmatpush.bf16.msrb.mxu2 %v4418_v31  ;;  %v3306_v3 = vcvt.s32.f32 %v1738_v59  ;;  %v3310_v7 = vcvt.s32.f32 %v1742_v49  ;;  %v1642_v61 = vunpack.c.2.s8 %v702_v36  ;;  %v1646_v11 = vunpack.c.3.s8 %v702_v36  ;;  %v5773_v31 = vpop.f32.mrf.mxu3 }
 0x37c   : > { %5952 = vmatmul.bf16.vlgmr.msrb.gmra.mxu1 %v7931_v29  ;;  %5977 = vmatpush.bf16.msra.mxu3 %v4306_v56  ;;  %v4346_v18 = vpack.c.bf16 %v3078_v37, %v3074_v23  ;;  %v3170_v45 = vcvt.s32.f32 %v1602_v8  ;;  %v1498_v54 = vunpack.c.2.s8 %v666_v28  ;;  %v3174_v32 = vcvt.s32.f32 %v1606_v12 }
 0x37d   : > { %5996 = vmatpush.bf16.msra.mxu1 %v4398_v14  ;;  %v4462_v19 = vpack.c.bf16 %v3310_v7, %v3306_v3  ;;  %v3210_v47 = vcvt.s32.f32 %v1642_v61  ;;  %v1502_v9 = vunpack.c.3.s8 %v666_v28  ;;  %v3214_v55 = vcvt.s32.f32 %v1646_v11  ;;  %v5786_v7 = vpop.f32.mrf.mxu0 }
 0x37e   : > { %5988 = vmatpush.bf16.msra.mxu0 %v4346_v18  ;;  %v3066_v63 = vcvt.s32.f32 %v1498_v54  ;;  %v1730_v16 = vunpack.c.0.s8 %v726_v4  ;;  %v1734_v13 = vunpack.c.1.s8 %v726_v4  ;;  %v4394_v29 = vpack.c.bf16 %v3174_v32, %v3170_v45  ;;  %v742_v4 = vld [vmem:[%s7886_s14 + $0x6f8] sm:$0xff] }
 0x37f   : > { %v3070_v62 = vcvt.s32.f32 %v1502_v9  ;;  %v1594_v50 = vunpack.c.2.s8 %v690_v58  ;;  %v1598_v53 = vunpack.c.3.s8 %v690_v58  ;;  %v4414_v57 = vpack.c.bf16 %v3214_v55, %v3210_v47  ;;  %5978 = vmatmul.bf16.vlgmr.msra.gmra.mxu3 %v7974_v10  ;;  %v698_v45 = vld [vmem:[%s7886_s14 + $0x598] sm:$0xff] }
 0x380   : > { %6022 = vmatpush.bf16.msrb.mxu3 %v4462_v19  ;;  %v3298_v21 = vcvt.s32.f32 %v1730_v16  ;;  %v3302_v42 = vcvt.s32.f32 %v1734_v13  ;;  %v1634_v2 = vunpack.c.0.s8 %v702_v36  ;;  %v1638_v14 = vunpack.c.1.s8 %v702_v36 }
 0x381   : > { %5997 = vmatpush.bf16.msra.mxu1 %v4394_v29  ;;  %v4342_v46 = vpack.c.bf16 %v3070_v62, %v3066_v63  ;;  %v3162_v0 = vcvt.s32.f32 %v1594_v50  ;;  %v3166_v51 = vcvt.s32.f32 %v1598_v53  ;;  %6013 = vmatpush.bf16.msrb.mxu2 %v4414_v57  ;;  %v1490_v56 = vunpack.c.0.s8 %v666_v28  ;;  %v686_v50 = vld [vmem:[%s7886_s14 + $0x538] sm:$0xff] }
 0x382   : > { %v4458_v59 = vpack.c.bf16 %v3302_v42, %v3298_v21  ;;  %v3202_v49 = vcvt.s32.f32 %v1634_v2  ;;  %v1494_v23 = vunpack.c.1.s8 %v666_v28  ;;  %v3206_v10 = vcvt.s32.f32 %v1638_v14 }
 0x383   : > { %5989 = vmatpush.bf16.msra.mxu0 %v4342_v46  ;;  %v4390_v37 = vpack.c.bf16 %v3166_v51, %v3162_v0  ;;  %v8810_v8 = vadd.f32 %v8770_v26, %v8777_v25  ;;  %v1722_v3 = vunpack.c.2.s8 %v722_v35  ;;  %v3058_v12 = vcvt.s32.f32 %v1490_v56  ;;  %v774_v51 = vld [vmem:[%s7886_s14 + $0x7f8] sm:$0xff] }
 0x384   : > { %6023 = vmatpush.bf16.msrb.mxu3 %v4458_v59  ;;  %v3062_v36 = vcvt.s32.f32 %v1494_v23  ;;  %v1726_v61 = vunpack.c.3.s8 %v722_v35  ;;  %v1802_v18 = vunpack.c.2.s8 %v742_v4  ;;  %v4410_v11 = vpack.c.bf16 %v3206_v10, %v3202_v49  ;;  %v718_v56 = vld [vmem:[%s7886_s14 + $0x638] sm:$0xff] }
 0x385   : > { %5998 = vmatpush.bf16.msra.mxu1 %v4390_v37  ;;  %v3290_v54 = vcvt.s32.f32 %v1722_v3  ;;  %v1806_v19 = vunpack.c.3.s8 %v742_v4  ;;  %v1586_v28 = vunpack.c.0.s8 %v690_v58  ;;  %v1590_v55 = vunpack.c.1.s8 %v690_v58 }
 0x386   : > { %v4338_v32 = vpack.c.bf16 %v3062_v36, %v3058_v12  ;;  %v3294_v47 = vcvt.s32.f32 %v1726_v61  ;;  %v3370_v9 = vcvt.s32.f32 %v1802_v18  ;;  %6014 = vmatpush.bf16.msrb.mxu2 %v4410_v11  ;;  %v1626_v63 = vunpack.c.2.s8 %v698_v45  ;;  %v738_v36 = vld [vmem:[%s7886_s14 + $0x6d8] sm:$0xff] }
 0x387   : > { %v3374_v26 = vcvt.s32.f32 %v1806_v19  ;;  %v3154_v25 = vcvt.s32.f32 %v1586_v28  ;;  %v1630_v16 = vunpack.c.3.s8 %v698_v45  ;;  %v3158_v41 = vcvt.s32.f32 %v1590_v55 }
 0x388   : > { %5990 = vmatpush.bf16.msra.mxu0 %v4338_v32  ;;  %v4454_v13 = vpack.c.bf16 %v3294_v47, %v3290_v54  ;;  %v1714_v29 = vunpack.c.0.s8 %v722_v35  ;;  %v1718_v62 = vunpack.c.1.s8 %v722_v35  ;;  %v3194_v57 = vcvt.s32.f32 %v1626_v63 }
 0x389   : > { %v4494_v53 = vpack.c.bf16 %v3374_v26, %v3370_v9  ;;  %v3198_v21 = vcvt.s32.f32 %v1630_v16  ;;  %v1794_v42 = vunpack.c.0.s8 %v742_v4  ;;  %v4386_v2 = vpack.c.bf16 %v3158_v41, %v3154_v25 }
 0x38a   : > { %6024 = vmatpush.bf16.msrb.mxu3 %v4454_v13  ;;  %v3282_v58 = vcvt.s32.f32 %v1714_v29  ;;  %v3286_v46 = vcvt.s32.f32 %v1718_v62  ;;  %v1798_v0 = vunpack.c.1.s8 %v742_v4  ;;  %v1578_v59 = vunpack.c.2.s8 %v686_v50  ;;  %v8820_v13 = vpop.f32.mrf.mxu1 }
 0x38b   : > { %v4406_v14 = vpack.c.bf16 %v3198_v21, %v3194_v57  ;;  %v3362_v31 = vcvt.s32.f32 %v1794_v42  ;;  %v1582_v49 = vunpack.c.3.s8 %v686_v50  ;;  %5999 = vmatpush.bf16.msra.mxu1 %v4386_v2  ;;  %5991 = vmatmul.bf16.vlgmr.msra.gmra.mxu0 %v7976_v15  ;;  %v1618_v37 = vunpack.c.0.s8 %v698_v45 }
 0x38c   : > { %6035 = vmatpush.bf16.msrb.mxu0 %v4494_v53  ;;  %v4450_v35 = vpack.c.bf16 %v3286_v46, %v3282_v58  ;;  %v3366_v23 = vcvt.s32.f32 %v1798_v0  ;;  %v1622_v10 = vunpack.c.1.s8 %v698_v45  ;;  %v3146_v3 = vcvt.s32.f32 %v1578_v59  ;;  %v682_v58 = vld [vmem:[%s7886_s14 + $0x518] sm:$0xff] }
 0x38d   : > { %6015 = vmatpush.bf16.msrb.mxu2 %v4406_v14  ;;  %v3150_v7 = vcvt.s32.f32 %v1582_v49  ;;  %v1930_v12 = vunpack.c.2.s8 %v774_v51  ;;  %v1934_v4 = vunpack.c.3.s8 %v774_v51  ;;  %v3186_v18 = vcvt.s32.f32 %v1618_v37  ;;  %v770_v49 = vld [vmem:[%s7886_s14 + $0x7d8] sm:$0xff] }
 0x38e   : > { %6025 = vmatpush.bf16.msrb.mxu3 %v4450_v35  ;;  %v4490_v61 = vpack.c.bf16 %v3366_v23, %v3362_v31  ;;  %v3190_v11 = vcvt.s32.f32 %v1622_v10  ;;  %v1706_v54 = vunpack.c.2.s8 %v718_v56  ;;  %v1710_v47 = vunpack.c.3.s8 %v718_v56  ;;  %v714_v37 = vld [vmem:[%s7886_s14 + $0x618] sm:$0xff] }
 0x38f   : > { %v4382_v19 = vpack.c.bf16 %v3150_v7, %v3146_v3  ;;  %v3498_v28 = vcvt.s32.f32 %v1930_v12  ;;  %v3502_v32 = vcvt.s32.f32 %v1934_v4  ;;  %v1786_v55 = vunpack.c.2.s8 %v738_v36  ;;  %v8831_v4 = vld [vmem:[%s7886_s14 + $0x6b8] sm:$0xff] }
 0x390   : > { %6036 = vmatpush.bf16.msrb.mxu0 %v4490_v61  ;;  %v4402_v15 = vpack.c.bf16 %v3190_v11, %v3186_v18  ;;  %v3274_v9 = vcvt.s32.f32 %v1706_v54  ;;  %v1790_v45 = vunpack.c.3.s8 %v738_v36  ;;  %v3278_v25 = vcvt.s32.f32 %v1710_v47 }
 0x391   : > { %6000 = vmatpush.bf16.msra.mxu1 %v4382_v19  ;;  %v4558_v26 = vpack.c.bf16 %v3502_v32, %v3498_v28  ;;  %v5759_v63 = vadd.f32 %v8791_v33, %v8810_v8  ;;  %v1570_v16 = vunpack.c.0.s8 %v686_v50  ;;  %v3354_v41 = vcvt.s32.f32 %v1786_v55 }
 0x392   : > { %6016 = vmatpush.bf16.msrb.mxu2 %v4402_v15  ;;  %v3358_v29 = vcvt.s32.f32 %v1790_v45  ;;  %v1574_v62 = vunpack.c.1.s8 %v686_v50  ;;  %v1922_v53 = vunpack.c.0.s8 %v774_v51  ;;  %v4446_v57 = vpack.c.bf16 %v3278_v25, %v3274_v9  ;;  %v5799_v19 = vpop.f32.mrf.mxu1  ;;  %v8835_v9 = vld [vmem:[%s7886_s14 + $0x778] sm:$0xff] }
 0x393   : > { %v3138_v21 = vcvt.s32.f32 %v1570_v16  ;;  %v1926_v42 = vunpack.c.1.s8 %v774_v51  ;;  %v5772_v2 = vadd.f32 %v8797_v1, %v5759_v63  ;;  %v1698_v8 = vunpack.c.0.s8 %v718_v56 }
 0x394   : > { %v4486_v46 = vpack.c.bf16 %v3358_v29, %v3354_v41  ;;  %v3142_v0 = vcvt.s32.f32 %v1574_v62  ;;  %v3490_v33 = vcvt.s32.f32 %v1922_v53  ;;  %6026 = vmatpush.bf16.msrb.mxu3 %v4446_v57  ;;  %v1702_v31 = vunpack.c.1.s8 %v718_v56 }
 0x395   : > { %v3494_v14 = vcvt.s32.f32 %v1926_v42  ;;  %v1778_v59 = vunpack.c.0.s8 %v738_v36  ;;  %v1782_v50 = vunpack.c.1.s8 %v738_v36  ;;  %6017 = vmatmul.bf16.vlgmr.msrb.gmra.mxu2 %v7981_v24  ;;  %v3266_v51 = vcvt.s32.f32 %v1698_v8 }
 0x396   : > { %6061 = vmatpush.bf16.msra.mxu2 %v4558_v26  ;;  %6037 = vmatpush.bf16.msrb.mxu0 %v4486_v46  ;;  %v4378_v35 = vpack.c.bf16 %v3142_v0, %v3138_v21  ;;  %v8827_v1 = vadd.f32 %v8801_v44, %v5772_v2  ;;  %v1562_v23 = vunpack.c.2.s8 %v682_v58  ;;  %v3270_v3 = vcvt.s32.f32 %v1702_v31 }
 0x397   : > { %v4554_v10 = vpack.c.bf16 %v3494_v14, %v3490_v33  ;;  %v3346_v7 = vcvt.s32.f32 %v1778_v59  ;;  %v3350_v12 = vcvt.s32.f32 %v1782_v50  ;;  %v1566_v56 = vunpack.c.3.s8 %v682_v58  ;;  %v8841_v59 = vpop.f32.mrf.mxu2 }
 0x398   : > { %6001 = vmatpush.bf16.msra.mxu1 %v4378_v35  ;;  %v3130_v36 = vcvt.s32.f32 %v1562_v23  ;;  %v1914_v61 = vunpack.c.2.s8 %v770_v49  ;;  %v1918_v24 = vunpack.c.3.s8 %v770_v49  ;;  %v4442_v18 = vpack.c.bf16 %v3270_v3, %v3266_v51 }
 0x399   : > { %v4482_v11 = vpack.c.bf16 %v3350_v12, %v3346_v7  ;;  %v1690_v54 = vunpack.c.2.s8 %v714_v37  ;;  %v1694_v44 = vunpack.c.3.s8 %v714_v37  ;;  %v3134_v28 = vcvt.s32.f32 %v1566_v56  ;;  %v766_v12 = vld [vmem:[%s7886_s14 + $0x7b8] sm:$0xff] }
 0x39a   : > { %6062 = vmatpush.bf16.msra.mxu2 %v4554_v10  ;;  %v3482_v32 = vcvt.s32.f32 %v1914_v61  ;;  %v3486_v47 = vcvt.s32.f32 %v1918_v24  ;;  %v1770_v15 = vunpack.c.2.s8 %v8831_v4  ;;  %6027 = vmatpush.bf16.msrb.mxu3 %v4442_v18  ;;  %v1774_v26 = vunpack.c.3.s8 %v8831_v4  ;;  %v730_v24 = vld [vmem:[%s7886_s14 + $0x698] sm:$0xff]  ;;  %v8847_v18 = vpop.f32.mrf.mxu3 }
 0x39b   : > { %6038 = vmatpush.bf16.msrb.mxu0 %v4482_v11  ;;  %v3258_v55 = vcvt.s32.f32 %v1690_v54  ;;  %v3262_v45 = vcvt.s32.f32 %v1694_v44  ;;  %v1554_v25 = vunpack.c.0.s8 %v682_v58  ;;  %v4374_v63 = vpack.c.bf16 %v3134_v28, %v3130_v36 }
 0x39c   : > { %v4550_v16 = vpack.c.bf16 %v3486_v47, %v3482_v32  ;;  %v3338_v41 = vcvt.s32.f32 %v1770_v15  ;;  %v1558_v29 = vunpack.c.1.s8 %v682_v58  ;;  %v3342_v53 = vcvt.s32.f32 %v1774_v26  ;;  %v790_v58 = vld [vmem:[%s7886_s14 + $0x878] sm:$0xff]  ;;  %v8851_v15 = vpop.f32.mrf.mxu0 }
 0x39d   : > { %v4438_v62 = vpack.c.bf16 %v3262_v45, %v3258_v55  ;;  %v3122_v57 = vcvt.s32.f32 %v1554_v25  ;;  %v1866_v21 = vunpack.c.2.s8 %v8835_v9  ;;  %6002 = vmatpush.bf16.msra.mxu1 %v4374_v63  ;;  %v1870_v2 = vunpack.c.3.s8 %v8835_v9  ;;  %v754_v63 = vld [vmem:[%s7886_s14 + $0x758] sm:$0xff] }
 0x39e   : > { %6063 = vmatpush.bf16.msra.mxu2 %v4550_v16  ;;  %v3126_v42 = vcvt.s32.f32 %v1558_v29  ;;  %v1906_v46 = vunpack.c.0.s8 %v770_v49  ;;  %v1910_v0 = vunpack.c.1.s8 %v770_v49  ;;  %v4478_v33 = vpack.c.bf16 %v3342_v53, %v3338_v41 }
 0x39f   : > { %6028 = vmatpush.bf16.msrb.mxu3 %v4438_v62  ;;  %v3434_v8 = vcvt.s32.f32 %v1866_v21  ;;  %v1682_v14 = vunpack.c.0.s8 %v714_v37  ;;  %v1686_v31 = vunpack.c.1.s8 %v714_v37  ;;  %v3438_v35 = vcvt.s32.f32 %v1870_v2 }
 0x3a0   : > { %v4370_v50 = vpack.c.bf16 %v3126_v42, %v3122_v57  ;;  %v3474_v51 = vcvt.s32.f32 %v1906_v46  ;;  %v3478_v23 = vcvt.s32.f32 %v1910_v0  ;;  %6039 = vmatpush.bf16.msrb.mxu0 %v4478_v33  ;;  %v1762_v7 = vunpack.c.0.s8 %v8831_v4  ;;  %v5812_v42 = vpop.f32.mrf.mxu2 }
 0x3a1   : > { %v3250_v10 = vcvt.s32.f32 %v1682_v14  ;;  %v3254_v3 = vcvt.s32.f32 %v1686_v31  ;;  %v1766_v49 = vunpack.c.1.s8 %v8831_v4  ;;  %v4526_v56 = vpack.c.bf16 %v3438_v35, %v3434_v8 }
 0x3a2   : > { %6003 = vmatpush.bf16.msra.mxu1 %v4370_v50  ;;  %v4546_v36 = vpack.c.bf16 %v3478_v23, %v3474_v51  ;;  %v1994_v37 = vunpack.c.2.s8 %v790_v58  ;;  %v1998_v61 = vunpack.c.3.s8 %v790_v58  ;;  %v3330_v54 = vcvt.s32.f32 %v1762_v7  ;;  %v786_v50 = vld [vmem:[%s7886_s14 + $0x858] sm:$0xff] }
 0x3a3   : > { %v4434_v11 = vpack.c.bf16 %v3254_v3, %v3250_v10  ;;  %v3334_v44 = vcvt.s32.f32 %v1766_v49  ;;  %v1858_v19 = vunpack.c.0.s8 %v8835_v9  ;;  %v1862_v4 = vunpack.c.1.s8 %v8835_v9  ;;  %v5825_v3 = vpop.f32.mrf.mxu3 }
 0x3a4   : > { %6064 = vmatpush.bf16.msra.mxu2 %v4546_v36  ;;  %v3562_v28 = vcvt.s32.f32 %v1994_v37  ;;  %v3566_v32 = vcvt.s32.f32 %v1998_v61  ;;  %v1898_v47 = vunpack.c.2.s8 %v766_v12  ;;  %v1902_v26 = vunpack.c.3.s8 %v766_v12 }
 0x3a5   : > { %6004 = vmatmul.bf16.vlgmr.msra.gmra.mxu1 %v7978_v20  ;;  %6029 = vmatpush.bf16.msrb.mxu3 %v4434_v11  ;;  %v4474_v55 = vpack.c.bf16 %v3334_v44, %v3330_v54  ;;  %v3426_v45 = vcvt.s32.f32 %v1858_v19  ;;  %v1754_v25 = vunpack.c.2.s8 %v730_v24  ;;  %v3430_v41 = vcvt.s32.f32 %v1862_v4  ;;  %v5838_v54 = vpop.f32.mrf.mxu0 }
 0x3a6   : > { %6048 = vmatpush.bf16.msrb.mxu1 %v4526_v56  ;;  %v4590_v16 = vpack.c.bf16 %v3566_v32, %v3562_v28  ;;  %v3466_v29 = vcvt.s32.f32 %v1898_v47  ;;  %v1758_v62 = vunpack.c.3.s8 %v730_v24  ;;  %v3470_v53 = vcvt.s32.f32 %v1902_v26  ;;  %v762_v32 = vld [vmem:[%s7886_s14 + $0x798] sm:$0xff] }
 0x3a7   : > { %6040 = vmatpush.bf16.msrb.mxu0 %v4474_v55  ;;  %v3322_v57 = vcvt.s32.f32 %v1754_v25  ;;  %v1986_v9 = vunpack.c.0.s8 %v790_v58  ;;  %v1990_v21 = vunpack.c.1.s8 %v790_v58  ;;  %v4522_v20 = vpack.c.bf16 %v3430_v41, %v3426_v45  ;;  %v806_v58 = vld [vmem:[%s7886_s14 + $0x8f8] sm:$0xff] }
 0x3a8   : > { %v3326_v2 = vcvt.s32.f32 %v1758_v62  ;;  %v1850_v46 = vunpack.c.2.s8 %v754_v63  ;;  %v1854_v0 = vunpack.c.3.s8 %v754_v63  ;;  %v4542_v33 = vpack.c.bf16 %v3470_v53, %v3466_v29  ;;  %6030 = vmatmul.bf16.vlgmr.msrb.gmra.mxu3 %v8008_v39 }
 0x3a9   : > { %6074 = vmatpush.bf16.msra.mxu3 %v4590_v16  ;;  %v3554_v8 = vcvt.s32.f32 %v1986_v9  ;;  %v3558_v14 = vcvt.s32.f32 %v1990_v21  ;;  %v1890_v31 = vunpack.c.0.s8 %v766_v12  ;;  %v1894_v10 = vunpack.c.1.s8 %v766_v12  ;;  %v750_v21 = vld [vmem:[%s7886_s14 + $0x738] sm:$0xff] }
 0x3aa   : > { %6049 = vmatpush.bf16.msrb.mxu1 %v4522_v20  ;;  %v4470_v35 = vpack.c.bf16 %v3326_v2, %v3322_v57  ;;  %v3418_v51 = vcvt.s32.f32 %v1850_v46  ;;  %v3422_v23 = vcvt.s32.f32 %v1854_v0  ;;  %6065 = vmatpush.bf16.msra.mxu2 %v4542_v33  ;;  %v1746_v56 = vunpack.c.0.s8 %v730_v24 }
 0x3ab   : > { %v4586_v7 = vpack.c.bf16 %v3558_v14, %v3554_v8  ;;  %v3458_v49 = vcvt.s32.f32 %v1890_v31  ;;  %v1750_v36 = vunpack.c.1.s8 %v730_v24  ;;  %v3462_v39 = vcvt.s32.f32 %v1894_v10  ;;  %v838_v14 = vld [vmem:[%s7886_s14 + $0x9f8] sm:$0xff] }
 0x3ac   : > { %6041 = vmatpush.bf16.msrb.mxu0 %v4470_v35  ;;  %v4518_v37 = vpack.c.bf16 %v3422_v23, %v3418_v51  ;;  %v8860_v61 = vadd.f32 %v8820_v13, %v8827_v1  ;;  %v1978_v11 = vunpack.c.2.s8 %v786_v50  ;;  %v3314_v44 = vcvt.s32.f32 %v1746_v56  ;;  %v8866_v10 = vld [vmem:[%s7886_s14 + $0x838] sm:$0xff] }
 0x3ad   : > { %6075 = vmatpush.bf16.msra.mxu3 %v4586_v7  ;;  %v3318_v12 = vcvt.s32.f32 %v1750_v36  ;;  %v1982_v19 = vunpack.c.3.s8 %v786_v50  ;;  %v2058_v28 = vunpack.c.2.s8 %v806_v58  ;;  %v4538_v4 = vpack.c.bf16 %v3462_v39, %v3458_v49  ;;  %v802_v39 = vld [vmem:[%s7886_s14 + $0x8d8] sm:$0xff] }
 0x3ae   : > { %6050 = vmatpush.bf16.msrb.mxu1 %v4518_v37  ;;  %v3546_v47 = vcvt.s32.f32 %v1978_v11  ;;  %v2062_v55 = vunpack.c.3.s8 %v806_v58  ;;  %v1842_v24 = vunpack.c.0.s8 %v754_v63  ;;  %v1846_v16 = vunpack.c.1.s8 %v754_v63 }
 0x3af   : > { %v4466_v45 = vpack.c.bf16 %v3318_v12, %v3314_v44  ;;  %v3550_v26 = vcvt.s32.f32 %v1982_v19  ;;  %v3626_v25 = vcvt.s32.f32 %v2058_v28  ;;  %6066 = vmatpush.bf16.msra.mxu2 %v4538_v4  ;;  %v1882_v41 = vunpack.c.2.s8 %v762_v32 }
 0x3b0   : > { %v3630_v13 = vcvt.s32.f32 %v2062_v55  ;;  %v3410_v1 = vcvt.s32.f32 %v1842_v24  ;;  %v1886_v29 = vunpack.c.3.s8 %v762_v32  ;;  %v3414_v53 = vcvt.s32.f32 %v1846_v16 }
 0x3b1   : > { %6042 = vmatpush.bf16.msrb.mxu0 %v4466_v45  ;;  %v4582_v62 = vpack.c.bf16 %v3550_v26, %v3546_v47  ;;  %v1970_v57 = vunpack.c.0.s8 %v786_v50  ;;  %v1974_v9 = vunpack.c.1.s8 %v786_v50  ;;  %v3450_v20 = vcvt.s32.f32 %v1882_v41 }
 0x3b2   : > { %v4622_v42 = vpack.c.bf16 %v3630_v13, %v3626_v25  ;;  %v3454_v2 = vcvt.s32.f32 %v1886_v29  ;;  %v2050_v46 = vunpack.c.0.s8 %v806_v58  ;;  %v4514_v0 = vpack.c.bf16 %v3414_v53, %v3410_v1  ;;  %v8874_v13 = vpop.f32.mrf.mxu1 }
 0x3b3   : > { %6076 = vmatpush.bf16.msra.mxu3 %v4582_v62  ;;  %v3538_v63 = vcvt.s32.f32 %v1970_v57  ;;  %v3542_v33 = vcvt.s32.f32 %v1974_v9  ;;  %v2054_v8 = vunpack.c.1.s8 %v806_v58  ;;  %v1834_v51 = vunpack.c.2.s8 %v750_v21 }
 0x3b4   : > { %v4534_v31 = vpack.c.bf16 %v3454_v2, %v3450_v20  ;;  %v3618_v35 = vcvt.s32.f32 %v2050_v46  ;;  %v1838_v23 = vunpack.c.3.s8 %v750_v21  ;;  %6051 = vmatpush.bf16.msrb.mxu1 %v4514_v0  ;;  %6043 = vmatmul.bf16.vlgmr.msrb.gmra.mxu0 %v8010_v43  ;;  %v1874_v7 = vunpack.c.0.s8 %v762_v32  ;;  %v746_v20 = vld [vmem:[%s7886_s14 + $0x718] sm:$0xff] }
 0x3b5   : > { %6087 = vmatpush.bf16.msra.mxu0 %v4622_v42  ;;  %v4578_v50 = vpack.c.bf16 %v3542_v33, %v3538_v63  ;;  %v3622_v3 = vcvt.s32.f32 %v2054_v8  ;;  %v1878_v49 = vunpack.c.1.s8 %v762_v32  ;;  %v3402_v56 = vcvt.s32.f32 %v1834_v51  ;;  %v834_v8 = vld [vmem:[%s7886_s14 + $0x9d8] sm:$0xff] }
 0x3b6   : > { %6067 = vmatpush.bf16.msra.mxu2 %v4534_v31  ;;  %v3406_v36 = vcvt.s32.f32 %v1838_v23  ;;  %v2186_v58 = vunpack.c.2.s8 %v838_v14  ;;  %v2190_v37 = vunpack.c.3.s8 %v838_v14  ;;  %v3442_v54 = vcvt.s32.f32 %v1874_v7  ;;  %v778_v51 = vld [vmem:[%s7886_s14 + $0x818] sm:$0xff]  ;;  %v8886_v23 = vpop.f32.mrf.mxu2 }
 0x3b7   : > { %6077 = vmatpush.bf16.msra.mxu3 %v4578_v50  ;;  %v4618_v11 = vpack.c.bf16 %v3622_v3, %v3618_v35  ;;  %v3446_v44 = vcvt.s32.f32 %v1878_v49  ;;  %v1962_v12 = vunpack.c.2.s8 %v8866_v10  ;;  %v1966_v43 = vunpack.c.3.s8 %v8866_v10  ;;  %v798_v49 = vld [vmem:[%s7886_s14 + $0x8b8] sm:$0xff] }
 0x3b8   : > { %v4510_v19 = vpack.c.bf16 %v3406_v36, %v3402_v56  ;;  %v3754_v28 = vcvt.s32.f32 %v2186_v58  ;;  %v3758_v4 = vcvt.s32.f32 %v2190_v37  ;;  %v2042_v55 = vunpack.c.2.s8 %v802_v39 }
 0x3b9   : > { %6088 = vmatpush.bf16.msra.mxu0 %v4618_v11  ;;  %v4530_v47 = vpack.c.bf16 %v3446_v44, %v3442_v54  ;;  %v3530_v32 = vcvt.s32.f32 %v1962_v12  ;;  %v2046_v24 = vunpack.c.3.s8 %v802_v39  ;;  %v3534_v26 = vcvt.s32.f32 %v1966_v43 }
 0x3ba   : > { %6052 = vmatpush.bf16.msrb.mxu1 %v4510_v19  ;;  %v4686_v45 = vpack.c.bf16 %v3758_v4, %v3754_v28  ;;  %v5811_v25 = vadd.f32 %v8841_v59, %v8860_v61  ;;  %v1826_v16 = vunpack.c.0.s8 %v750_v21  ;;  %v3610_v1 = vcvt.s32.f32 %v2042_v55  ;;  %v5851_v54 = vpop.f32.mrf.mxu1  ;;  %v822_v4 = vld [vmem:[%s7886_s14 + $0x978] sm:$0xff] }
 0x3bb   : > { %6068 = vmatpush.bf16.msra.mxu2 %v4530_v47  ;;  %v3614_v41 = vcvt.s32.f32 %v2046_v24  ;;  %v1830_v29 = vunpack.c.1.s8 %v750_v21  ;;  %v2178_v62 = vunpack.c.0.s8 %v838_v14  ;;  %v4574_v53 = vpack.c.bf16 %v3534_v26, %v3530_v32 }
 0x3bc   : > { %v3394_v57 = vcvt.s32.f32 %v1826_v16  ;;  %v2182_v9 = vunpack.c.1.s8 %v838_v14  ;;  %v5824_v42 = vadd.f32 %v8847_v18, %v5811_v25  ;;  %v1954_v61 = vunpack.c.0.s8 %v8866_v10 }
 0x3bd   : > { %v4614_v2 = vpack.c.bf16 %v3614_v41, %v3610_v1  ;;  %v3398_v46 = vcvt.s32.f32 %v1830_v29  ;;  %v3746_v59 = vcvt.s32.f32 %v2178_v62  ;;  %6078 = vmatpush.bf16.msra.mxu3 %v4574_v53  ;;  %v1958_v63 = vunpack.c.1.s8 %v8866_v10 }
 0x3be   : > { %v3750_v0 = vcvt.s32.f32 %v2182_v9  ;;  %v2034_v21 = vunpack.c.0.s8 %v802_v39  ;;  %v2038_v33 = vunpack.c.1.s8 %v802_v39  ;;  %6069 = vmatmul.bf16.vlgmr.msra.gmra.mxu2 %v8015_v52  ;;  %v3522_v18 = vcvt.s32.f32 %v1954_v61 }
 0x3bf   : > { %6113 = vmatpush.bf16.msrb.mxu2 %v4686_v45  ;;  %6089 = vmatpush.bf16.msra.mxu0 %v4614_v2  ;;  %v4506_v14 = vpack.c.bf16 %v3398_v46, %v3394_v57  ;;  %v8883_v31 = vadd.f32 %v8851_v15, %v5824_v42  ;;  %v1818_v35 = vunpack.c.2.s8 %v746_v20  ;;  %v3526_v3 = vcvt.s32.f32 %v1958_v63  ;;  %v5864_v42 = vpop.f32.mrf.mxu2 }
 0x3c0   : > { %v4682_v50 = vpack.c.bf16 %v3750_v0, %v3746_v59  ;;  %v3602_v7 = vcvt.s32.f32 %v2034_v21  ;;  %v3606_v10 = vcvt.s32.f32 %v2038_v33  ;;  %v1822_v56 = vunpack.c.3.s8 %v746_v20  ;;  %v854_v0 = vld [vmem:[%s7886_s14 + $0xa78] sm:$0xff] }
 0x3c1   : > { %6053 = vmatpush.bf16.msrb.mxu1 %v4506_v14  ;;  %v3386_v36 = vcvt.s32.f32 %v1818_v35  ;;  %v2170_v52 = vunpack.c.2.s8 %v834_v8  ;;  %v2174_v58 = vunpack.c.3.s8 %v834_v8  ;;  %v4570_v37 = vpack.c.bf16 %v3526_v3, %v3522_v18  ;;  %v830_v3 = vld [vmem:[%s7886_s14 + $0x9b8] sm:$0xff] }
 0x3c2   : > { %v4610_v39 = vpack.c.bf16 %v3606_v10, %v3602_v7  ;;  %v1946_v15 = vunpack.c.2.s8 %v778_v51  ;;  %v1950_v11 = vunpack.c.3.s8 %v778_v51  ;;  %v3390_v44 = vcvt.s32.f32 %v1822_v56 }
 0x3c3   : > { %6114 = vmatpush.bf16.msrb.mxu2 %v4682_v50  ;;  %v3738_v12 = vcvt.s32.f32 %v2170_v52  ;;  %v3742_v19 = vcvt.s32.f32 %v2174_v58  ;;  %v2026_v28 = vunpack.c.2.s8 %v798_v49  ;;  %6079 = vmatpush.bf16.msra.mxu3 %v4570_v37  ;;  %v2030_v32 = vunpack.c.3.s8 %v798_v49 }
 0x3c4   : > { %6090 = vmatpush.bf16.msra.mxu0 %v4610_v39  ;;  %v3514_v43 = vcvt.s32.f32 %v1946_v15  ;;  %v3518_v47 = vcvt.s32.f32 %v1950_v11  ;;  %v1810_v55 = vunpack.c.0.s8 %v746_v20  ;;  %v4502_v24 = vpack.c.bf16 %v3390_v44, %v3386_v36  ;;  %v794_v36 = vld [vmem:[%s7886_s14 + $0x898] sm:$0xff] }
 0x3c5   : > { %v4678_v45 = vpack.c.bf16 %v3742_v19, %v3738_v12  ;;  %v3594_v26 = vcvt.s32.f32 %v2026_v28  ;;  %v1814_v25 = vunpack.c.1.s8 %v746_v20  ;;  %v3598_v1 = vcvt.s32.f32 %v2030_v32  ;;  %v818_v28 = vld [vmem:[%s7886_s14 + $0x958] sm:$0xff] }
 0x3c6   : > { %v4566_v16 = vpack.c.bf16 %v3518_v47, %v3514_v43  ;;  %v3378_v41 = vcvt.s32.f32 %v1810_v55  ;;  %v2122_v29 = vunpack.c.2.s8 %v822_v4  ;;  %6054 = vmatpush.bf16.msrb.mxu1 %v4502_v24  ;;  %v2126_v53 = vunpack.c.3.s8 %v822_v4 }
 0x3c7   : > { %6115 = vmatpush.bf16.msrb.mxu2 %v4678_v45  ;;  %v3382_v62 = vcvt.s32.f32 %v1814_v25  ;;  %v2162_v57 = vunpack.c.0.s8 %v834_v8  ;;  %v2166_v9 = vunpack.c.1.s8 %v834_v8  ;;  %v4606_v2 = vpack.c.bf16 %v3598_v1, %v3594_v26 }
 0x3c8   : > { %6080 = vmatpush.bf16.msra.mxu3 %v4566_v16  ;;  %v3690_v46 = vcvt.s32.f32 %v2122_v29  ;;  %v1938_v59 = vunpack.c.0.s8 %v778_v51  ;;  %v1942_v61 = vunpack.c.1.s8 %v778_v51  ;;  %v3694_v63 = vcvt.s32.f32 %v2126_v53 }
 0x3c9   : > { %v4498_v20 = vpack.c.bf16 %v3382_v62, %v3378_v41  ;;  %v3730_v21 = vcvt.s32.f32 %v2162_v57  ;;  %v3734_v33 = vcvt.s32.f32 %v2166_v9  ;;  %6091 = vmatpush.bf16.msra.mxu0 %v4606_v2  ;;  %v2018_v35 = vunpack.c.0.s8 %v798_v49  ;;  %v850_v57 = vld [vmem:[%s7886_s14 + $0xa58] sm:$0xff] }
 0x3ca   : > { %v3506_v14 = vcvt.s32.f32 %v1938_v59  ;;  %v3510_v18 = vcvt.s32.f32 %v1942_v61  ;;  %v2022_v50 = vunpack.c.1.s8 %v798_v49  ;;  %v4654_v8 = vpack.c.bf16 %v3694_v63, %v3690_v46  ;;  %v870_v59 = vld [vmem:[%s7886_s14 + $0xaf8] sm:$0xff] }
 0x3cb   : > { %6055 = vmatpush.bf16.msrb.mxu1 %v4498_v20  ;;  %v4674_v7 = vpack.c.bf16 %v3734_v33, %v3730_v21  ;;  %v2250_v10 = vunpack.c.2.s8 %v854_v0  ;;  %v2254_v56 = vunpack.c.3.s8 %v854_v0  ;;  %v3586_v51 = vcvt.s32.f32 %v2018_v35 }
 0x3cc   : > { %v4562_v52 = vpack.c.bf16 %v3510_v18, %v3506_v14  ;;  %v3590_v58 = vcvt.s32.f32 %v2022_v50  ;;  %v2114_v37 = vunpack.c.0.s8 %v822_v4  ;;  %v2118_v11 = vunpack.c.1.s8 %v822_v4 }
 0x3cd   : > { %6116 = vmatpush.bf16.msrb.mxu2 %v4674_v7  ;;  %v3818_v39 = vcvt.s32.f32 %v2250_v10  ;;  %v3822_v15 = vcvt.s32.f32 %v2254_v56  ;;  %v2154_v54 = vunpack.c.2.s8 %v830_v3  ;;  %v2158_v12 = vunpack.c.3.s8 %v830_v3 }
 0x3ce   : > { %6056 = vmatmul.bf16.vlgmr.msrb.gmra.mxu1 %v8012_v48  ;;  %6081 = vmatpush.bf16.msra.mxu3 %v4562_v52  ;;  %v4602_v49 = vpack.c.bf16 %v3590_v58, %v3586_v51  ;;  %v3682_v44 = vcvt.s32.f32 %v2114_v37  ;;  %v2010_v19 = vunpack.c.2.s8 %v794_v36  ;;  %v3686_v47 = vcvt.s32.f32 %v2118_v11 }
 0x3cf   : > { %6100 = vmatpush.bf16.msra.mxu1 %v4654_v8  ;;  %v4718_v43 = vpack.c.bf16 %v3822_v15, %v3818_v39  ;;  %v3722_v32 = vcvt.s32.f32 %v2154_v54  ;;  %v2014_v55 = vunpack.c.3.s8 %v794_v36  ;;  %v3726_v24 = vcvt.s32.f32 %v2158_v12 }
 0x3d0   : > { %6092 = vmatpush.bf16.msra.mxu0 %v4602_v49  ;;  %v3578_v45 = vcvt.s32.f32 %v2010_v19  ;;  %v2242_v26 = vunpack.c.0.s8 %v854_v0  ;;  %v2246_v25 = vunpack.c.1.s8 %v854_v0  ;;  %v4650_v4 = vpack.c.bf16 %v3686_v47, %v3682_v44  ;;  %v814_v44 = vld [vmem:[%s7886_s14 + $0x938] sm:$0xff] }
 0x3d1   : > { %v3582_v48 = vcvt.s32.f32 %v2014_v55  ;;  %v2106_v16 = vunpack.c.2.s8 %v818_v28  ;;  %v2110_v1 = vunpack.c.3.s8 %v818_v28  ;;  %v4670_v41 = vpack.c.bf16 %v3726_v24, %v3722_v32  ;;  %6082 = vmatmul.bf16.vlgmr.msra.gmra.mxu3 %v8045_v17  ;;  %v902_v24 = vld [vmem:[%s7886_s14 + $0xbf8] sm:$0xff] }
 0x3d2   : > { %6126 = vmatpush.bf16.msrb.mxu3 %v4718_v43  ;;  %v3810_v29 = vcvt.s32.f32 %v2242_v26  ;;  %v3814_v62 = vcvt.s32.f32 %v2246_v25  ;;  %v2146_v53 = vunpack.c.0.s8 %v830_v3  ;;  %v2150_v46 = vunpack.c.1.s8 %v830_v3  ;;  %v826_v3 = vld [vmem:[%s7886_s14 + $0x998] sm:$0xff] }
 0x3d3   : > { %6101 = vmatpush.bf16.msra.mxu1 %v4650_v4  ;;  %v4598_v9 = vpack.c.bf16 %v3582_v48, %v3578_v45  ;;  %v3674_v42 = vcvt.s32.f32 %v2106_v16  ;;  %v3678_v2 = vcvt.s32.f32 %v2110_v1  ;;  %6117 = vmatpush.bf16.msrb.mxu2 %v4670_v41  ;;  %v2002_v20 = vunpack.c.0.s8 %v794_v36  ;;  %v846_v41 = vld [vmem:[%s7886_s14 + $0xa38] sm:$0xff] }
 0x3d4   : > { %v4714_v61 = vpack.c.bf16 %v3814_v62, %v3810_v29  ;;  %v3714_v0 = vcvt.s32.f32 %v2146_v53  ;;  %v2006_v63 = vunpack.c.1.s8 %v794_v36  ;;  %v3718_v33 = vcvt.s32.f32 %v2150_v46 }
 0x3d5   : > { %6093 = vmatpush.bf16.msra.mxu0 %v4598_v9  ;;  %v4646_v21 = vpack.c.bf16 %v3678_v2, %v3674_v42  ;;  %v5850_v17 = vadd.f32 %v8874_v13, %v8883_v31  ;;  %v2234_v14 = vunpack.c.2.s8 %v850_v57  ;;  %v3570_v18 = vcvt.s32.f32 %v2002_v20  ;;  %v866_v9 = vld [vmem:[%s7886_s14 + $0xad8] sm:$0xff] }
 0x3d6   : > { %6127 = vmatpush.bf16.msrb.mxu3 %v4714_v61  ;;  %v3574_v35 = vcvt.s32.f32 %v2006_v63  ;;  %v2238_v50 = vunpack.c.3.s8 %v850_v57  ;;  %v2314_v8 = vunpack.c.2.s8 %v870_v59  ;;  %v4666_v7 = vpack.c.bf16 %v3718_v33, %v3714_v0 }
 0x3d7   : > { %6102 = vmatpush.bf16.msra.mxu1 %v4646_v21  ;;  %v3802_v10 = vcvt.s32.f32 %v2234_v14  ;;  %v2318_v56 = vunpack.c.3.s8 %v870_v59  ;;  %v2098_v52 = vunpack.c.0.s8 %v818_v28  ;;  %v2102_v37 = vunpack.c.1.s8 %v818_v28 }
 0x3d8   : > { %v4594_v36 = vpack.c.bf16 %v3574_v35, %v3570_v18  ;;  %v3806_v51 = vcvt.s32.f32 %v2238_v50  ;;  %v3882_v58 = vcvt.s32.f32 %v2314_v8  ;;  %6118 = vmatpush.bf16.msrb.mxu2 %v4666_v7  ;;  %v2138_v31 = vunpack.c.2.s8 %v826_v3 }
 0x3d9   : > { %v3886_v39 = vcvt.s32.f32 %v2318_v56  ;;  %v3666_v13 = vcvt.s32.f32 %v2098_v52  ;;  %v2142_v15 = vunpack.c.3.s8 %v826_v3  ;;  %v3670_v54 = vcvt.s32.f32 %v2102_v37 }
 0x3da   : > { %6094 = vmatpush.bf16.msra.mxu0 %v4594_v36  ;;  %v4710_v11 = vpack.c.bf16 %v3806_v51, %v3802_v10  ;;  %v8902_v49 = vadd.f32 %v8886_v23, %v5850_v17  ;;  %v3706_v19 = vcvt.s32.f32 %v2138_v31  ;;  %v2226_v47 = vunpack.c.0.s8 %v850_v57  ;;  %v810_v31 = vld [vmem:[%s7886_s14 + $0x918] sm:$0xff] }
 0x3db   : > { %v4750_v12 = vpack.c.bf16 %v3886_v39, %v3882_v58  ;;  %v3710_v43 = vcvt.s32.f32 %v2142_v15  ;;  %v4642_v28 = vpack.c.bf16 %v3670_v54, %v3666_v13  ;;  %v2230_v32 = vunpack.c.1.s8 %v850_v57 }
 0x3dc   : > { %6128 = vmatpush.bf16.msrb.mxu3 %v4710_v11  ;;  %v2306_v55 = vunpack.c.0.s8 %v870_v59  ;;  %v3794_v26 = vcvt.s32.f32 %v2226_v47  ;;  %v2310_v25 = vunpack.c.1.s8 %v870_v59  ;;  %v2090_v4 = vunpack.c.2.s8 %v814_v44 }
 0x3dd   : > { %v4662_v45 = vpack.c.bf16 %v3710_v43, %v3706_v19  ;;  %6103 = vmatpush.bf16.msra.mxu1 %v4642_v28  ;;  %6095 = vmatmul.bf16.vlgmr.msra.gmra.mxu0 %v8047_v22  ;;  %v3798_v23 = vcvt.s32.f32 %v2230_v32  ;;  %v2094_v16 = vunpack.c.3.s8 %v814_v44  ;;  %v2130_v1 = vunpack.c.0.s8 %v826_v3  ;;  %v898_v19 = vld [vmem:[%s7886_s14 + $0xbd8] sm:$0xff] }
 0x3de   : > { %6139 = vmatpush.bf16.msrb.mxu0 %v4750_v12  ;;  %v3874_v48 = vcvt.s32.f32 %v2306_v55  ;;  %v3878_v29 = vcvt.s32.f32 %v2310_v25  ;;  %v3658_v62 = vcvt.s32.f32 %v2090_v4  ;;  %v2134_v53 = vunpack.c.1.s8 %v826_v3  ;;  %v8913_v32 = vld [vmem:[%s7886_s14 + $0xa18] sm:$0xff]  ;;  %v8918_v4 = vpop.f32.mrf.mxu3 }
 0x3df   : > { %6119 = vmatpush.bf16.msrb.mxu2 %v4662_v45  ;;  %v2442_v57 = vunpack.c.2.s8 %v902_v24  ;;  %v4706_v42 = vpack.c.bf16 %v3798_v23, %v3794_v26  ;;  %v3662_v2 = vcvt.s32.f32 %v2094_v16  ;;  %v3698_v46 = vcvt.s32.f32 %v2130_v1  ;;  %v8916_v25 = vld [vmem:[%s7886_s14 + $0xab8] sm:$0xff] }
 0x3e0   : > { %v2446_v61 = vunpack.c.3.s8 %v902_v24  ;;  %v4746_v59 = vpack.c.bf16 %v3878_v29, %v3874_v48  ;;  %v3702_v0 = vcvt.s32.f32 %v2134_v53  ;;  %v2218_v63 = vunpack.c.2.s8 %v846_v41 }
 0x3e1   : > { %v4010_v20 = vcvt.s32.f32 %v2442_v57  ;;  %6129 = vmatpush.bf16.msrb.mxu3 %v4706_v42  ;;  %v4638_v22 = vpack.c.bf16 %v3662_v2, %v3658_v62  ;;  %v2222_v33 = vunpack.c.3.s8 %v846_v41  ;;  %v2298_v17 = vunpack.c.2.s8 %v866_v9  ;;  %v886_v2 = vld [vmem:[%s7886_s14 + $0xb78] sm:$0xff] }
 0x3e2   : > { %v4014_v21 = vcvt.s32.f32 %v2446_v61  ;;  %6140 = vmatpush.bf16.msrb.mxu0 %v4746_v59  ;;  %v4658_v14 = vpack.c.bf16 %v3702_v0, %v3698_v46  ;;  %v3786_v18 = vcvt.s32.f32 %v2218_v63  ;;  %v2302_v35 = vunpack.c.3.s8 %v866_v9  ;;  %v8924_v46 = vpop.f32.mrf.mxu0 }
 0x3e3   : > { %v2082_v50 = vunpack.c.0.s8 %v814_v44  ;;  %6104 = vmatpush.bf16.msra.mxu1 %v4638_v22  ;;  %v3790_v3 = vcvt.s32.f32 %v2222_v33  ;;  %v3866_v7 = vcvt.s32.f32 %v2298_v17  ;;  %v2086_v10 = vunpack.c.1.s8 %v814_v44 }
 0x3e4   : > { %v4814_v8 = vpack.c.bf16 %v4014_v21, %v4010_v20  ;;  %6120 = vmatpush.bf16.msrb.mxu2 %v4658_v14  ;;  %v3870_v56 = vcvt.s32.f32 %v2302_v35  ;;  %v2434_v36 = vunpack.c.0.s8 %v902_v24  ;;  %v2438_v51 = vunpack.c.1.s8 %v902_v24 }
 0x3e5   : > { %v3650_v52 = vcvt.s32.f32 %v2082_v50  ;;  %v4702_v58 = vpack.c.bf16 %v3790_v3, %v3786_v18  ;;  %v3654_v37 = vcvt.s32.f32 %v2086_v10  ;;  %v2210_v39 = vunpack.c.0.s8 %v846_v41 }
 0x3e6   : > { %v2214_v13 = vunpack.c.1.s8 %v846_v41  ;;  %v4742_v15 = vpack.c.bf16 %v3870_v56, %v3866_v7  ;;  %v4002_v11 = vcvt.s32.f32 %v2434_v36  ;;  %v4006_v54 = vcvt.s32.f32 %v2438_v51  ;;  %v5877_v51 = vpop.f32.mrf.mxu3 }
 0x3e7   : > { %v2290_v12 = vunpack.c.0.s8 %v866_v9  ;;  %6130 = vmatpush.bf16.msrb.mxu3 %v4702_v58  ;;  %v4634_v44 = vpack.c.bf16 %v3654_v37, %v3650_v52  ;;  %v3778_v43 = vcvt.s32.f32 %v2210_v39  ;;  %v2294_v28 = vunpack.c.1.s8 %v866_v9  ;;  %6121 = vmatmul.bf16.vlgmr.msrb.gmra.mxu2 %v8052_v34 }
 0x3e8   : > { %6165 = vmatpush.bf16.msra.mxu2 %v4814_v8  ;;  %v3782_v47 = vcvt.s32.f32 %v2214_v13  ;;  %6141 = vmatpush.bf16.msrb.mxu0 %v4742_v15  ;;  %v4810_v55 = vpack.c.bf16 %v4006_v54, %v4002_v11  ;;  %v2074_v45 = vunpack.c.2.s8 %v810_v31  ;;  %v2078_v26 = vunpack.c.3.s8 %v810_v31  ;;  %v8930_v15 = vpop.f32.mrf.mxu1 }
 0x3e9   : > { %v3858_v24 = vcvt.s32.f32 %v2290_v12  ;;  %6105 = vmatpush.bf16.msra.mxu1 %v4634_v44  ;;  %v3862_v48 = vcvt.s32.f32 %v2294_v28  ;;  %v2426_v16 = vunpack.c.2.s8 %v898_v19  ;;  %v2430_v1 = vunpack.c.3.s8 %v898_v19  ;;  %v858_v44 = vld [vmem:[%s7886_s14 + $0xa98] sm:$0xff] }
 0x3ea   : > { %v4698_v23 = vpack.c.bf16 %v3782_v47, %v3778_v43  ;;  %v3642_v41 = vcvt.s32.f32 %v2074_v45  ;;  %v3646_v34 = vcvt.s32.f32 %v2078_v26  ;;  %v2202_v29 = vunpack.c.2.s8 %v8913_v32 }
 0x3eb   : > { %v2206_v62 = vunpack.c.3.s8 %v8913_v32  ;;  %v4738_v53 = vpack.c.bf16 %v3862_v48, %v3858_v24  ;;  %v3994_v57 = vcvt.s32.f32 %v2426_v16  ;;  %v3998_v9 = vcvt.s32.f32 %v2430_v1  ;;  %v5890_v24 = vpop.f32.mrf.mxu0  ;;  %v910_v48 = vld [vmem:[%s7886_s14 + $0xc38] sm:$0xff] }
 0x3ec   : > { %6166 = vmatpush.bf16.msra.mxu2 %v4810_v55  ;;  %6131 = vmatpush.bf16.msrb.mxu3 %v4698_v23  ;;  %v2282_v42 = vunpack.c.2.s8 %v8916_v25  ;;  %v4630_v61 = vpack.c.bf16 %v3646_v34, %v3642_v41  ;;  %v3770_v59 = vcvt.s32.f32 %v2202_v29  ;;  %v2286_v20 = vunpack.c.3.s8 %v8916_v25  ;;  %v8937_v29 = vpop.f32.mrf.mxu2 }
 0x3ed   : > { %v3774_v0 = vcvt.s32.f32 %v2206_v62  ;;  %6142 = vmatpush.bf16.msrb.mxu0 %v4738_v53  ;;  %v4806_v63 = vpack.c.bf16 %v3998_v9, %v3994_v57  ;;  %v2066_v21 = vunpack.c.0.s8 %v810_v31  ;;  %v2070_v33 = vunpack.c.1.s8 %v810_v31  ;;  %v894_v31 = vld [vmem:[%s7886_s14 + $0xbb8] sm:$0xff] }
 0x3ee   : > { %v3850_v22 = vcvt.s32.f32 %v2282_v42  ;;  %6106 = vmatpush.bf16.msra.mxu1 %v4630_v61  ;;  %v3854_v14 = vcvt.s32.f32 %v2286_v20  ;;  %v2378_v18 = vunpack.c.2.s8 %v886_v2  ;;  %v2382_v35 = vunpack.c.3.s8 %v886_v2 }
 0x3ef   : > { %v4694_v17 = vpack.c.bf16 %v3774_v0, %v3770_v59  ;;  %v3634_v50 = vcvt.s32.f32 %v2066_v21  ;;  %v3638_v8 = vcvt.s32.f32 %v2070_v33  ;;  %v2418_v3 = vunpack.c.0.s8 %v898_v19 }
 0x3f0   : > { %6167 = vmatpush.bf16.msra.mxu2 %v4806_v63  ;;  %v2422_v7 = vunpack.c.1.s8 %v898_v19  ;;  %v4734_v10 = vpack.c.bf16 %v3854_v14, %v3850_v22  ;;  %v3946_v56 = vcvt.s32.f32 %v2378_v18  ;;  %v3950_v52 = vcvt.s32.f32 %v2382_v35  ;;  %v5903_v14 = vpop.f32.mrf.mxu1 }
 0x3f1   : > { %6132 = vmatpush.bf16.msrb.mxu3 %v4694_v17  ;;  %v2194_v36 = vunpack.c.0.s8 %v8913_v32  ;;  %v4626_v58 = vpack.c.bf16 %v3638_v8, %v3634_v50  ;;  %v3986_v37 = vcvt.s32.f32 %v2418_v3  ;;  %v2198_v13 = vunpack.c.1.s8 %v8913_v32 }
 0x3f2   : > { %v3990_v39 = vcvt.s32.f32 %v2422_v7  ;;  %6143 = vmatpush.bf16.msrb.mxu0 %v4734_v10  ;;  %v4782_v11 = vpack.c.bf16 %v3950_v52, %v3946_v56  ;;  %v2274_v12 = vunpack.c.0.s8 %v8916_v25  ;;  %v2278_v19 = vunpack.c.1.s8 %v8916_v25  ;;  %v882_v25 = vld [vmem:[%s7886_s14 + $0xb58] sm:$0xff] }
 0x3f3   : > { %v3762_v54 = vcvt.s32.f32 %v2194_v36  ;;  %6107 = vmatpush.bf16.msra.mxu1 %v4626_v58  ;;  %v3766_v47 = vcvt.s32.f32 %v2198_v13  ;;  %v2370_v28 = vunpack.c.0.s8 %v886_v2  ;;  %v2374_v55 = vunpack.c.1.s8 %v886_v2  ;;  %v890_v52 = vld [vmem:[%s7886_s14 + $0xb98] sm:$0xff] }
 0x3f4   : > { %v4802_v43 = vpack.c.bf16 %v3990_v39, %v3986_v37  ;;  %v3842_v32 = vcvt.s32.f32 %v2274_v12  ;;  %v3846_v45 = vcvt.s32.f32 %v2278_v19  ;;  %v2410_v26 = vunpack.c.2.s8 %v894_v31  ;;  %v906_v39 = vld [vmem:[%s7886_s14 + $0xc18] sm:$0xff]  ;;  %v5916_v12 = vpop.f32.mrf.mxu2 }
 0x3f5   : > { %v2414_v23 = vunpack.c.3.s8 %v894_v31  ;;  %v4690_v16 = vpack.c.bf16 %v3766_v47, %v3762_v54  ;;  %v3938_v1 = vcvt.s32.f32 %v2370_v28  ;;  %v3942_v41 = vcvt.s32.f32 %v2374_v55  ;;  %v8949_v54 = vpop.f32.mrf.mxu3  ;;  %v878_v28 = vld [vmem:[%s7886_s14 + $0xb38] sm:$0xff] }
 0x3f6   : > { %6168 = vmatpush.bf16.msra.mxu2 %v4802_v43  ;;  %v2266_v34 = vunpack.c.2.s8 %v858_v44  ;;  %6108 = vmatmul.bf16.vlgmr.msra.gmra.mxu1 %v8049_v30  ;;  %v4730_v62 = vpack.c.bf16 %v3846_v45, %v3842_v32  ;;  %v3978_v53 = vcvt.s32.f32 %v2410_v26  ;;  %v2270_v9 = vunpack.c.3.s8 %v858_v44 }
 0x3f7   : > { %6152 = vmatpush.bf16.msrb.mxu1 %v4782_v11  ;;  %v3982_v57 = vcvt.s32.f32 %v2414_v23  ;;  %6133 = vmatpush.bf16.msrb.mxu3 %v4690_v16  ;;  %v4778_v42 = vpack.c.bf16 %v3942_v41, %v3938_v1  ;;  %v2474_v61 = vunpack.c.2.s8 %v910_v48  ;;  %v2478_v59 = vunpack.c.3.s8 %v910_v48  ;;  %v8953_v1 = vld [vmem:[%s8947_s24 + $0x160] sm:$0xff] }
 0x3f8   : > { %v3834_v2 = vcvt.s32.f32 %v2266_v34  ;;  %6144 = vmatpush.bf16.msrb.mxu0 %v4730_v62  ;;  %v3838_v20 = vcvt.s32.f32 %v2270_v9  ;;  %v2362_v63 = vunpack.c.2.s8 %v882_v25  ;;  %v2366_v22 = vunpack.c.3.s8 %v882_v25 }
 0x3f9   : > { %v4798_v0 = vpack.c.bf16 %v3982_v57, %v3978_v53  ;;  %v4042_v21 = vcvt.s32.f32 %v2474_v61  ;;  %v4046_v33 = vcvt.s32.f32 %v2478_v59  ;;  %v2402_v30 = vunpack.c.0.s8 %v894_v31  ;;  %v8955_v53 = vpop.f32.mrf.mxu0 }
 0x3fa   : > { %v2406_v17 = vunpack.c.1.s8 %v894_v31  ;;  %6134 = vmatmul.bf16.vlgmr.msrb.gmra.mxu3 %v8086_v6  ;;  %v4726_v18 = vpack.c.bf16 %v3838_v20, %v3834_v2  ;;  %v3930_v35 = vcvt.s32.f32 %v2362_v63  ;;  %v3934_v50 = vcvt.s32.f32 %v2366_v22  ;;  %v6266_v63 = vld [vmem:[%s8947_s24 + $0x1e0] sm:$0xff] }
 0x3fb   : > { %6153 = vmatpush.bf16.msrb.mxu1 %v4778_v42  ;;  %6169 = vmatpush.bf16.msra.mxu2 %v4798_v0  ;;  %v2258_v8 = vunpack.c.0.s8 %v858_v44  ;;  %v4830_v3 = vpack.c.bf16 %v4046_v33, %v4042_v21  ;;  %v3970_v7 = vcvt.s32.f32 %v2402_v30  ;;  %v2262_v56 = vunpack.c.1.s8 %v858_v44 }
 0x3fc   : > { %v3974_v10 = vcvt.s32.f32 %v2406_v17  ;;  %6145 = vmatpush.bf16.msrb.mxu0 %v4726_v18  ;;  %v4774_v36 = vpack.c.bf16 %v3934_v50, %v3930_v35  ;;  %v2466_v58 = vunpack.c.0.s8 %v910_v48  ;;  %v2470_v37 = vunpack.c.1.s8 %v910_v48  ;;  %v8962_v50 = vld [vmem:[%s8947_s24 + $0x60] sm:$0xff] }
 0x3fd   : > { %v3826_v51 = vcvt.s32.f32 %v2258_v8  ;;  %6182 = vmatpush.bf16.msra.mxu3 %v4830_v3  ;;  %v3830_v13 = vcvt.s32.f32 %v2262_v56  ;;  %v2354_v31 = vunpack.c.0.s8 %v882_v25  ;;  %v2358_v11 = vunpack.c.1.s8 %v882_v25  ;;  %v5929_v8 = vpop.f32.mrf.mxu3 }
 0x3fe   : > { %v4794_v6 = vpack.c.bf16 %v3974_v10, %v3970_v7  ;;  %v4034_v19 = vcvt.s32.f32 %v2466_v58  ;;  %v4038_v44 = vcvt.s32.f32 %v2470_v37  ;;  %v2394_v43 = vunpack.c.2.s8 %v890_v52  ;;  %v8966_v58 = vpop.f32.mrf.mxu1 }
 0x3ff   : > { %6154 = vmatpush.bf16.msrb.mxu1 %v4774_v36  ;;  %v2398_v47 = vunpack.c.3.s8 %v890_v52  ;;  %v4722_v55 = vpack.c.bf16 %v3830_v13, %v3826_v51  ;;  %v3922_v24 = vcvt.s32.f32 %v2354_v31  ;;  %v3926_v32 = vcvt.s32.f32 %v2358_v11 }
 0x400   : > { %6170 = vmatpush.bf16.msra.mxu2 %v4794_v6  ;;  %v2458_v45 = vunpack.c.2.s8 %v906_v39  ;;  %v4826_v26 = vpack.c.bf16 %v4038_v44, %v4034_v19  ;;  %v3962_v23 = vcvt.s32.f32 %v2394_v43  ;;  %v2462_v16 = vunpack.c.3.s8 %v906_v39 }
 0x401   : > { %v3966_v48 = vcvt.s32.f32 %v2398_v47  ;;  %6146 = vmatpush.bf16.msrb.mxu0 %v4722_v55  ;;  %v4770_v41 = vpack.c.bf16 %v3926_v32, %v3922_v24  ;;  %v2346_v25 = vunpack.c.2.s8 %v878_v28  ;;  %v2350_v62 = vunpack.c.3.s8 %v878_v28  ;;  %v5942_v12 = vpop.f32.mrf.mxu0  ;;  %v874_v55 = vld [vmem:[%s7886_s14 + $0xb18] sm:$0xff] }
 0x402   : > { %v4026_v34 = vcvt.s32.f32 %v2458_v45  ;;  %6183 = vmatpush.bf16.msra.mxu3 %v4826_v26  ;;  %v4030_v9 = vcvt.s32.f32 %v2462_v16  ;;  %v2386_v42 = vunpack.c.0.s8 %v890_v52  ;;  %v2390_v2 = vunpack.c.1.s8 %v890_v52  ;;  %v8974_v26 = vld [vmem:[%s8947_s24 + $0x140] sm:$0xff] }
 0x403   : > { %v4790_v57 = vpack.c.bf16 %v3966_v48, %v3962_v23  ;;  %6155 = vmatpush.bf16.msrb.mxu1 %v4770_v41  ;;  %v3914_v61 = vcvt.s32.f32 %v2346_v25  ;;  %v3918_v59 = vcvt.s32.f32 %v2350_v62  ;;  %v6454_v0 = vunpack.c.2.s8 %v8953_v1  ;;  %v8977_v23 = vpop.f32.mrf.mxu2 }
 0x404   : > { %v6458_v20 = vunpack.c.3.s8 %v8953_v1  ;;  %6147 = vmatmul.bf16.vlgmr.msrb.gmra.mxu0 %v8088_v27  ;;  %v4822_v22 = vpack.c.bf16 %v4030_v9, %v4026_v34  ;;  %v3954_v21 = vcvt.s32.f32 %v2386_v42  ;;  %v3958_v33 = vcvt.s32.f32 %v2390_v2 }
 0x405   : > { %6171 = vmatpush.bf16.msra.mxu2 %v4790_v57  ;;  %v2450_v30 = vunpack.c.0.s8 %v906_v39  ;;  %v4766_v17 = vpack.c.bf16 %v3918_v59, %v3914_v61  ;;  %v6710_v14 = vcvt.s32.f32 %v6454_v0  ;;  %v2454_v35 = vunpack.c.1.s8 %v906_v39  ;;  %v6262_v61 = vld [vmem:[%s8947_s24 + $0x1c0] sm:$0xff] }
 0x406   : > { %v6714_v18 = vcvt.s32.f32 %v6458_v20  ;;  %6184 = vmatpush.bf16.msra.mxu3 %v4822_v22  ;;  %v4786_v3 = vpack.c.bf16 %v3958_v33, %v3954_v21  ;;  %v5889_v10 = vadd.f32 %v8924_v46, %v8918_v4  ;;  %v6518_v56 = vunpack.c.2.s8 %v6266_v63  ;;  %v8987_v22 = vld [vmem:[%s8947_s24 + $0x40] sm:$0xff]  ;;  %v5955_v21 = vpop.f32.mrf.mxu1 }
 0x407   : > { %v4018_v7 = vcvt.s32.f32 %v2450_v30  ;;  %6156 = vmatpush.bf16.msrb.mxu1 %v4766_v17  ;;  %v4022_v52 = vcvt.s32.f32 %v2454_v35  ;;  %v6522_v36 = vunpack.c.3.s8 %v6266_v63  ;;  %v2338_v51 = vunpack.c.0.s8 %v878_v28 }
 0x408   : > { %v6874_v27 = vpack.c.bf16 %v6714_v18, %v6710_v14  ;;  %v6774_v37 = vcvt.s32.f32 %v6518_v56  ;;  %v2342_v39 = vunpack.c.1.s8 %v878_v28  ;;  %v6326_v6 = vunpack.c.2.s8 %v8962_v50 }
 0x409   : > { %6172 = vmatpush.bf16.msra.mxu2 %v4786_v3  ;;  %v6330_v13 = vunpack.c.3.s8 %v8962_v50  ;;  %v4818_v31 = vpack.c.bf16 %v4022_v52, %v4018_v7  ;;  %v6778_v4 = vcvt.s32.f32 %v6522_v36  ;;  %v3906_v46 = vcvt.s32.f32 %v2338_v51  ;;  %v6234_v3 = vld [vmem:[%s8947_s24 + $0xe0] sm:$0xff] }
 0x40a   : > { %v6446_v11 = vunpack.c.0.s8 %v8953_v1  ;;  %v3910_v19 = vcvt.s32.f32 %v2342_v39  ;;  %v6582_v44 = vcvt.s32.f32 %v6326_v6  ;;  %v6450_v47 = vunpack.c.1.s8 %v8953_v1 }
 0x40b   : > { %v6586_v43 = vcvt.s32.f32 %v6330_v13  ;;  %6185 = vmatpush.bf16.msra.mxu3 %v4818_v31  ;;  %v6906_v28 = vpack.c.bf16 %v6778_v4, %v6774_v37  ;;  %v6510_v32 = vunpack.c.0.s8 %v6266_v63  ;;  %v6514_v45 = vunpack.c.1.s8 %v6266_v63  ;;  %v7669_v63 = vld [vmem:[#allocation1] sm:$0xff]  ;;  %v5968_v39 = vpop.f32.mrf.mxu2  ;;  %v8993_v4 = vpop.f32.mrf.mxu3 }
 0x40c   : > { %v6702_v24 = vcvt.s32.f32 %v6446_v11  ;;  %6173 = vmatmul.bf16.vlgmr.msra.gmra.mxu2 %v8093_v40  ;;  %v4762_v48 = vpack.c.bf16 %v3910_v19, %v3906_v46  ;;  %v6706_v41 = vcvt.s32.f32 %v6450_v47  ;;  %v5902_v34 = vadd.f32 %v8930_v15, %v5889_v10 }
 0x40d   : > { %6946 = vmatpush.bf16.msrb.mxu2 %v6874_v27  ;;  %v6810_v16 = vpack.c.bf16 %v6586_v43, %v6582_v44  ;;  %v6766_v1 = vcvt.s32.f32 %v6510_v32  ;;  %v6770_v25 = vcvt.s32.f32 %v6514_v45  ;;  %v2330_v62 = vunpack.c.2.s8 %v874_v55 }
 0x40e   : > { %v2334_v57 = vunpack.c.3.s8 %v874_v55  ;;  %6157 = vmatpush.bf16.msrb.mxu1 %v4762_v48  ;;  %v6870_v9 = vpack.c.bf16 %v6706_v41, %v6702_v24  ;;  %v6318_v42 = vunpack.c.0.s8 %v8962_v50  ;;  %v6322_v40 = vunpack.c.1.s8 %v8962_v50  ;;  %7554 = vmatmul.msk.bf16.vlgmr.msra.gmra.mxu3 %vm4888_vm0, %v7669_v63  ;;  %v6242_v48 = vld [vmem:[%s8947_s24 + $0x120] sm:$0xff] }
 0x40f   : > { %6959 = vmatpush.bf16.msrb.mxu3 %v6906_v28  ;;  %6920 = vmatpush.bf16.msra.mxu0 %v6810_v16  ;;  %v6438_v2 = vunpack.c.2.s8 %v8974_v26  ;;  %v6902_v59 = vpack.c.bf16 %v6770_v25, %v6766_v1  ;;  %v3898_v0 = vcvt.s32.f32 %v2330_v62  ;;  %v6442_v15 = vunpack.c.3.s8 %v8974_v26 }
 0x410   : > { %v3902_v20 = vcvt.s32.f32 %v2334_v57  ;;  %v6574_v33 = vcvt.s32.f32 %v6318_v42  ;;  %v6578_v30 = vcvt.s32.f32 %v6322_v40  ;;  %v5915_v14 = vadd.f32 %v8937_v29, %v5902_v34  ;;  %v6258_v42 = vld [vmem:[%s8947_s24 + $0x1a0] sm:$0xff] }
 0x411   : > { %6947 = vmatpush.bf16.msrb.mxu2 %v6870_v9  ;;  %v6694_v17 = vcvt.s32.f32 %v6438_v2  ;;  %v6698_v35 = vcvt.s32.f32 %v6442_v15  ;;  %v6502_v50 = vunpack.c.2.s8 %v6262_v61  ;;  %v6506_v8 = vunpack.c.3.s8 %v6262_v61 }
 0x412   : > { %v4758_v18 = vpack.c.bf16 %v3902_v20, %v3898_v0  ;;  %v6806_v7 = vpack.c.bf16 %v6578_v30, %v6574_v33  ;;  %v2322_v10 = vunpack.c.0.s8 %v874_v55  ;;  %v2326_v56 = vunpack.c.1.s8 %v874_v55  ;;  %v9008_v0 = vpop.f32.mrf.mxu0  ;;  %v6230_v33 = vld [vmem:[%s8947_s24 + $0xc0] sm:$0xff] }
 0x413   : > { %6960 = vmatpush.bf16.msrb.mxu3 %v6902_v59  ;;  %v6310_v27 = vunpack.c.2.s8 %v8987_v22  ;;  %v6866_v52 = vpack.c.bf16 %v6698_v35, %v6694_v17  ;;  %v6758_v36 = vcvt.s32.f32 %v6502_v50  ;;  %v6762_v51 = vcvt.s32.f32 %v6506_v8 }
 0x414   : > { %6158 = vmatpush.bf16.msrb.mxu1 %v4758_v18  ;;  %v6314_v37 = vunpack.c.3.s8 %v8987_v22  ;;  %6921 = vmatpush.bf16.msra.mxu0 %v6806_v7  ;;  %v3890_v29 = vcvt.s32.f32 %v2322_v10  ;;  %v3894_v6 = vcvt.s32.f32 %v2326_v56  ;;  %v6390_v31 = vunpack.c.2.s8 %v6234_v3  ;;  %v5981_v18 = vpop.f32.mrf.mxu3 }
 0x415   : > { %v6566_v13 = vcvt.s32.f32 %v6310_v27  ;;  %6948 = vmatpush.bf16.msrb.mxu2 %v6866_v52  ;;  %v6898_v46 = vpack.c.bf16 %v6762_v51, %v6758_v36  ;;  %v6394_v12 = vunpack.c.3.s8 %v6234_v3  ;;  %v6430_v19 = vunpack.c.0.s8 %v8974_v26 }
 0x416   : > { %v6570_v11 = vcvt.s32.f32 %v6314_v37  ;;  %v4754_v44 = vpack.c.bf16 %v3894_v6, %v3890_v29  ;;  %v6646_v43 = vcvt.s32.f32 %v6390_v31  ;;  %v6434_v47 = vunpack.c.1.s8 %v8974_v26  ;;  %v6205_v26 = vld [vmem:[%s9416_s1] sm:$0xf] }
 0x417   : > { %v6494_v55 = vunpack.c.0.s8 %v6262_v61  ;;  %6961 = vmatpush.bf16.msrb.mxu3 %v6898_v46  ;;  %v6650_v24 = vcvt.s32.f32 %v6394_v12  ;;  %v6686_v32 = vcvt.s32.f32 %v6430_v19  ;;  %v6498_v45 = vunpack.c.1.s8 %v6262_v61  ;;  %6911 = vst [vmem:[#allocation1] ss:$9 sm:$0xff] %v6205_v26 }
 0x418   : > { %v6802_v28 = vpack.c.bf16 %v6570_v11, %v6566_v13  ;;  %6159 = vmatpush.bf16.msrb.mxu1 %v4754_v44  ;;  %v6690_v16 = vcvt.s32.f32 %v6434_v47  ;;  %v5928_v34 = vadd.f32 %v8949_v54, %v5915_v14  ;;  %v6302_v1 = vunpack.c.0.s8 %v8987_v22  ;;  %v9006_v54 = vld [vmem:[%s8947_s24 + $0x20] sm:$0xff] }
 0x419   : > { %v6750_v41 = vcvt.s32.f32 %v6494_v55  ;;  %v6842_v25 = vpack.c.bf16 %v6650_v24, %v6646_v43  ;;  %v6754_v62 = vcvt.s32.f32 %v6498_v45  ;;  %v6306_v57 = vunpack.c.1.s8 %v8987_v22  ;;  %v6238_v43 = vld [vmem:[%s8947_s24 + $0x100] sm:$0xff] }
 0x41a   : > { %6922 = vmatpush.bf16.msra.mxu0 %v6802_v28  ;;  %v6382_v9 = vunpack.c.0.s8 %v6234_v3  ;;  %v6862_v40 = vpack.c.bf16 %v6690_v16, %v6686_v32  ;;  %v6558_v2 = vcvt.s32.f32 %v6302_v1  ;;  %v6386_v61 = vunpack.c.1.s8 %v6234_v3  ;;  %v5994_v47 = vpop.f32.mrf.mxu0 }
 0x41b   : > { %v6422_v59 = vunpack.c.2.s8 %v6242_v48  ;;  %v6894_v20 = vpack.c.bf16 %v6754_v62, %v6750_v41  ;;  %v6562_v15 = vcvt.s32.f32 %v6306_v57  ;;  %v6426_v21 = vunpack.c.3.s8 %v6242_v48  ;;  %6160 = vmatmul.bf16.vlgmr.msrb.gmra.mxu1 %v8091_v38  ;;  %v9021_v62 = vld [vmem:[%s8947_s24] sm:$0xff] }
 0x41c   : > { %6933 = vmatpush.bf16.msra.mxu1 %v6842_v25  ;;  %v6638_v63 = vcvt.s32.f32 %v6382_v9  ;;  %6949 = vmatpush.bf16.msrb.mxu2 %v6862_v40  ;;  %v6642_v22 = vcvt.s32.f32 %v6386_v61  ;;  %v5941_v17 = vadd.f32 %v8955_v53, %v5928_v34  ;;  %v6486_v14 = vunpack.c.2.s8 %v6258_v42  ;;  %v6254_v34 = vld [vmem:[%s8947_s24 + $0x180] sm:$0xff] }
 0x41d   : > { %v6678_v30 = vcvt.s32.f32 %v6422_v59  ;;  %6962 = vmatpush.bf16.msrb.mxu3 %v6894_v20  ;;  %v6798_v35 = vpack.c.bf16 %v6562_v15, %v6558_v2  ;;  %v6682_v50 = vcvt.s32.f32 %v6426_v21  ;;  %v6490_v8 = vunpack.c.3.s8 %v6258_v42  ;;  %v9025_v2 = vld [vmem:[%s8947_s24 + $0xa0] sm:$0xff] }
 0x41e   : > { %v6294_v3 = vunpack.c.2.s8 %v9006_v54  ;;  %v6838_v7 = vpack.c.bf16 %v6642_v22, %v6638_v63  ;;  %v6742_v10 = vcvt.s32.f32 %v6486_v14  ;;  %v6298_v56 = vunpack.c.3.s8 %v9006_v54  ;;  %v9030_v22 = vld [vmem:[%s8947_s24 + $0x168] sm:$0xff] }
 0x41f   : > { %v6374_v27 = vunpack.c.2.s8 %v6230_v33  ;;  %6923 = vmatpush.bf16.msra.mxu0 %v6798_v35  ;;  %v6858_v52 = vpack.c.bf16 %v6682_v50, %v6678_v30  ;;  %v6746_v38 = vcvt.s32.f32 %v6490_v8  ;;  %v6378_v51 = vunpack.c.3.s8 %v6230_v33 }
 0x420   : > { %v6550_v36 = vcvt.s32.f32 %v6294_v3  ;;  %6934 = vmatpush.bf16.msra.mxu1 %v6838_v7  ;;  %v6554_v53 = vcvt.s32.f32 %v6298_v56  ;;  %v6414_v39 = vunpack.c.0.s8 %v6242_v48  ;;  %v6418_v29 = vunpack.c.1.s8 %v6242_v48 }
 0x421   : > { %v6630_v37 = vcvt.s32.f32 %v6374_v27  ;;  %6950 = vmatpush.bf16.msrb.mxu2 %v6858_v52  ;;  %v6890_v6 = vpack.c.bf16 %v6746_v38, %v6742_v10  ;;  %v6634_v13 = vcvt.s32.f32 %v6378_v51  ;;  %v6478_v31 = vunpack.c.0.s8 %v6258_v42  ;;  %v9036_v27 = vld [vmem:[%s8947_s24 + $0x1e8] sm:$0xff] }
 0x422   : > { %v6482_v46 = vunpack.c.1.s8 %v6258_v42  ;;  %v6794_v11 = vpack.c.bf16 %v6554_v53, %v6550_v36  ;;  %v6670_v12 = vcvt.s32.f32 %v6414_v39  ;;  %v6674_v19 = vcvt.s32.f32 %v6418_v29 }
 0x423   : > { %v5954_v44 = vadd.f32 %v8966_v58, %v5941_v17  ;;  %6963 = vmatpush.bf16.msrb.mxu3 %v6890_v6  ;;  %v6834_v55 = vpack.c.bf16 %v6634_v13, %v6630_v37  ;;  %v6734_v28 = vcvt.s32.f32 %v6478_v31  ;;  %v6286_v32 = vunpack.c.0.s8 %v9006_v54 }
 0x424   : > { %v6738_v24 = vcvt.s32.f32 %v6482_v46  ;;  %6924 = vmatpush.bf16.msra.mxu0 %v6794_v11  ;;  %v6854_v45 = vpack.c.bf16 %v6674_v19, %v6670_v12  ;;  %v6290_v48 = vunpack.c.1.s8 %v9006_v54  ;;  %v6366_v16 = vunpack.c.0.s8 %v6230_v33 }
 0x425   : > { %v6370_v41 = vunpack.c.1.s8 %v6230_v33  ;;  %6935 = vmatpush.bf16.msra.mxu1 %v6834_v55  ;;  %v6542_v58 = vcvt.s32.f32 %v6286_v32  ;;  %v6406_v26 = vunpack.c.2.s8 %v6238_v43  ;;  %v6410_v25 = vunpack.c.3.s8 %v6238_v43  ;;  %v9044_v32 = vpop.f32.mrf.mxu1 }
 0x426   : > { %v6886_v1 = vpack.c.bf16 %v6738_v24, %v6734_v28  ;;  %6951 = vmatpush.bf16.msrb.mxu2 %v6854_v45  ;;  %v6546_v57 = vcvt.s32.f32 %v6290_v48  ;;  %v6622_v9 = vcvt.s32.f32 %v6366_v16  ;;  %v5967_v40 = vadd.f32 %v8977_v23, %v5954_v44 }
 0x427   : > { %v6626_v42 = vcvt.s32.f32 %v6370_v41  ;;  %v6662_v61 = vcvt.s32.f32 %v6406_v26  ;;  %v6666_v59 = vcvt.s32.f32 %v6410_v25  ;;  %v6470_v54 = vunpack.c.2.s8 %v6254_v34 }
 0x428   : > { %6964 = vmatpush.bf16.msrb.mxu3 %v6886_v1  ;;  %v6474_v20 = vunpack.c.3.s8 %v6254_v34  ;;  %v6790_v15 = vpack.c.bf16 %v6546_v57, %v6542_v58  ;;  %v6278_v21 = vunpack.c.2.s8 %v9021_v62  ;;  %v6282_v33 = vunpack.c.3.s8 %v9021_v62 }
 0x429   : > { %v6830_v63 = vpack.c.bf16 %v6626_v42, %v6622_v9  ;;  %v6850_v30 = vpack.c.bf16 %v6666_v59, %v6662_v61  ;;  %v6726_v17 = vcvt.s32.f32 %v6470_v54  ;;  %v6358_v23 = vunpack.c.2.s8 %v9025_v2 }
 0x42a   : > { %v6730_v14 = vcvt.s32.f32 %v6474_v20  ;;  %6925 = vmatpush.bf16.msra.mxu0 %v6790_v15  ;;  %v6534_v18 = vcvt.s32.f32 %v6278_v21  ;;  %v6538_v35 = vcvt.s32.f32 %v6282_v33  ;;  %v6362_v50 = vunpack.c.3.s8 %v9025_v2  ;;  %v9062_v20 = vpop.f32.mrf.mxu2 }
 0x42b   : > { %6936 = vmatpush.bf16.msra.mxu1 %v6830_v63  ;;  %v6398_v8 = vunpack.c.0.s8 %v6238_v43  ;;  %6952 = vmatpush.bf16.msrb.mxu2 %v6850_v30  ;;  %v6614_v7 = vcvt.s32.f32 %v6358_v23  ;;  %v6402_v10 = vunpack.c.1.s8 %v6238_v43  ;;  %v6455_v56 = vunpack.c.2.s8 %v9030_v22  ;;  %v6219_v43 = vld [vmem:[%s8947_s24 + $0x68] sm:$0xff] }
 0x42c   : > { %v6882_v3 = vpack.c.bf16 %v6730_v14, %v6726_v17  ;;  %v6786_v52 = vpack.c.bf16 %v6538_v35, %v6534_v18  ;;  %v6618_v38 = vcvt.s32.f32 %v6362_v50  ;;  %v6459_v51 = vunpack.c.3.s8 %v9030_v22  ;;  %v9066_v30 = vld [vmem:[%s8947_s24 + $0x148] sm:$0xff] }
 0x42d   : > { %v6654_v36 = vcvt.s32.f32 %v6398_v8  ;;  %v6658_v53 = vcvt.s32.f32 %v6402_v10  ;;  %v6711_v37 = vcvt.s32.f32 %v6455_v56  ;;  %v6462_v39 = vunpack.c.0.s8 %v6254_v34  ;;  %v6263_v8 = vld [vmem:[%s8947_s24 + $0x1c8] sm:$0xff] }
 0x42e   : > { %6965 = vmatpush.bf16.msrb.mxu3 %v6882_v3  ;;  %v6466_v29 = vunpack.c.1.s8 %v6254_v34  ;;  %6926 = vmatpush.bf16.msra.mxu0 %v6786_v52  ;;  %v6826_v6 = vpack.c.bf16 %v6618_v38, %v6614_v7  ;;  %v6715_v13 = vcvt.s32.f32 %v6459_v51  ;;  %v6519_v31 = vunpack.c.2.s8 %v9036_v27  ;;  %v9049_v34 = vld [vmem:[#allocation1 + $0x12] sm:$0xff]  ;;  %v9073_v3 = vld [vmem:[#allocation1] sm:$0xff]  ;;  %v6007_v52 = vpop.f32.mrf.mxu1 }
 0x42f   : > { %v6523_v46 = vunpack.c.3.s8 %v9036_v27  ;;  %v6846_v11 = vpack.c.bf16 %v6658_v53, %v6654_v36  ;;  %v6718_v12 = vcvt.s32.f32 %v6462_v39  ;;  %v5980_v44 = vadd.f32 %v8993_v4, %v5967_v40  ;;  %v9053_v40 = vld [vmem:[%s8947_s24 + $0x80] sm:$0xff] }
 0x430   : > { %v6722_v19 = vcvt.s32.f32 %v6466_v29  ;;  %6937 = vmatpush.bf16.msra.mxu1 %v6826_v6  ;;  %v6875_v47 = vpack.c.bf16 %v6715_v13, %v6711_v37  ;;  %v6775_v55 = vcvt.s32.f32 %v6519_v31  ;;  %v6270_v24 = vunpack.c.0.s8 %v9021_v62  ;;  %v6215_v37 = vld [vmem:[%s8947_s24 + $0x48] sm:$0xff] }
 0x431   : > { %v6779_v28 = vcvt.s32.f32 %v6523_v46  ;;  %6953 = vmatpush.bf16.msrb.mxu2 %v6846_v11  ;;  %v6274_v48 = vunpack.c.1.s8 %v9021_v62  ;;  %v6350_v16 = vunpack.c.0.s8 %v9025_v2  ;;  %v6354_v41 = vunpack.c.1.s8 %v9025_v2  ;;  %v9055_v62 = vld [vmem:[#allocation1 + $0x1b] sm:$0xff]  ;;  %v6235_v31 = vld [vmem:[%s8947_s24 + $0xe8] sm:$0xff] }
 0x432   : > { %v6878_v45 = vpack.c.bf16 %v6722_v19, %v6718_v12  ;;  %v6526_v1 = vcvt.s32.f32 %v6270_v24  ;;  %v6327_v58 = vunpack.c.2.s8 %v6219_v43  ;;  %v6331_v26 = vunpack.c.3.s8 %v6219_v43 }
 0x433   : > { %v6907_v4 = vpack.c.bf16 %v6779_v28, %v6775_v55  ;;  %v6530_v25 = vcvt.s32.f32 %v6274_v48  ;;  %v6606_v57 = vcvt.s32.f32 %v6350_v16  ;;  %v6610_v9 = vcvt.s32.f32 %v6354_v41  ;;  %v6020_v28 = vpop.f32.mrf.mxu2  ;;  %v9082_v41 = vpop.f32.mrf.mxu3 }
 0x434   : > { %6966 = vmatpush.bf16.msrb.mxu3 %v6878_v45  ;;  %v6447_v42 = vunpack.c.0.s8 %v9030_v22  ;;  %v6583_v2 = vcvt.s32.f32 %v6327_v58  ;;  %v6587_v61 = vcvt.s32.f32 %v6331_v26  ;;  %v6451_v59 = vunpack.c.1.s8 %v9030_v22  ;;  %6954 = vmatmul.bf16.vlgmr.msrb.gmra.mxu2 %v9049_v34 }
 0x435   : > { %6998 = vmatpush.bf16.msra.mxu2 %v6875_v47  ;;  %v9059_v54 = vadd.f32 %v9008_v0, %v5980_v44  ;;  %v6782_v15 = vpack.c.bf16 %v6530_v25, %v6526_v1  ;;  %v6822_v63 = vpack.c.bf16 %v6610_v9, %v6606_v57  ;;  %v6511_v33 = vunpack.c.0.s8 %v9036_v27 }
 0x436   : > { %v6703_v21 = vcvt.s32.f32 %v6447_v42  ;;  %v6811_v17 = vpack.c.bf16 %v6587_v61, %v6583_v2  ;;  %v6707_v14 = vcvt.s32.f32 %v6451_v59  ;;  %v6515_v23 = vunpack.c.1.s8 %v9036_v27 }
 0x437   : > { %v6342_v22 = vunpack.c.2.s8 %v9053_v40  ;;  %6967 = vmatmul.bf16.vlgmr.msrb.gmra.mxu3 %v9055_v62  ;;  %6927 = vmatpush.bf16.msra.mxu0 %v6782_v15  ;;  %v6767_v0 = vcvt.s32.f32 %v6511_v33  ;;  %v6346_v18 = vunpack.c.3.s8 %v9053_v40  ;;  %v6319_v35 = vunpack.c.0.s8 %v6219_v43 }
 0x438   : > { %7011 = vmatpush.bf16.msra.mxu3 %v6907_v4  ;;  %6938 = vmatpush.bf16.msra.mxu1 %v6822_v63  ;;  %v6323_v50 = vunpack.c.1.s8 %v6219_v43  ;;  %v6871_v7 = vpack.c.bf16 %v6707_v14, %v6703_v21  ;;  %v6771_v10 = vcvt.s32.f32 %v6515_v23  ;;  %v6439_v27 = vunpack.c.2.s8 %v9066_v30  ;;  %v9087_v23 = vld [vmem:[#allocation1 + $0x9] sm:$0xff] }
 0x439   : > { %v6598_v56 = vcvt.s32.f32 %v6342_v22  ;;  %v6602_v38 = vcvt.s32.f32 %v6346_v18  ;;  %v6575_v36 = vcvt.s32.f32 %v6319_v35  ;;  %v6443_v53 = vunpack.c.3.s8 %v9066_v30 }
 0x43a   : > { %v6579_v51 = vcvt.s32.f32 %v6323_v50  ;;  %6999 = vmatpush.bf16.msra.mxu2 %v6871_v7  ;;  %v6903_v39 = vpack.c.bf16 %v6771_v10, %v6767_v0  ;;  %v6695_v29 = vcvt.s32.f32 %v6439_v27  ;;  %v6503_v6 = vunpack.c.2.s8 %v6263_v8  ;;  %6928 = vmatmul.bf16.vlgmr.msra.gmra.mxu0 %v9073_v3  ;;  %v9091_v10 = vld [vmem:[%s8947_s24 + $0x28] sm:$0xff] }
 0x43b   : > { %6972 = vmatpush.bf16.msrb.mxu0 %v6811_v17  ;;  %v6507_v13 = vunpack.c.3.s8 %v6263_v8  ;;  %v6818_v46 = vpack.c.bf16 %v6602_v38, %v6598_v56  ;;  %v6699_v12 = vcvt.s32.f32 %v6443_v53  ;;  %v6334_v19 = vunpack.c.0.s8 %v9053_v40  ;;  %v6243_v17 = vld [vmem:[%s8947_s24 + $0x128] sm:$0xff]  ;;  %v9093_v56 = vpop.f32.mrf.mxu0 }
 0x43c   : > { %v6807_v11 = vpack.c.bf16 %v6579_v51, %v6575_v36  ;;  %7012 = vmatpush.bf16.msra.mxu3 %v6903_v39  ;;  %v6759_v44 = vcvt.s32.f32 %v6503_v6  ;;  %v6338_v47 = vunpack.c.1.s8 %v9053_v40  ;;  %v6311_v55 = vunpack.c.2.s8 %v6215_v37  ;;  %v6033_v6 = vpop.f32.mrf.mxu3 }
 0x43d   : > { %v6763_v43 = vcvt.s32.f32 %v6507_v13  ;;  %6939 = vmatpush.bf16.msra.mxu1 %v6818_v46  ;;  %v6867_v24 = vpack.c.bf16 %v6699_v12, %v6695_v29  ;;  %v6590_v45 = vcvt.s32.f32 %v6334_v19  ;;  %v6315_v48 = vunpack.c.3.s8 %v6215_v37  ;;  %v6231_v29 = vld [vmem:[%s8947_s24 + $0xc8] sm:$0xff]  ;;  %v9115_v6 = vld [vmem:[%s8947_s24 + $0x170] sm:$0xff] }
 0x43e   : > { %v6391_v16 = vunpack.c.2.s8 %v6235_v31  ;;  %v6594_v1 = vcvt.s32.f32 %v6338_v47  ;;  %v6567_v58 = vcvt.s32.f32 %v6311_v55  ;;  %v6395_v26 = vunpack.c.3.s8 %v6235_v31 }
 0x43f   : > { %6973 = vmatpush.bf16.msrb.mxu0 %v6807_v11  ;;  %v6899_v4 = vpack.c.bf16 %v6763_v43, %v6759_v44  ;;  %7000 = vmatpush.bf16.msra.mxu2 %v6867_v24  ;;  %v6571_v25 = vcvt.s32.f32 %v6315_v48  ;;  %v6431_v9 = vunpack.c.0.s8 %v9066_v30  ;;  %v6435_v42 = vunpack.c.1.s8 %v9066_v30  ;;  %v6259_v30 = vld [vmem:[%s8947_s24 + $0x1a8] sm:$0xff] }
 0x440   : > { %v6647_v57 = vcvt.s32.f32 %v6391_v16  ;;  %v6814_v40 = vpack.c.bf16 %v6594_v1, %v6590_v45  ;;  %v6651_v2 = vcvt.s32.f32 %v6395_v26  ;;  %v6495_v61 = vunpack.c.0.s8 %v6263_v8 }
 0x441   : > { %7013 = vmatpush.bf16.msra.mxu3 %v6899_v4  ;;  %v6499_v59 = vunpack.c.1.s8 %v6263_v8  ;;  %v6803_v15 = vpack.c.bf16 %v6571_v25, %v6567_v58  ;;  %v6687_v63 = vcvt.s32.f32 %v6431_v9  ;;  %v6691_v21 = vcvt.s32.f32 %v6435_v42 }
 0x442   : > { %v6303_v33 = vunpack.c.0.s8 %v6215_v37  ;;  %6940 = vmatpush.bf16.msra.mxu1 %v6814_v40  ;;  %v6843_v14 = vpack.c.bf16 %v6651_v2, %v6647_v57  ;;  %v6751_v22 = vcvt.s32.f32 %v6495_v61  ;;  %v6307_v18 = vunpack.c.1.s8 %v6215_v37  ;;  %v6239_v2 = vld [vmem:[%s8947_s24 + $0x108] sm:$0xff] }
 0x443   : > { %v6755_v0 = vcvt.s32.f32 %v6499_v59  ;;  %6974 = vmatpush.bf16.msrb.mxu0 %v6803_v15  ;;  %v6863_v35 = vpack.c.bf16 %v6691_v21, %v6687_v63  ;;  %v6383_v7 = vunpack.c.0.s8 %v6235_v31  ;;  %v6387_v8 = vunpack.c.1.s8 %v6235_v31  ;;  %v6046_v61 = vpop.f32.mrf.mxu0 }
 0x444   : > { %v6559_v50 = vcvt.s32.f32 %v6303_v33  ;;  %v6563_v52 = vcvt.s32.f32 %v6307_v18  ;;  %v6423_v38 = vunpack.c.2.s8 %v6243_v17  ;;  %v6427_v36 = vunpack.c.3.s8 %v6243_v17 }
 0x445   : > { %v6895_v27 = vpack.c.bf16 %v6755_v0, %v6751_v22  ;;  %7001 = vmatpush.bf16.msra.mxu2 %v6863_v35  ;;  %6941 = vmatmul.bf16.vlgmr.msra.gmra.mxu1 %v9087_v23  ;;  %v6639_v51 = vcvt.s32.f32 %v6383_v7  ;;  %v6643_v53 = vcvt.s32.f32 %v6387_v8  ;;  %v6487_v37 = vunpack.c.2.s8 %v6259_v30  ;;  %v6255_v0 = vld [vmem:[%s8947_s24 + $0x188] sm:$0xff] }
 0x446   : > { %6985 = vmatpush.bf16.msrb.mxu1 %v6843_v14  ;;  %v6491_v39 = vunpack.c.3.s8 %v6259_v30  ;;  %v6799_v13 = vpack.c.bf16 %v6563_v52, %v6559_v50  ;;  %v6679_v31 = vcvt.s32.f32 %v6423_v38  ;;  %v6683_v46 = vcvt.s32.f32 %v6427_v36  ;;  %v9106_v35 = vld [vmem:[%s8947_s24 + $0x8] sm:$0xff] }
 0x447   : > { %7014 = vmatpush.bf16.msra.mxu3 %v6895_v27  ;;  %v6295_v11 = vunpack.c.2.s8 %v9091_v10  ;;  %v6839_v12 = vpack.c.bf16 %v6643_v53, %v6639_v51  ;;  %v6743_v19 = vcvt.s32.f32 %v6487_v37  ;;  %v6299_v43 = vunpack.c.3.s8 %v9091_v10  ;;  %v9110_v52 = vld [vmem:[%s8947_s24 + $0xa8] sm:$0xff] }
 0x448   : > { %v6747_v44 = vcvt.s32.f32 %v6491_v39  ;;  %6975 = vmatpush.bf16.msrb.mxu0 %v6799_v13  ;;  %v6859_v47 = vpack.c.bf16 %v6683_v46, %v6679_v31  ;;  %v6375_v28 = vunpack.c.2.s8 %v6231_v29  ;;  %v6379_v24 = vunpack.c.3.s8 %v6231_v29 }
 0x449   : > { %v6551_v55 = vcvt.s32.f32 %v6295_v11  ;;  %v6555_v48 = vcvt.s32.f32 %v6299_v43  ;;  %v6415_v16 = vunpack.c.0.s8 %v6243_v17  ;;  %v6419_v4 = vunpack.c.1.s8 %v6243_v17 }
 0x44a   : > { %6986 = vmatpush.bf16.msrb.mxu1 %v6839_v12  ;;  %v6891_v45 = vpack.c.bf16 %v6747_v44, %v6743_v19  ;;  %7002 = vmatpush.bf16.msra.mxu2 %v6859_v47  ;;  %v6631_v1 = vcvt.s32.f32 %v6375_v28  ;;  %v6635_v58 = vcvt.s32.f32 %v6379_v24  ;;  %v6479_v26 = vunpack.c.0.s8 %v6259_v30  ;;  %v9121_v24 = vld [vmem:[%s8947_s24 + $0x1f0] sm:$0xff] }
 0x44b   : > { %v6483_v25 = vunpack.c.1.s8 %v6259_v30  ;;  %v6795_v57 = vpack.c.bf16 %v6555_v48, %v6551_v55  ;;  %v6671_v9 = vcvt.s32.f32 %v6415_v16  ;;  %v6675_v42 = vcvt.s32.f32 %v6419_v4 }
 0x44c   : > { %7015 = vmatpush.bf16.msra.mxu3 %v6891_v45  ;;  %v6006_v40 = vadd.f32 %v9044_v32, %v9059_v54  ;;  %v6835_v59 = vpack.c.bf16 %v6635_v58, %v6631_v1  ;;  %v6735_v15 = vcvt.s32.f32 %v6479_v26  ;;  %v6287_v21 = vunpack.c.0.s8 %v9091_v10 }
 0x44d   : > { %v6739_v63 = vcvt.s32.f32 %v6483_v25  ;;  %6976 = vmatpush.bf16.msrb.mxu0 %v6795_v57  ;;  %v6855_v33 = vpack.c.bf16 %v6675_v42, %v6671_v9  ;;  %v6291_v17 = vunpack.c.1.s8 %v9091_v10  ;;  %v6367_v14 = vunpack.c.0.s8 %v6231_v29 }
 0x44e   : > { %v6371_v22 = vunpack.c.1.s8 %v6231_v29  ;;  %6987 = vmatpush.bf16.msrb.mxu1 %v6835_v59  ;;  %v6543_v30 = vcvt.s32.f32 %v6287_v21  ;;  %v6407_v32 = vunpack.c.2.s8 %v6239_v2  ;;  %v6411_v54 = vunpack.c.3.s8 %v6239_v2 }
 0x44f   : > { %v6887_v18 = vpack.c.bf16 %v6739_v63, %v6735_v15  ;;  %7003 = vmatpush.bf16.msra.mxu2 %v6855_v33  ;;  %v6547_v50 = vcvt.s32.f32 %v6291_v17  ;;  %v6623_v7 = vcvt.s32.f32 %v6367_v14  ;;  %v6019_v27 = vadd.f32 %v9062_v20, %v6006_v40  ;;  %v6220_v63 = vld [vmem:[%s8947_s24 + $0x70] sm:$0xff] }
 0x450   : > { %v6627_v8 = vcvt.s32.f32 %v6371_v22  ;;  %v6663_v10 = vcvt.s32.f32 %v6407_v32  ;;  %v6667_v38 = vcvt.s32.f32 %v6411_v54  ;;  %v6471_v36 = vunpack.c.2.s8 %v6255_v0  ;;  %v9129_v22 = vpop.f32.mrf.mxu1 }
 0x451   : > { %7016 = vmatpush.bf16.msra.mxu3 %v6887_v18  ;;  %v6475_v51 = vunpack.c.3.s8 %v6255_v0  ;;  %v6791_v53 = vpack.c.bf16 %v6547_v50, %v6543_v30  ;;  %v6279_v39 = vunpack.c.2.s8 %v9106_v35  ;;  %v6283_v29 = vunpack.c.3.s8 %v9106_v35 }
 0x452   : > { %v6831_v37 = vpack.c.bf16 %v6627_v8, %v6623_v7  ;;  %v6851_v13 = vpack.c.bf16 %v6667_v38, %v6663_v10  ;;  %v6727_v31 = vcvt.s32.f32 %v6471_v36  ;;  %v6359_v20 = vunpack.c.2.s8 %v9110_v52  ;;  %v6223_v36 = vld [vmem:[%s8947_s24 + $0x88] sm:$0xff] }
 0x453   : > { %v6731_v46 = vcvt.s32.f32 %v6475_v51  ;;  %6977 = vmatpush.bf16.msrb.mxu0 %v6791_v53  ;;  %v6535_v11 = vcvt.s32.f32 %v6279_v39  ;;  %v6539_v12 = vcvt.s32.f32 %v6283_v29  ;;  %v6363_v19 = vunpack.c.3.s8 %v9110_v52 }
 0x454   : > { %6988 = vmatpush.bf16.msrb.mxu1 %v6831_v37  ;;  %v6399_v44 = vunpack.c.0.s8 %v6239_v2  ;;  %7004 = vmatpush.bf16.msra.mxu2 %v6851_v13  ;;  %v6615_v47 = vcvt.s32.f32 %v6359_v20  ;;  %v6403_v55 = vunpack.c.1.s8 %v6239_v2  ;;  %v6456_v28 = vunpack.c.2.s8 %v9115_v6  ;;  %v9141_v37 = vpop.f32.mrf.mxu2 }
 0x455   : > { %v6883_v43 = vpack.c.bf16 %v6731_v46, %v6727_v31  ;;  %v6787_v45 = vpack.c.bf16 %v6539_v12, %v6535_v11  ;;  %v6619_v48 = vcvt.s32.f32 %v6363_v19  ;;  %v6460_v4 = vunpack.c.3.s8 %v9115_v6  ;;  %v9145_v46 = vld [vmem:[%s8947_s24 + $0x150] sm:$0xff] }
 0x456   : > { %v6655_v16 = vcvt.s32.f32 %v6399_v44  ;;  %v6659_v1 = vcvt.s32.f32 %v6403_v55  ;;  %v6712_v58 = vcvt.s32.f32 %v6456_v28  ;;  %v6463_v26 = vunpack.c.0.s8 %v6255_v0 }
 0x457   : > { %7017 = vmatpush.bf16.msra.mxu3 %v6883_v43  ;;  %v6467_v25 = vunpack.c.1.s8 %v6255_v0  ;;  %6978 = vmatpush.bf16.msrb.mxu0 %v6787_v45  ;;  %v6827_v57 = vpack.c.bf16 %v6619_v48, %v6615_v47  ;;  %v6716_v9 = vcvt.s32.f32 %v6460_v4  ;;  %v6520_v42 = vunpack.c.2.s8 %v9121_v24  ;;  %v6264_v47 = vld [vmem:[%s8947_s24 + $0x1d0] sm:$0xff] }
 0x458   : > { %v6524_v40 = vunpack.c.3.s8 %v9121_v24  ;;  %v6847_v2 = vpack.c.bf16 %v6659_v1, %v6655_v16  ;;  %v6719_v61 = vcvt.s32.f32 %v6463_v26  ;;  %v6032_v15 = vadd.f32 %v9082_v41, %v6019_v27  ;;  %v6059_v16 = vpop.f32.mrf.mxu1  ;;  %v6216_v26 = vld [vmem:[%s8947_s24 + $0x50] sm:$0xff] }
 0x459   : > { %v6723_v59 = vcvt.s32.f32 %v6467_v25  ;;  %6989 = vmatpush.bf16.msrb.mxu1 %v6827_v57  ;;  %v6876_v21 = vpack.c.bf16 %v6716_v9, %v6712_v58  ;;  %v6776_v33 = vcvt.s32.f32 %v6520_v42  ;;  %v6271_v14 = vunpack.c.0.s8 %v9106_v35 }
 0x45a   : > { %v6780_v17 = vcvt.s32.f32 %v6524_v40  ;;  %7005 = vmatpush.bf16.msra.mxu2 %v6847_v2  ;;  %v6275_v18 = vunpack.c.1.s8 %v9106_v35  ;;  %v6351_v30 = vunpack.c.0.s8 %v9110_v52  ;;  %v6355_v32 = vunpack.c.1.s8 %v9110_v52  ;;  %v6236_v40 = vld [vmem:[%s8947_s24 + $0xf0] sm:$0xff] }
 0x45b   : > { %v6879_v0 = vpack.c.bf16 %v6723_v59, %v6719_v61  ;;  %v6527_v54 = vcvt.s32.f32 %v6271_v14  ;;  %v6328_v50 = vunpack.c.2.s8 %v6220_v63  ;;  %v6332_v7 = vunpack.c.3.s8 %v6220_v63 }
 0x45c   : > { %v6908_v41 = vpack.c.bf16 %v6780_v17, %v6776_v33  ;;  %v6531_v8 = vcvt.s32.f32 %v6275_v18  ;;  %v6607_v27 = vcvt.s32.f32 %v6351_v30  ;;  %v6611_v10 = vcvt.s32.f32 %v6355_v32  ;;  %v6072_v14 = vpop.f32.mrf.mxu2 }
 0x45d   : > { %7018 = vmatpush.bf16.msra.mxu3 %v6879_v0  ;;  %v6448_v38 = vunpack.c.0.s8 %v9115_v6  ;;  %v6584_v51 = vcvt.s32.f32 %v6328_v50  ;;  %v6588_v35 = vcvt.s32.f32 %v6332_v7  ;;  %v6452_v53 = vunpack.c.1.s8 %v9115_v6  ;;  %7006 = vmatmul.bf16.vlgmr.msra.gmra.mxu2 %v9049_v34 }
 0x45e   : > { %7050 = vmatpush.bf16.msrb.mxu2 %v6876_v21  ;;  %v9138_v52 = vadd.f32 %v9093_v56, %v6032_v15  ;;  %v6783_v39 = vpack.c.bf16 %v6531_v8, %v6527_v54  ;;  %v6823_v29 = vpack.c.bf16 %v6611_v10, %v6607_v27  ;;  %v6512_v31 = vunpack.c.0.s8 %v9121_v24 }
 0x45f   : > { %v6704_v13 = vcvt.s32.f32 %v6448_v38  ;;  %v6812_v20 = vpack.c.bf16 %v6588_v35, %v6584_v51  ;;  %v6708_v11 = vcvt.s32.f32 %v6452_v53  ;;  %v6516_v12 = vunpack.c.1.s8 %v9121_v24 }
 0x460   : > { %v6343_v6 = vunpack.c.2.s8 %v6223_v36  ;;  %7019 = vmatmul.bf16.vlgmr.msra.gmra.mxu3 %v9055_v62  ;;  %6979 = vmatpush.bf16.msrb.mxu0 %v6783_v39  ;;  %v6768_v56 = vcvt.s32.f32 %v6512_v31  ;;  %v6347_v19 = vunpack.c.3.s8 %v6223_v36  ;;  %v6320_v44 = vunpack.c.0.s8 %v6220_v63 }
 0x461   : > { %7063 = vmatpush.bf16.msrb.mxu3 %v6908_v41  ;;  %6990 = vmatpush.bf16.msrb.mxu1 %v6823_v29  ;;  %v6324_v43 = vunpack.c.1.s8 %v6220_v63  ;;  %v6872_v55 = vpack.c.bf16 %v6708_v11, %v6704_v13  ;;  %v6772_v28 = vcvt.s32.f32 %v6516_v12  ;;  %v6440_v48 = vunpack.c.2.s8 %v9145_v46  ;;  %v9155_v41 = vpop.f32.mrf.mxu3  ;;  %v6244_v11 = vld [vmem:[%s8947_s24 + $0x130] sm:$0xff] }
 0x462   : > { %v6599_v45 = vcvt.s32.f32 %v6343_v6  ;;  %v6603_v24 = vcvt.s32.f32 %v6347_v19  ;;  %v6576_v4 = vcvt.s32.f32 %v6320_v44  ;;  %v6444_v58 = vunpack.c.3.s8 %v9145_v46  ;;  %v6260_v44 = vld [vmem:[%s8947_s24 + $0x1b0] sm:$0xff] }
 0x463   : > { %v6580_v1 = vcvt.s32.f32 %v6324_v43  ;;  %7051 = vmatpush.bf16.msrb.mxu2 %v6872_v55  ;;  %v6904_v25 = vpack.c.bf16 %v6772_v28, %v6768_v56  ;;  %v6696_v57 = vcvt.s32.f32 %v6440_v48  ;;  %v6504_v9 = vunpack.c.2.s8 %v6264_v47  ;;  %6980 = vmatmul.bf16.vlgmr.msrb.gmra.mxu0 %v9073_v3 }
 0x464   : > { %7024 = vmatpush.bf16.msra.mxu0 %v6812_v20  ;;  %v6508_v42 = vunpack.c.3.s8 %v6264_v47  ;;  %v6819_v2 = vpack.c.bf16 %v6603_v24, %v6599_v45  ;;  %v6700_v59 = vcvt.s32.f32 %v6444_v58  ;;  %v6335_v15 = vunpack.c.0.s8 %v6223_v36  ;;  %v9162_v45 = vld [vmem:[%s8947_s24 + $0x30] sm:$0xff] }
 0x465   : > { %v6808_v61 = vpack.c.bf16 %v6580_v1, %v6576_v4  ;;  %7064 = vmatpush.bf16.msrb.mxu3 %v6904_v25  ;;  %v6760_v63 = vcvt.s32.f32 %v6504_v9  ;;  %v6339_v33 = vunpack.c.1.s8 %v6223_v36  ;;  %v6312_v17 = vunpack.c.2.s8 %v6216_v26 }
 0x466   : > { %v6764_v21 = vcvt.s32.f32 %v6508_v42  ;;  %6991 = vmatpush.bf16.msrb.mxu1 %v6819_v2  ;;  %v6868_v0 = vpack.c.bf16 %v6700_v59, %v6696_v57  ;;  %v6591_v18 = vcvt.s32.f32 %v6335_v15  ;;  %v6316_v30 = vunpack.c.3.s8 %v6216_v26  ;;  %v6232_v57 = vld [vmem:[%s8947_s24 + $0xd0] sm:$0xff] }
 0x467   : > { %v6392_v32 = vunpack.c.2.s8 %v6236_v40  ;;  %v6595_v50 = vcvt.s32.f32 %v6339_v33  ;;  %v6568_v7 = vcvt.s32.f32 %v6312_v17  ;;  %v6396_v8 = vunpack.c.3.s8 %v6236_v40 }
 0x468   : > { %7025 = vmatpush.bf16.msra.mxu0 %v6808_v61  ;;  %v6900_v54 = vpack.c.bf16 %v6764_v21, %v6760_v63  ;;  %7052 = vmatpush.bf16.msrb.mxu2 %v6868_v0  ;;  %v6572_v27 = vcvt.s32.f32 %v6316_v30  ;;  %v6432_v38 = vunpack.c.0.s8 %v9145_v46  ;;  %v6436_v36 = vunpack.c.1.s8 %v9145_v46 }
 0x469   : > { %v6648_v10 = vcvt.s32.f32 %v6392_v32  ;;  %v6815_v51 = vpack.c.bf16 %v6595_v50, %v6591_v18  ;;  %v6652_v35 = vcvt.s32.f32 %v6396_v8  ;;  %v6496_v53 = vunpack.c.0.s8 %v6264_v47  ;;  %v6085_v9 = vpop.f32.mrf.mxu3 }
 0x46a   : > { %7065 = vmatpush.bf16.msrb.mxu3 %v6900_v54  ;;  %v6500_v39 = vunpack.c.1.s8 %v6264_v47  ;;  %v6804_v29 = vpack.c.bf16 %v6572_v27, %v6568_v7  ;;  %v6688_v13 = vcvt.s32.f32 %v6432_v38  ;;  %v6692_v31 = vcvt.s32.f32 %v6436_v36  ;;  %v9164_v47 = vpop.f32.mrf.mxu0  ;;  %v9186_v9 = vld [vmem:[%s8947_s24 + $0x178] sm:$0xff] }
 0x46b   : > { %v6304_v20 = vunpack.c.0.s8 %v6216_v26  ;;  %6992 = vmatpush.bf16.msrb.mxu1 %v6815_v51  ;;  %v6844_v12 = vpack.c.bf16 %v6652_v35, %v6648_v10  ;;  %v6752_v6 = vcvt.s32.f32 %v6496_v53  ;;  %v6308_v19 = vunpack.c.1.s8 %v6216_v26  ;;  %v6240_v35 = vld [vmem:[%s8947_s24 + $0x110] sm:$0xff] }
 0x46c   : > { %v6756_v56 = vcvt.s32.f32 %v6500_v39  ;;  %7026 = vmatpush.bf16.msra.mxu0 %v6804_v29  ;;  %v6864_v46 = vpack.c.bf16 %v6692_v31, %v6688_v13  ;;  %v6384_v55 = vunpack.c.0.s8 %v6236_v40  ;;  %v6388_v28 = vunpack.c.1.s8 %v6236_v40 }
 0x46d   : > { %v6560_v43 = vcvt.s32.f32 %v6304_v20  ;;  %v6564_v16 = vcvt.s32.f32 %v6308_v19  ;;  %v6424_v24 = vunpack.c.2.s8 %v6244_v11  ;;  %v6428_v4 = vunpack.c.3.s8 %v6244_v11 }
 0x46e   : > { %v6896_v48 = vpack.c.bf16 %v6756_v56, %v6752_v6  ;;  %7053 = vmatpush.bf16.msrb.mxu2 %v6864_v46  ;;  %6993 = vmatmul.bf16.vlgmr.msrb.gmra.mxu1 %v9087_v23  ;;  %v6640_v1 = vcvt.s32.f32 %v6384_v55  ;;  %v6644_v58 = vcvt.s32.f32 %v6388_v28  ;;  %v6488_v26 = vunpack.c.2.s8 %v6260_v44  ;;  %v6256_v56 = vld [vmem:[%s8947_s24 + $0x190] sm:$0xff] }
 0x46f   : > { %7037 = vmatpush.bf16.msra.mxu1 %v6844_v12  ;;  %v6492_v25 = vunpack.c.3.s8 %v6260_v44  ;;  %v6800_v42 = vpack.c.bf16 %v6564_v16, %v6560_v43  ;;  %v6680_v40 = vcvt.s32.f32 %v6424_v24  ;;  %v6684_v2 = vcvt.s32.f32 %v6428_v4  ;;  %v9177_v46 = vld [vmem:[%s8947_s24 + $0x10] sm:$0xff] }
 0x470   : > { %7066 = vmatpush.bf16.msrb.mxu3 %v6896_v48  ;;  %v6296_v61 = vunpack.c.2.s8 %v9162_v45  ;;  %v6840_v59 = vpack.c.bf16 %v6644_v58, %v6640_v1  ;;  %v6744_v15 = vcvt.s32.f32 %v6488_v26  ;;  %v6300_v21 = vunpack.c.3.s8 %v9162_v45  ;;  %v9181_v16 = vld [vmem:[%s8947_s24 + $0xb0] sm:$0xff] }
 0x471   : > { %v6748_v63 = vcvt.s32.f32 %v6492_v25  ;;  %7027 = vmatpush.bf16.msra.mxu0 %v6800_v42  ;;  %v6860_v33 = vpack.c.bf16 %v6684_v2, %v6680_v40  ;;  %v6376_v14 = vunpack.c.2.s8 %v6232_v57  ;;  %v6380_v0 = vunpack.c.3.s8 %v6232_v57 }
 0x472   : > { %v6552_v17 = vcvt.s32.f32 %v6296_v61  ;;  %v6556_v30 = vcvt.s32.f32 %v6300_v21  ;;  %v6416_v32 = vunpack.c.0.s8 %v6244_v11  ;;  %v6420_v54 = vunpack.c.1.s8 %v6244_v11  ;;  %v6098_v53 = vpop.f32.mrf.mxu0 }
 0x473   : > { %7038 = vmatpush.bf16.msra.mxu1 %v6840_v59  ;;  %v6892_v18 = vpack.c.bf16 %v6748_v63, %v6744_v15  ;;  %7054 = vmatpush.bf16.msrb.mxu2 %v6860_v33  ;;  %v6632_v50 = vcvt.s32.f32 %v6376_v14  ;;  %v6636_v7 = vcvt.s32.f32 %v6380_v0  ;;  %v6480_v8 = vunpack.c.0.s8 %v6260_v44  ;;  %v9192_v0 = vld [vmem:[%s8947_s24 + $0x1f8] sm:$0xff] }
 0x474   : > { %v6484_v27 = vunpack.c.1.s8 %v6260_v44  ;;  %v6796_v10 = vpack.c.bf16 %v6556_v30, %v6552_v17  ;;  %v6672_v38 = vcvt.s32.f32 %v6416_v32  ;;  %v6676_v36 = vcvt.s32.f32 %v6420_v54 }
 0x475   : > { %7067 = vmatpush.bf16.msrb.mxu3 %v6892_v18  ;;  %v6058_v51 = vadd.f32 %v9129_v22, %v9138_v52  ;;  %v6836_v39 = vpack.c.bf16 %v6636_v7, %v6632_v50  ;;  %v6736_v29 = vcvt.s32.f32 %v6480_v8  ;;  %v6288_v31 = vunpack.c.0.s8 %v9162_v45 }
 0x476   : > { %v6740_v13 = vcvt.s32.f32 %v6484_v27  ;;  %7028 = vmatpush.bf16.msra.mxu0 %v6796_v10  ;;  %v6856_v20 = vpack.c.bf16 %v6676_v36, %v6672_v38  ;;  %v6292_v11 = vunpack.c.1.s8 %v9162_v45  ;;  %v6368_v12 = vunpack.c.0.s8 %v6232_v57 }
 0x477   : > { %v6372_v6 = vunpack.c.1.s8 %v6232_v57  ;;  %7039 = vmatpush.bf16.msra.mxu1 %v6836_v39  ;;  %v6544_v44 = vcvt.s32.f32 %v6288_v31  ;;  %v6408_v22 = vunpack.c.2.s8 %v6240_v35  ;;  %v6412_v52 = vunpack.c.3.s8 %v6240_v35 }
 0x478   : > { %v6888_v19 = vpack.c.bf16 %v6740_v13, %v6736_v29  ;;  %7055 = vmatpush.bf16.msrb.mxu2 %v6856_v20  ;;  %v6548_v43 = vcvt.s32.f32 %v6292_v11  ;;  %v6624_v55 = vcvt.s32.f32 %v6368_v12  ;;  %v6071_v48 = vadd.f32 %v9141_v37, %v6058_v51  ;;  %v6221_v13 = vld [vmem:[%s8947_s24 + $0x78] sm:$0xff] }
 0x479   : > { %v6628_v28 = vcvt.s32.f32 %v6372_v6  ;;  %v6664_v45 = vcvt.s32.f32 %v6408_v22  ;;  %v6668_v24 = vcvt.s32.f32 %v6412_v52  ;;  %v6472_v4 = vunpack.c.2.s8 %v6256_v56  ;;  %v9200_v6 = vpop.f32.mrf.mxu1 }
 0x47a   : > { %7068 = vmatpush.bf16.msrb.mxu3 %v6888_v19  ;;  %v6476_v1 = vunpack.c.3.s8 %v6256_v56  ;;  %v6792_v58 = vpack.c.bf16 %v6548_v43, %v6544_v44  ;;  %v6280_v25 = vunpack.c.2.s8 %v9177_v46  ;;  %v6284_v57 = vunpack.c.3.s8 %v9177_v46 }
 0x47b   : > { %v6832_v26 = vpack.c.bf16 %v6628_v28, %v6624_v55  ;;  %v6852_v42 = vpack.c.bf16 %v6668_v24, %v6664_v45  ;;  %v6728_v40 = vcvt.s32.f32 %v6472_v4  ;;  %v6360_v37 = vunpack.c.2.s8 %v9181_v16  ;;  %v6224_v4 = vld [vmem:[%s8947_s24 + $0x90] sm:$0xff] }
 0x47c   : > { %v6732_v2 = vcvt.s32.f32 %v6476_v1  ;;  %7029 = vmatpush.bf16.msra.mxu0 %v6792_v58  ;;  %v6536_v61 = vcvt.s32.f32 %v6280_v25  ;;  %v6540_v59 = vcvt.s32.f32 %v6284_v57  ;;  %v6364_v15 = vunpack.c.3.s8 %v9181_v16 }
 0x47d   : > { %7040 = vmatpush.bf16.msra.mxu1 %v6832_v26  ;;  %v6400_v63 = vunpack.c.0.s8 %v6240_v35  ;;  %7056 = vmatpush.bf16.msrb.mxu2 %v6852_v42  ;;  %v6616_v33 = vcvt.s32.f32 %v6360_v37  ;;  %v6404_v17 = vunpack.c.1.s8 %v6240_v35  ;;  %v6457_v14 = vunpack.c.2.s8 %v9186_v9  ;;  %v9212_v26 = vpop.f32.mrf.mxu2 }
 0x47e   : > { %v6884_v21 = vpack.c.bf16 %v6732_v2, %v6728_v40  ;;  %v6788_v18 = vpack.c.bf16 %v6540_v59, %v6536_v61  ;;  %v6620_v30 = vcvt.s32.f32 %v6364_v15  ;;  %v6461_v54 = vunpack.c.3.s8 %v9186_v9  ;;  %v9216_v2 = vld [vmem:[%s8947_s24 + $0x158] sm:$0xff] }
 0x47f   : > { %v6656_v32 = vcvt.s32.f32 %v6400_v63  ;;  %v6660_v50 = vcvt.s32.f32 %v6404_v17  ;;  %v6713_v7 = vcvt.s32.f32 %v6457_v14  ;;  %v6464_v8 = vunpack.c.0.s8 %v6256_v56 }
 0x480   : > { %7069 = vmatpush.bf16.msrb.mxu3 %v6884_v21  ;;  %v6468_v27 = vunpack.c.1.s8 %v6256_v56  ;;  %7030 = vmatpush.bf16.msra.mxu0 %v6788_v18  ;;  %v6828_v10 = vpack.c.bf16 %v6620_v30, %v6616_v33  ;;  %v6717_v38 = vcvt.s32.f32 %v6461_v54  ;;  %v6521_v36 = vunpack.c.2.s8 %v9192_v0  ;;  %v6265_v21 = vld [vmem:[%s8947_s24 + $0x1d8] sm:$0xff] }
 0x481   : > { %v6525_v51 = vunpack.c.3.s8 %v9192_v0  ;;  %v6848_v35 = vpack.c.bf16 %v6660_v50, %v6656_v32  ;;  %v6720_v53 = vcvt.s32.f32 %v6464_v8  ;;  %v6084_v29 = vadd.f32 %v9155_v41, %v6071_v48  ;;  %v6111_v30 = vpop.f32.mrf.mxu1  ;;  %v6217_v50 = vld [vmem:[%s8947_s24 + $0x58] sm:$0xff] }
 0x482   : > { %v6724_v39 = vcvt.s32.f32 %v6468_v27  ;;  %7041 = vmatpush.bf16.msra.mxu1 %v6828_v10  ;;  %v6877_v31 = vpack.c.bf16 %v6717_v38, %v6713_v7  ;;  %v6777_v20 = vcvt.s32.f32 %v6521_v36  ;;  %v6272_v12 = vunpack.c.0.s8 %v9177_v46  ;;  %v6237_v38 = vld [vmem:[%s8947_s24 + $0xf8] sm:$0xff] }
 0x483   : > { %v6781_v11 = vcvt.s32.f32 %v6525_v51  ;;  %7057 = vmatpush.bf16.msrb.mxu2 %v6848_v35  ;;  %v6276_v19 = vunpack.c.1.s8 %v9177_v46  ;;  %v6352_v44 = vunpack.c.0.s8 %v9181_v16  ;;  %v6356_v22 = vunpack.c.1.s8 %v9181_v16 }
 0x484   : > { %v6880_v56 = vpack.c.bf16 %v6724_v39, %v6720_v53  ;;  %v6528_v52 = vcvt.s32.f32 %v6272_v12  ;;  %v6329_v43 = vunpack.c.2.s8 %v6221_v13  ;;  %v6333_v55 = vunpack.c.3.s8 %v6221_v13 }
 0x485   : > { %v6909_v41 = vpack.c.bf16 %v6781_v11, %v6777_v20  ;;  %v6532_v28 = vcvt.s32.f32 %v6276_v19  ;;  %v6608_v48 = vcvt.s32.f32 %v6352_v44  ;;  %v6612_v45 = vcvt.s32.f32 %v6356_v22  ;;  %v6124_v20 = vpop.f32.mrf.mxu2  ;;  %v9226_v44 = vpop.f32.mrf.mxu3 }
 0x486   : > { %7070 = vmatpush.bf16.msrb.mxu3 %v6880_v56  ;;  %v6449_v24 = vunpack.c.0.s8 %v9186_v9  ;;  %v6585_v1 = vcvt.s32.f32 %v6329_v43  ;;  %v6589_v46 = vcvt.s32.f32 %v6333_v55  ;;  %v6453_v58 = vunpack.c.1.s8 %v9186_v9  ;;  %7058 = vmatmul.bf16.vlgmr.msrb.gmra.mxu2 %v9049_v34  ;;  %v9228_v43 = vpop.f32.mrf.mxu0 }
 0x487   : > { %7102 = vmatpush.bf16.msra.mxu2 %v6877_v31  ;;  %v9209_v16 = vadd.f32 %v9164_v47, %v6084_v29  ;;  %v6784_v25 = vpack.c.bf16 %v6532_v28, %v6528_v52  ;;  %v6824_v57 = vpack.c.bf16 %v6612_v45, %v6608_v48  ;;  %v6513_v40 = vunpack.c.0.s8 %v9192_v0 }
 0x488   : > { %v6705_v42 = vcvt.s32.f32 %v6449_v24  ;;  %v6813_v37 = vpack.c.bf16 %v6589_v46, %v6585_v1  ;;  %v6709_v61 = vcvt.s32.f32 %v6453_v58  ;;  %v6517_v59 = vunpack.c.1.s8 %v9192_v0 }
 0x489   : > { %v6344_v9 = vunpack.c.2.s8 %v6224_v4  ;;  %7071 = vmatmul.bf16.vlgmr.msrb.gmra.mxu3 %v9055_v62  ;;  %7031 = vmatpush.bf16.msra.mxu0 %v6784_v25  ;;  %v6769_v34 = vcvt.s32.f32 %v6513_v40  ;;  %v6348_v47 = vunpack.c.3.s8 %v6224_v4  ;;  %v6321_v15 = vunpack.c.0.s8 %v6221_v13  ;;  %v6245_v40 = vld [vmem:[%s8947_s24 + $0x138] sm:$0xff] }
 0x48a   : > { %7115 = vmatpush.bf16.msra.mxu3 %v6909_v41  ;;  %7042 = vmatpush.bf16.msra.mxu1 %v6824_v57  ;;  %v6325_v63 = vunpack.c.1.s8 %v6221_v13  ;;  %v6873_v33 = vpack.c.bf16 %v6709_v61, %v6705_v42  ;;  %v6773_v17 = vcvt.s32.f32 %v6517_v59  ;;  %v6441_v18 = vunpack.c.2.s8 %v9216_v2 }
 0x48b   : > { %v6600_v14 = vcvt.s32.f32 %v6344_v9  ;;  %v6604_v0 = vcvt.s32.f32 %v6348_v47  ;;  %v6577_v32 = vcvt.s32.f32 %v6321_v15  ;;  %v6445_v62 = vunpack.c.3.s8 %v9216_v2 }
 0x48c   : > { %v6581_v54 = vcvt.s32.f32 %v6325_v63  ;;  %7103 = vmatpush.bf16.msra.mxu2 %v6873_v33  ;;  %v6905_v7 = vpack.c.bf16 %v6773_v17, %v6769_v34  ;;  %v6697_v8 = vcvt.s32.f32 %v6441_v18  ;;  %v6505_v27 = vunpack.c.2.s8 %v6265_v21  ;;  %7032 = vmatmul.bf16.vlgmr.msra.gmra.mxu0 %v9073_v3  ;;  %v6261_v34 = vld [vmem:[%s8947_s24 + $0x1b8] sm:$0xff] }
 0x48d   : > { %7076 = vmatpush.bf16.msrb.mxu0 %v6813_v37  ;;  %v6509_v10 = vunpack.c.3.s8 %v6265_v21  ;;  %v6820_v36 = vpack.c.bf16 %v6604_v0, %v6600_v14  ;;  %v6701_v35 = vcvt.s32.f32 %v6445_v62  ;;  %v6336_v53 = vunpack.c.0.s8 %v6224_v4  ;;  %v9235_v33 = vld [vmem:[%s8947_s24 + $0x38] sm:$0xff] }
 0x48e   : > { %v6809_v51 = vpack.c.bf16 %v6581_v54, %v6577_v32  ;;  %7116 = vmatpush.bf16.msra.mxu3 %v6905_v7  ;;  %v6761_v39 = vcvt.s32.f32 %v6505_v27  ;;  %v6340_v13 = vunpack.c.1.s8 %v6224_v4  ;;  %v6313_v31 = vunpack.c.2.s8 %v6217_v50  ;;  %v6233_v62 = vld [vmem:[%s8947_s24 + $0xd8] sm:$0xff] }
 0x48f   : > { %v6765_v29 = vcvt.s32.f32 %v6509_v10  ;;  %7043 = vmatpush.bf16.msra.mxu1 %v6820_v36  ;;  %v6869_v11 = vpack.c.bf16 %v6701_v35, %v6697_v8  ;;  %v6592_v12 = vcvt.s32.f32 %v6336_v53  ;;  %v6317_v56 = vunpack.c.3.s8 %v6217_v50 }
 0x490   : > { %v6393_v19 = vunpack.c.2.s8 %v6237_v38  ;;  %v6596_v3 = vcvt.s32.f32 %v6340_v13  ;;  %v6569_v41 = vcvt.s32.f32 %v6313_v31  ;;  %v6397_v52 = vunpack.c.3.s8 %v6237_v38 }
 0x491   : > { %7077 = vmatpush.bf16.msrb.mxu0 %v6809_v51  ;;  %v6901_v22 = vpack.c.bf16 %v6765_v29, %v6761_v39  ;;  %7104 = vmatpush.bf16.msra.mxu2 %v6869_v11  ;;  %v6573_v55 = vcvt.s32.f32 %v6317_v56  ;;  %v6433_v48 = vunpack.c.0.s8 %v9216_v2  ;;  %v6437_v45 = vunpack.c.1.s8 %v9216_v2 }
 0x492   : > { %v6649_v28 = vcvt.s32.f32 %v6393_v19  ;;  %v6816_v24 = vpack.c.bf16 %v6596_v3, %v6592_v12  ;;  %v6653_v4 = vcvt.s32.f32 %v6397_v52  ;;  %v6497_v1 = vunpack.c.0.s8 %v6265_v21  ;;  %v9243_v19 = vpop.f32.mrf.mxu2 }
 0x493   : > { %7117 = vmatpush.bf16.msra.mxu3 %v6901_v22  ;;  %v6501_v46 = vunpack.c.1.s8 %v6265_v21  ;;  %v6805_v58 = vpack.c.bf16 %v6573_v55, %v6569_v41  ;;  %v6689_v25 = vcvt.s32.f32 %v6433_v48  ;;  %v6693_v57 = vcvt.s32.f32 %v6437_v45 }
 0x494   : > { %v6305_v42 = vunpack.c.0.s8 %v6217_v50  ;;  %7044 = vmatpush.bf16.msra.mxu1 %v6816_v24  ;;  %v6845_v37 = vpack.c.bf16 %v6653_v4, %v6649_v28  ;;  %v6753_v61 = vcvt.s32.f32 %v6497_v1  ;;  %v6309_v9 = vunpack.c.1.s8 %v6217_v50  ;;  %v6137_v50 = vpop.f32.mrf.mxu3  ;;  %v6241_v24 = vld [vmem:[%s8947_s24 + $0x118] sm:$0xff] }
 0x495   : > { %v6757_v59 = vcvt.s32.f32 %v6501_v46  ;;  %7078 = vmatpush.bf16.msrb.mxu0 %v6805_v58  ;;  %v6865_v2 = vpack.c.bf16 %v6693_v57, %v6689_v25  ;;  %v6385_v15 = vunpack.c.0.s8 %v6237_v38  ;;  %v6389_v63 = vunpack.c.1.s8 %v6237_v38  ;;  %v6150_v38 = vpop.f32.mrf.mxu0 }
 0x496   : > { %v6561_v47 = vcvt.s32.f32 %v6305_v42  ;;  %v6565_v17 = vcvt.s32.f32 %v6309_v9  ;;  %v6425_v14 = vunpack.c.2.s8 %v6245_v40  ;;  %v6429_v18 = vunpack.c.3.s8 %v6245_v40 }
 0x497   : > { %v6897_v21 = vpack.c.bf16 %v6757_v59, %v6753_v61  ;;  %7105 = vmatpush.bf16.msra.mxu2 %v6865_v2  ;;  %7045 = vmatmul.bf16.vlgmr.msra.gmra.mxu1 %v9087_v23  ;;  %v6641_v30 = vcvt.s32.f32 %v6385_v15  ;;  %v6645_v0 = vcvt.s32.f32 %v6389_v63  ;;  %v6489_v32 = vunpack.c.2.s8 %v6261_v34 }
 0x498   : > { %7089 = vmatpush.bf16.msrb.mxu1 %v6845_v37  ;;  %v6493_v54 = vunpack.c.3.s8 %v6261_v34  ;;  %v6801_v7 = vpack.c.bf16 %v6565_v17, %v6561_v47  ;;  %v6681_v8 = vcvt.s32.f32 %v6425_v14  ;;  %v6685_v27 = vcvt.s32.f32 %v6429_v18  ;;  %v9241_v56 = vpop.f32.mrf.mxu1  ;;  %v6257_v37 = vld [vmem:[%s8947_s24 + $0x198] sm:$0xff] }
 0x499   : > { %7118 = vmatpush.bf16.msra.mxu3 %v6897_v21  ;;  %v6297_v10 = vunpack.c.2.s8 %v9235_v33  ;;  %v6841_v36 = vpack.c.bf16 %v6645_v0, %v6641_v30  ;;  %v6745_v51 = vcvt.s32.f32 %v6489_v32  ;;  %v6301_v53 = vunpack.c.3.s8 %v9235_v33  ;;  %v6229_v21 = vld [vmem:[%s8947_s24 + $0xb8] sm:$0xff] }
 0x49a   : > { %v6749_v35 = vcvt.s32.f32 %v6493_v54  ;;  %7079 = vmatpush.bf16.msrb.mxu0 %v6801_v7  ;;  %v6861_v23 = vpack.c.bf16 %v6685_v27, %v6681_v8  ;;  %v6377_v29 = vunpack.c.2.s8 %v6233_v62  ;;  %v6381_v13 = vunpack.c.3.s8 %v6233_v62  ;;  %v6176_v50 = vpop.f32.mrf.mxu2 }
 0x49b   : > { %v6553_v39 = vcvt.s32.f32 %v6297_v10  ;;  %v6557_v20 = vcvt.s32.f32 %v6301_v53  ;;  %v6417_v11 = vunpack.c.0.s8 %v6245_v40  ;;  %v6421_v12 = vunpack.c.1.s8 %v6245_v40 }
 0x49c   : > { %7090 = vmatpush.bf16.msrb.mxu1 %v6841_v36  ;;  %v6893_v31 = vpack.c.bf16 %v6749_v35, %v6745_v51  ;;  %7106 = vmatpush.bf16.msra.mxu2 %v6861_v23  ;;  %v6633_v22 = vcvt.s32.f32 %v6377_v29  ;;  %v6637_v3 = vcvt.s32.f32 %v6381_v13  ;;  %v6481_v41 = vunpack.c.0.s8 %v6261_v34  ;;  %v9251_v61 = vpop.f32.mrf.mxu3 }
 0x49d   : > { %v6485_v52 = vunpack.c.1.s8 %v6261_v34  ;;  %v6797_v55 = vpack.c.bf16 %v6557_v20, %v6553_v39  ;;  %v6673_v28 = vcvt.s32.f32 %v6417_v11  ;;  %v6677_v48 = vcvt.s32.f32 %v6421_v12  ;;  %v6209_v34 = vld [vmem:[%s8947_s24 + $0x18] sm:$0xff] }
 0x49e   : > { %7119 = vmatpush.bf16.msra.mxu3 %v6893_v31  ;;  %v6110_v45 = vadd.f32 %v9200_v6, %v9209_v16  ;;  %v6837_v4 = vpack.c.bf16 %v6637_v3, %v6633_v22  ;;  %v6737_v1 = vcvt.s32.f32 %v6481_v41  ;;  %v6289_v58 = vunpack.c.0.s8 %v9235_v33 }
 0x49f   : > { %v6741_v46 = vcvt.s32.f32 %v6485_v52  ;;  %7080 = vmatpush.bf16.msrb.mxu0 %v6797_v55  ;;  %v6857_v25 = vpack.c.bf16 %v6677_v48, %v6673_v28  ;;  %v6293_v57 = vunpack.c.1.s8 %v9235_v33  ;;  %v6369_v42 = vunpack.c.0.s8 %v6233_v62  ;;  %v6225_v52 = vld [vmem:[%s8947_s24 + $0x98] sm:$0xff]  ;;  %s500_s24 = scalar_lea.vmem %s9418_s6, %s9265_s30  ;;  %s7597_s30 = sshll.u32 %s7880_s29, 6 }
 0x4a0   : > { %v6373_v40 = vunpack.c.1.s8 %v6233_v62  ;;  %7091 = vmatpush.bf16.msrb.mxu1 %v6837_v4  ;;  %v6545_v6 = vcvt.s32.f32 %v6289_v58  ;;  %v6409_v16 = vunpack.c.2.s8 %v6241_v24  ;;  %v6413_v9 = vunpack.c.3.s8 %v6241_v24  ;;  %v6163_v62 = vpop.f32.mrf.mxu1  ;;  %s9306_s22 = scalar_lea.vmem %s9398_s8, %s7597_s30 }
 0x4a1   : > { %v6889_v59 = vpack.c.bf16 %v6741_v46, %v6737_v1  ;;  %7107 = vmatpush.bf16.msra.mxu2 %v6857_v25  ;;  %v6549_v2 = vcvt.s32.f32 %v6293_v57  ;;  %v6625_v47 = vcvt.s32.f32 %v6369_v42  ;;  %v6123_v63 = vadd.f32 %v9212_v26, %v6110_v45  ;;  %v9275_v62 = vld [vmem:[%s491_s15] sm:$0xf] }
 0x4a2   : > { %v6629_v15 = vcvt.s32.f32 %v6373_v40  ;;  %v6665_v33 = vcvt.s32.f32 %v6409_v16  ;;  %v6669_v17 = vcvt.s32.f32 %v6413_v9  ;;  %v6473_v14 = vunpack.c.2.s8 %v6257_v37 }
 0x4a3   : > { %7120 = vmatpush.bf16.msra.mxu3 %v6889_v59  ;;  %v6477_v18 = vunpack.c.3.s8 %v6257_v37  ;;  %v6793_v30 = vpack.c.bf16 %v6549_v2, %v6545_v6  ;;  %v6281_v32 = vunpack.c.2.s8 %v6209_v34  ;;  %v6285_v54 = vunpack.c.3.s8 %v6209_v34 }
 0x4a4   : > { %v6833_v0 = vpack.c.bf16 %v6629_v15, %v6625_v47  ;;  %v6853_v7 = vpack.c.bf16 %v6669_v17, %v6665_v33  ;;  %v6729_v8 = vcvt.s32.f32 %v6473_v14  ;;  %v6361_v10 = vunpack.c.2.s8 %v6229_v21  ;;  %v6189_v11 = vpop.f32.mrf.mxu3  ;;  %v7670_v47 = vld [vmem:[#allocation1 + $0x12] sm:$0xff]  ;;  %v7671_v15 = vld [vmem:[#allocation1 + $0x1b] sm:$0xff] }
 0x4a5   : > { %v6733_v27 = vcvt.s32.f32 %v6477_v18  ;;  %7081 = vmatpush.bf16.msrb.mxu0 %v6793_v30  ;;  %v6537_v38 = vcvt.s32.f32 %v6281_v32  ;;  %v6541_v26 = vcvt.s32.f32 %v6285_v54  ;;  %v6365_v36 = vunpack.c.3.s8 %v6229_v21  ;;  %v7672_v14 = vld [vmem:[#allocation1] sm:$0xff]  ;;  %v7673_v32 = vld [vmem:[#allocation1 + $0x9] sm:$0xff] }
 0x4a6   : > { %7092 = vmatpush.bf16.msrb.mxu1 %v6833_v0  ;;  %v6401_v51 = vunpack.c.0.s8 %v6241_v24  ;;  %7108 = vmatpush.bf16.msra.mxu2 %v6853_v7  ;;  %v6617_v53 = vcvt.s32.f32 %v6361_v10  ;;  %v6405_v23 = vunpack.c.1.s8 %v6241_v24  ;;  %v6465_v39 = vunpack.c.0.s8 %v6257_v37  ;;  %v9277_v7 = vld [vmem:[%s500_s24] sm:$0xf]  ;;  %s7694_s24 = scalar_lea.hbm %s9399_s9, 8 }
 0x4a7   : > { %v6885_v35 = vpack.c.bf16 %v6733_v27, %v6729_v8  ;;  %v6789_v29 = vpack.c.bf16 %v6541_v26, %v6537_v38  ;;  %v6621_v13 = vcvt.s32.f32 %v6365_v36  ;;  %v6469_v20 = vunpack.c.1.s8 %v6257_v37 }
 0x4a8   : > { %v6657_v31 = vcvt.s32.f32 %v6401_v51  ;;  %v6661_v12 = vcvt.s32.f32 %v6405_v23  ;;  %v6721_v22 = vcvt.s32.f32 %v6465_v39  ;;  %v6136_v3 = vadd.f32 %v9226_v44, %v6123_v63 }
 0x4a9   : > { %7121 = vmatpush.bf16.msra.mxu3 %v6885_v35  ;;  %v6273_v41 = vunpack.c.0.s8 %v6209_v34  ;;  %7082 = vmatpush.bf16.msrb.mxu0 %v6789_v29  ;;  %v6829_v55 = vpack.c.bf16 %v6621_v13, %v6617_v53  ;;  %v6725_v28 = vcvt.s32.f32 %v6469_v20  ;;  %v6277_v48 = vunpack.c.1.s8 %v6209_v34 }
 0x4aa   : > { %v6353_v45 = vunpack.c.0.s8 %v6229_v21  ;;  %v6849_v4 = vpack.c.bf16 %v6661_v12, %v6657_v31  ;;  %v6357_v1 = vunpack.c.1.s8 %v6229_v21  ;;  %v6149_v46 = vadd.f32 %v9228_v43, %v6136_v3 }
 0x4ab   : > { %v6529_v24 = vcvt.s32.f32 %v6273_v41  ;;  %7093 = vmatpush.bf16.msrb.mxu1 %v6829_v55  ;;  %v6881_v58 = vpack.c.bf16 %v6725_v28, %v6721_v22  ;;  %v6533_v25 = vcvt.s32.f32 %v6277_v48  ;;  %v6345_v42 = vunpack.c.2.s8 %v6225_v52  ;;  %v9288_v41 = vld [vmem:[%s504_s12] sm:$0xf]  ;;  %s9316_s12 = sand.u32 1, %s7760_s18  }
 0x4ac   : > { %v6609_v57 = vcvt.s32.f32 %v6353_v45  ;;  %7109 = vmatpush.bf16.msra.mxu2 %v6849_v4  ;;  %v6613_v40 = vcvt.s32.f32 %v6357_v1  ;;  %v6349_v44 = vunpack.c.3.s8 %v6225_v52  ;;  %v6337_v37 = vunpack.c.0.s8 %v6225_v52  ;;  %s7539_s30 = sshll.u32 %s9316_s12, 1  ;;  %s7306_s4 = scalar_lea.sflag [#allocation3], %s9316_s12 }
 0x4ad   : > { %v6341_v59 = vunpack.c.1.s8 %v6225_v52  ;;  %7122 = vmatpush.bf16.msra.mxu3 %v6881_v58  ;;  %v6785_v6 = vpack.c.bf16 %v6533_v25, %v6529_v24  ;;  %v6601_v16 = vcvt.s32.f32 %v6345_v42  ;;  %v6162_v9 = vadd.f32 %v9241_v56, %v6149_v46  ;;  %s9324_s15 = scalar_lea.vmem [#allocation4], %s7539_s30  ;;  %s465_s16 = scalar_lea.vmem [#allocation2], %s7539_s30 }
 0x4ae   : > { %v6825_v34 = vpack.c.bf16 %v6613_v40, %v6609_v57  ;;  %v6605_v2 = vcvt.s32.f32 %v6349_v44  ;;  %v6593_v21 = vcvt.s32.f32 %v6337_v37  ;;  %v6193_v27 = vperm.slane %v9275_v62, 0  ;;  %s7327_s2 = sshll.u32 %s465_s16, 4  ;;  %s7328_s2 = int_to_ptr.vmem [resolvable:$true] %s7327_s2 }
 0x4af   : > { %7110 = vmatmul.bf16.vlgmr.msra.gmra.mxu2 %v7670_v47  ;;  %7083 = vmatpush.bf16.msrb.mxu0 %v6785_v6  ;;  %v6175_v43 = vadd.f32 %v9243_v19, %v6162_v9  ;;  %v6597_v33 = vcvt.s32.f32 %v6341_v59  ;;  %v7130_v38 = vperm.slane %v9277_v7, 0  ;;  %v6194_v22 = vperm.slane %v9275_v62, 1 }
 0x4b0   : > { %7094 = vmatpush.bf16.msrb.mxu1 %v6825_v34  ;;  %7123 = vmatmul.bf16.vlgmr.msra.gmra.mxu3 %v7671_v15  ;;  %v6821_v63 = vpack.c.bf16 %v6605_v2, %v6601_v16  ;;  %v6201_v36 = vmul.f32 %v6193_v27, %v8296_v5  ;;  %v7131_v5 = vperm.slane %v9277_v7, 1  ;;  %v7148_v28 = vperm.slane %v9288_v41, 0 }
 0x4b1   : > { %v9262_v17 = vadd.f32 %v9251_v61, %v6175_v43  ;;  %v6817_v56 = vpack.c.bf16 %v6597_v33, %v6593_v21  ;;  %v6202_v55 = vmul.f32 %v6194_v22, %v8594_v60  ;;  %v7149_v45 = vperm.slane %v9288_v41, 1 }
 0x4b2   : > { %7084 = vmatmul.bf16.vlgmr.msrb.gmra.mxu0 %v7672_v14  ;;  %v6195_v33 = vperm.slane %v9275_v62, 2 }
 0x4b4   : > { %7095 = vmatpush.bf16.msrb.mxu1 %v6821_v63 }
 0x4b7   : > { %v6929_v18 = vpop.f32.mrf.mxu0  ;;  %v6955_v30 = vpop.f32.mrf.mxu2 }
 0x4b8   : > { %7096 = vmatpush.bf16.msrb.mxu1 %v6817_v56  ;;  %v7132_v56 = vperm.slane %v9277_v7, 2 }
 0x4ba   : > { %v6968_v0 = vpop.f32.mrf.mxu3 }
 0x4bb   : > { %7097 = vmatmul.bf16.vlgmr.msrb.gmra.mxu1 %v7673_v32  ;;  %v6203_v32 = vmul.f32 %v6195_v33, %v8902_v49 }
 0x4bf   : > { %v6931_v19 = vpop.f32.mrf.mxu0  ;;  %v6957_v61 = vpop.f32.mrf.mxu2 }
 0x4c0   : > { %v7150_v61 = vperm.slane %v9288_v41, 2 }
 0x4c2   : > { %v6970_v54 = vpop.f32.mrf.mxu3  ;;  %v6942_v50 = vpop.f32.mrf.mxu1 }
 0x4c3   : > { %v6943_v8 = vadd.f32 %v6942_v50, %v6929_v18 }
 0x4c5   : > { %v6956_v10 = vadd.f32 %v6955_v30, %v6943_v8 }
 0x4c7   : > { %v6969_v26 = vadd.f32 %v6968_v0, %v6956_v10 }
 0x4c9   : > { %v7138_v51 = vmul.f32 %v7130_v38, %v6969_v26 }
 0x4ca   : > { %v6944_v35 = vpop.f32.mrf.mxu1 }
 0x4cb   : > { %v7142_v53 = vadd.f32 %v7138_v51, %v6201_v36 }
 0x4cd   : > { %v7156_v1 = vadd.f32 %v7148_v28, %v7142_v53 }
 0x4cf   : > { %v7555_v25 = vmul.f32 -1.442695, %v7156_v1 }
 0x4e0   : > { %v6981_v23 = vpop.f32.mrf.mxu0  ;;  %v7007_v39 = vpop.f32.mrf.mxu2 }
 0x4e3   : > { %v7020_v29 = vpop.f32.mrf.mxu3 }
 0x4e8   : > { %v6983_v13 = vpop.f32.mrf.mxu0  ;;  %v7009_v31 = vpop.f32.mrf.mxu2 }
 0x4eb   : > { %v7022_v20 = vpop.f32.mrf.mxu3  ;;  %v6994_v11 = vpop.f32.mrf.mxu1 }
 0x4ec   : > { %v6995_v12 = vadd.f32 %v6994_v11, %v6981_v23  ;;  %v7218_v20 = vld [vmem:[%s482_s25] sm:$0x3] }
 0x4ee   : > { %v7008_v3 = vadd.f32 %v7007_v39, %v6995_v12 }
 0x4f0   : > { %v7021_v52 = vadd.f32 %v7020_v29, %v7008_v3  ;;  %v7605_v29 = vld [vmem:[%s9306_s22 + $0x38] sm:$0xff] }
 0x4f1   : > { %7291 = vmatpush.bf16.msra.mxu0 %v7605_v29 }
 0x4f2   : > { %v7139_v48 = vmul.f32 %v7131_v5, %v7021_v52  ;;  %v7604_v5 = vld [vmem:[%s9306_s22 + $0x30] sm:$0xff] }
 0x4f3   : > { %v6996_v4 = vpop.f32.mrf.mxu1 }
 0x4f4   : > { %v7143_v24 = vadd.f32 %v7139_v48, %v6202_v55  ;;  %v7603_v55 = vld [vmem:[%s9306_s22 + $0x28] sm:$0xff]  ;;  %v7602_v48 = vld [vmem:[%s9306_s22 + $0x20] sm:$0xff] }
 0x4f5   : > { %7292 = vmatpush.bf16.msra.mxu0 %v7604_v5 }
 0x4f6   : > { %v7157_v46 = vadd.f32 %v7149_v45, %v7143_v24  ;;  %v7601_v24 = vld [vmem:[%s9306_s22 + $0x18] sm:$0xff] }
 0x4f8   : > { %v7556_v58 = vmul.f32 -1.442695, %v7157_v46  ;;  %v7600_v46 = vld [vmem:[%s9306_s22 + $0x10] sm:$0xff] }
 0x4f9   : > { %7293 = vmatpush.bf16.msra.mxu0 %v7603_v55 }
 0x4fa   : > { %7651 = vpow2.f32 %v7556_v58 }
 0x4fb   : > { %7653 = vpow2.f32 %v7555_v25 }
 0x4fd   : > { %7294 = vmatpush.bf16.msra.mxu0 %v7602_v48 }
 0x500   : > { %v7652_v57 = vpop.eup %7651 }
 0x501   : > { %v7654_v42 = vpop.eup %7653  ;;  %v7182_v40 = vadd.f32 1.0, %v7652_v57  ;;  %7295 = vmatpush.bf16.msra.mxu0 %v7601_v24 }
 0x502   : > { %v7163_v44 = vadd.f32 1.0, %v7654_v42  ;;  %v7599_v42 = vld [vmem:[%s9306_s22 + $0x8] sm:$0xff] }
 0x503   : > { %7655 = vrcp.f32 %v7182_v40  ;;  %v7194_v10 = vand.u32 2147483648, %v7182_v40  ;;  %vm7188_vm2 = vweird.f32 %v7182_v40  ;;  %v7192_v36 = vand.u32 2147483647, %v7182_v40 }
 0x504   : > { %7657 = vrcp.f32 %v7163_v44  ;;  %v7175_v51 = vand.u32 2147483648, %v7163_v44  ;;  %vm7169_vm5 = vweird.f32 %v7163_v44  ;;  %v7173_v35 = vand.u32 2147483647, %v7163_v44 }
 0x505   : > { %v7195_v23 = vor.u32 1.1754944e-38, %v7194_v10  ;;  %vm7193_vm7 = vcmp.eq.f32.partialorder %v7192_v36, 8.507059e+37  ;;  %7296 = vmatpush.bf16.msra.mxu0 %v7600_v46 }
 0x506   : > { %v7176_v13 = vor.u32 1.1754944e-38, %v7175_v51  ;;  %vm7174_vm8 = vcmp.eq.f32.partialorder %v7173_v35, 8.507059e+37 }
 0x509   : > { %v7033_v37 = vpop.f32.mrf.mxu0  ;;  %v7059_v60 = vpop.f32.mrf.mxu2  ;;  %7297 = vmatpush.bf16.msra.mxu0 %v7599_v42 }
 0x50a   : > { %v7656_v6 = vpop.eup %7655 }
 0x50b   : > { %v7658_v16 = vpop.eup %7657  ;;  %v7184_v2 = vmul.f32 %v7656_v6, %v7182_v40  ;;  %vm7189_vm1 = vweird.f32 %v7656_v6  ;;  %v6196_v40 = vperm.slane %v9275_v62, 3 }
 0x50c   : > { %v7072_v59 = vpop.f32.mrf.mxu3  ;;  %v7165_v43 = vmul.f32 %v7658_v16, %v7163_v44  ;;  %vm7170_vm3 = vweird.f32 %v7658_v16  ;;  %vm9299_vm4 = vmor %vm7188_vm2, %vm7189_vm1 }
 0x50d   : > { %v7185_v21 = vsub.f32 1.0, %v7184_v2  ;;  %vm7171_vm6 = vmor %vm7169_vm5, %vm7170_vm3 }
 0x50e   : > { %v7166_v18 = vsub.f32 1.0, %v7165_v43 }
 0x50f   : > { %v7186_v0 = vmul.f32 %v7656_v6, %v7185_v21 }
 0x510   : > { %v7167_v54 = vmul.f32 %v7658_v16, %v7166_v18 }
 0x511   : > { %v7035_v9 = vpop.f32.mrf.mxu0  ;;  %v7061_v34 = vpop.f32.mrf.mxu2  ;;  %v7187_v27 = vadd.f32 %v7656_v6, %v7186_v0 }
 0x512   : > { %v7168_v26 = vadd.f32 %v7658_v16, %v7167_v54  ;;  %v7151_v34 = vperm.slane %v9288_v41, 3 }
 0x513   : > { %v7191_v53 = vsel %vm9299_vm4, %v7656_v6, %v7187_v27  ;;  %v7598_v6 = vld [vmem:[%s9306_s22] sm:$0xff]  ;;  %s7592_s22 = sshll.u32 %s7851_s21, 1 }
 0x514   : > { %v7074_v47 = vpop.f32.mrf.mxu3  ;;  %v7046_v15 = vpop.f32.mrf.mxu1  ;;  %v7172_v39 = vsel %vm7171_vm6, %v7658_v16, %v7168_v26  ;;  %v7196_v31 = vsel %vm7193_vm7, %v7195_v23, %v7191_v53  ;;  %v6204_v16 = vmul.f32 %v6196_v40, %v9262_v17  ;;  %7298 = vmatpush.bf16.msra.mxu0 %v7598_v6  ;;  %s7325_s25 = scalar_lea.hbm %s9399_s9, %s7592_s22  ;;  %s7339_s1 = scalar_lea.hbm %s9400_s10, %s7592_s22 }
 0x515   : > { %v7047_v63 = vadd.f32 %v7046_v15, %v7033_v37  ;;  %v7177_v12 = vsel %vm7174_vm8, %v7176_v13, %v7172_v39  ;;  %v7219_v22 = vmul.f32 %v7218_v20, %v7196_v31  ;;  %v7133_v37 = vperm.slane %v9277_v7, 3  ;;  %s7329_s3 = sshll.u32 %s7325_s25, 4  ;;  %s7330_s3 = int_to_ptr.hbm [resolvable:$true] %s7329_s3 }
 0x516   : > { %s7688_s5 = sshra.s32 %s7330_s3, 4  ;;  %s7689_s5 = int_to_ptr.hbm [resolvable:$true] %s7688_s5 }
 0x517   : > { %v7060_v14 = vadd.f32 %v7059_v60, %v7047_v63  ;;  %s7690_s6 = scalar_lea.hbm %s7689_s5, 2  ;;  %p7695_p0 = scmp.lt.s32.totalorder %s7689_s5, %s9399_s9 }
 0x518   : > { %p7691_p11 = scmp.ne.s32.totalorder %s7689_s5, %s7690_s6  ;;  %p7696_p1 = scmp.lt.s32.totalorder %s7694_s24, %s7690_s6 }
 0x519   : > { %v7073_v30 = vadd.f32 %v7072_v59, %v7060_v14 }
 0x51a   : > { %p7692_p12 = pnand %p7691_p11, %p7868_p5  ;;  %p7697_p2 = por %p7696_p1, %p7695_p0 }
 0x51b   : > { %v7140_v19 = vmul.f32 %v7132_v56, %v7073_v30 }
 0x51c   : > { %v7048_v50 = vpop.f32.mrf.mxu1  ;;  %p7693_p13 = pneg %p7692_p12 }
 0x51d   : > { %v7144_v8 = vadd.f32 %v7140_v19, %v6203_v32 }
 0x51e   : > { %p7698_p3 = pnand %p7697_p2, %p7693_p13 }
 0x51f   : > { %v7158_v38 = vadd.f32 %v7150_v61, %v7144_v8 }
 0x521   : > { %7659 = vtanh.f32 %v7158_v38 }
 0x527   : > { %v7660_v11 = vpop.eup %7659 }
 0x528   : > { %v7220_v3 = vmul.f32 %v7660_v11, %v7177_v12 }
 0x52a   : > { %v7221_v52 = vadd.f32 %v7220_v3, %v7219_v22 }
 0x52c   : > { %7225 = vst [vmem:[%s9324_s15] sm:$0x3] %v7221_v52 }
 0x52f   : > { %v7085_v28 = vpop.f32.mrf.mxu0 }
 0x532   : > { %v7111_v45 = vpop.f32.mrf.mxu2 }
 0x533   : > { %v7124_v4 = vpop.f32.mrf.mxu3 }
 0x537   : > { %v7087_v1 = vpop.f32.mrf.mxu0 }
 0x538   : > { %v7098_v58 = vpop.f32.mrf.mxu1 }
 0x539   : > { %v7099_v25 = vadd.f32 %v7098_v58, %v7085_v28 }
 0x53a   : > { %v7113_v57 = vpop.f32.mrf.mxu2 }
 0x53b   : > { %v7112_v44 = vadd.f32 %v7111_v45, %v7099_v25  ;;  %v7126_v60 = vpop.f32.mrf.mxu3 }
 0x53d   : > { %v7125_v59 = vadd.f32 %v7124_v4, %v7112_v44 }
 0x53f   : > { %v7141_v9 = vmul.f32 %v7133_v37, %v7125_v59 }
 0x540   : > { %v7100_v2 = vpop.f32.mrf.mxu1 }
 0x541   : > { %v7145_v47 = vadd.f32 %v7141_v9, %v6204_v16 }
 0x543   : > { %v7159_v43 = vadd.f32 %v7151_v34, %v7145_v47 }
 0x545   : > { %v7557_v15 = vmul.f32 -1.442695, %v7159_v43 }
 0x547   : > { %7661 = vpow2.f32 %v7557_v15 }
 0x54d   : > { %v7662_v63 = vpop.eup %7661 }
 0x54e   : > { %v7202_v62 = vadd.f32 1.0, %v7662_v63 }
 0x550   : > { %7663 = vrcp.f32 %v7202_v62  ;;  %v7214_v14 = vand.u32 2147483648, %v7202_v62  ;;  %v7212_v17 = vand.u32 2147483647, %v7202_v62  ;;  %vm7208_vm10 = vweird.f32 %v7202_v62 }
 0x551   : > { %7665 = vtanh.f32 %v7221_v52 }
 0x552   : > { %v7215_v18 = vor.u32 1.1754944e-38, %v7214_v14  ;;  %vm7213_vm12 = vcmp.eq.f32.partialorder %v7212_v17, 8.507059e+37 }
 0x556   : > { %v7664_v21 = vpop.eup %7663 }
 0x557   : > { %v7204_v7 = vmul.f32 %v7664_v21, %v7202_v62  ;;  %vm7209_vm9 = vweird.f32 %v7664_v21  ;;  %v7666_v0 = vpop.eup %7665 }
 0x558   : > { %vm7210_vm11 = vmor %vm7208_vm10, %vm7209_vm9 }
 0x559   : > { %v7205_v33 = vsub.f32 1.0, %v7204_v7 }
 0x55b   : > { %v7206_v56 = vmul.f32 %v7664_v21, %v7205_v33 }
 0x55d   : > { %v7207_v41 = vadd.f32 %v7664_v21, %v7206_v56 }
 0x55f   : > { %v7211_v30 = vsel %vm7210_vm11, %v7664_v21, %v7207_v41 }
 0x560   : > { %v7216_v32 = vsel %vm7213_vm12, %v7215_v18, %v7211_v30 }
 0x561   : > { %v7223_v19 = vmul.f32 %v7666_v0, %v7216_v32 }
 0x563   : > { %v7226_v61 = vpack.c.bf16 %v7223_v19, %v7223_v19  ;;  %7224 = vst [vmem:[%s465_s16] sm:$0x3] %v7223_v19 }
 0x565   : > { %7299 = vmatmul.bf16.vlgmr.msra.gmra.mxu0 %v7226_v61 }
 0x566   : > { %7701 = shalt.err (!%p7698_p3)
}
 0x567   : > { %7607 = dma.vmem_to_hbm [thread:$0]  (%p7868_p5), %s7328_s2, 32, %s7330_s3, %s7306_s4  }
 0x568   : > { %s7341_s0 = sshll.u32 %s9324_s15, 4  ;;  %s7343_s13 = sshll.u32 %s7339_s1, 4  ;;  %s7342_s0 = int_to_ptr.vmem [resolvable:$true] %s7341_s0  ;;  %s7344_s13 = int_to_ptr.hbm [resolvable:$true] %s7343_s13 }
 0x569   : > { %s7311_s16 = scalar_lea.sflag [#allocation5], %s9316_s12  ;;  %s7716_s22 = sshra.s32 %s7344_s13, 4  ;;  %s7717_s22 = int_to_ptr.hbm [resolvable:$true] %s7716_s22 }
 0x56a   : > { %s7718_s25 = scalar_lea.hbm %s7717_s22, 2  ;;  %s7722_s7 = scalar_lea.hbm %s9400_s10, 8 }
 0x56b   : > { %p7719_p4 = scmp.ne.s32.totalorder %s7717_s22, %s7718_s25  ;;  %p7723_p9 = scmp.lt.s32.totalorder %s7717_s22, %s9400_s10 }
 0x56c   : > { %p7724_p10 = scmp.lt.s32.totalorder %s7722_s7, %s7718_s25 }
 0x56d   : > { %p7720_p7 = pnand %p7719_p4, %p7868_p5 }
 0x56e   : > { %p7725_p11 = por %p7724_p10, %p7723_p9 }
 0x56f   : > { %p7721_p8 = pneg %p7720_p7 }
 0x571   : > { %p7726_p12 = pnand %p7725_p11, %p7721_p8 }
 0x573   : > { %7729 = shalt.err (!%p7726_p12)
}
 0x574   : > { %7608 = dma.vmem_to_hbm [thread:$0]  (%p7868_p5), %s7342_s0, 32, %s7344_s13, %s7311_s16  }
 0x575   : > { %s9423_s1 = sshll.u32 %s7880_s29, 1 }
 0x576   : > { %s513_s4 = scalar_lea.vmem %s9401_s11, %s9423_s1 }
 0x5e2   : > { %v7300_v54 = vpop.f32.mrf.mxu0 }
 0x5e3   : > { %7304 = vst [vmem:[%s513_s4] sm:$0x3] %v7300_v54 }
 0x5ea   : > { %v7302_v50 = vpop.f32.mrf.mxu0 }
 0x5eb PF: > { %p7618_p13 = scmp.ge.s32.totalorder %s7768_s20, 2  ;;  %s7358_s12 = sand.u32 1, %s7756_s17  }
 0x5ec   : > { %s7359_s27 = scalar_lea.sflag [#allocation3], %s7358_s12 }
 0x5ed   : > { %p7612_p0 = pnand %p7618_p13, %p7872_p6 }
 0x5ef   : > { %p7613_p1 = pneg %p7612_p0 }
 0x5f1   : > { %7747 = dma.done.wait (%p7613_p1), %s7359_s27, 32  }
 0x5f2   : > { %7749 = vsyncadd (%p7613_p1), %s7359_s27, 4294967264  ;;  %s7369_s29 = scalar_lea.sflag [#allocation5], %s7358_s12 }
 0x5f3   : > { %7751 = dma.done.wait (%p7613_p1), %s7369_s29, 32  }
 0x5f4   : > { %7753 = vsyncadd (%p7613_p1), %s7369_s29, 4294967264  ;;  %p25_p5 = scmp.ge.s32.totalorder %s7855_s23, 6   ;;  %s9424_s17 = smov %s7760_s18 }
 0x5f5   : > { %s9425_s18 = smov %s7764_s19  ;;  %s9426_s19 = smov %s7866_s26 }
 0x5f6   : > { %s9427_s20 = smov %s7855_s23  ;;  %27 = sbr.rel (!%p25_p5) target bundleno = 14 (0xe), region = 138 }
 0x5fb   :  { %7382 = vsyncpa [#allocation3], 1 }
 0x5fc   :  { %7384 = vsyncpa [#allocation3 + $0x1], 1 }
 0x5fd   :  { %7385 = vsyncpa [#allocation5], 1 }
 0x5fe   :  { %7387 = vsyncpa [#allocation5 + $0x1], 1 }

</bundles_post_ra>
